<compile_context>
chip_gen: v5e
topology: v5e:2x2
jax: 0.10.0
libtpu: 0.0.40
codegen_flags: <defaults>
</compile_context>

<pallas_src>
import functools
import math

import jax
import jax.numpy as jnp
from jax import lax
from jax.experimental import pallas as pl
from jax.experimental.pallas import tpu as pltpu

EPS = 1e-5                      # nn.BatchNorm2d default eps
LANE = 128                      # TPU lane width: keep channel dims lane-dense
MAX_BLOCK_ROWS = 2048           # row-tile cap for the 1x1-conv matmul kernels
TARGET_CONV_M = 256             # target M (= R*W) per conv3x3 grid step
VMEM_LIMIT = 48 * 1024 * 1024   # safe on v7x (64 MiB VMEM); v5e/v6e could raise


def _round_up(x, m):
    return ((x + m - 1) // m) * m


def _pick_row_block(rows):
    """Row tile for the 1x1 kernels: >=2 grid steps when possible (megacore),
    multiple of 16 (bf16 sublane tile), capped at MAX_BLOCK_ROWS."""
    if rows <= 16:
        return rows
    return min(MAX_BLOCK_ROWS, _round_up((rows + 1) // 2, 16))


def _largest_divisor_at_most(n, cap):
    cap = max(1, min(n, cap))
    for d in range(cap, 0, -1):
        if n % d == 0:
            return d
    return 1


# ----------------------------------------------------------------------------
# Pallas kernels
# ----------------------------------------------------------------------------
def _bn_mm_kernel(x_ref, sc_ref, sh_ref, w_ref, *rest,
                  rows, block_rows, has_residual):
    """y = relu(x*scale+shift) @ w (+ residual); emits per-block sum / sum-sq."""
    if has_residual:
        res_ref, o_ref, sum_ref, sq_ref = rest
    else:
        res_ref = None
        o_ref, sum_ref, sq_ref = rest

    a = jnp.maximum(x_ref[...].astype(jnp.float32) * sc_ref[...] + sh_ref[...],
                    0.0)

    # Row-validity mask exists only when the row count is not block-divisible
    # (compiled out entirely otherwise); it keeps padded rows out of the stats.
    needs_mask = (rows % block_rows) != 0
    if needs_mask:
        row0 = pl.program_id(0) * block_rows
        rid = row0 + lax.broadcasted_iota(jnp.int32, (block_rows, 1), 0)
        valid = rid < rows
        a = jnp.where(valid, a, 0.0)

    y = jnp.dot(a.astype(w_ref.dtype), w_ref[...],
                preferred_element_type=jnp.float32)

    if has_residual:
        res = res_ref[...].astype(jnp.float32)
        if needs_mask:
            res = jnp.where(valid, res, 0.0)
        y = y + res

    o_ref[...] = y.astype(o_ref.dtype)
    # fused BN-statistics epilogue (one partial per row block, reduced in JAX)
    sum_ref[...] = jnp.sum(y, axis=0, keepdims=True)[None]
    sq_ref[...] = jnp.sum(y * y, axis=0, keepdims=True)[None]


def _conv3x3_kernel(up_ref, mid_ref, dn_ref, sc_ref, sh_ref, w_ref,
                    o_ref, sum_ref, sq_ref, pad_ref, *, W, R):
    """3x3 / stride 1 / pad 1 conv of relu(bn(y1)) over an (R, W) slab of one image.

    The BN+ReLU'd activation (R rows plus a 1-row halo above/below, zeroed at
    the image edges == zero padding of the post-activation) is staged once into
    the (R+2, W, C) VMEM scratch.  The three column taps are K-stacked along
    lanes, so the conv is 3 matmuls of (R*W, 3C) @ (3C, Cout), accumulated as
    chained register adds and stored once.
    """
    r = pl.program_id(1)
    n_rb = pl.num_programs(1)
    scale = sc_ref[...]
    shift = sh_ref[...]

    def bn_relu(v):
        return jnp.maximum(v.astype(jnp.float32) * scale + shift, 0.0)

    top_ok = (r > 0).astype(jnp.float32)          # zero padding above the image
    bot_ok = (r < n_rb - 1).astype(jnp.float32)   # zero padding below the image
    pad_ref[0] = bn_relu(up_ref[0, 0]) * top_ok
    pad_ref[pl.ds(1, R)] = bn_relu(mid_ref[0])
    pad_ref[R + 1] = bn_relu(dn_ref[0, 0]) * bot_ok

    acc = None
    for kh in range(3):                           # kernel row taps
        a = pad_ref[pl.ds(kh, R)]                 # (R, W, C): rows h + kh - 1
        zcol = jnp.zeros_like(a[:, :1, :])
        left = jnp.concatenate([zcol, a[:, :W - 1, :]], axis=1)   # col w-1 (kw=0)
        right = jnp.concatenate([a[:, 1:, :], zcol], axis=1)      # col w+1 (kw=2)
        a_cat = jnp.concatenate([left, a, right], axis=-1)        # (R, W, 3C)
        a_cat = a_cat.reshape(R * W, -1).astype(w_ref.dtype)
        d = jnp.dot(a_cat, w_ref[kh], preferred_element_type=jnp.float32)
        acc = d if acc is None else acc + d

    o_ref[...] = acc.reshape(o_ref.shape).astype(o_ref.dtype)
    sum_ref[...] = jnp.sum(acc, axis=0).reshape(sum_ref.shape)
    sq_ref[...] = jnp.sum(acc * acc, axis=0).reshape(sq_ref.shape)


# ----------------------------------------------------------------------------
# pallas_call wrappers
# ----------------------------------------------------------------------------
def _bn_matmul(x, scale, shift, w_bf16, residual=None, out_dtype=jnp.float32):
    """relu(x*scale+shift) @ w (+ residual), with fused stats of the output."""
    rows, cin = x.shape
    cout = w_bf16.shape[1]
    br = _pick_row_block(rows)
    nb = pl.cdiv(rows, br)

    kernel = functools.partial(_bn_mm_kernel, rows=rows, block_rows=br,
                               has_residual=residual is not None)

    in_specs = [
        pl.BlockSpec((br, cin), lambda i: (i, 0)),
        pl.BlockSpec((1, cin), lambda i: (0, 0)),
        pl.BlockSpec((1, cin), lambda i: (0, 0)),
        pl.BlockSpec((cin, cout), lambda i: (0, 0)),
    ]
    args = [x, scale, shift, w_bf16]
    if residual is not None:
        in_specs.append(pl.BlockSpec((br, cout), lambda i: (i, 0)))
        args.append(residual)

    out_shape = (
        jax.ShapeDtypeStruct((rows, cout), out_dtype),
        jax.ShapeDtypeStruct((nb, 1, cout), jnp.float32),
        jax.ShapeDtypeStruct((nb, 1, cout), jnp.float32),
    )
    out_specs = (
        pl.BlockSpec((br, cout), lambda i: (i, 0)),
        pl.BlockSpec((1, 1, cout), lambda i: (i, 0, 0)),
        pl.BlockSpec((1, 1, cout), lambda i: (i, 0, 0)),
    )

    bytes_accessed = (x.size * x.dtype.itemsize + 2 * cin * cout
                      + rows * cout * jnp.dtype(out_dtype).itemsize)
    if residual is not None:
        bytes_accessed += 4 * rows * cout

    y, s, ss = pl.pallas_call(
        kernel,
        out_shape=out_shape,
        grid_spec=pltpu.PrefetchScalarGridSpec(
            num_scalar_prefetch=0, grid=(nb,),
            in_specs=in_specs, out_specs=out_specs),
        compiler_params=pltpu.CompilerParams(
            dimension_semantics=("parallel",),
            vmem_limit_bytes=VMEM_LIMIT),
        cost_estimate=pl.CostEstimate(
            flops=int(2 * rows * cin * cout), transcendentals=0,
            bytes_accessed=int(bytes_accessed)),
    )(*args)
    return y, (jnp.sum(s[:, 0, :], axis=0), jnp.sum(ss[:, 0, :], axis=0))


def _conv3x3(y1, scale, shift, w_stack):
    """3x3 conv of relu(bn(y1)); y1: (N, H, W, C) lane-padded (bf16)."""
    n, h, w, cin = y1.shape
    cout = w_stack.shape[-1]
    R = _largest_divisor_at_most(h, max(1, TARGET_CONV_M // max(w, 1)))
    n_rb = h // R
    kernel = functools.partial(_conv3x3_kernel, W=w, R=R)

    in_specs = [
        # 1-row halo above / R-row mid block / 1-row halo below of the same y1
        # (halo traffic is 2 rows per R-row block instead of re-reading 3x).
        pl.BlockSpec((1, 1, w, cin),
                     lambda b, r: (b, jnp.maximum(r * R - 1, 0), 0, 0)),
        pl.BlockSpec((1, R, w, cin), lambda b, r: (b, r, 0, 0)),
        pl.BlockSpec((1, 1, w, cin),
                     lambda b, r: (b, jnp.minimum((r + 1) * R, h - 1), 0, 0)),
        pl.BlockSpec((1, cin), lambda b, r: (0, 0)),
        pl.BlockSpec((1, cin), lambda b, r: (0, 0)),
        pl.BlockSpec((3, 3 * cin, cout), lambda b, r: (0, 0, 0)),
    ]
    out_shape = (
        jax.ShapeDtypeStruct((n, h, w, cout), jnp.bfloat16),
        jax.ShapeDtypeStruct((n, n_rb, 1, cout), jnp.float32),
        jax.ShapeDtypeStruct((n, n_rb, 1, cout), jnp.float32),
    )
    out_specs = (
        pl.BlockSpec((1, R, w, cout), lambda b, r: (b, r, 0, 0)),
        pl.BlockSpec((1, 1, 1, cout), lambda b, r: (b, r, 0, 0)),
        pl.BlockSpec((1, 1, 1, cout), lambda b, r: (b, r, 0, 0)),
    )

    act_bytes = y1.dtype.itemsize
    y, s, ss = pl.pallas_call(
        kernel,
        out_shape=out_shape,
        grid_spec=pltpu.PrefetchScalarGridSpec(
            num_scalar_prefetch=0, grid=(n, n_rb),
            in_specs=in_specs, out_specs=out_specs,
            scratch_shapes=[pltpu.VMEM((R + 2, w, cin), jnp.float32)]),
        compiler_params=pltpu.CompilerParams(
            dimension_semantics=("parallel", "parallel"),
            vmem_limit_bytes=VMEM_LIMIT),
        cost_estimate=pl.CostEstimate(
            flops=int(2 * 9 * n * h * w * cin * cout), transcendentals=0,
            bytes_accessed=int(act_bytes * n * h * w * cin * (R + 2) // R
                               + 2 * n * h * w * cout + 2 * 9 * cin * cout)),
    )(y1, y1, y1, scale, shift, w_stack)
    return y, (jnp.sum(s, axis=(0, 1, 2)), jnp.sum(ss, axis=(0, 1, 2)))


# ----------------------------------------------------------------------------
# BatchNorm glue (training-mode batch statistics, gamma=1, beta=0)
# ----------------------------------------------------------------------------
def _bn_scale_shift(chan_sum, chan_sumsq, count):
    # TODO(synk): BatchNorm running_mean/running_var momentum updates are
    # stateful training side-effects and are not reproduced (forward output
    # unaffected).
    mean = chan_sum / count
    # NOTE: single-pass variance, clamped at 0.  Fine at these activation
    # scales; a two-pass / shifted variant is preferable for extreme inputs.
    var = jnp.maximum(chan_sumsq / count - mean * mean, 0.0)
    scale = lax.rsqrt(var + EPS)
    shift = -mean * scale
    return (scale.reshape(1, -1).astype(jnp.float32),
            shift.reshape(1, -1).astype(jnp.float32))


# ----------------------------------------------------------------------------
# Bottleneck forward (identity branch, as instantiated by FMFHourglass)
# ----------------------------------------------------------------------------
def bottleneck_forward(x4, bparams, in_stats=None):
    """x4: (N, H, W, Cp) channel-padded NHWC f32.
    Returns (out4, (sum, sumsq)) of the f32 output, so a chained bottleneck can
    fuse its bn1 without re-reading the tensor."""
    n, h, w, cp = x4.shape
    rows = n * h * w
    pp = bparams["w1"].shape[1]
    xf = x4.reshape(rows, cp)

    if in_stats is None:
        # Producer is non-Pallas glue (maxpool / upsample / add): let XLA fuse
        # the reduction with that glue op instead of an extra Pallas pass.
        s1, ss1 = jnp.sum(xf, axis=0), jnp.sum(xf * xf, axis=0)
    else:
        s1, ss1 = in_stats

    sc1, sh1 = _bn_scale_shift(s1, ss1, rows)
    y1, (s2, ss2) = _bn_matmul(xf, sc1, sh1, bparams["w1"],          # bn1+relu1+conv1
                               out_dtype=jnp.bfloat16)

    sc2, sh2 = _bn_scale_shift(s2, ss2, rows)
    y2, (s3, ss3) = _conv3x3(y1.reshape(n, h, w, pp), sc2, sh2,       # bn2+relu2+conv2
                             bparams["w2"])

    sc3, sh3 = _bn_scale_shift(s3, ss3, rows)
    out, out_stats = _bn_matmul(y2.reshape(rows, pp), sc3, sh3,       # bn3+relu3+conv3(+res)
                                bparams["w3"], residual=xf,
                                out_dtype=jnp.float32)
    return out.reshape(n, h, w, cp), out_stats


# ----------------------------------------------------------------------------
# Hourglass glue ops (pure data movement / tiny interp matmuls)
# ----------------------------------------------------------------------------
def maxpool2x2(x4):
    # TODO(synk): nn.MaxPool2d(2, 2) left as thin XLA glue (pure data movement).
    n, h, w, c = x4.shape
    return x4.reshape(n, h // 2, 2, w // 2, 2, c).max(axis=(2, 4))


def _interp_matrix_x2(n_in):
    """F.interpolate(scale_factor=2, mode='bilinear', align_corners=True)."""
    n_out = 2 * n_in
    if n_in == 1:
        return jnp.ones((n_out, 1), jnp.float32)
    src = jnp.arange(n_out, dtype=jnp.float32) * (n_in - 1) / (n_out - 1)
    lo = jnp.clip(jnp.floor(src).astype(jnp.int32), 0, n_in - 2)
    t = src - lo.astype(jnp.float32)
    m = jnp.zeros((n_out, n_in), jnp.float32)
    m = m.at[jnp.arange(n_out), lo].set(1.0 - t)
    m = m.at[jnp.arange(n_out), lo + 1].add(t)
    return m


def upsample_bilinear_x2(x4):
    # TODO(synk): bilinear x2 upsample left as XLA glue (two tiny interp matmuls).
    n, h, w, c = x4.shape
    ah = _interp_matrix_x2(h)
    aw = _interp_matrix_x2(w)
    y = jnp.einsum("oh,nhwc->nowc", ah, x4)
    return jnp.einsum("pw,nowc->nopc", aw, y)


# ----------------------------------------------------------------------------
# FMFHourglass forward
# ----------------------------------------------------------------------------
def fmf_hourglass_forward(x_nchw, hg_params, depth):
    x = jnp.transpose(x_nchw, (0, 2, 3, 1)).astype(jnp.float32)   # NHWC
    c = x.shape[-1]
    cp = _round_up(c, LANE)
    if cp != c:
        x = jnp.pad(x, ((0, 0), (0, 0), (0, 0), (0, cp - c)))     # lane-dense channels

    def hour(n, h4, h_stats):
        up1, _ = bottleneck_forward(h4, hg_params[n - 1][2], h_stats)
        low1 = maxpool2x2(h4)
        low1, low1_stats = bottleneck_forward(low1, hg_params[n - 1][0])
        if n > 1:
            low2 = hour(n - 1, low1, low1_stats)
            low2, _ = bottleneck_forward(low2, hg_params[n - 1][1])
        else:
            low2, _ = bottleneck_forward(low1, hg_params[n - 1][1], low1_stats)
        return up1 + upsample_bilinear_x2(low2)

    out = maxpool2x2(x)
    out, stats = bottleneck_forward(out, hg_params[depth - 1][0])
    if depth > 1:
        out = hour(depth - 1, out, stats)
        stats = None
    out, _ = bottleneck_forward(out, hg_params[depth - 1][1], stats)
    out = upsample_bilinear_x2(out)
    return jnp.transpose(out[..., :c], (0, 3, 1, 2))              # back to NCHW


# ----------------------------------------------------------------------------
# Parameters
# ----------------------------------------------------------------------------
def kaiming_uniform(key, shape):
    fan_in = math.prod(shape[1:])
    bound = math.sqrt(6.0 / fan_in)
    return jax.random.uniform(key, shape, jnp.float32, -bound, bound)


def make_raw_params(key, planes, depth):
    """PyTorch-layout (OIHW) conv weights for every Bottleneck in FMFHourglass."""
    c = planes * 4  # Bottleneck.expansion = 4; inplanes == planes * 4 everywhere
    params = []
    for index in range(depth):
        n_blocks = 2 if index == depth - 1 else 3
        blocks = []
        for _ in range(n_blocks):
            key, k1, k2, k3 = jax.random.split(key, 4)
            blocks.append({
                "conv1": kaiming_uniform(k1, (planes, c, 1, 1)),
                "conv2": kaiming_uniform(k2, (planes, planes, 3, 3)),
                "conv3": kaiming_uniform(k3, (c, planes, 1, 1)),
            })
        params.append(blocks)
    return params


def prepare_params(raw_params):
    """Pad channels to 128 lanes, reorder to (in, out), K-stack conv2, cast bf16."""
    prepared = []
    for blocks in raw_params:
        pblocks = []
        for b in blocks:
            p, c = b["conv1"].shape[:2]
            cp, pp = _round_up(c, LANE), _round_up(p, LANE)
            w1 = jnp.zeros((cp, pp), jnp.float32).at[:c, :p].set(
                b["conv1"].reshape(p, c).T)
            w2 = jnp.zeros((3, 3, pp, pp), jnp.float32).at[:, :, :p, :p].set(
                jnp.transpose(b["conv2"], (2, 3, 1, 0)))        # (kh, kw, in, out)
            w2 = w2.reshape(3, 3 * pp, pp)                       # K-stack the kw taps
            w3 = jnp.zeros((pp, cp), jnp.float32).at[:p, :c].set(
                b["conv3"].reshape(c, p).T)
            pblocks.append({"w1": w1.astype(jnp.bfloat16),
                            "w2": w2.astype(jnp.bfloat16),
                            "w3": w3.astype(jnp.bfloat16)})
        prepared.append(pblocks)
    return prepared


# ----------------------------------------------------------------------------
# Pure-JAX reference (same training-mode BN, same bf16 matmul inputs)
# ----------------------------------------------------------------------------
def ref_fmf_hourglass(x_nchw, raw_params, depth):
    x = jnp.transpose(x_nchw, (0, 2, 3, 1)).astype(jnp.float32)

    def bn_relu(h):
        m = jnp.mean(h, axis=(0, 1, 2))
        v = jnp.maximum(jnp.mean(h * h, axis=(0, 1, 2)) - m * m, 0.0)
        scale = lax.rsqrt(v + EPS)
        return jnp.maximum(h * scale - m * scale, 0.0)

    def conv(h, w, pad):
        return lax.conv_general_dilated(
            h.astype(jnp.bfloat16), w.astype(jnp.bfloat16), (1, 1),
            [(pad, pad), (pad, pad)],
            dimension_numbers=("NHWC", "OIHW", "NHWC"),
            preferred_element_type=jnp.float32)

    def bottleneck(h, prm):
        out = conv(bn_relu(h), prm["conv1"], 0)
        out = conv(bn_relu(out), prm["conv2"], 1)
        out = conv(bn_relu(out), prm["conv3"], 0)
        return out + h

    def hour(n, h):
        up1 = bottleneck(h, raw_params[n - 1][2])
        low1 = bottleneck(maxpool2x2(h), raw_params[n - 1][0])
        if n > 1:
            low2 = bottleneck(hour(n - 1, low1), raw_params[n - 1][1])
        else:
            low2 = bottleneck(low1, raw_params[n - 1][1])
        return up1 + upsample_bilinear_x2(low2)

    out = bottleneck(maxpool2x2(x), raw_params[depth - 1][0])
    if depth > 1:
        out = hour(depth - 1, out)
    out = bottleneck(out, raw_params[depth - 1][1])
    return jnp.transpose(upsample_bilinear_x2(out), (0, 3, 1, 2))


if __name__ == "__main__":
    key = jax.random.PRNGKey(0)
    planes, depth = 4, 2
    n, c, h, w = 2, planes * 4, 32, 32   # 32x32 keeps W a multiple of 8 at every level

    kp, kx = jax.random.split(key)
    raw_params = make_raw_params(kp, planes, depth)
    hg_params = prepare_params(raw_params)
    x = jax.random.normal(kx, (n, c, h, w), jnp.float32)

    fwd = jax.jit(functools.partial(fmf_hourglass_forward, depth=depth))
    out = jax.block_until_ready(fwd(x, hg_params))
    assert out.shape == (n, c, h, w), out.shape

    ref = jax.jit(functools.partial(ref_fmf_hourglass, depth=depth))(x, raw_params)
    max_err = float(jnp.max(jnp.abs(out - ref)))
    scale = float(jnp.max(jnp.abs(ref)))
    # bf16 intermediate activations (perf-review item) add ~1 bf16 ulp of noise
    # per conv; compare at 3% of the output dynamic range rather than a strict
    # per-element atol.
    assert max_err <= 3e-2 * max(scale, 1.0), \
        f"max abs err = {max_err} (ref scale {scale})"

    print("KERNEL_OK")
</pallas_src>

<mosaic_0001>
module attributes {stable_mosaic.version = 11 : i64} {
  func.func @_bn_mm_kernel(%arg0: i32, %arg1: memref<256x128xf32, #tpu.memory_space<vmem>>, %arg2: memref<1x128xf32, #tpu.memory_space<vmem>>, %arg3: memref<1x128xf32, #tpu.memory_space<vmem>>, %arg4: memref<128x128xbf16, #tpu.memory_space<vmem>>, %arg5: memref<256x128xbf16, #tpu.memory_space<vmem>>, %arg6: memref<1x1x128xf32, #tpu.memory_space<vmem>>, %arg7: memref<1x1x128xf32, #tpu.memory_space<vmem>>) attributes {dimension_semantics = [#tpu.dimension_semantics<parallel>], iteration_bounds = array<i64: 2>, scalar_prefetch = 0 : i64, scratch_operands = 0 : i64, tpu.core_type = #tpu.core_type<tc>, window_params = [{transform_indices = @transform_0, window_bounds = array<i64: 256, 128>}, {pipeline_mode = #tpu.pipeline_mode<synchronous>, transform_indices = @transform_1, window_bounds = array<i64: 1, 128>}, {pipeline_mode = #tpu.pipeline_mode<synchronous>, transform_indices = @transform_2, window_bounds = array<i64: 1, 128>}, {pipeline_mode = #tpu.pipeline_mode<synchronous>, transform_indices = @transform_3, window_bounds = array<i64: 128, 128>}, {transform_indices = @transform_4, window_bounds = array<i64: 256, 128>}, {transform_indices = @transform_5, window_bounds = array<i64: 1, 1, 128>}, {transform_indices = @transform_6, window_bounds = array<i64: 1, 1, 128>}]} {
    %c0 = arith.constant 0 : index
    %c0_0 = arith.constant 0 : index
    %0 = vector.load %arg1[%c0, %c0_0] : memref<256x128xf32, #tpu.memory_space<vmem>>, vector<256x128xf32>
    %c0_1 = arith.constant 0 : index
    %c0_2 = arith.constant 0 : index
    %1 = vector.load %arg2[%c0_1, %c0_2] : memref<1x128xf32, #tpu.memory_space<vmem>>, vector<1x128xf32>
    %2 = vector.broadcast %1 : vector<1x128xf32> to vector<256x128xf32>
    %3 = arith.mulf %0, %2 : vector<256x128xf32>
    %c0_3 = arith.constant 0 : index
    %c0_4 = arith.constant 0 : index
    %4 = vector.load %arg3[%c0_3, %c0_4] : memref<1x128xf32, #tpu.memory_space<vmem>>, vector<1x128xf32>
    %5 = vector.broadcast %4 : vector<1x128xf32> to vector<256x128xf32>
    %6 = arith.addf %3, %5 : vector<256x128xf32>
    %cst = arith.constant 0.000000e+00 : f32
    %7 = vector.broadcast %cst : f32 to vector<256x128xf32>
    %8 = arith.maximumf %6, %7 : vector<256x128xf32>
    %9 = arith.truncf %8 : vector<256x128xf32> to vector<256x128xbf16>
    %c0_5 = arith.constant 0 : index
    %c0_6 = arith.constant 0 : index
    %10 = vector.load %arg4[%c0_5, %c0_6] : memref<128x128xbf16, #tpu.memory_space<vmem>>, vector<128x128xbf16>
    %cst_7 = arith.constant dense<0.000000e+00> : vector<256x128xf32>
    %11 = tpu.matmul %9, %10, %cst_7 {dimension_numbers = #tpu.dot_dimension_numbers<[1], [0], [0], [1], [0, 0, 1, 1], [], []>} : vector<256x128xbf16>, vector<128x128xbf16>, vector<256x128xf32> -> vector<256x128xf32>
    %12 = arith.truncf %11 : vector<256x128xf32> to vector<256x128xbf16>
    %c0_8 = arith.constant 0 : index
    %c0_9 = arith.constant 0 : index
    %13 = vector.load %arg5[%c0_8, %c0_9] : memref<256x128xbf16, #tpu.memory_space<vmem>>, vector<256x128xbf16>
    tpu.vector_store %arg5[%c0_8, %c0_9], %12 {strides = array<i32>} : memref<256x128xbf16, #tpu.memory_space<vmem>>, vector<256x128xbf16>,
    %cst_10 = arith.constant dense<0.000000e+00> : vector<128xf32>
    %14 = vector.multi_reduction <add>, %11, %cst_10 [0] : vector<256x128xf32> to vector<128xf32>
    %15 = vector.shape_cast %14 : vector<128xf32> to vector<1x128xf32>
    %16 = vector.shape_cast %15 : vector<1x128xf32> to vector<1x1x128xf32>
    %c0_11 = arith.constant 0 : index
    %c0_12 = arith.constant 0 : index
    %c0_13 = arith.constant 0 : index
    %17 = vector.load %arg6[%c0_11, %c0_12, %c0_13] : memref<1x1x128xf32, #tpu.memory_space<vmem>>, vector<1x1x128xf32>
    tpu.vector_store %arg6[%c0_11, %c0_12, %c0_13], %16 {strides = array<i32>} : memref<1x1x128xf32, #tpu.memory_space<vmem>>, vector<1x1x128xf32>,
    %18 = arith.mulf %11, %11 : vector<256x128xf32>
    %cst_14 = arith.constant dense<0.000000e+00> : vector<128xf32>
    %19 = vector.multi_reduction <add>, %18, %cst_14 [0] : vector<256x128xf32> to vector<128xf32>
    %20 = vector.shape_cast %19 : vector<128xf32> to vector<1x128xf32>
    %21 = vector.shape_cast %20 : vector<1x128xf32> to vector<1x1x128xf32>
    %c0_15 = arith.constant 0 : index
    %c0_16 = arith.constant 0 : index
    %c0_17 = arith.constant 0 : index
    %22 = vector.load %arg7[%c0_15, %c0_16, %c0_17] : memref<1x1x128xf32, #tpu.memory_space<vmem>>, vector<1x1x128xf32>
    tpu.vector_store %arg7[%c0_15, %c0_16, %c0_17], %21 {strides = array<i32>} : memref<1x1x128xf32, #tpu.memory_space<vmem>>, vector<1x1x128xf32>,
    return
  }
  func.func @transform_0(%arg0: i32) -> (i32, i32) {
    %c0_i32 = arith.constant 0 : i32
    %c0_i32_0 = arith.constant 0 : i32
    return %arg0, %c0_i32 : i32, i32
  }
  func.func @transform_1(%arg0: i32) -> (i32, i32) {
    %c0_i32 = arith.constant 0 : i32
    %c0_i32_0 = arith.constant 0 : i32
    %c0_i32_1 = arith.constant 0 : i32
    return %c0_i32, %c0_i32_0 : i32, i32
  }
  func.func @transform_2(%arg0: i32) -> (i32, i32) {
    %c0_i32 = arith.constant 0 : i32
    %c0_i32_0 = arith.constant 0 : i32
    %c0_i32_1 = arith.constant 0 : i32
    return %c0_i32, %c0_i32_0 : i32, i32
  }
  func.func @transform_3(%arg0: i32) -> (i32, i32) {
    %c0_i32 = arith.constant 0 : i32
    %c0_i32_0 = arith.constant 0 : i32
    %c0_i32_1 = arith.constant 0 : i32
    return %c0_i32, %c0_i32_0 : i32, i32
  }
  func.func @transform_4(%arg0: i32) -> (i32, i32) {
    %c0_i32 = arith.constant 0 : i32
    %c0_i32_0 = arith.constant 0 : i32
    return %arg0, %c0_i32 : i32, i32
  }
  func.func @transform_5(%arg0: i32) -> (i32, i32, i32) {
    %c0_i32 = arith.constant 0 : i32
    %c0_i32_0 = arith.constant 0 : i32
    %c0_i32_1 = arith.constant 0 : i32
    return %arg0, %c0_i32, %c0_i32_0 : i32, i32, i32
  }
  func.func @transform_6(%arg0: i32) -> (i32, i32, i32) {
    %c0_i32 = arith.constant 0 : i32
    %c0_i32_0 = arith.constant 0 : i32
    %c0_i32_1 = arith.constant 0 : i32
    return %arg0, %c0_i32, %c0_i32_0 : i32, i32, i32
  }
}

module attributes {stable_mosaic.version = 11 : i64} {
  func.func @_conv3x3_kernel(%arg0: i32, %arg1: i32, %arg2: memref<1x1x16x128xbf16, #tpu.memory_space<vmem>>, %arg3: memref<1x16x16x128xbf16, #tpu.memory_space<vmem>>, %arg4: memref<1x1x16x128xbf16, #tpu.memory_space<vmem>>, %arg5: memref<1x128xf32, #tpu.memory_space<vmem>>, %arg6: memref<1x128xf32, #tpu.memory_space<vmem>>, %arg7: memref<3x384x128xbf16, #tpu.memory_space<vmem>>, %arg8: memref<1x16x16x128xbf16, #tpu.memory_space<vmem>>, %arg9: memref<1x1x1x128xf32, #tpu.memory_space<vmem>>, %arg10: memref<1x1x1x128xf32, #tpu.memory_space<vmem>>, %arg11: memref<18x16x128xf32, #tpu.memory_space<vmem>>) attributes {dimension_semantics = [#tpu.dimension_semantics<parallel>, #tpu.dimension_semantics<parallel>], iteration_bounds = array<i64: 2, 1>, scalar_prefetch = 0 : i64, scratch_operands = 1 : i64, tpu.core_type = #tpu.core_type<tc>, window_params = [{transform_indices = @transform_0, window_bounds = array<i64: 1, 1, 16, 128>}, {transform_indices = @transform_1, window_bounds = array<i64: 1, 16, 16, 128>}, {transform_indices = @transform_2, window_bounds = array<i64: 1, 1, 16, 128>}, {pipeline_mode = #tpu.pipeline_mode<synchronous>, transform_indices = @transform_3, window_bounds = array<i64: 1, 128>}, {pipeline_mode = #tpu.pipeline_mode<synchronous>, transform_indices = @transform_4, window_bounds = array<i64: 1, 128>}, {pipeline_mode = #tpu.pipeline_mode<synchronous>, transform_indices = @transform_5, window_bounds = array<i64: 3, 384, 128>}, {transform_indices = @transform_6, window_bounds = array<i64: 1, 16, 16, 128>}, {transform_indices = @transform_7, window_bounds = array<i64: 1, 1, 1, 128>}, {transform_indices = @transform_8, window_bounds = array<i64: 1, 1, 1, 128>}]} {
    %c0 = arith.constant 0 : index
    %c0_0 = arith.constant 0 : index
    %0 = vector.load %arg5[%c0, %c0_0] : memref<1x128xf32, #tpu.memory_space<vmem>>, vector<1x128xf32>
    %c0_1 = arith.constant 0 : index
    %c0_2 = arith.constant 0 : index
    %1 = vector.load %arg6[%c0_1, %c0_2] : memref<1x128xf32, #tpu.memory_space<vmem>>, vector<1x128xf32>
    %c0_i32 = arith.constant 0 : i32
    %2 = arith.cmpi sgt, %arg1, %c0_i32 : i32
    %3 = arith.extui %2 : i1 to i32
    %4 = arith.sitofp %3 : i32 to f32
    %c0_i32_3 = arith.constant 0 : i32
    %5 = arith.cmpi slt, %arg1, %c0_i32_3 : i32
    %6 = arith.extui %5 : i1 to i32
    %7 = arith.sitofp %6 : i32 to f32
    %c0_4 = arith.constant 0 : index
    %c0_5 = arith.constant 0 : index
    %c0_6 = arith.constant 0 : index
    %c0_7 = arith.constant 0 : index
    %8 = vector.load %arg2[%c0_4, %c0_5, %c0_6, %c0_7] : memref<1x1x16x128xbf16, #tpu.memory_space<vmem>>, vector<1x1x16x128xbf16>
    %9 = vector.shape_cast %8 : vector<1x1x16x128xbf16> to vector<16x128xbf16>
    %10 = arith.extf %9 : vector<16x128xbf16> to vector<16x128xf32>
    %11 = vector.broadcast %0 : vector<1x128xf32> to vector<16x128xf32>
    %12 = arith.mulf %10, %11 : vector<16x128xf32>
    %13 = vector.broadcast %1 : vector<1x128xf32> to vector<16x128xf32>
    %14 = arith.addf %12, %13 : vector<16x128xf32>
    %cst = arith.constant 0.000000e+00 : f32
    %15 = vector.broadcast %cst : f32 to vector<16x128xf32>
    %16 = arith.maximumf %14, %15 : vector<16x128xf32>
    %17 = vector.broadcast %4 : f32 to vector<16x128xf32>
    %18 = arith.mulf %16, %17 : vector<16x128xf32>
    %c0_8 = arith.constant 0 : index
    %c0_9 = arith.constant 0 : index
    %c0_10 = arith.constant 0 : index
    %19 = vector.load %arg11[%c0_8, %c0_9, %c0_10] : memref<18x16x128xf32, #tpu.memory_space<vmem>>, vector<1x16x128xf32>
    %20 = vector.shape_cast %19 : vector<1x16x128xf32> to vector<16x128xf32>
    %21 = vector.shape_cast %18 : vector<16x128xf32> to vector<1x16x128xf32>
    tpu.vector_store %arg11[%c0_8, %c0_9, %c0_10], %21 {strides = array<i32>} : memref<18x16x128xf32, #tpu.memory_space<vmem>>, vector<1x16x128xf32>,
    %c0_11 = arith.constant 0 : index
    %c0_12 = arith.constant 0 : index
    %c0_13 = arith.constant 0 : index
    %c0_14 = arith.constant 0 : index
    %22 = vector.load %arg3[%c0_11, %c0_12, %c0_13, %c0_14] : memref<1x16x16x128xbf16, #tpu.memory_space<vmem>>, vector<1x16x16x128xbf16>
    %23 = vector.shape_cast %22 : vector<1x16x16x128xbf16> to vector<16x16x128xbf16>
    %24 = arith.extf %23 : vector<16x16x128xbf16> to vector<16x16x128xf32>
    %25 = vector.shape_cast %0 : vector<1x128xf32> to vector<1x1x128xf32>
    %26 = vector.broadcast %25 : vector<1x1x128xf32> to vector<16x16x128xf32>
    %27 = arith.mulf %24, %26 : vector<16x16x128xf32>
    %28 = vector.shape_cast %1 : vector<1x128xf32> to vector<1x1x128xf32>
    %29 = vector.broadcast %28 : vector<1x1x128xf32> to vector<16x16x128xf32>
    %30 = arith.addf %27, %29 : vector<16x16x128xf32>
    %cst_15 = arith.constant 0.000000e+00 : f32
    %31 = vector.broadcast %cst_15 : f32 to vector<16x16x128xf32>
    %32 = arith.maximumf %30, %31 : vector<16x16x128xf32>
    %c1 = arith.constant 1 : index
    %c0_16 = arith.constant 0 : index
    %c0_17 = arith.constant 0 : index
    %33 = vector.load %arg11[%c1, %c0_16, %c0_17] : memref<18x16x128xf32, #tpu.memory_space<vmem>>, vector<16x16x128xf32>
    tpu.vector_store %arg11[%c1, %c0_16, %c0_17], %32 {strides = array<i32>} : memref<18x16x128xf32, #tpu.memory_space<vmem>>, vector<16x16x128xf32>,
    %c0_18 = arith.constant 0 : index
    %c0_19 = arith.constant 0 : index
    %c0_20 = arith.constant 0 : index
    %c0_21 = arith.constant 0 : index
    %34 = vector.load %arg4[%c0_18, %c0_19, %c0_20, %c0_21] : memref<1x1x16x128xbf16, #tpu.memory_space<vmem>>, vector<1x1x16x128xbf16>
    %35 = vector.shape_cast %34 : vector<1x1x16x128xbf16> to vector<16x128xbf16>
    %36 = arith.extf %35 : vector<16x128xbf16> to vector<16x128xf32>
    %37 = vector.broadcast %0 : vector<1x128xf32> to vector<16x128xf32>
    %38 = arith.mulf %36, %37 : vector<16x128xf32>
    %39 = vector.broadcast %1 : vector<1x128xf32> to vector<16x128xf32>
    %40 = arith.addf %38, %39 : vector<16x128xf32>
    %cst_22 = arith.constant 0.000000e+00 : f32
    %41 = vector.broadcast %cst_22 : f32 to vector<16x128xf32>
    %42 = arith.maximumf %40, %41 : vector<16x128xf32>
    %43 = vector.broadcast %7 : f32 to vector<16x128xf32>
    %44 = arith.mulf %42, %43 : vector<16x128xf32>
    %c17 = arith.constant 17 : index
    %c0_23 = arith.constant 0 : index
    %c0_24 = arith.constant 0 : index
    %45 = vector.load %arg11[%c17, %c0_23, %c0_24] : memref<18x16x128xf32, #tpu.memory_space<vmem>>, vector<1x16x128xf32>
    %46 = vector.shape_cast %45 : vector<1x16x128xf32> to vector<16x128xf32>
    %47 = vector.shape_cast %44 : vector<16x128xf32> to vector<1x16x128xf32>
    tpu.vector_store %arg11[%c17, %c0_23, %c0_24], %47 {strides = array<i32>} : memref<18x16x128xf32, #tpu.memory_space<vmem>>, vector<1x16x128xf32>,
    %c0_25 = arith.constant 0 : index
    %c0_26 = arith.constant 0 : index
    %c0_27 = arith.constant 0 : index
    %48 = vector.load %arg11[%c0_25, %c0_26, %c0_27] : memref<18x16x128xf32, #tpu.memory_space<vmem>>, vector<16x16x128xf32>
    %cst_28 = arith.constant 0.000000e+00 : f32
    %49 = vector.broadcast %cst_28 : f32 to vector<16x1x128xf32>
    %50 = vector.extract_strided_slice %48 {offsets = [0, 0, 0], sizes = [16, 15, 128], strides = [1, 1, 1]} : vector<16x16x128xf32> to vector<16x15x128xf32>
    %51 = tpu.concatenate %49, %50 in 1 : vector<16x1x128xf32>, vector<16x15x128xf32> -> vector<16x16x128xf32>
    %52 = vector.extract_strided_slice %48 {offsets = [0, 1, 0], sizes = [16, 15, 128], strides = [1, 1, 1]} : vector<16x16x128xf32> to vector<16x15x128xf32>
    %53 = tpu.concatenate %52, %49 in 1 : vector<16x15x128xf32>, vector<16x1x128xf32> -> vector<16x16x128xf32>
    %54 = tpu.concatenate %51, %48, %53 in 2 : vector<16x16x128xf32>, vector<16x16x128xf32>, vector<16x16x128xf32> -> vector<16x16x384xf32>
    %55 = vector.shape_cast %54 : vector<16x16x384xf32> to vector<256x384xf32>
    %56 = arith.truncf %55 : vector<256x384xf32> to vector<256x384xbf16>
    %c0_29 = arith.constant 0 : index
    %c0_30 = arith.constant 0 : index
    %c0_31 = arith.constant 0 : index
    %57 = vector.load %arg7[%c0_29, %c0_30, %c0_31] : memref<3x384x128xbf16, #tpu.memory_space<vmem>>, vector<1x384x128xbf16>
    %58 = vector.shape_cast %57 : vector<1x384x128xbf16> to vector<384x128xbf16>
    %cst_32 = arith.constant dense<0.000000e+00> : vector<256x128xf32>
    %59 = tpu.matmul %56, %58, %cst_32 {dimension_numbers = #tpu.dot_dimension_numbers<[1], [0], [0], [1], [0, 0, 1, 1], [], []>} : vector<256x384xbf16>, vector<384x128xbf16>, vector<256x128xf32> -> vector<256x128xf32>
    %c1_33 = arith.constant 1 : index
    %c0_34 = arith.constant 0 : index
    %c0_35 = arith.constant 0 : index
    %60 = vector.load %arg11[%c1_33, %c0_34, %c0_35] : memref<18x16x128xf32, #tpu.memory_space<vmem>>, vector<16x16x128xf32>
    %cst_36 = arith.constant 0.000000e+00 : f32
    %61 = vector.broadcast %cst_36 : f32 to vector<16x1x128xf32>
    %62 = vector.extract_strided_slice %60 {offsets = [0, 0, 0], sizes = [16, 15, 128], strides = [1, 1, 1]} : vector<16x16x128xf32> to vector<16x15x128xf32>
    %63 = tpu.concatenate %61, %62 in 1 : vector<16x1x128xf32>, vector<16x15x128xf32> -> vector<16x16x128xf32>
    %64 = vector.extract_strided_slice %60 {offsets = [0, 1, 0], sizes = [16, 15, 128], strides = [1, 1, 1]} : vector<16x16x128xf32> to vector<16x15x128xf32>
    %65 = tpu.concatenate %64, %61 in 1 : vector<16x15x128xf32>, vector<16x1x128xf32> -> vector<16x16x128xf32>
    %66 = tpu.concatenate %63, %60, %65 in 2 : vector<16x16x128xf32>, vector<16x16x128xf32>, vector<16x16x128xf32> -> vector<16x16x384xf32>
    %67 = vector.shape_cast %66 : vector<16x16x384xf32> to vector<256x384xf32>
    %68 = arith.truncf %67 : vector<256x384xf32> to vector<256x384xbf16>
    %c1_37 = arith.constant 1 : index
    %c0_38 = arith.constant 0 : index
    %c0_39 = arith.constant 0 : index
    %69 = vector.load %arg7[%c1_37, %c0_38, %c0_39] : memref<3x384x128xbf16, #tpu.memory_space<vmem>>, vector<1x384x128xbf16>
    %70 = vector.shape_cast %69 : vector<1x384x128xbf16> to vector<384x128xbf16>
    %cst_40 = arith.constant dense<0.000000e+00> : vector<256x128xf32>
    %71 = tpu.matmul %68, %70, %cst_40 {dimension_numbers = #tpu.dot_dimension_numbers<[1], [0], [0], [1], [0, 0, 1, 1], [], []>} : vector<256x384xbf16>, vector<384x128xbf16>, vector<256x128xf32> -> vector<256x128xf32>
    %72 = arith.addf %59, %71 : vector<256x128xf32>
    %c2 = arith.constant 2 : index
    %c0_41 = arith.constant 0 : index
    %c0_42 = arith.constant 0 : index
    %73 = vector.load %arg11[%c2, %c0_41, %c0_42] : memref<18x16x128xf32, #tpu.memory_space<vmem>>, vector<16x16x128xf32>
    %cst_43 = arith.constant 0.000000e+00 : f32
    %74 = vector.broadcast %cst_43 : f32 to vector<16x1x128xf32>
    %75 = vector.extract_strided_slice %73 {offsets = [0, 0, 0], sizes = [16, 15, 128], strides = [1, 1, 1]} : vector<16x16x128xf32> to vector<16x15x128xf32>
    %76 = tpu.concatenate %74, %75 in 1 : vector<16x1x128xf32>, vector<16x15x128xf32> -> vector<16x16x128xf32>
    %77 = vector.extract_strided_slice %73 {offsets = [0, 1, 0], sizes = [16, 15, 128], strides = [1, 1, 1]} : vector<16x16x128xf32> to vector<16x15x128xf32>
    %78 = tpu.concatenate %77, %74 in 1 : vector<16x15x128xf32>, vector<16x1x128xf32> -> vector<16x16x128xf32>
    %79 = tpu.concatenate %76, %73, %78 in 2 : vector<16x16x128xf32>, vector<16x16x128xf32>, vector<16x16x128xf32> -> vector<16x16x384xf32>
    %80 = vector.shape_cast %79 : vector<16x16x384xf32> to vector<256x384xf32>
    %81 = arith.truncf %80 : vector<256x384xf32> to vector<256x384xbf16>
    %c2_44 = arith.constant 2 : index
    %c0_45 = arith.constant 0 : index
    %c0_46 = arith.constant 0 : index
    %82 = vector.load %arg7[%c2_44, %c0_45, %c0_46] : memref<3x384x128xbf16, #tpu.memory_space<vmem>>, vector<1x384x128xbf16>
    %83 = vector.shape_cast %82 : vector<1x384x128xbf16> to vector<384x128xbf16>
    %cst_47 = arith.constant dense<0.000000e+00> : vector<256x128xf32>
    %84 = tpu.matmul %81, %83, %cst_47 {dimension_numbers = #tpu.dot_dimension_numbers<[1], [0], [0], [1], [0, 0, 1, 1], [], []>} : vector<256x384xbf16>, vector<384x128xbf16>, vector<256x128xf32> -> vector<256x128xf32>
    %85 = arith.addf %72, %84 : vector<256x128xf32>
    %86 = vector.shape_cast %85 : vector<256x128xf32> to vector<1x16x16x128xf32>
    %87 = arith.truncf %86 : vector<1x16x16x128xf32> to vector<1x16x16x128xbf16>
    %c0_48 = arith.constant 0 : index
    %c0_49 = arith.constant 0 : index
    %c0_50 = arith.constant 0 : index
    %c0_51 = arith.constant 0 : index
    %88 = vector.load %arg8[%c0_48, %c0_49, %c0_50, %c0_51] : memref<1x16x16x128xbf16, #tpu.memory_space<vmem>>, vector<1x16x16x128xbf16>
    tpu.vector_store %arg8[%c0_48, %c0_49, %c0_50, %c0_51], %87 {strides = array<i32>} : memref<1x16x16x128xbf16, #tpu.memory_space<vmem>>, vector<1x16x16x128xbf16>,
    %cst_52 = arith.constant dense<0.000000e+00> : vector<128xf32>
    %89 = vector.multi_reduction <add>, %85, %cst_52 [0] : vector<256x128xf32> to vector<128xf32>
    %90 = vector.shape_cast %89 : vector<128xf32> to vector<1x1x1x128xf32>
    %c0_53 = arith.constant 0 : index
    %c0_54 = arith.constant 0 : index
    %c0_55 = arith.constant 0 : index
    %c0_56 = arith.constant 0 : index
    %91 = vector.load %arg9[%c0_53, %c0_54, %c0_55, %c0_56] : memref<1x1x1x128xf32, #tpu.memory_space<vmem>>, vector<1x1x1x128xf32>
    tpu.vector_store %arg9[%c0_53, %c0_54, %c0_55, %c0_56], %90 {strides = array<i32>} : memref<1x1x1x128xf32, #tpu.memory_space<vmem>>, vector<1x1x1x128xf32>,
    %92 = arith.mulf %85, %85 : vector<256x128xf32>
    %cst_57 = arith.constant dense<0.000000e+00> : vector<128xf32>
    %93 = vector.multi_reduction <add>, %92, %cst_57 [0] : vector<256x128xf32> to vector<128xf32>
    %94 = vector.shape_cast %93 : vector<128xf32> to vector<1x1x1x128xf32>
    %c0_58 = arith.constant 0 : index
    %c0_59 = arith.constant 0 : index
    %c0_60 = arith.constant 0 : index
    %c0_61 = arith.constant 0 : index
    %95 = vector.load %arg10[%c0_58, %c0_59, %c0_60, %c0_61] : memref<1x1x1x128xf32, #tpu.memory_space<vmem>>, vector<1x1x1x128xf32>
    tpu.vector_store %arg10[%c0_58, %c0_59, %c0_60, %c0_61], %94 {strides = array<i32>} : memref<1x1x1x128xf32, #tpu.memory_space<vmem>>, vector<1x1x1x128xf32>,
    return
  }
  func.func @transform_0(%arg0: i32, %arg1: i32) -> (i32, i32, i32, i32) {
    %c16_i32 = arith.constant 16 : i32
    %0 = arith.muli %arg1, %c16_i32 : i32
    %c1_i32 = arith.constant 1 : i32
    %1 = arith.subi %0, %c1_i32 : i32
    %c0_i32 = arith.constant 0 : i32
    %2 = arith.maxsi %1, %c0_i32 : i32
    %c0_i32_0 = arith.constant 0 : i32
    %c0_i32_1 = arith.constant 0 : i32
    %c0_i32_2 = arith.constant 0 : i32
    return %arg0, %2, %c0_i32_0, %c0_i32_1 : i32, i32, i32, i32
  }
  func.func @transform_1(%arg0: i32, %arg1: i32) -> (i32, i32, i32, i32) {
    %c0_i32 = arith.constant 0 : i32
    %c0_i32_0 = arith.constant 0 : i32
    %c0_i32_1 = arith.constant 0 : i32
    return %arg0, %arg1, %c0_i32, %c0_i32_0 : i32, i32, i32, i32
  }
  func.func @transform_2(%arg0: i32, %arg1: i32) -> (i32, i32, i32, i32) {
    %c1_i32 = arith.constant 1 : i32
    %0 = arith.addi %arg1, %c1_i32 : i32
    %c16_i32 = arith.constant 16 : i32
    %1 = arith.muli %0, %c16_i32 : i32
    %c15_i32 = arith.constant 15 : i32
    %2 = arith.minsi %1, %c15_i32 : i32
    %c0_i32 = arith.constant 0 : i32
    %c0_i32_0 = arith.constant 0 : i32
    %c0_i32_1 = arith.constant 0 : i32
    return %arg0, %2, %c0_i32, %c0_i32_0 : i32, i32, i32, i32
  }
  func.func @transform_3(%arg0: i32, %arg1: i32) -> (i32, i32) {
    %c0_i32 = arith.constant 0 : i32
    %c0_i32_0 = arith.constant 0 : i32
    %c0_i32_1 = arith.constant 0 : i32
    return %c0_i32, %c0_i32_0 : i32, i32
  }
  func.func @transform_4(%arg0: i32, %arg1: i32) -> (i32, i32) {
    %c0_i32 = arith.constant 0 : i32
    %c0_i32_0 = arith.constant 0 : i32
    %c0_i32_1 = arith.constant 0 : i32
    return %c0_i32, %c0_i32_0 : i32, i32
  }
  func.func @transform_5(%arg0: i32, %arg1: i32) -> (i32, i32, i32) {
    %c0_i32 = arith.constant 0 : i32
    %c0_i32_0 = arith.constant 0 : i32
    %c0_i32_1 = arith.constant 0 : i32
    %c0_i32_2 = arith.constant 0 : i32
    return %c0_i32, %c0_i32_0, %c0_i32_1 : i32, i32, i32
  }
  func.func @transform_6(%arg0: i32, %arg1: i32) -> (i32, i32, i32, i32) {
    %c0_i32 = arith.constant 0 : i32
    %c0_i32_0 = arith.constant 0 : i32
    %c0_i32_1 = arith.constant 0 : i32
    return %arg0, %arg1, %c0_i32, %c0_i32_0 : i32, i32, i32, i32
  }
  func.func @transform_7(%arg0: i32, %arg1: i32) -> (i32, i32, i32, i32) {
    %c0_i32 = arith.constant 0 : i32
    %c0_i32_0 = arith.constant 0 : i32
    %c0_i32_1 = arith.constant 0 : i32
    return %arg0, %arg1, %c0_i32, %c0_i32_0 : i32, i32, i32, i32
  }
  func.func @transform_8(%arg0: i32, %arg1: i32) -> (i32, i32, i32, i32) {
    %c0_i32 = arith.constant 0 : i32
    %c0_i32_0 = arith.constant 0 : i32
    %c0_i32_1 = arith.constant 0 : i32
    return %arg0, %arg1, %c0_i32, %c0_i32_0 : i32, i32, i32, i32
  }
}

module attributes {stable_mosaic.version = 11 : i64} {
  func.func @_bn_mm_kernel(%arg0: i32, %arg1: memref<256x128xbf16, #tpu.memory_space<vmem>>, %arg2: memref<1x128xf32, #tpu.memory_space<vmem>>, %arg3: memref<1x128xf32, #tpu.memory_space<vmem>>, %arg4: memref<128x128xbf16, #tpu.memory_space<vmem>>, %arg5: memref<256x128xf32, #tpu.memory_space<vmem>>, %arg6: memref<256x128xf32, #tpu.memory_space<vmem>>, %arg7: memref<1x1x128xf32, #tpu.memory_space<vmem>>, %arg8: memref<1x1x128xf32, #tpu.memory_space<vmem>>) attributes {dimension_semantics = [#tpu.dimension_semantics<parallel>], iteration_bounds = array<i64: 2>, scalar_prefetch = 0 : i64, scratch_operands = 0 : i64, tpu.core_type = #tpu.core_type<tc>, window_params = [{transform_indices = @transform_0, window_bounds = array<i64: 256, 128>}, {pipeline_mode = #tpu.pipeline_mode<synchronous>, transform_indices = @transform_1, window_bounds = array<i64: 1, 128>}, {pipeline_mode = #tpu.pipeline_mode<synchronous>, transform_indices = @transform_2, window_bounds = array<i64: 1, 128>}, {pipeline_mode = #tpu.pipeline_mode<synchronous>, transform_indices = @transform_3, window_bounds = array<i64: 128, 128>}, {transform_indices = @transform_4, window_bounds = array<i64: 256, 128>}, {transform_indices = @transform_5, window_bounds = array<i64: 256, 128>}, {transform_indices = @transform_6, window_bounds = array<i64: 1, 1, 128>}, {transform_indices = @transform_7, window_bounds = array<i64: 1, 1, 128>}]} {
    %c0 = arith.constant 0 : index
    %c0_0 = arith.constant 0 : index
    %0 = vector.load %arg1[%c0, %c0_0] : memref<256x128xbf16, #tpu.memory_space<vmem>>, vector<256x128xbf16>
    %1 = arith.extf %0 : vector<256x128xbf16> to vector<256x128xf32>
    %c0_1 = arith.constant 0 : index
    %c0_2 = arith.constant 0 : index
    %2 = vector.load %arg2[%c0_1, %c0_2] : memref<1x128xf32, #tpu.memory_space<vmem>>, vector<1x128xf32>
    %3 = vector.broadcast %2 : vector<1x128xf32> to vector<256x128xf32>
    %4 = arith.mulf %1, %3 : vector<256x128xf32>
    %c0_3 = arith.constant 0 : index
    %c0_4 = arith.constant 0 : index
    %5 = vector.load %arg3[%c0_3, %c0_4] : memref<1x128xf32, #tpu.memory_space<vmem>>, vector<1x128xf32>
    %6 = vector.broadcast %5 : vector<1x128xf32> to vector<256x128xf32>
    %7 = arith.addf %4, %6 : vector<256x128xf32>
    %cst = arith.constant 0.000000e+00 : f32
    %8 = vector.broadcast %cst : f32 to vector<256x128xf32>
    %9 = arith.maximumf %7, %8 : vector<256x128xf32>
    %10 = arith.truncf %9 : vector<256x128xf32> to vector<256x128xbf16>
    %c0_5 = arith.constant 0 : index
    %c0_6 = arith.constant 0 : index
    %11 = vector.load %arg4[%c0_5, %c0_6] : memref<128x128xbf16, #tpu.memory_space<vmem>>, vector<128x128xbf16>
    %cst_7 = arith.constant dense<0.000000e+00> : vector<256x128xf32>
    %12 = tpu.matmul %10, %11, %cst_7 {dimension_numbers = #tpu.dot_dimension_numbers<[1], [0], [0], [1], [0, 0, 1, 1], [], []>} : vector<256x128xbf16>, vector<128x128xbf16>, vector<256x128xf32> -> vector<256x128xf32>
    %c0_8 = arith.constant 0 : index
    %c0_9 = arith.constant 0 : index
    %13 = vector.load %arg5[%c0_8, %c0_9] : memref<256x128xf32, #tpu.memory_space<vmem>>, vector<256x128xf32>
    %14 = arith.addf %12, %13 : vector<256x128xf32>
    %c0_10 = arith.constant 0 : index
    %c0_11 = arith.constant 0 : index
    %15 = vector.load %arg6[%c0_10, %c0_11] : memref<256x128xf32, #tpu.memory_space<vmem>>, vector<256x128xf32>
    tpu.vector_store %arg6[%c0_10, %c0_11], %14 {strides = array<i32>} : memref<256x128xf32, #tpu.memory_space<vmem>>, vector<256x128xf32>,
    %cst_12 = arith.constant dense<0.000000e+00> : vector<128xf32>
    %16 = vector.multi_reduction <add>, %14, %cst_12 [0] : vector<256x128xf32> to vector<128xf32>
    %17 = vector.shape_cast %16 : vector<128xf32> to vector<1x128xf32>
    %18 = vector.shape_cast %17 : vector<1x128xf32> to vector<1x1x128xf32>
    %c0_13 = arith.constant 0 : index
    %c0_14 = arith.constant 0 : index
    %c0_15 = arith.constant 0 : index
    %19 = vector.load %arg7[%c0_13, %c0_14, %c0_15] : memref<1x1x128xf32, #tpu.memory_space<vmem>>, vector<1x1x128xf32>
    tpu.vector_store %arg7[%c0_13, %c0_14, %c0_15], %18 {strides = array<i32>} : memref<1x1x128xf32, #tpu.memory_space<vmem>>, vector<1x1x128xf32>,
    %20 = arith.mulf %14, %14 : vector<256x128xf32>
    %cst_16 = arith.constant dense<0.000000e+00> : vector<128xf32>
    %21 = vector.multi_reduction <add>, %20, %cst_16 [0] : vector<256x128xf32> to vector<128xf32>
    %22 = vector.shape_cast %21 : vector<128xf32> to vector<1x128xf32>
    %23 = vector.shape_cast %22 : vector<1x128xf32> to vector<1x1x128xf32>
    %c0_17 = arith.constant 0 : index
    %c0_18 = arith.constant 0 : index
    %c0_19 = arith.constant 0 : index
    %24 = vector.load %arg8[%c0_17, %c0_18, %c0_19] : memref<1x1x128xf32, #tpu.memory_space<vmem>>, vector<1x1x128xf32>
    tpu.vector_store %arg8[%c0_17, %c0_18, %c0_19], %23 {strides = array<i32>} : memref<1x1x128xf32, #tpu.memory_space<vmem>>, vector<1x1x128xf32>,
    return
  }
  func.func @transform_0(%arg0: i32) -> (i32, i32) {
    %c0_i32 = arith.constant 0 : i32
    %c0_i32_0 = arith.constant 0 : i32
    return %arg0, %c0_i32 : i32, i32
  }
  func.func @transform_1(%arg0: i32) -> (i32, i32) {
    %c0_i32 = arith.constant 0 : i32
    %c0_i32_0 = arith.constant 0 : i32
    %c0_i32_1 = arith.constant 0 : i32
    return %c0_i32, %c0_i32_0 : i32, i32
  }
  func.func @transform_2(%arg0: i32) -> (i32, i32) {
    %c0_i32 = arith.constant 0 : i32
    %c0_i32_0 = arith.constant 0 : i32
    %c0_i32_1 = arith.constant 0 : i32
    return %c0_i32, %c0_i32_0 : i32, i32
  }
  func.func @transform_3(%arg0: i32) -> (i32, i32) {
    %c0_i32 = arith.constant 0 : i32
    %c0_i32_0 = arith.constant 0 : i32
    %c0_i32_1 = arith.constant 0 : i32
    return %c0_i32, %c0_i32_0 : i32, i32
  }
  func.func @transform_4(%arg0: i32) -> (i32, i32) {
    %c0_i32 = arith.constant 0 : i32
    %c0_i32_0 = arith.constant 0 : i32
    return %arg0, %c0_i32 : i32, i32
  }
  func.func @transform_5(%arg0: i32) -> (i32, i32) {
    %c0_i32 = arith.constant 0 : i32
    %c0_i32_0 = arith.constant 0 : i32
    return %arg0, %c0_i32 : i32, i32
  }
  func.func @transform_6(%arg0: i32) -> (i32, i32, i32) {
    %c0_i32 = arith.constant 0 : i32
    %c0_i32_0 = arith.constant 0 : i32
    %c0_i32_1 = arith.constant 0 : i32
    return %arg0, %c0_i32, %c0_i32_0 : i32, i32, i32
  }
  func.func @transform_7(%arg0: i32) -> (i32, i32, i32) {
    %c0_i32 = arith.constant 0 : i32
    %c0_i32_0 = arith.constant 0 : i32
    %c0_i32_1 = arith.constant 0 : i32
    return %arg0, %c0_i32, %c0_i32_0 : i32, i32, i32
  }
}

module attributes {stable_mosaic.version = 11 : i64} {
  func.func @_bn_mm_kernel(%arg0: i32, %arg1: memref<64x128xf32, #tpu.memory_space<vmem>>, %arg2: memref<1x128xf32, #tpu.memory_space<vmem>>, %arg3: memref<1x128xf32, #tpu.memory_space<vmem>>, %arg4: memref<128x128xbf16, #tpu.memory_space<vmem>>, %arg5: memref<64x128xbf16, #tpu.memory_space<vmem>>, %arg6: memref<1x1x128xf32, #tpu.memory_space<vmem>>, %arg7: memref<1x1x128xf32, #tpu.memory_space<vmem>>) attributes {dimension_semantics = [#tpu.dimension_semantics<parallel>], iteration_bounds = array<i64: 2>, scalar_prefetch = 0 : i64, scratch_operands = 0 : i64, tpu.core_type = #tpu.core_type<tc>, window_params = [{transform_indices = @transform_0, window_bounds = array<i64: 64, 128>}, {pipeline_mode = #tpu.pipeline_mode<synchronous>, transform_indices = @transform_1, window_bounds = array<i64: 1, 128>}, {pipeline_mode = #tpu.pipeline_mode<synchronous>, transform_indices = @transform_2, window_bounds = array<i64: 1, 128>}, {pipeline_mode = #tpu.pipeline_mode<synchronous>, transform_indices = @transform_3, window_bounds = array<i64: 128, 128>}, {transform_indices = @transform_4, window_bounds = array<i64: 64, 128>}, {transform_indices = @transform_5, window_bounds = array<i64: 1, 1, 128>}, {transform_indices = @transform_6, window_bounds = array<i64: 1, 1, 128>}]} {
    %c0 = arith.constant 0 : index
    %c0_0 = arith.constant 0 : index
    %0 = vector.load %arg1[%c0, %c0_0] : memref<64x128xf32, #tpu.memory_space<vmem>>, vector<64x128xf32>
    %c0_1 = arith.constant 0 : index
    %c0_2 = arith.constant 0 : index
    %1 = vector.load %arg2[%c0_1, %c0_2] : memref<1x128xf32, #tpu.memory_space<vmem>>, vector<1x128xf32>
    %2 = vector.broadcast %1 : vector<1x128xf32> to vector<64x128xf32>
    %3 = arith.mulf %0, %2 : vector<64x128xf32>
    %c0_3 = arith.constant 0 : index
    %c0_4 = arith.constant 0 : index
    %4 = vector.load %arg3[%c0_3, %c0_4] : memref<1x128xf32, #tpu.memory_space<vmem>>, vector<1x128xf32>
    %5 = vector.broadcast %4 : vector<1x128xf32> to vector<64x128xf32>
    %6 = arith.addf %3, %5 : vector<64x128xf32>
    %cst = arith.constant 0.000000e+00 : f32
    %7 = vector.broadcast %cst : f32 to vector<64x128xf32>
    %8 = arith.maximumf %6, %7 : vector<64x128xf32>
    %9 = arith.truncf %8 : vector<64x128xf32> to vector<64x128xbf16>
    %c0_5 = arith.constant 0 : index
    %c0_6 = arith.constant 0 : index
    %10 = vector.load %arg4[%c0_5, %c0_6] : memref<128x128xbf16, #tpu.memory_space<vmem>>, vector<128x128xbf16>
    %cst_7 = arith.constant dense<0.000000e+00> : vector<64x128xf32>
    %11 = tpu.matmul %9, %10, %cst_7 {dimension_numbers = #tpu.dot_dimension_numbers<[1], [0], [0], [1], [0, 0, 1, 1], [], []>} : vector<64x128xbf16>, vector<128x128xbf16>, vector<64x128xf32> -> vector<64x128xf32>
    %12 = arith.truncf %11 : vector<64x128xf32> to vector<64x128xbf16>
    %c0_8 = arith.constant 0 : index
    %c0_9 = arith.constant 0 : index
    %13 = vector.load %arg5[%c0_8, %c0_9] : memref<64x128xbf16, #tpu.memory_space<vmem>>, vector<64x128xbf16>
    tpu.vector_store %arg5[%c0_8, %c0_9], %12 {strides = array<i32>} : memref<64x128xbf16, #tpu.memory_space<vmem>>, vector<64x128xbf16>,
    %cst_10 = arith.constant dense<0.000000e+00> : vector<128xf32>
    %14 = vector.multi_reduction <add>, %11, %cst_10 [0] : vector<64x128xf32> to vector<128xf32>
    %15 = vector.shape_cast %14 : vector<128xf32> to vector<1x128xf32>
    %16 = vector.shape_cast %15 : vector<1x128xf32> to vector<1x1x128xf32>
    %c0_11 = arith.constant 0 : index
    %c0_12 = arith.constant 0 : index
    %c0_13 = arith.constant 0 : index
    %17 = vector.load %arg6[%c0_11, %c0_12, %c0_13] : memref<1x1x128xf32, #tpu.memory_space<vmem>>, vector<1x1x128xf32>
    tpu.vector_store %arg6[%c0_11, %c0_12, %c0_13], %16 {strides = array<i32>} : memref<1x1x128xf32, #tpu.memory_space<vmem>>, vector<1x1x128xf32>,
    %18 = arith.mulf %11, %11 : vector<64x128xf32>
    %cst_14 = arith.constant dense<0.000000e+00> : vector<128xf32>
    %19 = vector.multi_reduction <add>, %18, %cst_14 [0] : vector<64x128xf32> to vector<128xf32>
    %20 = vector.shape_cast %19 : vector<128xf32> to vector<1x128xf32>
    %21 = vector.shape_cast %20 : vector<1x128xf32> to vector<1x1x128xf32>
    %c0_15 = arith.constant 0 : index
    %c0_16 = arith.constant 0 : index
    %c0_17 = arith.constant 0 : index
    %22 = vector.load %arg7[%c0_15, %c0_16, %c0_17] : memref<1x1x128xf32, #tpu.memory_space<vmem>>, vector<1x1x128xf32>
    tpu.vector_store %arg7[%c0_15, %c0_16, %c0_17], %21 {strides = array<i32>} : memref<1x1x128xf32, #tpu.memory_space<vmem>>, vector<1x1x128xf32>,
    return
  }
  func.func @transform_0(%arg0: i32) -> (i32, i32) {
    %c0_i32 = arith.constant 0 : i32
    %c0_i32_0 = arith.constant 0 : i32
    return %arg0, %c0_i32 : i32, i32
  }
  func.func @transform_1(%arg0: i32) -> (i32, i32) {
    %c0_i32 = arith.constant 0 : i32
    %c0_i32_0 = arith.constant 0 : i32
    %c0_i32_1 = arith.constant 0 : i32
    return %c0_i32, %c0_i32_0 : i32, i32
  }
  func.func @transform_2(%arg0: i32) -> (i32, i32) {
    %c0_i32 = arith.constant 0 : i32
    %c0_i32_0 = arith.constant 0 : i32
    %c0_i32_1 = arith.constant 0 : i32
    return %c0_i32, %c0_i32_0 : i32, i32
  }
  func.func @transform_3(%arg0: i32) -> (i32, i32) {
    %c0_i32 = arith.constant 0 : i32
    %c0_i32_0 = arith.constant 0 : i32
    %c0_i32_1 = arith.constant 0 : i32
    return %c0_i32, %c0_i32_0 : i32, i32
  }
  func.func @transform_4(%arg0: i32) -> (i32, i32) {
    %c0_i32 = arith.constant 0 : i32
    %c0_i32_0 = arith.constant 0 : i32
    return %arg0, %c0_i32 : i32, i32
  }
  func.func @transform_5(%arg0: i32) -> (i32, i32, i32) {
    %c0_i32 = arith.constant 0 : i32
    %c0_i32_0 = arith.constant 0 : i32
    %c0_i32_1 = arith.constant 0 : i32
    return %arg0, %c0_i32, %c0_i32_0 : i32, i32, i32
  }
  func.func @transform_6(%arg0: i32) -> (i32, i32, i32) {
    %c0_i32 = arith.constant 0 : i32
    %c0_i32_0 = arith.constant 0 : i32
    %c0_i32_1 = arith.constant 0 : i32
    return %arg0, %c0_i32, %c0_i32_0 : i32, i32, i32
  }
}

module attributes {stable_mosaic.version = 11 : i64} {
  func.func @_conv3x3_kernel(%arg0: i32, %arg1: i32, %arg2: memref<1x1x8x128xbf16, #tpu.memory_space<vmem>>, %arg3: memref<1x8x8x128xbf16, #tpu.memory_space<vmem>>, %arg4: memref<1x1x8x128xbf16, #tpu.memory_space<vmem>>, %arg5: memref<1x128xf32, #tpu.memory_space<vmem>>, %arg6: memref<1x128xf32, #tpu.memory_space<vmem>>, %arg7: memref<3x384x128xbf16, #tpu.memory_space<vmem>>, %arg8: memref<1x8x8x128xbf16, #tpu.memory_space<vmem>>, %arg9: memref<1x1x1x128xf32, #tpu.memory_space<vmem>>, %arg10: memref<1x1x1x128xf32, #tpu.memory_space<vmem>>, %arg11: memref<10x8x128xf32, #tpu.memory_space<vmem>>) attributes {dimension_semantics = [#tpu.dimension_semantics<parallel>, #tpu.dimension_semantics<parallel>], iteration_bounds = array<i64: 2, 1>, scalar_prefetch = 0 : i64, scratch_operands = 1 : i64, tpu.core_type = #tpu.core_type<tc>, window_params = [{transform_indices = @transform_0, window_bounds = array<i64: 1, 1, 8, 128>}, {transform_indices = @transform_1, window_bounds = array<i64: 1, 8, 8, 128>}, {transform_indices = @transform_2, window_bounds = array<i64: 1, 1, 8, 128>}, {pipeline_mode = #tpu.pipeline_mode<synchronous>, transform_indices = @transform_3, window_bounds = array<i64: 1, 128>}, {pipeline_mode = #tpu.pipeline_mode<synchronous>, transform_indices = @transform_4, window_bounds = array<i64: 1, 128>}, {pipeline_mode = #tpu.pipeline_mode<synchronous>, transform_indices = @transform_5, window_bounds = array<i64: 3, 384, 128>}, {transform_indices = @transform_6, window_bounds = array<i64: 1, 8, 8, 128>}, {transform_indices = @transform_7, window_bounds = array<i64: 1, 1, 1, 128>}, {transform_indices = @transform_8, window_bounds = array<i64: 1, 1, 1, 128>}]} {
    %c0 = arith.constant 0 : index
    %c0_0 = arith.constant 0 : index
    %0 = vector.load %arg5[%c0, %c0_0] : memref<1x128xf32, #tpu.memory_space<vmem>>, vector<1x128xf32>
    %c0_1 = arith.constant 0 : index
    %c0_2 = arith.constant 0 : index
    %1 = vector.load %arg6[%c0_1, %c0_2] : memref<1x128xf32, #tpu.memory_space<vmem>>, vector<1x128xf32>
    %c0_i32 = arith.constant 0 : i32
    %2 = arith.cmpi sgt, %arg1, %c0_i32 : i32
    %3 = arith.extui %2 : i1 to i32
    %4 = arith.sitofp %3 : i32 to f32
    %c0_i32_3 = arith.constant 0 : i32
    %5 = arith.cmpi slt, %arg1, %c0_i32_3 : i32
    %6 = arith.extui %5 : i1 to i32
    %7 = arith.sitofp %6 : i32 to f32
    %c0_4 = arith.constant 0 : index
    %c0_5 = arith.constant 0 : index
    %c0_6 = arith.constant 0 : index
    %c0_7 = arith.constant 0 : index
    %8 = vector.load %arg2[%c0_4, %c0_5, %c0_6, %c0_7] : memref<1x1x8x128xbf16, #tpu.memory_space<vmem>>, vector<1x1x8x128xbf16>
    %9 = vector.shape_cast %8 : vector<1x1x8x128xbf16> to vector<8x128xbf16>
    %10 = arith.extf %9 : vector<8x128xbf16> to vector<8x128xf32>
    %11 = vector.broadcast %0 : vector<1x128xf32> to vector<8x128xf32>
    %12 = arith.mulf %10, %11 : vector<8x128xf32>
    %13 = vector.broadcast %1 : vector<1x128xf32> to vector<8x128xf32>
    %14 = arith.addf %12, %13 : vector<8x128xf32>
    %cst = arith.constant 0.000000e+00 : f32
    %15 = vector.broadcast %cst : f32 to vector<8x128xf32>
    %16 = arith.maximumf %14, %15 : vector<8x128xf32>
    %17 = vector.broadcast %4 : f32 to vector<8x128xf32>
    %18 = arith.mulf %16, %17 : vector<8x128xf32>
    %c0_8 = arith.constant 0 : index
    %c0_9 = arith.constant 0 : index
    %c0_10 = arith.constant 0 : index
    %19 = vector.load %arg11[%c0_8, %c0_9, %c0_10] : memref<10x8x128xf32, #tpu.memory_space<vmem>>, vector<1x8x128xf32>
    %20 = vector.shape_cast %19 : vector<1x8x128xf32> to vector<8x128xf32>
    %21 = vector.shape_cast %18 : vector<8x128xf32> to vector<1x8x128xf32>
    tpu.vector_store %arg11[%c0_8, %c0_9, %c0_10], %21 {strides = array<i32>} : memref<10x8x128xf32, #tpu.memory_space<vmem>>, vector<1x8x128xf32>,
    %c0_11 = arith.constant 0 : index
    %c0_12 = arith.constant 0 : index
    %c0_13 = arith.constant 0 : index
    %c0_14 = arith.constant 0 : index
    %22 = vector.load %arg3[%c0_11, %c0_12, %c0_13, %c0_14] : memref<1x8x8x128xbf16, #tpu.memory_space<vmem>>, vector<1x8x8x128xbf16>
    %23 = vector.shape_cast %22 : vector<1x8x8x128xbf16> to vector<8x8x128xbf16>
    %24 = arith.extf %23 : vector<8x8x128xbf16> to vector<8x8x128xf32>
    %25 = vector.shape_cast %0 : vector<1x128xf32> to vector<1x1x128xf32>
    %26 = vector.broadcast %25 : vector<1x1x128xf32> to vector<8x8x128xf32>
    %27 = arith.mulf %24, %26 : vector<8x8x128xf32>
    %28 = vector.shape_cast %1 : vector<1x128xf32> to vector<1x1x128xf32>
    %29 = vector.broadcast %28 : vector<1x1x128xf32> to vector<8x8x128xf32>
    %30 = arith.addf %27, %29 : vector<8x8x128xf32>
    %cst_15 = arith.constant 0.000000e+00 : f32
    %31 = vector.broadcast %cst_15 : f32 to vector<8x8x128xf32>
    %32 = arith.maximumf %30, %31 : vector<8x8x128xf32>
    %c1 = arith.constant 1 : index
    %c0_16 = arith.constant 0 : index
    %c0_17 = arith.constant 0 : index
    %33 = vector.load %arg11[%c1, %c0_16, %c0_17] : memref<10x8x128xf32, #tpu.memory_space<vmem>>, vector<8x8x128xf32>
    tpu.vector_store %arg11[%c1, %c0_16, %c0_17], %32 {strides = array<i32>} : memref<10x8x128xf32, #tpu.memory_space<vmem>>, vector<8x8x128xf32>,
    %c0_18 = arith.constant 0 : index
    %c0_19 = arith.constant 0 : index
    %c0_20 = arith.constant 0 : index
    %c0_21 = arith.constant 0 : index
    %34 = vector.load %arg4[%c0_18, %c0_19, %c0_20, %c0_21] : memref<1x1x8x128xbf16, #tpu.memory_space<vmem>>, vector<1x1x8x128xbf16>
    %35 = vector.shape_cast %34 : vector<1x1x8x128xbf16> to vector<8x128xbf16>
    %36 = arith.extf %35 : vector<8x128xbf16> to vector<8x128xf32>
    %37 = vector.broadcast %0 : vector<1x128xf32> to vector<8x128xf32>
    %38 = arith.mulf %36, %37 : vector<8x128xf32>
    %39 = vector.broadcast %1 : vector<1x128xf32> to vector<8x128xf32>
    %40 = arith.addf %38, %39 : vector<8x128xf32>
    %cst_22 = arith.constant 0.000000e+00 : f32
    %41 = vector.broadcast %cst_22 : f32 to vector<8x128xf32>
    %42 = arith.maximumf %40, %41 : vector<8x128xf32>
    %43 = vector.broadcast %7 : f32 to vector<8x128xf32>
    %44 = arith.mulf %42, %43 : vector<8x128xf32>
    %c9 = arith.constant 9 : index
    %c0_23 = arith.constant 0 : index
    %c0_24 = arith.constant 0 : index
    %45 = vector.load %arg11[%c9, %c0_23, %c0_24] : memref<10x8x128xf32, #tpu.memory_space<vmem>>, vector<1x8x128xf32>
    %46 = vector.shape_cast %45 : vector<1x8x128xf32> to vector<8x128xf32>
    %47 = vector.shape_cast %44 : vector<8x128xf32> to vector<1x8x128xf32>
    tpu.vector_store %arg11[%c9, %c0_23, %c0_24], %47 {strides = array<i32>} : memref<10x8x128xf32, #tpu.memory_space<vmem>>, vector<1x8x128xf32>,
    %c0_25 = arith.constant 0 : index
    %c0_26 = arith.constant 0 : index
    %c0_27 = arith.constant 0 : index
    %48 = vector.load %arg11[%c0_25, %c0_26, %c0_27] : memref<10x8x128xf32, #tpu.memory_space<vmem>>, vector<8x8x128xf32>
    %cst_28 = arith.constant 0.000000e+00 : f32
    %49 = vector.broadcast %cst_28 : f32 to vector<8x1x128xf32>
    %50 = vector.extract_strided_slice %48 {offsets = [0, 0, 0], sizes = [8, 7, 128], strides = [1, 1, 1]} : vector<8x8x128xf32> to vector<8x7x128xf32>
    %51 = tpu.concatenate %49, %50 in 1 : vector<8x1x128xf32>, vector<8x7x128xf32> -> vector<8x8x128xf32>
    %52 = vector.extract_strided_slice %48 {offsets = [0, 1, 0], sizes = [8, 7, 128], strides = [1, 1, 1]} : vector<8x8x128xf32> to vector<8x7x128xf32>
    %53 = tpu.concatenate %52, %49 in 1 : vector<8x7x128xf32>, vector<8x1x128xf32> -> vector<8x8x128xf32>
    %54 = tpu.concatenate %51, %48, %53 in 2 : vector<8x8x128xf32>, vector<8x8x128xf32>, vector<8x8x128xf32> -> vector<8x8x384xf32>
    %55 = vector.shape_cast %54 : vector<8x8x384xf32> to vector<64x384xf32>
    %56 = arith.truncf %55 : vector<64x384xf32> to vector<64x384xbf16>
    %c0_29 = arith.constant 0 : index
    %c0_30 = arith.constant 0 : index
    %c0_31 = arith.constant 0 : index
    %57 = vector.load %arg7[%c0_29, %c0_30, %c0_31] : memref<3x384x128xbf16, #tpu.memory_space<vmem>>, vector<1x384x128xbf16>
    %58 = vector.shape_cast %57 : vector<1x384x128xbf16> to vector<384x128xbf16>
    %cst_32 = arith.constant dense<0.000000e+00> : vector<64x128xf32>
    %59 = tpu.matmul %56, %58, %cst_32 {dimension_numbers = #tpu.dot_dimension_numbers<[1], [0], [0], [1], [0, 0, 1, 1], [], []>} : vector<64x384xbf16>, vector<384x128xbf16>, vector<64x128xf32> -> vector<64x128xf32>
    %c1_33 = arith.constant 1 : index
    %c0_34 = arith.constant 0 : index
    %c0_35 = arith.constant 0 : index
    %60 = vector.load %arg11[%c1_33, %c0_34, %c0_35] : memref<10x8x128xf32, #tpu.memory_space<vmem>>, vector<8x8x128xf32>
    %cst_36 = arith.constant 0.000000e+00 : f32
    %61 = vector.broadcast %cst_36 : f32 to vector<8x1x128xf32>
    %62 = vector.extract_strided_slice %60 {offsets = [0, 0, 0], sizes = [8, 7, 128], strides = [1, 1, 1]} : vector<8x8x128xf32> to vector<8x7x128xf32>
    %63 = tpu.concatenate %61, %62 in 1 : vector<8x1x128xf32>, vector<8x7x128xf32> -> vector<8x8x128xf32>
    %64 = vector.extract_strided_slice %60 {offsets = [0, 1, 0], sizes = [8, 7, 128], strides = [1, 1, 1]} : vector<8x8x128xf32> to vector<8x7x128xf32>
    %65 = tpu.concatenate %64, %61 in 1 : vector<8x7x128xf32>, vector<8x1x128xf32> -> vector<8x8x128xf32>
    %66 = tpu.concatenate %63, %60, %65 in 2 : vector<8x8x128xf32>, vector<8x8x128xf32>, vector<8x8x128xf32> -> vector<8x8x384xf32>
    %67 = vector.shape_cast %66 : vector<8x8x384xf32> to vector<64x384xf32>
    %68 = arith.truncf %67 : vector<64x384xf32> to vector<64x384xbf16>
    %c1_37 = arith.constant 1 : index
    %c0_38 = arith.constant 0 : index
    %c0_39 = arith.constant 0 : index
    %69 = vector.load %arg7[%c1_37, %c0_38, %c0_39] : memref<3x384x128xbf16, #tpu.memory_space<vmem>>, vector<1x384x128xbf16>
    %70 = vector.shape_cast %69 : vector<1x384x128xbf16> to vector<384x128xbf16>
    %cst_40 = arith.constant dense<0.000000e+00> : vector<64x128xf32>
    %71 = tpu.matmul %68, %70, %cst_40 {dimension_numbers = #tpu.dot_dimension_numbers<[1], [0], [0], [1], [0, 0, 1, 1], [], []>} : vector<64x384xbf16>, vector<384x128xbf16>, vector<64x128xf32> -> vector<64x128xf32>
    %72 = arith.addf %59, %71 : vector<64x128xf32>
    %c2 = arith.constant 2 : index
    %c0_41 = arith.constant 0 : index
    %c0_42 = arith.constant 0 : index
    %73 = vector.load %arg11[%c2, %c0_41, %c0_42] : memref<10x8x128xf32, #tpu.memory_space<vmem>>, vector<8x8x128xf32>
    %cst_43 = arith.constant 0.000000e+00 : f32
    %74 = vector.broadcast %cst_43 : f32 to vector<8x1x128xf32>
    %75 = vector.extract_strided_slice %73 {offsets = [0, 0, 0], sizes = [8, 7, 128], strides = [1, 1, 1]} : vector<8x8x128xf32> to vector<8x7x128xf32>
    %76 = tpu.concatenate %74, %75 in 1 : vector<8x1x128xf32>, vector<8x7x128xf32> -> vector<8x8x128xf32>
    %77 = vector.extract_strided_slice %73 {offsets = [0, 1, 0], sizes = [8, 7, 128], strides = [1, 1, 1]} : vector<8x8x128xf32> to vector<8x7x128xf32>
    %78 = tpu.concatenate %77, %74 in 1 : vector<8x7x128xf32>, vector<8x1x128xf32> -> vector<8x8x128xf32>
    %79 = tpu.concatenate %76, %73, %78 in 2 : vector<8x8x128xf32>, vector<8x8x128xf32>, vector<8x8x128xf32> -> vector<8x8x384xf32>
    %80 = vector.shape_cast %79 : vector<8x8x384xf32> to vector<64x384xf32>
    %81 = arith.truncf %80 : vector<64x384xf32> to vector<64x384xbf16>
    %c2_44 = arith.constant 2 : index
    %c0_45 = arith.constant 0 : index
    %c0_46 = arith.constant 0 : index
    %82 = vector.load %arg7[%c2_44, %c0_45, %c0_46] : memref<3x384x128xbf16, #tpu.memory_space<vmem>>, vector<1x384x128xbf16>
    %83 = vector.shape_cast %82 : vector<1x384x128xbf16> to vector<384x128xbf16>
    %cst_47 = arith.constant dense<0.000000e+00> : vector<64x128xf32>
    %84 = tpu.matmul %81, %83, %cst_47 {dimension_numbers = #tpu.dot_dimension_numbers<[1], [0], [0], [1], [0, 0, 1, 1], [], []>} : vector<64x384xbf16>, vector<384x128xbf16>, vector<64x128xf32> -> vector<64x128xf32>
    %85 = arith.addf %72, %84 : vector<64x128xf32>
    %86 = vector.shape_cast %85 : vector<64x128xf32> to vector<1x8x8x128xf32>
    %87 = arith.truncf %86 : vector<1x8x8x128xf32> to vector<1x8x8x128xbf16>
    %c0_48 = arith.constant 0 : index
    %c0_49 = arith.constant 0 : index
    %c0_50 = arith.constant 0 : index
    %c0_51 = arith.constant 0 : index
    %88 = vector.load %arg8[%c0_48, %c0_49, %c0_50, %c0_51] : memref<1x8x8x128xbf16, #tpu.memory_space<vmem>>, vector<1x8x8x128xbf16>
    tpu.vector_store %arg8[%c0_48, %c0_49, %c0_50, %c0_51], %87 {strides = array<i32>} : memref<1x8x8x128xbf16, #tpu.memory_space<vmem>>, vector<1x8x8x128xbf16>,
    %cst_52 = arith.constant dense<0.000000e+00> : vector<128xf32>
    %89 = vector.multi_reduction <add>, %85, %cst_52 [0] : vector<64x128xf32> to vector<128xf32>
    %90 = vector.shape_cast %89 : vector<128xf32> to vector<1x1x1x128xf32>
    %c0_53 = arith.constant 0 : index
    %c0_54 = arith.constant 0 : index
    %c0_55 = arith.constant 0 : index
    %c0_56 = arith.constant 0 : index
    %91 = vector.load %arg9[%c0_53, %c0_54, %c0_55, %c0_56] : memref<1x1x1x128xf32, #tpu.memory_space<vmem>>, vector<1x1x1x128xf32>
    tpu.vector_store %arg9[%c0_53, %c0_54, %c0_55, %c0_56], %90 {strides = array<i32>} : memref<1x1x1x128xf32, #tpu.memory_space<vmem>>, vector<1x1x1x128xf32>,
    %92 = arith.mulf %85, %85 : vector<64x128xf32>
    %cst_57 = arith.constant dense<0.000000e+00> : vector<128xf32>
    %93 = vector.multi_reduction <add>, %92, %cst_57 [0] : vector<64x128xf32> to vector<128xf32>
    %94 = vector.shape_cast %93 : vector<128xf32> to vector<1x1x1x128xf32>
    %c0_58 = arith.constant 0 : index
    %c0_59 = arith.constant 0 : index
    %c0_60 = arith.constant 0 : index
    %c0_61 = arith.constant 0 : index
    %95 = vector.load %arg10[%c0_58, %c0_59, %c0_60, %c0_61] : memref<1x1x1x128xf32, #tpu.memory_space<vmem>>, vector<1x1x1x128xf32>
    tpu.vector_store %arg10[%c0_58, %c0_59, %c0_60, %c0_61], %94 {strides = array<i32>} : memref<1x1x1x128xf32, #tpu.memory_space<vmem>>, vector<1x1x1x128xf32>,
    return
  }
  func.func @transform_0(%arg0: i32, %arg1: i32) -> (i32, i32, i32, i32) {
    %c8_i32 = arith.constant 8 : i32
    %0 = arith.muli %arg1, %c8_i32 : i32
    %c1_i32 = arith.constant 1 : i32
    %1 = arith.subi %0, %c1_i32 : i32
    %c0_i32 = arith.constant 0 : i32
    %2 = arith.maxsi %1, %c0_i32 : i32
    %c0_i32_0 = arith.constant 0 : i32
    %c0_i32_1 = arith.constant 0 : i32
    %c0_i32_2 = arith.constant 0 : i32
    return %arg0, %2, %c0_i32_0, %c0_i32_1 : i32, i32, i32, i32
  }
  func.func @transform_1(%arg0: i32, %arg1: i32) -> (i32, i32, i32, i32) {
    %c0_i32 = arith.constant 0 : i32
    %c0_i32_0 = arith.constant 0 : i32
    %c0_i32_1 = arith.constant 0 : i32
    return %arg0, %arg1, %c0_i32, %c0_i32_0 : i32, i32, i32, i32
  }
  func.func @transform_2(%arg0: i32, %arg1: i32) -> (i32, i32, i32, i32) {
    %c1_i32 = arith.constant 1 : i32
    %0 = arith.addi %arg1, %c1_i32 : i32
    %c8_i32 = arith.constant 8 : i32
    %1 = arith.muli %0, %c8_i32 : i32
    %c7_i32 = arith.constant 7 : i32
    %2 = arith.minsi %1, %c7_i32 : i32
    %c0_i32 = arith.constant 0 : i32
    %c0_i32_0 = arith.constant 0 : i32
    %c0_i32_1 = arith.constant 0 : i32
    return %arg0, %2, %c0_i32, %c0_i32_0 : i32, i32, i32, i32
  }
  func.func @transform_3(%arg0: i32, %arg1: i32) -> (i32, i32) {
    %c0_i32 = arith.constant 0 : i32
    %c0_i32_0 = arith.constant 0 : i32
    %c0_i32_1 = arith.constant 0 : i32
    return %c0_i32, %c0_i32_0 : i32, i32
  }
  func.func @transform_4(%arg0: i32, %arg1: i32) -> (i32, i32) {
    %c0_i32 = arith.constant 0 : i32
    %c0_i32_0 = arith.constant 0 : i32
    %c0_i32_1 = arith.constant 0 : i32
    return %c0_i32, %c0_i32_0 : i32, i32
  }
  func.func @transform_5(%arg0: i32, %arg1: i32) -> (i32, i32, i32) {
    %c0_i32 = arith.constant 0 : i32
    %c0_i32_0 = arith.constant 0 : i32
    %c0_i32_1 = arith.constant 0 : i32
    %c0_i32_2 = arith.constant 0 : i32
    return %c0_i32, %c0_i32_0, %c0_i32_1 : i32, i32, i32
  }
  func.func @transform_6(%arg0: i32, %arg1: i32) -> (i32, i32, i32, i32) {
    %c0_i32 = arith.constant 0 : i32
    %c0_i32_0 = arith.constant 0 : i32
    %c0_i32_1 = arith.constant 0 : i32
    return %arg0, %arg1, %c0_i32, %c0_i32_0 : i32, i32, i32, i32
  }
  func.func @transform_7(%arg0: i32, %arg1: i32) -> (i32, i32, i32, i32) {
    %c0_i32 = arith.constant 0 : i32
    %c0_i32_0 = arith.constant 0 : i32
    %c0_i32_1 = arith.constant 0 : i32
    return %arg0, %arg1, %c0_i32, %c0_i32_0 : i32, i32, i32, i32
  }
  func.func @transform_8(%arg0: i32, %arg1: i32) -> (i32, i32, i32, i32) {
    %c0_i32 = arith.constant 0 : i32
    %c0_i32_0 = arith.constant 0 : i32
    %c0_i32_1 = arith.constant 0 : i32
    return %arg0, %arg1, %c0_i32, %c0_i32_0 : i32, i32, i32, i32
  }
}

module attributes {stable_mosaic.version = 11 : i64} {
  func.func @_bn_mm_kernel(%arg0: i32, %arg1: memref<64x128xbf16, #tpu.memory_space<vmem>>, %arg2: memref<1x128xf32, #tpu.memory_space<vmem>>, %arg3: memref<1x128xf32, #tpu.memory_space<vmem>>, %arg4: memref<128x128xbf16, #tpu.memory_space<vmem>>, %arg5: memref<64x128xf32, #tpu.memory_space<vmem>>, %arg6: memref<64x128xf32, #tpu.memory_space<vmem>>, %arg7: memref<1x1x128xf32, #tpu.memory_space<vmem>>, %arg8: memref<1x1x128xf32, #tpu.memory_space<vmem>>) attributes {dimension_semantics = [#tpu.dimension_semantics<parallel>], iteration_bounds = array<i64: 2>, scalar_prefetch = 0 : i64, scratch_operands = 0 : i64, tpu.core_type = #tpu.core_type<tc>, window_params = [{transform_indices = @transform_0, window_bounds = array<i64: 64, 128>}, {pipeline_mode = #tpu.pipeline_mode<synchronous>, transform_indices = @transform_1, window_bounds = array<i64: 1, 128>}, {pipeline_mode = #tpu.pipeline_mode<synchronous>, transform_indices = @transform_2, window_bounds = array<i64: 1, 128>}, {pipeline_mode = #tpu.pipeline_mode<synchronous>, transform_indices = @transform_3, window_bounds = array<i64: 128, 128>}, {transform_indices = @transform_4, window_bounds = array<i64: 64, 128>}, {transform_indices = @transform_5, window_bounds = array<i64: 64, 128>}, {transform_indices = @transform_6, window_bounds = array<i64: 1, 1, 128>}, {transform_indices = @transform_7, window_bounds = array<i64: 1, 1, 128>}]} {
    %c0 = arith.constant 0 : index
    %c0_0 = arith.constant 0 : index
    %0 = vector.load %arg1[%c0, %c0_0] : memref<64x128xbf16, #tpu.memory_space<vmem>>, vector<64x128xbf16>
    %1 = arith.extf %0 : vector<64x128xbf16> to vector<64x128xf32>
    %c0_1 = arith.constant 0 : index
    %c0_2 = arith.constant 0 : index
    %2 = vector.load %arg2[%c0_1, %c0_2] : memref<1x128xf32, #tpu.memory_space<vmem>>, vector<1x128xf32>
    %3 = vector.broadcast %2 : vector<1x128xf32> to vector<64x128xf32>
    %4 = arith.mulf %1, %3 : vector<64x128xf32>
    %c0_3 = arith.constant 0 : index
    %c0_4 = arith.constant 0 : index
    %5 = vector.load %arg3[%c0_3, %c0_4] : memref<1x128xf32, #tpu.memory_space<vmem>>, vector<1x128xf32>
    %6 = vector.broadcast %5 : vector<1x128xf32> to vector<64x128xf32>
    %7 = arith.addf %4, %6 : vector<64x128xf32>
    %cst = arith.constant 0.000000e+00 : f32
    %8 = vector.broadcast %cst : f32 to vector<64x128xf32>
    %9 = arith.maximumf %7, %8 : vector<64x128xf32>
    %10 = arith.truncf %9 : vector<64x128xf32> to vector<64x128xbf16>
    %c0_5 = arith.constant 0 : index
    %c0_6 = arith.constant 0 : index
    %11 = vector.load %arg4[%c0_5, %c0_6] : memref<128x128xbf16, #tpu.memory_space<vmem>>, vector<128x128xbf16>
    %cst_7 = arith.constant dense<0.000000e+00> : vector<64x128xf32>
    %12 = tpu.matmul %10, %11, %cst_7 {dimension_numbers = #tpu.dot_dimension_numbers<[1], [0], [0], [1], [0, 0, 1, 1], [], []>} : vector<64x128xbf16>, vector<128x128xbf16>, vector<64x128xf32> -> vector<64x128xf32>
    %c0_8 = arith.constant 0 : index
    %c0_9 = arith.constant 0 : index
    %13 = vector.load %arg5[%c0_8, %c0_9] : memref<64x128xf32, #tpu.memory_space<vmem>>, vector<64x128xf32>
    %14 = arith.addf %12, %13 : vector<64x128xf32>
    %c0_10 = arith.constant 0 : index
    %c0_11 = arith.constant 0 : index
    %15 = vector.load %arg6[%c0_10, %c0_11] : memref<64x128xf32, #tpu.memory_space<vmem>>, vector<64x128xf32>
    tpu.vector_store %arg6[%c0_10, %c0_11], %14 {strides = array<i32>} : memref<64x128xf32, #tpu.memory_space<vmem>>, vector<64x128xf32>,
    %cst_12 = arith.constant dense<0.000000e+00> : vector<128xf32>
    %16 = vector.multi_reduction <add>, %14, %cst_12 [0] : vector<64x128xf32> to vector<128xf32>
    %17 = vector.shape_cast %16 : vector<128xf32> to vector<1x128xf32>
    %18 = vector.shape_cast %17 : vector<1x128xf32> to vector<1x1x128xf32>
    %c0_13 = arith.constant 0 : index
    %c0_14 = arith.constant 0 : index
    %c0_15 = arith.constant 0 : index
    %19 = vector.load %arg7[%c0_13, %c0_14, %c0_15] : memref<1x1x128xf32, #tpu.memory_space<vmem>>, vector<1x1x128xf32>
    tpu.vector_store %arg7[%c0_13, %c0_14, %c0_15], %18 {strides = array<i32>} : memref<1x1x128xf32, #tpu.memory_space<vmem>>, vector<1x1x128xf32>,
    %20 = arith.mulf %14, %14 : vector<64x128xf32>
    %cst_16 = arith.constant dense<0.000000e+00> : vector<128xf32>
    %21 = vector.multi_reduction <add>, %20, %cst_16 [0] : vector<64x128xf32> to vector<128xf32>
    %22 = vector.shape_cast %21 : vector<128xf32> to vector<1x128xf32>
    %23 = vector.shape_cast %22 : vector<1x128xf32> to vector<1x1x128xf32>
    %c0_17 = arith.constant 0 : index
    %c0_18 = arith.constant 0 : index
    %c0_19 = arith.constant 0 : index
    %24 = vector.load %arg8[%c0_17, %c0_18, %c0_19] : memref<1x1x128xf32, #tpu.memory_space<vmem>>, vector<1x1x128xf32>
    tpu.vector_store %arg8[%c0_17, %c0_18, %c0_19], %23 {strides = array<i32>} : memref<1x1x128xf32, #tpu.memory_space<vmem>>, vector<1x1x128xf32>,
    return
  }
  func.func @transform_0(%arg0: i32) -> (i32, i32) {
    %c0_i32 = arith.constant 0 : i32
    %c0_i32_0 = arith.constant 0 : i32
    return %arg0, %c0_i32 : i32, i32
  }
  func.func @transform_1(%arg0: i32) -> (i32, i32) {
    %c0_i32 = arith.constant 0 : i32
    %c0_i32_0 = arith.constant 0 : i32
    %c0_i32_1 = arith.constant 0 : i32
    return %c0_i32, %c0_i32_0 : i32, i32
  }
  func.func @transform_2(%arg0: i32) -> (i32, i32) {
    %c0_i32 = arith.constant 0 : i32
    %c0_i32_0 = arith.constant 0 : i32
    %c0_i32_1 = arith.constant 0 : i32
    return %c0_i32, %c0_i32_0 : i32, i32
  }
  func.func @transform_3(%arg0: i32) -> (i32, i32) {
    %c0_i32 = arith.constant 0 : i32
    %c0_i32_0 = arith.constant 0 : i32
    %c0_i32_1 = arith.constant 0 : i32
    return %c0_i32, %c0_i32_0 : i32, i32
  }
  func.func @transform_4(%arg0: i32) -> (i32, i32) {
    %c0_i32 = arith.constant 0 : i32
    %c0_i32_0 = arith.constant 0 : i32
    return %arg0, %c0_i32 : i32, i32
  }
  func.func @transform_5(%arg0: i32) -> (i32, i32) {
    %c0_i32 = arith.constant 0 : i32
    %c0_i32_0 = arith.constant 0 : i32
    return %arg0, %c0_i32 : i32, i32
  }
  func.func @transform_6(%arg0: i32) -> (i32, i32, i32) {
    %c0_i32 = arith.constant 0 : i32
    %c0_i32_0 = arith.constant 0 : i32
    %c0_i32_1 = arith.constant 0 : i32
    return %arg0, %c0_i32, %c0_i32_0 : i32, i32, i32
  }
  func.func @transform_7(%arg0: i32) -> (i32, i32, i32) {
    %c0_i32 = arith.constant 0 : i32
    %c0_i32_0 = arith.constant 0 : i32
    %c0_i32_1 = arith.constant 0 : i32
    return %arg0, %c0_i32, %c0_i32_0 : i32, i32, i32
  }
}

module attributes {stable_mosaic.version = 11 : i64} {
  func.func @_bn_mm_kernel(%arg0: i32, %arg1: memref<64x128xbf16, #tpu.memory_space<vmem>>, %arg2: memref<1x128xf32, #tpu.memory_space<vmem>>, %arg3: memref<1x128xf32, #tpu.memory_space<vmem>>, %arg4: memref<128x128xbf16, #tpu.memory_space<vmem>>, %arg5: memref<64x128xf32, #tpu.memory_space<vmem>>, %arg6: memref<64x128xf32, #tpu.memory_space<vmem>>, %arg7: memref<1x1x128xf32, #tpu.memory_space<vmem>>, %arg8: memref<1x1x128xf32, #tpu.memory_space<vmem>>) attributes {dimension_semantics = [#tpu.dimension_semantics<parallel>], iteration_bounds = array<i64: 2>, scalar_prefetch = 0 : i64, scratch_operands = 0 : i64, tpu.core_type = #tpu.core_type<tc>, window_params = [{transform_indices = @transform_0, window_bounds = array<i64: 64, 128>}, {pipeline_mode = #tpu.pipeline_mode<synchronous>, transform_indices = @transform_1, window_bounds = array<i64: 1, 128>}, {pipeline_mode = #tpu.pipeline_mode<synchronous>, transform_indices = @transform_2, window_bounds = array<i64: 1, 128>}, {pipeline_mode = #tpu.pipeline_mode<synchronous>, transform_indices = @transform_3, window_bounds = array<i64: 128, 128>}, {transform_indices = @transform_4, window_bounds = array<i64: 64, 128>}, {transform_indices = @transform_5, window_bounds = array<i64: 64, 128>}, {transform_indices = @transform_6, window_bounds = array<i64: 1, 1, 128>}, {transform_indices = @transform_7, window_bounds = array<i64: 1, 1, 128>}]} {
    %c0 = arith.constant 0 : index
    %c0_0 = arith.constant 0 : index
    %0 = vector.load %arg1[%c0, %c0_0] : memref<64x128xbf16, #tpu.memory_space<vmem>>, vector<64x128xbf16>
    %1 = arith.extf %0 : vector<64x128xbf16> to vector<64x128xf32>
    %c0_1 = arith.constant 0 : index
    %c0_2 = arith.constant 0 : index
    %2 = vector.load %arg2[%c0_1, %c0_2] : memref<1x128xf32, #tpu.memory_space<vmem>>, vector<1x128xf32>
    %3 = vector.broadcast %2 : vector<1x128xf32> to vector<64x128xf32>
    %4 = arith.mulf %1, %3 : vector<64x128xf32>
    %c0_3 = arith.constant 0 : index
    %c0_4 = arith.constant 0 : index
    %5 = vector.load %arg3[%c0_3, %c0_4] : memref<1x128xf32, #tpu.memory_space<vmem>>, vector<1x128xf32>
    %6 = vector.broadcast %5 : vector<1x128xf32> to vector<64x128xf32>
    %7 = arith.addf %4, %6 : vector<64x128xf32>
    %cst = arith.constant 0.000000e+00 : f32
    %8 = vector.broadcast %cst : f32 to vector<64x128xf32>
    %9 = arith.maximumf %7, %8 : vector<64x128xf32>
    %10 = arith.truncf %9 : vector<64x128xf32> to vector<64x128xbf16>
    %c0_5 = arith.constant 0 : index
    %c0_6 = arith.constant 0 : index
    %11 = vector.load %arg4[%c0_5, %c0_6] : memref<128x128xbf16, #tpu.memory_space<vmem>>, vector<128x128xbf16>
    %cst_7 = arith.constant dense<0.000000e+00> : vector<64x128xf32>
    %12 = tpu.matmul %10, %11, %cst_7 {dimension_numbers = #tpu.dot_dimension_numbers<[1], [0], [0], [1], [0, 0, 1, 1], [], []>} : vector<64x128xbf16>, vector<128x128xbf16>, vector<64x128xf32> -> vector<64x128xf32>
    %c0_8 = arith.constant 0 : index
    %c0_9 = arith.constant 0 : index
    %13 = vector.load %arg5[%c0_8, %c0_9] : memref<64x128xf32, #tpu.memory_space<vmem>>, vector<64x128xf32>
    %14 = arith.addf %12, %13 : vector<64x128xf32>
    %c0_10 = arith.constant 0 : index
    %c0_11 = arith.constant 0 : index
    %15 = vector.load %arg6[%c0_10, %c0_11] : memref<64x128xf32, #tpu.memory_space<vmem>>, vector<64x128xf32>
    tpu.vector_store %arg6[%c0_10, %c0_11], %14 {strides = array<i32>} : memref<64x128xf32, #tpu.memory_space<vmem>>, vector<64x128xf32>,
    %cst_12 = arith.constant dense<0.000000e+00> : vector<128xf32>
    %16 = vector.multi_reduction <add>, %14, %cst_12 [0] : vector<64x128xf32> to vector<128xf32>
    %17 = vector.shape_cast %16 : vector<128xf32> to vector<1x128xf32>
    %18 = vector.shape_cast %17 : vector<1x128xf32> to vector<1x1x128xf32>
    %c0_13 = arith.constant 0 : index
    %c0_14 = arith.constant 0 : index
    %c0_15 = arith.constant 0 : index
    %19 = vector.load %arg7[%c0_13, %c0_14, %c0_15] : memref<1x1x128xf32, #tpu.memory_space<vmem>>, vector<1x1x128xf32>
    tpu.vector_store %arg7[%c0_13, %c0_14, %c0_15], %18 {strides = array<i32>} : memref<1x1x128xf32, #tpu.memory_space<vmem>>, vector<1x1x128xf32>,
    %20 = arith.mulf %14, %14 : vector<64x128xf32>
    %cst_16 = arith.constant dense<0.000000e+00> : vector<128xf32>
    %21 = vector.multi_reduction <add>, %20, %cst_16 [0] : vector<64x128xf32> to vector<128xf32>
    %22 = vector.shape_cast %21 : vector<128xf32> to vector<1x128xf32>
    %23 = vector.shape_cast %22 : vector<1x128xf32> to vector<1x1x128xf32>
    %c0_17 = arith.constant 0 : index
    %c0_18 = arith.constant 0 : index
    %c0_19 = arith.constant 0 : index
    %24 = vector.load %arg8[%c0_17, %c0_18, %c0_19] : memref<1x1x128xf32, #tpu.memory_space<vmem>>, vector<1x1x128xf32>
    tpu.vector_store %arg8[%c0_17, %c0_18, %c0_19], %23 {strides = array<i32>} : memref<1x1x128xf32, #tpu.memory_space<vmem>>, vector<1x1x128xf32>,
    return
  }
  func.func @transform_0(%arg0: i32) -> (i32, i32) {
    %c0_i32 = arith.constant 0 : i32
    %c0_i32_0 = arith.constant 0 : i32
    return %arg0, %c0_i32 : i32, i32
  }
  func.func @transform_1(%arg0: i32) -> (i32, i32) {
    %c0_i32 = arith.constant 0 : i32
    %c0_i32_0 = arith.constant 0 : i32
    %c0_i32_1 = arith.constant 0 : i32
    return %c0_i32, %c0_i32_0 : i32, i32
  }
  func.func @transform_2(%arg0: i32) -> (i32, i32) {
    %c0_i32 = arith.constant 0 : i32
    %c0_i32_0 = arith.constant 0 : i32
    %c0_i32_1 = arith.constant 0 : i32
    return %c0_i32, %c0_i32_0 : i32, i32
  }
  func.func @transform_3(%arg0: i32) -> (i32, i32) {
    %c0_i32 = arith.constant 0 : i32
    %c0_i32_0 = arith.constant 0 : i32
    %c0_i32_1 = arith.constant 0 : i32
    return %c0_i32, %c0_i32_0 : i32, i32
  }
  func.func @transform_4(%arg0: i32) -> (i32, i32) {
    %c0_i32 = arith.constant 0 : i32
    %c0_i32_0 = arith.constant 0 : i32
    return %arg0, %c0_i32 : i32, i32
  }
  func.func @transform_5(%arg0: i32) -> (i32, i32) {
    %c0_i32 = arith.constant 0 : i32
    %c0_i32_0 = arith.constant 0 : i32
    return %arg0, %c0_i32 : i32, i32
  }
  func.func @transform_6(%arg0: i32) -> (i32, i32, i32) {
    %c0_i32 = arith.constant 0 : i32
    %c0_i32_0 = arith.constant 0 : i32
    %c0_i32_1 = arith.constant 0 : i32
    return %arg0, %c0_i32, %c0_i32_0 : i32, i32, i32
  }
  func.func @transform_7(%arg0: i32) -> (i32, i32, i32) {
    %c0_i32 = arith.constant 0 : i32
    %c0_i32_0 = arith.constant 0 : i32
    %c0_i32_1 = arith.constant 0 : i32
    return %arg0, %c0_i32, %c0_i32_0 : i32, i32, i32
  }
}

module attributes {stable_mosaic.version = 11 : i64} {
  func.func @_bn_mm_kernel(%arg0: i32, %arg1: memref<256x128xbf16, #tpu.memory_space<vmem>>, %arg2: memref<1x128xf32, #tpu.memory_space<vmem>>, %arg3: memref<1x128xf32, #tpu.memory_space<vmem>>, %arg4: memref<128x128xbf16, #tpu.memory_space<vmem>>, %arg5: memref<256x128xf32, #tpu.memory_space<vmem>>, %arg6: memref<256x128xf32, #tpu.memory_space<vmem>>, %arg7: memref<1x1x128xf32, #tpu.memory_space<vmem>>, %arg8: memref<1x1x128xf32, #tpu.memory_space<vmem>>) attributes {dimension_semantics = [#tpu.dimension_semantics<parallel>], iteration_bounds = array<i64: 2>, scalar_prefetch = 0 : i64, scratch_operands = 0 : i64, tpu.core_type = #tpu.core_type<tc>, window_params = [{transform_indices = @transform_0, window_bounds = array<i64: 256, 128>}, {pipeline_mode = #tpu.pipeline_mode<synchronous>, transform_indices = @transform_1, window_bounds = array<i64: 1, 128>}, {pipeline_mode = #tpu.pipeline_mode<synchronous>, transform_indices = @transform_2, window_bounds = array<i64: 1, 128>}, {pipeline_mode = #tpu.pipeline_mode<synchronous>, transform_indices = @transform_3, window_bounds = array<i64: 128, 128>}, {transform_indices = @transform_4, window_bounds = array<i64: 256, 128>}, {transform_indices = @transform_5, window_bounds = array<i64: 256, 128>}, {transform_indices = @transform_6, window_bounds = array<i64: 1, 1, 128>}, {transform_indices = @transform_7, window_bounds = array<i64: 1, 1, 128>}]} {
    %c0 = arith.constant 0 : index
    %c0_0 = arith.constant 0 : index
    %0 = vector.load %arg1[%c0, %c0_0] : memref<256x128xbf16, #tpu.memory_space<vmem>>, vector<256x128xbf16>
    %1 = arith.extf %0 : vector<256x128xbf16> to vector<256x128xf32>
    %c0_1 = arith.constant 0 : index
    %c0_2 = arith.constant 0 : index
    %2 = vector.load %arg2[%c0_1, %c0_2] : memref<1x128xf32, #tpu.memory_space<vmem>>, vector<1x128xf32>
    %3 = vector.broadcast %2 : vector<1x128xf32> to vector<256x128xf32>
    %4 = arith.mulf %1, %3 : vector<256x128xf32>
    %c0_3 = arith.constant 0 : index
    %c0_4 = arith.constant 0 : index
    %5 = vector.load %arg3[%c0_3, %c0_4] : memref<1x128xf32, #tpu.memory_space<vmem>>, vector<1x128xf32>
    %6 = vector.broadcast %5 : vector<1x128xf32> to vector<256x128xf32>
    %7 = arith.addf %4, %6 : vector<256x128xf32>
    %cst = arith.constant 0.000000e+00 : f32
    %8 = vector.broadcast %cst : f32 to vector<256x128xf32>
    %9 = arith.maximumf %7, %8 : vector<256x128xf32>
    %10 = arith.truncf %9 : vector<256x128xf32> to vector<256x128xbf16>
    %c0_5 = arith.constant 0 : index
    %c0_6 = arith.constant 0 : index
    %11 = vector.load %arg4[%c0_5, %c0_6] : memref<128x128xbf16, #tpu.memory_space<vmem>>, vector<128x128xbf16>
    %cst_7 = arith.constant dense<0.000000e+00> : vector<256x128xf32>
    %12 = tpu.matmul %10, %11, %cst_7 {dimension_numbers = #tpu.dot_dimension_numbers<[1], [0], [0], [1], [0, 0, 1, 1], [], []>} : vector<256x128xbf16>, vector<128x128xbf16>, vector<256x128xf32> -> vector<256x128xf32>
    %c0_8 = arith.constant 0 : index
    %c0_9 = arith.constant 0 : index
    %13 = vector.load %arg5[%c0_8, %c0_9] : memref<256x128xf32, #tpu.memory_space<vmem>>, vector<256x128xf32>
    %14 = arith.addf %12, %13 : vector<256x128xf32>
    %c0_10 = arith.constant 0 : index
    %c0_11 = arith.constant 0 : index
    %15 = vector.load %arg6[%c0_10, %c0_11] : memref<256x128xf32, #tpu.memory_space<vmem>>, vector<256x128xf32>
    tpu.vector_store %arg6[%c0_10, %c0_11], %14 {strides = array<i32>} : memref<256x128xf32, #tpu.memory_space<vmem>>, vector<256x128xf32>,
    %cst_12 = arith.constant dense<0.000000e+00> : vector<128xf32>
    %16 = vector.multi_reduction <add>, %14, %cst_12 [0] : vector<256x128xf32> to vector<128xf32>
    %17 = vector.shape_cast %16 : vector<128xf32> to vector<1x128xf32>
    %18 = vector.shape_cast %17 : vector<1x128xf32> to vector<1x1x128xf32>
    %c0_13 = arith.constant 0 : index
    %c0_14 = arith.constant 0 : index
    %c0_15 = arith.constant 0 : index
    %19 = vector.load %arg7[%c0_13, %c0_14, %c0_15] : memref<1x1x128xf32, #tpu.memory_space<vmem>>, vector<1x1x128xf32>
    tpu.vector_store %arg7[%c0_13, %c0_14, %c0_15], %18 {strides = array<i32>} : memref<1x1x128xf32, #tpu.memory_space<vmem>>, vector<1x1x128xf32>,
    %20 = arith.mulf %14, %14 : vector<256x128xf32>
    %cst_16 = arith.constant dense<0.000000e+00> : vector<128xf32>
    %21 = vector.multi_reduction <add>, %20, %cst_16 [0] : vector<256x128xf32> to vector<128xf32>
    %22 = vector.shape_cast %21 : vector<128xf32> to vector<1x128xf32>
    %23 = vector.shape_cast %22 : vector<1x128xf32> to vector<1x1x128xf32>
    %c0_17 = arith.constant 0 : index
    %c0_18 = arith.constant 0 : index
    %c0_19 = arith.constant 0 : index
    %24 = vector.load %arg8[%c0_17, %c0_18, %c0_19] : memref<1x1x128xf32, #tpu.memory_space<vmem>>, vector<1x1x128xf32>
    tpu.vector_store %arg8[%c0_17, %c0_18, %c0_19], %23 {strides = array<i32>} : memref<1x1x128xf32, #tpu.memory_space<vmem>>, vector<1x1x128xf32>,
    return
  }
  func.func @transform_0(%arg0: i32) -> (i32, i32) {
    %c0_i32 = arith.constant 0 : i32
    %c0_i32_0 = arith.constant 0 : i32
    return %arg0, %c0_i32 : i32, i32
  }
  func.func @transform_1(%arg0: i32) -> (i32, i32) {
    %c0_i32 = arith.constant 0 : i32
    %c0_i32_0 = arith.constant 0 : i32
    %c0_i32_1 = arith.constant 0 : i32
    return %c0_i32, %c0_i32_0 : i32, i32
  }
  func.func @transform_2(%arg0: i32) -> (i32, i32) {
    %c0_i32 = arith.constant 0 : i32
    %c0_i32_0 = arith.constant 0 : i32
    %c0_i32_1 = arith.constant 0 : i32
    return %c0_i32, %c0_i32_0 : i32, i32
  }
  func.func @transform_3(%arg0: i32) -> (i32, i32) {
    %c0_i32 = arith.constant 0 : i32
    %c0_i32_0 = arith.constant 0 : i32
    %c0_i32_1 = arith.constant 0 : i32
    return %c0_i32, %c0_i32_0 : i32, i32
  }
  func.func @transform_4(%arg0: i32) -> (i32, i32) {
    %c0_i32 = arith.constant 0 : i32
    %c0_i32_0 = arith.constant 0 : i32
    return %arg0, %c0_i32 : i32, i32
  }
  func.func @transform_5(%arg0: i32) -> (i32, i32) {
    %c0_i32 = arith.constant 0 : i32
    %c0_i32_0 = arith.constant 0 : i32
    return %arg0, %c0_i32 : i32, i32
  }
  func.func @transform_6(%arg0: i32) -> (i32, i32, i32) {
    %c0_i32 = arith.constant 0 : i32
    %c0_i32_0 = arith.constant 0 : i32
    %c0_i32_1 = arith.constant 0 : i32
    return %arg0, %c0_i32, %c0_i32_0 : i32, i32, i32
  }
  func.func @transform_7(%arg0: i32) -> (i32, i32, i32) {
    %c0_i32 = arith.constant 0 : i32
    %c0_i32_0 = arith.constant 0 : i32
    %c0_i32_1 = arith.constant 0 : i32
    return %arg0, %c0_i32, %c0_i32_0 : i32, i32, i32
  }
}

</mosaic_0001>

<bundles_post_ra>
// kernel: fmf_hourglass_forward.15
= control target key start
LH: loop header
LB: loop body
LE: loop exit
PB: predicated region body
PF: predicated region fallthrough
CT: control target
= control target key end

     0   :  { %s1078_s21 = smov 0   ;;  %s1374_s0 = inlined_call_operand.vmem [shape: f32[512,128], index: 0, kind: input, shape index: {}]   ;;  %s1375_s1 = inlined_call_operand.vmem [shape: f32[1,128], index: 1, kind: input, shape index: {}]   ;;  %s1376_s2 = inlined_call_operand.vmem [shape: f32[1,128], index: 2, kind: input, shape index: {}]   ;;  %s1377_s3 = inlined_call_operand.vmem [shape: bf16[128,128], index: 3, kind: input, shape index: {}]   ;;  %s1378_s4 = inlined_call_operand.vmem [shape: bf16[512,128], index: 4, kind: output, shape index: {0}]   ;;  %s1379_s5 = inlined_call_operand.vmem [shape: f32[2,1,128], index: 5, kind: output, shape index: {1}]   ;;  %s1380_s6 = inlined_call_operand.vmem [shape: f32[2,1,128], index: 6, kind: output, shape index: {2}]  }
   0x1 LB: > { %s1084_s22 = sadd.s32 4294967295, %s1041_s21   ;;  %p859_p0 = scmp.ge.s32.totalorder %s1041_s21, 1  ;;  %s1041_s21 = sphi %s1078_s21, %s17_s21  }
   0x2   : > { %p218_p1 = scmp.lt.s32.totalorder %s1041_s21, 3 }
   0x4   : > { %p219_p2 = pnand %p859_p0, %p218_p1 }
   0x5   : > { %s860_s25 = sshll.u32 (!%p219_p2), %s1084_s22, 5  ;;  %p266_p4 = scmp.lt.s32.totalorder (!%p219_p2), %s1084_s22, 1 }
   0x6   : > { %222 = sbr.rel (%p219_p2) target bundleno = 290 (0x122), region = 36  ;;  %p255_p3 = scmp.lt.s32.totalorder (!%p219_p2), %s860_s25, 63 }
   0xb   : > { %v905_v0 = vld [vmem:[%s1377_s3 + $0x38] sm:$0xff]  ;;  %v904_v1 = vld [vmem:[%s1377_s3 + $0x30] sm:$0xff]  ;;  %s1382_s25 = smov (!%p255_p3, %s860_s25), 63  ;;  %v903_v2 = vld [vmem:[%s1377_s3 + $0x28] sm:$0xff]  ;;  %s1384_s22 = smov (!%p266_p4, %s1084_s22), 1 }
   0xc   : > { %488 = vmatpush.bf16.msra.mxu0 %v905_v0  ;;  %1001 = vmatpush.bf16.msra.mxu1 %v905_v0  ;;  %s861_s30 = sshll.u32 %s1382_s25, 3  ;;  %v902_v3 = vld [vmem:[%s1377_s3 + $0x20] sm:$0xff]  ;;  %v901_v4 = vld [vmem:[%s1377_s3 + $0x18] sm:$0xff]  ;;  %v900_v17 = vld [vmem:[%s1377_s3 + $0x10] sm:$0xff]  ;;  %s863_s27 = sshll.u32 %s1382_s25, 2 }
   0xd   : > { %1002 = vmatpush.bf16.msra.mxu2 %v905_v0  ;;  %1003 = vmatpush.bf16.msra.mxu3 %v905_v0  ;;  %s1107_s11 = scalar_lea.vmem %s1374_s0, %s861_s30  ;;  %v1116_v6 = vld [vmem:[%s1375_s1] ss:$0 sm:$0xff]  ;;  %v899_v24 = vld [vmem:[%s1377_s3 + $0x8] sm:$0xff]  ;;  %s1235_s30 = scalar_lea.vmem %s1378_s4, %s863_s27 }
   0xe   : > { %v272_v5 = vld [vmem:[%s1107_s11] sm:$0xff]  ;;  %v273_v7 = vld [vmem:[%s1107_s11 + $0x8] sm:$0xff]  ;;  %v274_v40 = vld [vmem:[%s1107_s11 + $0x10] sm:$0xff]  ;;  %s268_s8 = scalar_lea.vmem %s1379_s5, %s1384_s22 }
   0xf   : > { %v280_v8 = vld [vmem:[%s1107_s11 + $0x40] sm:$0xff]  ;;  %v281_v9 = vld [vmem:[%s1107_s11 + $0x48] sm:$0xff]  ;;  %v308_v12 = vmul.f32 %v1116_v6, %v272_v5  ;;  %v309_v13 = vmul.f32 %v1116_v6, %v273_v7  ;;  %v275_v42 = vld [vmem:[%s1107_s11 + $0x18] sm:$0xff]  ;;  %v310_v50 = vmul.f32 %v1116_v6, %v274_v40 }
  0x10   : > { %489 = vmatpush.bf16.msra.mxu0 %v904_v1  ;;  %1004 = vmatpush.bf16.msra.mxu1 %v904_v1  ;;  %v288_v10 = vld [vmem:[%s1107_s11 + $0x80] sm:$0xff]  ;;  %v289_v11 = vld [vmem:[%s1107_s11 + $0x88] sm:$0xff]  ;;  %v316_v15 = vmul.f32 %v1116_v6, %v280_v8  ;;  %v317_v16 = vmul.f32 %v1116_v6, %v281_v9  ;;  %v282_v44 = vld [vmem:[%s1107_s11 + $0x50] sm:$0xff]  ;;  %v311_v52 = vmul.f32 %v1116_v6, %v275_v42 }
  0x11   : > { %1005 = vmatpush.bf16.msra.mxu2 %v904_v1  ;;  %1006 = vmatpush.bf16.msra.mxu3 %v904_v1  ;;  %v1128_v14 = vld [vmem:[%s1376_s2] ss:$0 sm:$0xff]  ;;  %v324_v18 = vmul.f32 %v1116_v6, %v288_v10  ;;  %v325_v19 = vmul.f32 %v1116_v6, %v289_v11  ;;  %v297_v35 = vld [vmem:[%s1107_s11 + $0xc8] sm:$0xff]  ;;  %v283_v45 = vld [vmem:[%s1107_s11 + $0x58] sm:$0xff]  ;;  %v318_v53 = vmul.f32 %v1116_v6, %v282_v44 }
  0x12   : > { %v344_v20 = vadd.f32 %v1128_v14, %v308_v12  ;;  %v345_v21 = vadd.f32 %v1128_v14, %v309_v13  ;;  %v352_v22 = vadd.f32 %v1128_v14, %v316_v15  ;;  %v353_v23 = vadd.f32 %v1128_v14, %v317_v16  ;;  %v898_v31 = vld [vmem:[%s1377_s3] sm:$0xff]  ;;  %v290_v47 = vld [vmem:[%s1107_s11 + $0x90] sm:$0xff]  ;;  %v291_v48 = vld [vmem:[%s1107_s11 + $0x98] sm:$0xff] }
  0x13   : > { %v360_v25 = vadd.f32 %v1128_v14, %v324_v18  ;;  %v361_v26 = vadd.f32 %v1128_v14, %v325_v19  ;;  %v296_v34 = vld [vmem:[%s1107_s11 + $0xc0] sm:$0xff]  ;;  %v333_v37 = vmul.f32 %v1116_v6, %v297_v35  ;;  %v319_v54 = vmul.f32 %v1116_v6, %v283_v45  ;;  %v298_v7 = vld [vmem:[%s1107_s11 + $0xd0] sm:$0xff]  ;;  %v299_v8 = vld [vmem:[%s1107_s11 + $0xd8] sm:$0xff] }
  0x14   : > { %490 = vmatpush.bf16.msra.mxu0 %v903_v2  ;;  %1007 = vmatpush.bf16.msra.mxu1 %v903_v2  ;;  %v376_v27 = vmax.f32 %v344_v20, 0.0  ;;  %v377_v28 = vmax.f32 %v345_v21, 0.0  ;;  %v384_v29 = vmax.f32 %v352_v22, 0.0  ;;  %v385_v30 = vmax.f32 %v353_v23, 0.0  ;;  %v276_v13 = vld [vmem:[%s1107_s11 + $0x20] sm:$0xff]  ;;  %v277_v16 = vld [vmem:[%s1107_s11 + $0x28] sm:$0xff] }
  0x15   : > { %1008 = vmatpush.bf16.msra.mxu2 %v903_v2  ;;  %1009 = vmatpush.bf16.msra.mxu3 %v903_v2  ;;  %v392_v32 = vmax.f32 %v360_v25, 0.0  ;;  %v393_v33 = vmax.f32 %v361_v26, 0.0  ;;  %v332_v36 = vmul.f32 %v1116_v6, %v296_v34  ;;  %v369_v46 = vadd.f32 %v1128_v14, %v333_v37  ;;  %v284_v18 = vld [vmem:[%s1107_s11 + $0x60] sm:$0xff]  ;;  %v285_v19 = vld [vmem:[%s1107_s11 + $0x68] sm:$0xff] }
  0x16   : > { %v408_v38 = vpack.c.bf16 %v377_v28, %v376_v27  ;;  %v412_v39 = vpack.c.bf16 %v385_v30, %v384_v29  ;;  %v326_v55 = vmul.f32 %v1116_v6, %v290_v47  ;;  %v327_v56 = vmul.f32 %v1116_v6, %v291_v48  ;;  %v292_v21 = vld [vmem:[%s1107_s11 + $0xa0] sm:$0xff]  ;;  %v293_v22 = vld [vmem:[%s1107_s11 + $0xa8] sm:$0xff] }
  0x17   : > { %v368_v41 = vadd.f32 %v1128_v14, %v332_v36  ;;  %v416_v43 = vpack.c.bf16 %v393_v33, %v392_v32  ;;  %v401_v51 = vmax.f32 %v369_v46, 0.0  ;;  %v346_v58 = vadd.f32 %v1128_v14, %v310_v50  ;;  %v300_v32 = vld [vmem:[%s1107_s11 + $0xe0] sm:$0xff]  ;;  %v301_v33 = vld [vmem:[%s1107_s11 + $0xe8] sm:$0xff] }
  0x18   : > { %491 = vmatpush.bf16.msra.mxu0 %v902_v3  ;;  %1010 = vmatpush.bf16.msra.mxu1 %v902_v3  ;;  %v347_v59 = vadd.f32 %v1128_v14, %v311_v52  ;;  %v354_v60 = vadd.f32 %v1128_v14, %v318_v53  ;;  %v355_v61 = vadd.f32 %v1128_v14, %v319_v54  ;;  %v278_v54 = vld [vmem:[%s1107_s11 + $0x30] sm:$0xff] }
  0x19   : > { %1011 = vmatpush.bf16.msra.mxu2 %v902_v3  ;;  %1012 = vmatpush.bf16.msra.mxu3 %v902_v3  ;;  %v400_v49 = vmax.f32 %v368_v41, 0.0  ;;  %v362_v62 = vadd.f32 %v1128_v14, %v326_v55  ;;  %v363_v63 = vadd.f32 %v1128_v14, %v327_v56  ;;  %v378_v0 = vmax.f32 %v346_v58, 0.0  ;;  %v279_v55 = vld [vmem:[%s1107_s11 + $0x38] sm:$0xff] }
  0x1a   : > { %v379_v1 = vmax.f32 %v347_v59, 0.0  ;;  %v386_v2 = vmax.f32 %v354_v60, 0.0  ;;  %v387_v3 = vmax.f32 %v355_v61, 0.0  ;;  %v334_v9 = vmul.f32 %v1116_v6, %v298_v7  ;;  %v287_v58 = vld [vmem:[%s1107_s11 + $0x78] sm:$0xff]  ;;  %v294_v59 = vld [vmem:[%s1107_s11 + $0xb0] sm:$0xff] }
  0x1b   : > { %v420_v57 = vpack.c.bf16 %v401_v51, %v400_v49  ;;  %v395_v5 = vmax.f32 %v363_v63, 0.0  ;;  %v335_v10 = vmul.f32 %v1116_v6, %v299_v8  ;;  %v313_v26 = vmul.f32 %v1116_v6, %v277_v16  ;;  %v295_v60 = vld [vmem:[%s1107_s11 + $0xb8] sm:$0xff] }
  0x1c   : > { %492 = vmatpush.bf16.msra.mxu0 %v901_v4  ;;  %1013 = vmatpush.bf16.msra.mxu1 %v901_v4  ;;  %v409_v11 = vpack.c.bf16 %v379_v1, %v378_v0  ;;  %v413_v12 = vpack.c.bf16 %v387_v3, %v386_v2  ;;  %v370_v15 = vadd.f32 %v1128_v14, %v334_v9  ;;  %v302_v2 = vld [vmem:[%s1107_s11 + $0xf0] sm:$0xff]  ;;  %v303_v3 = vld [vmem:[%s1107_s11 + $0xf8] sm:$0xff] }
  0x1d   : > { %1014 = vmatpush.bf16.msra.mxu2 %v901_v4  ;;  %1015 = vmatpush.bf16.msra.mxu3 %v901_v4  ;;  %v394_v4 = vmax.f32 %v362_v62, 0.0  ;;  %v371_v20 = vadd.f32 %v1128_v14, %v335_v10  ;;  %v320_v27 = vmul.f32 %v1116_v6, %v284_v18  ;;  %v321_v28 = vmul.f32 %v1116_v6, %v285_v19 }
  0x1e   : > { %v402_v23 = vmax.f32 %v370_v15, 0.0  ;;  %v328_v29 = vmul.f32 %v1116_v6, %v292_v21  ;;  %v329_v30 = vmul.f32 %v1116_v6, %v293_v22  ;;  %v336_v34 = vmul.f32 %v1116_v6, %v300_v32 }
  0x1f   : > { %v403_v25 = vmax.f32 %v371_v20, 0.0  ;;  %v337_v35 = vmul.f32 %v1116_v6, %v301_v33  ;;  %v349_v37 = vadd.f32 %v1128_v14, %v313_v26  ;;  %v314_v61 = vmul.f32 %v1116_v6, %v278_v54 }
  0x20   : > { %493 = vmatpush.bf16.msra.mxu0 %v900_v17  ;;  %1016 = vmatpush.bf16.msra.mxu1 %v900_v17  ;;  %v364_v40 = vadd.f32 %v1128_v14, %v328_v29  ;;  %v365_v41 = vadd.f32 %v1128_v14, %v329_v30  ;;  %v372_v42 = vadd.f32 %v1128_v14, %v336_v34 }
  0x21   : > { %1017 = vmatpush.bf16.msra.mxu2 %v900_v17  ;;  %1018 = vmatpush.bf16.msra.mxu3 %v900_v17  ;;  %v417_v17 = vpack.c.bf16 %v395_v5, %v394_v4  ;;  %v381_v45 = vmax.f32 %v349_v37, 0.0  ;;  %v315_v63 = vmul.f32 %v1116_v6, %v279_v55  ;;  %v323_v1 = vmul.f32 %v1116_v6, %v287_v58 }
  0x22   : > { %v396_v48 = vmax.f32 %v364_v40, 0.0  ;;  %v397_v49 = vmax.f32 %v365_v41, 0.0  ;;  %v404_v50 = vmax.f32 %v372_v42, 0.0  ;;  %v330_v4 = vmul.f32 %v1116_v6, %v294_v59 }
  0x23   : > { %v331_v5 = vmul.f32 %v1116_v6, %v295_v60  ;;  %v338_v7 = vmul.f32 %v1116_v6, %v302_v2  ;;  %v339_v8 = vmul.f32 %v1116_v6, %v303_v3  ;;  %v350_v9 = vadd.f32 %v1128_v14, %v314_v61 }
  0x24   : > { %494 = vmatpush.bf16.msra.mxu0 %v899_v24  ;;  %1019 = vmatpush.bf16.msra.mxu1 %v899_v24  ;;  %v418_v56 = vpack.c.bf16 %v397_v49, %v396_v48  ;;  %v351_v10 = vadd.f32 %v1128_v14, %v315_v63 }
  0x25   : > { %1020 = vmatpush.bf16.msra.mxu2 %v899_v24  ;;  %1021 = vmatpush.bf16.msra.mxu3 %v899_v24  ;;  %v312_v24 = vmul.f32 %v1116_v6, %v276_v13  ;;  %v366_v13 = vadd.f32 %v1128_v14, %v330_v4  ;;  %v367_v15 = vadd.f32 %v1128_v14, %v331_v5  ;;  %v382_v18 = vmax.f32 %v350_v9, 0.0 }
  0x26   : > { %v374_v16 = vadd.f32 %v1128_v14, %v338_v7  ;;  %v383_v19 = vmax.f32 %v351_v10, 0.0 }
  0x27   : > { %v348_v36 = vadd.f32 %v1128_v14, %v312_v24  ;;  %v398_v21 = vmax.f32 %v366_v13, 0.0  ;;  %v399_v22 = vmax.f32 %v367_v15, 0.0 }
  0x28   : > { %495 = vmatpush.bf16.msra.mxu0 %v898_v31  ;;  %1022 = vmatpush.bf16.msra.mxu1 %v898_v31 }
  0x29   : > { %1023 = vmatpush.bf16.msra.mxu2 %v898_v31  ;;  %1024 = vmatpush.bf16.msra.mxu3 %v898_v31  ;;  %v421_v31 = vpack.c.bf16 %v403_v25, %v402_v23  ;;  %v380_v44 = vmax.f32 %v348_v36, 0.0  ;;  %v406_v23 = vmax.f32 %v374_v16, 0.0  ;;  %v411_v25 = vpack.c.bf16 %v383_v19, %v382_v18 }
  0x2b   : > { %496 = vmatmul.bf16.vlgmr.msra.gmra.mxu0 %v408_v38  ;;  %516 = vmatmul.bf16.vlgmr.msra.gmra.mxu1 %v412_v39  ;;  %v356_v38 = vadd.f32 %v1128_v14, %v320_v27  ;;  %v357_v39 = vadd.f32 %v1128_v14, %v321_v28  ;;  %v410_v52 = vpack.c.bf16 %v381_v45, %v380_v44 }
  0x2c   : > { %536 = vmatmul.bf16.vlgmr.msra.gmra.mxu2 %v416_v43  ;;  %556 = vmatmul.bf16.vlgmr.msra.gmra.mxu3 %v420_v57  ;;  %v373_v43 = vadd.f32 %v1128_v14, %v337_v35  ;;  %v286_v57 = vld [vmem:[%s1107_s11 + $0x70] sm:$0xff]  ;;  %v419_v27 = vpack.c.bf16 %v399_v22, %v398_v21  ;;  %s271_s11 = scalar_lea.vmem %s1380_s6, %s1384_s22 }
  0x2d   : > { %v388_v46 = vmax.f32 %v356_v38, 0.0  ;;  %v389_v47 = vmax.f32 %v357_v39, 0.0  ;;  %v322_v0 = vmul.f32 %v1116_v6, %v286_v57 }
  0x2e   : > { %v405_v51 = vmax.f32 %v373_v43, 0.0 }
  0x2f   : > { %v414_v53 = vpack.c.bf16 %v389_v47, %v388_v46 }
  0x30   : > { %v422_v62 = vpack.c.bf16 %v405_v51, %v404_v50 }
  0x3b   : > { %501 = vmatmul.bf16.gmra.mxu0 %v409_v11  ;;  %521 = vmatmul.bf16.gmra.mxu1 %v413_v12  ;;  %v358_v11 = vadd.f32 %v1128_v14, %v322_v0  ;;  %v359_v12 = vadd.f32 %v1128_v14, %v323_v1 }
  0x3c   : > { %541 = vmatmul.bf16.gmra.mxu2 %v417_v17  ;;  %561 = vmatmul.bf16.gmra.mxu3 %v421_v31  ;;  %v375_v17 = vadd.f32 %v1128_v14, %v339_v8 }
  0x3d   : > { %v390_v20 = vmax.f32 %v358_v11, 0.0  ;;  %v391_v6 = vmax.f32 %v359_v12, 0.0 }
  0x3e   : > { %v407_v24 = vmax.f32 %v375_v17, 0.0 }
  0x3f   : > { %v415_v26 = vpack.c.bf16 %v391_v6, %v390_v20 }
  0x40   : > { %v423_v28 = vpack.c.bf16 %v407_v24, %v406_v23 }
  0x4b   : > { %506 = vmatmul.bf16.gmra.mxu0 %v410_v52  ;;  %526 = vmatmul.bf16.gmra.mxu1 %v414_v53 }
  0x4c   : > { %546 = vmatmul.bf16.gmra.mxu2 %v418_v56  ;;  %566 = vmatmul.bf16.gmra.mxu3 %v422_v62 }
  0x5b   : > { %511 = vmatmul.bf16.gmra.mxu0 %v411_v25  ;;  %531 = vmatmul.bf16.gmra.mxu1 %v415_v26 }
  0x5c   : > { %551 = vmatmul.bf16.gmra.mxu2 %v419_v27  ;;  %571 = vmatmul.bf16.gmra.mxu3 %v423_v28 }
  0xa8   : > { %v497_v29 = vpop.f32.mrf.mxu0  ;;  %v1227_v30 = vpop.f32.mrf.mxu1 }
  0xa9   : > { %v679_v61 = vmul.f32 %v497_v29, %v497_v29 }
  0xaf   : > { %v1230_v14 = vpop.f32.mrf.mxu2  ;;  %v1241_v35 = vpop.f32.mrf.mxu3 }
  0xb0   : > { %v499_v31 = vpop.f32.mrf.mxu0  ;;  %v1237_v32 = vpop.f32.mrf.mxu1 }
  0xb1   : > { %v909_v33 = vpack.c.bf16 %v499_v31, %v497_v29  ;;  %v929_v34 = vpack.c.bf16 %v1237_v32, %v1227_v30  ;;  %v680_v60 = vmul.f32 %v499_v31, %v499_v31  ;;  %v641_v63 = vadd.f32 %v499_v31, %v497_v29 }
  0xb2   : > { %v687_v31 = vmul.f32 %v1227_v30, %v1227_v30 }
  0xb3   : > { %910 = vst [vmem:[%s1235_s30] sm:$0xff] %v909_v33   ;;  %v711_v0 = vadd.f32 %v680_v60, %v679_v61 }
  0xb4   : > { %989 = vst [vmem:[%s1235_s30 + $0x20] sm:$0xff] %v929_v34  }
  0xb7   : > { %v1245_v36 = vpop.f32.mrf.mxu2  ;;  %v1251_v40 = vpop.f32.mrf.mxu3 }
  0xb8   : > { %v502_v37 = vpop.f32.mrf.mxu0  ;;  %v1247_v38 = vpop.f32.mrf.mxu1  ;;  %v949_v39 = vpack.c.bf16 %v1245_v36, %v1230_v14  ;;  %v969_v41 = vpack.c.bf16 %v1251_v40, %v1241_v35 }
  0xb9   : > { %v681_v62 = vmul.f32 %v502_v37, %v502_v37  ;;  %v642_v2 = vadd.f32 %v641_v63, %v502_v37 }
  0xba   : > { %993 = vst [vmem:[%s1235_s30 + $0x40] sm:$0xff] %v949_v39  }
  0xbb   : > { %997 = vst [vmem:[%s1235_s30 + $0x60] sm:$0xff] %v969_v41   ;;  %v712_v4 = vadd.f32 %v711_v0, %v681_v62 }
  0xbf   : > { %v1257_v42 = vpop.f32.mrf.mxu2  ;;  %v1263_v47 = vpop.f32.mrf.mxu3 }
  0xc0   : > { %v504_v43 = vpop.f32.mrf.mxu0  ;;  %v1259_v44 = vpop.f32.mrf.mxu1 }
  0xc1   : > { %v914_v45 = vpack.c.bf16 %v504_v43, %v502_v37  ;;  %v934_v46 = vpack.c.bf16 %v1259_v44, %v1247_v38  ;;  %v682_v1 = vmul.f32 %v504_v43, %v504_v43  ;;  %v643_v10 = vadd.f32 %v642_v2, %v504_v43 }
  0xc2   : > { %v688_v37 = vmul.f32 %v1237_v32, %v1237_v32  ;;  %v689_v43 = vmul.f32 %v1247_v38, %v1247_v38 }
  0xc3   : > { %986 = vst [vmem:[%s1235_s30 + $0x8] sm:$0xff] %v914_v45   ;;  %v713_v12 = vadd.f32 %v712_v4, %v682_v1 }
  0xc4   : > { %990 = vst [vmem:[%s1235_s30 + $0x28] sm:$0xff] %v934_v46  }
  0xc7   : > { %v1267_v48 = vpop.f32.mrf.mxu2  ;;  %v1273_v52 = vpop.f32.mrf.mxu3 }
  0xc8   : > { %v507_v49 = vpop.f32.mrf.mxu0  ;;  %v1269_v50 = vpop.f32.mrf.mxu1  ;;  %v954_v51 = vpack.c.bf16 %v1267_v48, %v1257_v42  ;;  %v974_v53 = vpack.c.bf16 %v1273_v52, %v1263_v47 }
  0xc9   : > { %v683_v5 = vmul.f32 %v507_v49, %v507_v49  ;;  %v644_v16 = vadd.f32 %v643_v10, %v507_v49  ;;  %v696_v10 = vmul.f32 %v1245_v36, %v1245_v36 }
  0xca   : > { %994 = vst [vmem:[%s1235_s30 + $0x48] sm:$0xff] %v954_v51  }
  0xcb   : > { %998 = vst [vmem:[%s1235_s30 + $0x68] sm:$0xff] %v974_v53   ;;  %v714_v17 = vadd.f32 %v713_v12, %v683_v5 }
  0xcf   : > { %v1279_v54 = vpop.f32.mrf.mxu2  ;;  %v1285_v59 = vpop.f32.mrf.mxu3 }
  0xd0   : > { %v509_v55 = vpop.f32.mrf.mxu0  ;;  %v1281_v56 = vpop.f32.mrf.mxu1 }
  0xd1   : > { %v919_v57 = vpack.c.bf16 %v509_v55, %v507_v49  ;;  %v939_v58 = vpack.c.bf16 %v1281_v56, %v1269_v50  ;;  %v684_v13 = vmul.f32 %v509_v55, %v509_v55  ;;  %v645_v19 = vadd.f32 %v644_v16, %v509_v55 }
  0xd2   : > { %v698_v16 = vmul.f32 %v1267_v48, %v1267_v48 }
  0xd3   : > { %987 = vst [vmem:[%s1235_s30 + $0x10] sm:$0xff] %v919_v57   ;;  %v715_v20 = vadd.f32 %v714_v17, %v684_v13 }
  0xd4   : > { %991 = vst [vmem:[%s1235_s30 + $0x30] sm:$0xff] %v939_v58   ;;  %v691_v58 = vmul.f32 %v1269_v50, %v1269_v50 }
  0xd7   : > { %v1289_v3 = vpop.f32.mrf.mxu2  ;;  %v1293_v11 = vpop.f32.mrf.mxu3 }
  0xd8   : > { %v512_v7 = vpop.f32.mrf.mxu0  ;;  %v532_v8 = vpop.f32.mrf.mxu1  ;;  %v959_v9 = vpack.c.bf16 %v1289_v3, %v1279_v54  ;;  %v979_v15 = vpack.c.bf16 %v1293_v11, %v1285_v59 }
  0xd9   : > { %v685_v18 = vmul.f32 %v512_v7, %v512_v7  ;;  %v646_v6 = vadd.f32 %v645_v19, %v512_v7  ;;  %v693_v1 = vmul.f32 %v532_v8, %v532_v8 }
  0xda   : > { %995 = vst [vmem:[%s1235_s30 + $0x50] sm:$0xff] %v959_v9  }
  0xdb   : > { %999 = vst [vmem:[%s1235_s30 + $0x70] sm:$0xff] %v979_v15   ;;  %v716_v22 = vadd.f32 %v715_v20, %v685_v18 }
  0xdf   : > { %v552_v21 = vpop.f32.mrf.mxu2  ;;  %v1299_v29 = vpop.f32.mrf.mxu3 }
  0xe0   : > { %v514_v23 = vpop.f32.mrf.mxu0  ;;  %v534_v24 = vpop.f32.mrf.mxu1 }
  0xe1   : > { %v924_v25 = vpack.c.bf16 %v514_v23, %v512_v7  ;;  %v647_v26 = vadd.f32 %v646_v6, %v514_v23  ;;  %v686_v27 = vmul.f32 %v514_v23, %v514_v23  ;;  %v944_v28 = vpack.c.bf16 %v534_v24, %v532_v8 }
  0xe2   : > { %v694_v5 = vmul.f32 %v534_v24, %v534_v24  ;;  %v695_v7 = vmul.f32 %v1230_v14, %v1230_v14  ;;  %v700_v6 = vmul.f32 %v1289_v3, %v1289_v3 }
  0xe3   : > { %988 = vst [vmem:[%s1235_s30 + $0x18] sm:$0xff] %v924_v25   ;;  %v648_v33 = vadd.f32 %v647_v26, %v1227_v30  ;;  %v717_v34 = vadd.f32 %v716_v22, %v686_v27  ;;  %v690_v30 = vmul.f32 %v1259_v44, %v1259_v44 }
  0xe4   : > { %992 = vst [vmem:[%s1235_s30 + $0x38] sm:$0xff] %v944_v28  }
  0xe5   : > { %v649_v39 = vadd.f32 %v648_v33, %v1237_v32  ;;  %v718_v41 = vadd.f32 %v717_v34, %v687_v31 }
  0xe7   : > { %v650_v45 = vadd.f32 %v649_v39, %v1247_v38  ;;  %v719_v46 = vadd.f32 %v718_v41, %v688_v37  ;;  %v554_v49 = vpop.f32.mrf.mxu2  ;;  %v574_v57 = vpop.f32.mrf.mxu3  ;;  %v692_v38 = vmul.f32 %v1281_v56, %v1281_v56  ;;  %v706_v39 = vmul.f32 %v1273_v52, %v1273_v52 }
  0xe8   : > { %v964_v51 = vpack.c.bf16 %v554_v49, %v552_v21  ;;  %v984_v32 = vpack.c.bf16 %v574_v57, %v1299_v29  ;;  %v702_v27 = vmul.f32 %v554_v49, %v554_v49 }
  0xe9   : > { %v720_v53 = vadd.f32 %v719_v46, %v689_v43  ;;  %v651_v55 = vadd.f32 %v650_v45, %v1259_v44  ;;  %v707_v43 = vmul.f32 %v1285_v59, %v1285_v59 }
  0xea   : > { %996 = vst [vmem:[%s1235_s30 + $0x58] sm:$0xff] %v964_v51  }
  0xeb   : > { %v652_v60 = vadd.f32 %v651_v55, %v1269_v50  ;;  %v721_v61 = vadd.f32 %v720_v53, %v690_v30  ;;  %1000 = vst [vmem:[%s1235_s30 + $0x78] sm:$0xff] %v984_v32   ;;  %v709_v53 = vmul.f32 %v1299_v29, %v1299_v29  ;;  %v710_v32 = vmul.f32 %v574_v57, %v574_v57 }
  0xed   : > { %v653_v62 = vadd.f32 %v652_v60, %v1281_v56  ;;  %v722_v63 = vadd.f32 %v721_v61, %v691_v58  ;;  %v697_v56 = vmul.f32 %v1257_v42, %v1257_v42 }
  0xef   : > { %v654_v0 = vadd.f32 %v653_v62, %v532_v8  ;;  %v723_v44 = vadd.f32 %v722_v63, %v692_v38 }
  0xf1   : > { %v724_v2 = vadd.f32 %v723_v44, %v693_v1  ;;  %v655_v4 = vadd.f32 %v654_v0, %v534_v24  ;;  %v701_v24 = vmul.f32 %v552_v21, %v552_v21 }
  0xf3   : > { %v656_v9 = vadd.f32 %v655_v4, %v1230_v14  ;;  %v725_v50 = vadd.f32 %v724_v2, %v694_v5  ;;  %v699_v14 = vmul.f32 %v1279_v54, %v1279_v54 }
  0xf5   : > { %v657_v12 = vadd.f32 %v656_v9, %v1245_v36  ;;  %v726_v13 = vadd.f32 %v725_v50, %v695_v7 }
  0xf7   : > { %v658_v8 = vadd.f32 %v657_v12, %v1257_v42  ;;  %v727_v15 = vadd.f32 %v726_v13, %v696_v10 }
  0xf9   : > { %v728_v17 = vadd.f32 %v727_v15, %v697_v56  ;;  %v659_v18 = vadd.f32 %v658_v8, %v1267_v48  ;;  %v703_v48 = vmul.f32 %v1241_v35, %v1241_v35 }
  0xfb   : > { %v660_v19 = vadd.f32 %v659_v18, %v1279_v54  ;;  %v729_v20 = vadd.f32 %v728_v17, %v698_v16  ;;  %v704_v54 = vmul.f32 %v1251_v40, %v1251_v40 }
  0xfd   : > { %v661_v36 = vadd.f32 %v660_v19, %v1289_v3  ;;  %v730_v22 = vadd.f32 %v729_v20, %v699_v14  ;;  %v705_v3 = vmul.f32 %v1263_v47, %v1263_v47 }
  0xff   : > { %v731_v42 = vadd.f32 %v730_v22, %v700_v6  ;;  %v662_v23 = vadd.f32 %v661_v36, %v552_v21 }
 0x101   : > { %v732_v25 = vadd.f32 %v731_v42, %v701_v24  ;;  %v663_v26 = vadd.f32 %v662_v23, %v554_v49 }
 0x103   : > { %v664_v28 = vadd.f32 %v663_v26, %v1241_v35  ;;  %v733_v31 = vadd.f32 %v732_v25, %v702_v27 }
 0x105   : > { %v665_v33 = vadd.f32 %v664_v28, %v1251_v40  ;;  %v734_v34 = vadd.f32 %v733_v31, %v703_v48 }
 0x107   : > { %v666_v21 = vadd.f32 %v665_v33, %v1263_v47  ;;  %v735_v37 = vadd.f32 %v734_v34, %v704_v54  ;;  %v708_v47 = vmul.f32 %v1293_v11, %v1293_v11 }
 0x109   : > { %v736_v41 = vadd.f32 %v735_v37, %v705_v3  ;;  %v667_v35 = vadd.f32 %v666_v21, %v1273_v52 }
 0x10b   : > { %v668_v45 = vadd.f32 %v667_v35, %v1285_v59  ;;  %v737_v40 = vadd.f32 %v736_v41, %v706_v39 }
 0x10d   : > { %v669_v46 = vadd.f32 %v668_v45, %v1293_v11  ;;  %v738_v49 = vadd.f32 %v737_v40, %v707_v43 }
 0x10f   : > { %v739_v51 = vadd.f32 %v738_v49, %v708_v47  ;;  %v670_v30 = vadd.f32 %v669_v46, %v1299_v29 }
 0x111   : > { %v740_v52 = vadd.f32 %v739_v51, %v709_v53  ;;  %v671_v55 = vadd.f32 %v670_v30, %v574_v57 }
 0x113   : > { %v672_v58 = vrot.slane %v671_v55, 4  ;;  %v741_v60 = vadd.f32 %v740_v52, %v710_v32 }
 0x115   : > { %v673_v59 = vadd.f32 %v672_v58, %v671_v55  ;;  %v742_v61 = vrot.slane %v741_v60, 4 }
 0x117   : > { %v674_v38 = vrot.slane %v673_v59, 2  ;;  %v743_v62 = vadd.f32 %v742_v61, %v741_v60 }
 0x119   : > { %v675_v63 = vadd.f32 %v674_v38, %v673_v59  ;;  %v744_v11 = vrot.slane %v743_v62, 2 }
 0x11b   : > { %v676_v0 = vrot.slane %v675_v63, 1  ;;  %v745_v1 = vadd.f32 %v744_v11, %v743_v62 }
 0x11d   : > { %v677_v29 = vadd.f32 %v676_v0, %v675_v63  ;;  %v746_v44 = vrot.slane %v745_v1, 1 }
 0x11f   : > { %678 = vst [vmem:[%s268_s8] sm:$0x1] %v677_v29  ;;  %v747_v57 = vadd.f32 %v746_v44, %v745_v1 }
 0x121   : > { %748 = vst [vmem:[%s271_s11] sm:$0x1] %v747_v57 }
 0x122 PF: > { %s17_s21 = sadd.s32 1, %s1041_s21  }
 0x123   : > { %p14_p5 = scmp.ge.s32.totalorder %s17_s21, 4  }
 0x125   :  { %16 = sbr.rel (!%p14_p5) target bundleno = 1 (0x1), region = 90 }

// kernel: fmf_hourglass_forward.17
= control target key start
LH: loop header
LB: loop body
LE: loop exit
PB: predicated region body
PF: predicated region fallthrough
CT: control target
= control target key end

     0   :  { %s1162_s24 = smov 0   ;;  %s1525_s0 = inlined_call_operand.vmem [shape: bf16[512,128], index: 0, kind: input, shape index: {}]   ;;  %s1526_s1 = inlined_call_operand.vmem [shape: f32[1,128], index: 1, kind: input, shape index: {}]   ;;  %s1527_s2 = inlined_call_operand.vmem [shape: f32[1,128], index: 2, kind: input, shape index: {}]   ;;  %s1528_s3 = inlined_call_operand.vmem [shape: bf16[128,128], index: 3, kind: input, shape index: {}]   ;;  %s1529_s4 = inlined_call_operand.vmem [shape: f32[512,128], index: 4, kind: input, shape index: {}]   ;;  %s1530_s5 = inlined_call_operand.vmem [shape: f32[512,128], index: 5, kind: output, shape index: {0}]   ;;  %s1531_s6 = inlined_call_operand.vmem [shape: f32[2,1,128], index: 6, kind: output, shape index: {1}]   ;;  %s1532_s7 = inlined_call_operand.vmem [shape: f32[2,1,128], index: 7, kind: output, shape index: {2}]  }
   0x1 LB: > { %s1168_s25 = sadd.s32 4294967295, %s1120_s24   ;;  %p952_p0 = scmp.ge.s32.totalorder %s1120_s24, 1  ;;  %s1120_s24 = sphi %s1162_s24, %s18_s24  }
   0x2   : > { %p254_p1 = scmp.lt.s32.totalorder %s1120_s24, 3 }
   0x4   : > { %p255_p2 = pnand %p952_p0, %p254_p1 }
   0x5   : > { %s953_s28 = sshll.u32 (!%p255_p2), %s1168_s25, 5  ;;  %p315_p4 = scmp.lt.s32.totalorder (!%p255_p2), %s1168_s25, 1 }
   0x6   : > { %258 = sbr.rel (%p255_p2) target bundleno = 292 (0x124), region = 40  ;;  %p298_p3 = scmp.lt.s32.totalorder (!%p255_p2), %s953_s28, 63 }
   0xb   : > { %v1000_v0 = vld [vmem:[%s1528_s3 + $0x38] sm:$0xff]  ;;  %v999_v1 = vld [vmem:[%s1528_s3 + $0x30] sm:$0xff]  ;;  %s1534_s28 = smov (!%p298_p3, %s953_s28), 63  ;;  %v998_v2 = vld [vmem:[%s1528_s3 + $0x28] sm:$0xff]  ;;  %s1536_s25 = smov (!%p315_p4, %s1168_s25), 1 }
   0xc   : > { %601 = vmatpush.bf16.msra.mxu0 %v1000_v0  ;;  %1080 = vmatpush.bf16.msra.mxu1 %v1000_v0  ;;  %s954_s8 = sshll.u32 %s1534_s28, 2  ;;  %v997_v4 = vld [vmem:[%s1528_s3 + $0x20] sm:$0xff]  ;;  %v996_v12 = vld [vmem:[%s1528_s3 + $0x18] sm:$0xff]  ;;  %v995_v20 = vld [vmem:[%s1528_s3 + $0x10] sm:$0xff]  ;;  %s317_s16 = scalar_lea.vmem %s1531_s6, %s1536_s25 }
   0xd   : > { %1081 = vmatpush.bf16.msra.mxu2 %v1000_v0  ;;  %1082 = vmatpush.bf16.msra.mxu3 %v1000_v0  ;;  %s1188_s13 = scalar_lea.vmem %s1525_s0, %s954_s8  ;;  %v1199_v9 = vld [vmem:[%s1526_s1] ss:$0 sm:$0xff]  ;;  %v994_v27 = vld [vmem:[%s1528_s3 + $0x8] sm:$0xff]  ;;  %s956_s8 = sshll.u32 %s1534_s28, 3 }
   0xe   : > { %v1002_v3 = vld [vmem:[%s1188_s13] sm:$0xff]   ;;  %v1065_v32 = vld [vmem:[%s1188_s13 + $0x8] sm:$0xff]   ;;  %s1299_s11 = scalar_lea.vmem %s1529_s4, %s956_s8  ;;  %s1306_s14 = scalar_lea.vmem %s1530_s5, %s956_s8 }
   0xf   : > { %v1068_v5 = vld [vmem:[%s1188_s13 + $0x20] sm:$0xff]   ;;  %v1003_v7 = vunpack.c.l.bf16 %v1002_v3  ;;  %v1004_v8 = vunpack.c.h.bf16 %v1002_v3  ;;  %v1069_v36 = vld [vmem:[%s1188_s13 + $0x28] sm:$0xff]   ;;  %v1007_v42 = vunpack.c.l.bf16 %v1065_v32  ;;  %v1008_v45 = vunpack.c.h.bf16 %v1065_v32  ;;  %s320_s19 = scalar_lea.vmem %s1532_s7, %s1536_s25 }
  0x10   : > { %602 = vmatpush.bf16.msra.mxu0 %v999_v1  ;;  %1083 = vmatpush.bf16.msra.mxu1 %v999_v1  ;;  %v1072_v6 = vld [vmem:[%s1188_s13 + $0x40] sm:$0xff]   ;;  %v1019_v10 = vunpack.c.l.bf16 %v1068_v5  ;;  %v1020_v11 = vunpack.c.h.bf16 %v1068_v5  ;;  %v1073_v43 = vld [vmem:[%s1188_s13 + $0x48] sm:$0xff]   ;;  %v1023_v46 = vunpack.c.l.bf16 %v1069_v36  ;;  %v1024_v47 = vunpack.c.h.bf16 %v1069_v36 }
  0x11   : > { %1084 = vmatpush.bf16.msra.mxu2 %v999_v1  ;;  %1085 = vmatpush.bf16.msra.mxu3 %v999_v1  ;;  %v1035_v13 = vunpack.c.l.bf16 %v1072_v6  ;;  %v1036_v14 = vunpack.c.h.bf16 %v1072_v6  ;;  %v389_v15 = vmul.f32 %v1199_v9, %v1003_v7  ;;  %v390_v16 = vmul.f32 %v1199_v9, %v1004_v8  ;;  %v1209_v17 = vld [vmem:[%s1527_s2] ss:$0 sm:$0xff] }
  0x12   : > { %v397_v18 = vmul.f32 %v1199_v9, %v1019_v10  ;;  %v398_v19 = vmul.f32 %v1199_v9, %v1020_v11  ;;  %v1076_v33 = vld [vmem:[%s1188_s13 + $0x60] sm:$0xff]   ;;  %v1039_v53 = vunpack.c.l.bf16 %v1073_v43  ;;  %v1040_v54 = vunpack.c.h.bf16 %v1073_v43  ;;  %v1078_v43 = vld [vmem:[%s1188_s13 + $0x70] sm:$0xff]  }
  0x13   : > { %v405_v21 = vmul.f32 %v1199_v9, %v1035_v13  ;;  %v406_v22 = vmul.f32 %v1199_v9, %v1036_v14  ;;  %v425_v23 = vadd.f32 %v1209_v17, %v389_v15  ;;  %v426_v24 = vadd.f32 %v1209_v17, %v390_v16  ;;  %v993_v39 = vld [vmem:[%s1528_s3] sm:$0xff]  ;;  %v1066_v13 = vld [vmem:[%s1188_s13 + $0x10] sm:$0xff]  }
  0x14   : > { %603 = vmatpush.bf16.msra.mxu0 %v998_v2  ;;  %1086 = vmatpush.bf16.msra.mxu1 %v998_v2  ;;  %v433_v25 = vadd.f32 %v1209_v17, %v397_v18  ;;  %v434_v26 = vadd.f32 %v1209_v17, %v398_v19  ;;  %v1051_v37 = vunpack.c.l.bf16 %v1076_v33  ;;  %v1052_v38 = vunpack.c.h.bf16 %v1076_v33  ;;  %v1070_v19 = vld [vmem:[%s1188_s13 + $0x30] sm:$0xff]  }
  0x15   : > { %1087 = vmatpush.bf16.msra.mxu2 %v998_v2  ;;  %1088 = vmatpush.bf16.msra.mxu3 %v998_v2  ;;  %v441_v28 = vadd.f32 %v1209_v17, %v405_v21  ;;  %v442_v29 = vadd.f32 %v1209_v17, %v406_v22  ;;  %v457_v30 = vmax.f32 %v425_v23, 0.0  ;;  %v458_v31 = vmax.f32 %v426_v24, 0.0 }
  0x16   : > { %v465_v34 = vmax.f32 %v433_v25, 0.0  ;;  %v466_v35 = vmax.f32 %v434_v26, 0.0  ;;  %v413_v44 = vmul.f32 %v1199_v9, %v1051_v37  ;;  %v414_v48 = vmul.f32 %v1199_v9, %v1052_v38 }
  0x17   : > { %v473_v40 = vmax.f32 %v441_v28, 0.0  ;;  %v474_v41 = vmax.f32 %v442_v29, 0.0  ;;  %v489_v49 = vpack.c.bf16 %v458_v31, %v457_v30  ;;  %v391_v56 = vmul.f32 %v1199_v9, %v1007_v42 }
  0x18   : > { %604 = vmatpush.bf16.msra.mxu0 %v997_v4  ;;  %1089 = vmatpush.bf16.msra.mxu1 %v997_v4  ;;  %v493_v50 = vpack.c.bf16 %v466_v35, %v465_v34  ;;  %v449_v51 = vadd.f32 %v1209_v17, %v413_v44  ;;  %v450_v55 = vadd.f32 %v1209_v17, %v414_v48  ;;  %v1011_v25 = vunpack.c.l.bf16 %v1066_v13 }
  0x19   : > { %1090 = vmatpush.bf16.msra.mxu2 %v997_v4  ;;  %1091 = vmatpush.bf16.msra.mxu3 %v997_v4  ;;  %v497_v52 = vpack.c.bf16 %v474_v41, %v473_v40  ;;  %v392_v58 = vmul.f32 %v1199_v9, %v1008_v45  ;;  %v399_v59 = vmul.f32 %v1199_v9, %v1023_v46  ;;  %v1012_v26 = vunpack.c.h.bf16 %v1066_v13 }
  0x1a   : > { %v481_v57 = vmax.f32 %v449_v51, 0.0  ;;  %v400_v60 = vmul.f32 %v1199_v9, %v1024_v47  ;;  %v482_v61 = vmax.f32 %v450_v55, 0.0  ;;  %v407_v62 = vmul.f32 %v1199_v9, %v1039_v53 }
  0x1b   : > { %v408_v63 = vmul.f32 %v1199_v9, %v1040_v54  ;;  %v427_v1 = vadd.f32 %v1209_v17, %v391_v56  ;;  %v428_v2 = vadd.f32 %v1209_v17, %v392_v58  ;;  %v435_v3 = vadd.f32 %v1209_v17, %v399_v59 }
  0x1c   : > { %605 = vmatpush.bf16.msra.mxu0 %v996_v12  ;;  %1092 = vmatpush.bf16.msra.mxu1 %v996_v12  ;;  %v501_v0 = vpack.c.bf16 %v482_v61, %v481_v57  ;;  %v436_v4 = vadd.f32 %v1209_v17, %v400_v60  ;;  %v443_v5 = vadd.f32 %v1209_v17, %v407_v62  ;;  %v1028_v28 = vunpack.c.h.bf16 %v1070_v19  ;;  %v1067_v60 = vld [vmem:[%s1188_s13 + $0x18] sm:$0xff]  }
  0x1d   : > { %1093 = vmatpush.bf16.msra.mxu2 %v996_v12  ;;  %1094 = vmatpush.bf16.msra.mxu3 %v996_v12  ;;  %v444_v6 = vadd.f32 %v1209_v17, %v408_v63  ;;  %v459_v7 = vmax.f32 %v427_v1, 0.0  ;;  %v460_v8 = vmax.f32 %v428_v2, 0.0  ;;  %v467_v10 = vmax.f32 %v435_v3, 0.0  ;;  %v1077_v12 = vld [vmem:[%s1188_s13 + $0x68] sm:$0xff]   ;;  %v1071_v63 = vld [vmem:[%s1188_s13 + $0x38] sm:$0xff]  }
  0x1e   : > { %v468_v11 = vmax.f32 %v436_v4, 0.0  ;;  %v1055_v14 = vunpack.c.l.bf16 %v1077_v12  ;;  %v1056_v15 = vunpack.c.h.bf16 %v1077_v12  ;;  %v475_v16 = vmax.f32 %v443_v5, 0.0 }
  0x1f   : > { %v476_v18 = vmax.f32 %v444_v6, 0.0  ;;  %v490_v23 = vpack.c.bf16 %v460_v8, %v459_v7  ;;  %v393_v36 = vmul.f32 %v1199_v9, %v1011_v25  ;;  %v394_v37 = vmul.f32 %v1199_v9, %v1012_v26 }
  0x20   : > { %606 = vmatpush.bf16.msra.mxu0 %v995_v20  ;;  %1095 = vmatpush.bf16.msra.mxu1 %v995_v20  ;;  %v415_v21 = vmul.f32 %v1199_v9, %v1055_v14  ;;  %v416_v22 = vmul.f32 %v1199_v9, %v1056_v15  ;;  %v494_v24 = vpack.c.bf16 %v468_v11, %v467_v10  ;;  %v1059_v44 = vunpack.c.l.bf16 %v1078_v43  ;;  %v1079_v10 = vld [vmem:[%s1188_s13 + $0x78] sm:$0xff]  }
  0x21   : > { %1096 = vmatpush.bf16.msra.mxu2 %v995_v20  ;;  %1097 = vmatpush.bf16.msra.mxu3 %v995_v20  ;;  %v1074_v20 = vld [vmem:[%s1188_s13 + $0x50] sm:$0xff]   ;;  %v498_v31 = vpack.c.bf16 %v476_v18, %v475_v16  ;;  %v1060_v45 = vunpack.c.h.bf16 %v1078_v43  ;;  %v429_v46 = vadd.f32 %v1209_v17, %v393_v36  ;;  %v430_v47 = vadd.f32 %v1209_v17, %v394_v37 }
  0x22   : > { %v451_v29 = vadd.f32 %v1209_v17, %v415_v21  ;;  %v452_v30 = vadd.f32 %v1209_v17, %v416_v22  ;;  %v1043_v32 = vunpack.c.l.bf16 %v1074_v20  ;;  %v1044_v33 = vunpack.c.h.bf16 %v1074_v20 }
  0x23   : > { %v418_v51 = vmul.f32 %v1199_v9, %v1060_v45  ;;  %v461_v54 = vmax.f32 %v429_v46, 0.0  ;;  %v462_v55 = vmax.f32 %v430_v47, 0.0  ;;  %v1015_v2 = vunpack.c.l.bf16 %v1067_v60  ;;  %v529_v45 = vld [vmem:[%s1299_s11 + $0x40] sm:$0xff] }
  0x24   : > { %607 = vmatpush.bf16.msra.mxu0 %v994_v27  ;;  %1098 = vmatpush.bf16.msra.mxu1 %v994_v27  ;;  %v483_v34 = vmax.f32 %v451_v29, 0.0  ;;  %v484_v35 = vmax.f32 %v452_v30, 0.0  ;;  %v409_v41 = vmul.f32 %v1199_v9, %v1043_v32  ;;  %v410_v42 = vmul.f32 %v1199_v9, %v1044_v33 }
  0x25   : > { %1099 = vmatpush.bf16.msra.mxu2 %v994_v27  ;;  %1100 = vmatpush.bf16.msra.mxu3 %v994_v27  ;;  %v1027_v27 = vunpack.c.l.bf16 %v1070_v19  ;;  %v454_v57 = vadd.f32 %v1209_v17, %v418_v51  ;;  %v491_v1 = vpack.c.bf16 %v462_v55, %v461_v54  ;;  %v1016_v6 = vunpack.c.h.bf16 %v1067_v60  ;;  %v522_v51 = vld [vmem:[%s1299_s11 + $0x8] sm:$0xff] }
  0x26   : > { %v502_v40 = vpack.c.bf16 %v484_v35, %v483_v34  ;;  %v446_v53 = vadd.f32 %v1209_v17, %v410_v42  ;;  %v1031_v7 = vunpack.c.l.bf16 %v1071_v63  ;;  %v1032_v8 = vunpack.c.h.bf16 %v1071_v63  ;;  %v538_v60 = vld [vmem:[%s1299_s11 + $0x88] sm:$0xff]  ;;  %v531_v63 = vld [vmem:[%s1299_s11 + $0x50] sm:$0xff] }
  0x27   : > { %v401_v38 = vmul.f32 %v1199_v9, %v1027_v27  ;;  %v486_v4 = vmax.f32 %v454_v57, 0.0  ;;  %v395_v14 = vmul.f32 %v1199_v9, %v1015_v2  ;;  %v1063_v16 = vunpack.c.l.bf16 %v1079_v10 }
  0x28   : > { %608 = vmatpush.bf16.msra.mxu0 %v993_v39  ;;  %1101 = vmatpush.bf16.msra.mxu1 %v993_v39  ;;  %v478_v62 = vmax.f32 %v446_v53, 0.0  ;;  %v1064_v18 = vunpack.c.h.bf16 %v1079_v10  ;;  %v396_v19 = vmul.f32 %v1199_v9, %v1016_v6  ;;  %v403_v20 = vmul.f32 %v1199_v9, %v1031_v7 }
  0x29   : > { %1102 = vmatpush.bf16.msra.mxu2 %v993_v39  ;;  %1103 = vmatpush.bf16.msra.mxu3 %v993_v39  ;;  %v402_v39 = vmul.f32 %v1199_v9, %v1028_v28  ;;  %v437_v48 = vadd.f32 %v1209_v17, %v401_v38  ;;  %v404_v21 = vmul.f32 %v1199_v9, %v1032_v8 }
  0x2a   : > { %v420_v25 = vmul.f32 %v1199_v9, %v1064_v18  ;;  %v431_v26 = vadd.f32 %v1209_v17, %v395_v14  ;;  %v432_v27 = vadd.f32 %v1209_v17, %v396_v19  ;;  %v439_v28 = vadd.f32 %v1209_v17, %v403_v20 }
  0x2b   : > { %609 = vmatmul.bf16.vlgmr.msra.gmra.mxu0 %v489_v49  ;;  %629 = vmatmul.bf16.vlgmr.msra.gmra.mxu1 %v493_v50  ;;  %v438_v49 = vadd.f32 %v1209_v17, %v402_v39  ;;  %v417_v50 = vmul.f32 %v1199_v9, %v1059_v44  ;;  %v469_v58 = vmax.f32 %v437_v48, 0.0  ;;  %v440_v29 = vadd.f32 %v1209_v17, %v404_v21 }
  0x2c   : > { %649 = vmatmul.bf16.vlgmr.msra.gmra.mxu2 %v497_v52  ;;  %669 = vmatmul.bf16.vlgmr.msra.gmra.mxu3 %v501_v0  ;;  %v445_v52 = vadd.f32 %v1209_v17, %v409_v41  ;;  %v1075_v0 = vld [vmem:[%s1188_s13 + $0x58] sm:$0xff]   ;;  %v456_v33 = vadd.f32 %v1209_v17, %v420_v25  ;;  %v463_v34 = vmax.f32 %v431_v26, 0.0  ;;  %v464_v35 = vmax.f32 %v432_v27, 0.0 }
  0x2d   : > { %v453_v56 = vadd.f32 %v1209_v17, %v417_v50  ;;  %v470_v59 = vmax.f32 %v438_v49, 0.0  ;;  %v1047_v12 = vunpack.c.l.bf16 %v1075_v0  ;;  %v1048_v13 = vunpack.c.h.bf16 %v1075_v0  ;;  %v537_v50 = vld [vmem:[%s1299_s11 + $0x80] sm:$0xff] }
  0x2e   : > { %v477_v61 = vmax.f32 %v445_v52, 0.0  ;;  %v472_v36 = vmax.f32 %v440_v29, 0.0  ;;  %v492_v41 = vpack.c.bf16 %v464_v35, %v463_v34  ;;  %v530_v52 = vld [vmem:[%s1299_s11 + $0x48] sm:$0xff]  ;;  %v547_v29 = vld [vmem:[%s1299_s11 + $0xd0] sm:$0xff] }
  0x2f   : > { %v485_v3 = vmax.f32 %v453_v56, 0.0  ;;  %v495_v5 = vpack.c.bf16 %v470_v59, %v469_v58  ;;  %v411_v22 = vmul.f32 %v1199_v9, %v1047_v12  ;;  %v524_v12 = vld [vmem:[%s1299_s11 + $0x18] sm:$0xff] }
  0x30   : > { %v499_v11 = vpack.c.bf16 %v478_v62, %v477_v61  ;;  %v545_v61 = vld [vmem:[%s1299_s11 + $0xc0] sm:$0xff]  ;;  %v523_v62 = vld [vmem:[%s1299_s11 + $0x10] sm:$0xff] }
  0x31   : > { %v503_v15 = vpack.c.bf16 %v486_v4, %v485_v3  ;;  %v447_v30 = vadd.f32 %v1209_v17, %v411_v22  ;;  %v540_v22 = vld [vmem:[%s1299_s11 + $0x98] sm:$0xff] }
  0x33   : > { %v479_v37 = vmax.f32 %v447_v30, 0.0 }
  0x3b   : > { %614 = vmatmul.bf16.gmra.mxu0 %v490_v23  ;;  %634 = vmatmul.bf16.gmra.mxu1 %v494_v24  ;;  %v412_v23 = vmul.f32 %v1199_v9, %v1048_v13  ;;  %v419_v24 = vmul.f32 %v1199_v9, %v1063_v16  ;;  %v471_v9 = vmax.f32 %v439_v28, 0.0  ;;  %v532_v13 = vld [vmem:[%s1299_s11 + $0x58] sm:$0xff] }
  0x3c   : > { %654 = vmatmul.bf16.gmra.mxu2 %v498_v31  ;;  %674 = vmatmul.bf16.gmra.mxu3 %v502_v40  ;;  %v488_v40 = vmax.f32 %v456_v33, 0.0  ;;  %v548_v33 = vld [vmem:[%s1299_s11 + $0xd8] sm:$0xff] }
  0x3d   : > { %v448_v31 = vadd.f32 %v1209_v17, %v412_v23  ;;  %v455_v32 = vadd.f32 %v1209_v17, %v419_v24  ;;  %v496_v42 = vpack.c.bf16 %v472_v36, %v471_v9  ;;  %v521_v17 = vld [vmem:[%s1299_s11] sm:$0xff]  ;;  %v526_v36 = vld [vmem:[%s1299_s11 + $0x28] sm:$0xff] }
  0x3e   : > { %v525_v23 = vld [vmem:[%s1299_s11 + $0x20] sm:$0xff] }
  0x3f   : > { %v480_v38 = vmax.f32 %v448_v31, 0.0  ;;  %v487_v39 = vmax.f32 %v455_v32, 0.0  ;;  %v533_v24 = vld [vmem:[%s1299_s11 + $0x60] sm:$0xff] }
  0x40   : > { %v541_v9 = vld [vmem:[%s1299_s11 + $0xa0] sm:$0xff] }
  0x41   : > { %v500_v43 = vpack.c.bf16 %v480_v38, %v479_v37  ;;  %v504_v44 = vpack.c.bf16 %v488_v40, %v487_v39  ;;  %v534_v37 = vld [vmem:[%s1299_s11 + $0x68] sm:$0xff] }
  0x4b   : > { %619 = vmatmul.bf16.gmra.mxu0 %v491_v1  ;;  %639 = vmatmul.bf16.gmra.mxu1 %v495_v5  ;;  %v546_v5 = vld [vmem:[%s1299_s11 + $0xc8] sm:$0xff] }
  0x4c   : > { %659 = vmatmul.bf16.gmra.mxu2 %v499_v11  ;;  %679 = vmatmul.bf16.gmra.mxu3 %v503_v15  ;;  %v539_v11 = vld [vmem:[%s1299_s11 + $0x90] sm:$0xff] }
  0x5b   : > { %624 = vmatmul.bf16.gmra.mxu0 %v492_v41  ;;  %644 = vmatmul.bf16.gmra.mxu1 %v496_v42 }
  0x5c   : > { %664 = vmatmul.bf16.gmra.mxu2 %v500_v43  ;;  %684 = vmatmul.bf16.gmra.mxu3 %v504_v44 }
  0xa8   : > { %v610_v46 = vpop.f32.mrf.mxu0  ;;  %v630_v47 = vpop.f32.mrf.mxu1 }
  0xa9   : > { %v1308_v48 = vadd.f32 %v610_v46, %v521_v17  ;;  %v1310_v49 = vadd.f32 %v630_v47, %v529_v45  ;;  %v542_v45 = vld [vmem:[%s1299_s11 + $0xa8] sm:$0xff] }
  0xab   : > { %690 = vst [vmem:[%s1306_s14] sm:$0xff] %v1308_v48  ;;  %v760_v46 = vmul.f32 %v1308_v48, %v1308_v48 }
  0xac   : > { %698 = vst [vmem:[%s1306_s14 + $0x40] sm:$0xff] %v1310_v49 }
  0xaf   : > { %v650_v53 = vpop.f32.mrf.mxu2  ;;  %v670_v59 = vpop.f32.mrf.mxu3 }
  0xb0   : > { %v612_v54 = vpop.f32.mrf.mxu0  ;;  %v632_v55 = vpop.f32.mrf.mxu1  ;;  %v1319_v56 = vadd.f32 %v650_v53, %v537_v50  ;;  %v1335_v0 = vadd.f32 %v670_v59, %v545_v61  ;;  %v527_v50 = vld [vmem:[%s1299_s11 + $0x30] sm:$0xff] }
  0xb1   : > { %v1321_v57 = vadd.f32 %v612_v54, %v522_v51  ;;  %v1323_v58 = vadd.f32 %v632_v55, %v530_v52  ;;  %v535_v51 = vld [vmem:[%s1299_s11 + $0x70] sm:$0xff] }
  0xb2   : > { %706 = vst [vmem:[%s1306_s14 + $0x80] sm:$0xff] %v1319_v56 }
  0xb3   : > { %691 = vst [vmem:[%s1306_s14 + $0x8] sm:$0xff] %v1321_v57  ;;  %v761_v17 = vmul.f32 %v1321_v57, %v1321_v57  ;;  %v722_v47 = vadd.f32 %v1321_v57, %v1308_v48  ;;  %v550_v57 = vld [vmem:[%s1299_s11 + $0xe8] sm:$0xff] }
  0xb4   : > { %699 = vst [vmem:[%s1306_s14 + $0x48] sm:$0xff] %v1323_v58 }
  0xb5   : > { %714 = vst [vmem:[%s1306_s14 + $0xc0] sm:$0xff] %v1335_v0  ;;  %v792_v54 = vadd.f32 %v761_v17, %v760_v46  ;;  %v769_v17 = vmul.f32 %v1323_v58, %v1323_v58 }
  0xb7   : > { %v652_v1 = vpop.f32.mrf.mxu2  ;;  %v672_v8 = vpop.f32.mrf.mxu3 }
  0xb8   : > { %v615_v2 = vpop.f32.mrf.mxu0  ;;  %v635_v3 = vpop.f32.mrf.mxu1  ;;  %v1337_v4 = vadd.f32 %v652_v1, %v538_v60  ;;  %v1346_v10 = vadd.f32 %v672_v8, %v546_v5 }
  0xb9   : > { %v616_v6 = vadd.f32 %v615_v2, %v523_v62  ;;  %v1342_v7 = vadd.f32 %v635_v3, %v531_v63  ;;  %v549_v62 = vld [vmem:[%s1299_s11 + $0xe0] sm:$0xff] }
  0xba   : > { %707 = vst [vmem:[%s1306_s14 + $0x88] sm:$0xff] %v1337_v4 }
  0xbb   : > { %692 = vst [vmem:[%s1306_s14 + $0x10] sm:$0xff] %v616_v6  ;;  %v762_v52 = vmul.f32 %v616_v6, %v616_v6  ;;  %v723_v55 = vadd.f32 %v722_v47, %v616_v6 }
  0xbc   : > { %700 = vst [vmem:[%s1306_s14 + $0x50] sm:$0xff] %v1342_v7 }
  0xbd   : > { %715 = vst [vmem:[%s1306_s14 + $0xc8] sm:$0xff] %v1346_v10  ;;  %v793_v6 = vadd.f32 %v792_v54, %v762_v52  ;;  %v552_v52 = vld [vmem:[%s1299_s11 + $0xf8] sm:$0xff] }
  0xbf   : > { %v655_v14 = vpop.f32.mrf.mxu2  ;;  %v675_v21 = vpop.f32.mrf.mxu3 }
  0xc0   : > { %v617_v15 = vpop.f32.mrf.mxu0  ;;  %v637_v16 = vpop.f32.mrf.mxu1  ;;  %v1356_v18 = vadd.f32 %v655_v14, %v539_v11  ;;  %v1373_v32 = vadd.f32 %v675_v21, %v547_v29  ;;  %v536_v21 = vld [vmem:[%s1299_s11 + $0x78] sm:$0xff] }
  0xc1   : > { %v618_v19 = vadd.f32 %v617_v15, %v524_v12  ;;  %v1358_v20 = vadd.f32 %v637_v16, %v532_v13  ;;  %v543_v15 = vld [vmem:[%s1299_s11 + $0xb0] sm:$0xff]  ;;  %v528_v16 = vld [vmem:[%s1299_s11 + $0x38] sm:$0xff] }
  0xc2   : > { %708 = vst [vmem:[%s1306_s14 + $0x90] sm:$0xff] %v1356_v18 }
  0xc3   : > { %693 = vst [vmem:[%s1306_s14 + $0x18] sm:$0xff] %v618_v19  ;;  %v763_v63 = vmul.f32 %v618_v19, %v618_v19  ;;  %v724_v8 = vadd.f32 %v723_v55, %v618_v19 }
  0xc4   : > { %701 = vst [vmem:[%s1306_s14 + $0x58] sm:$0xff] %v1358_v20 }
  0xc5   : > { %716 = vst [vmem:[%s1306_s14 + $0xd0] sm:$0xff] %v1373_v32  ;;  %v794_v12 = vadd.f32 %v793_v6, %v763_v63 }
  0xc7   : > { %v657_v25 = vpop.f32.mrf.mxu2  ;;  %v677_v34 = vpop.f32.mrf.mxu3 }
  0xc8   : > { %v620_v26 = vpop.f32.mrf.mxu0  ;;  %v640_v27 = vpop.f32.mrf.mxu1  ;;  %v1368_v28 = vadd.f32 %v657_v25, %v540_v22  ;;  %v1378_v35 = vadd.f32 %v677_v34, %v548_v33 }
  0xc9   : > { %v621_v30 = vadd.f32 %v620_v26, %v525_v23  ;;  %v1371_v31 = vadd.f32 %v640_v27, %v533_v24 }
  0xca   : > { %709 = vst [vmem:[%s1306_s14 + $0x98] sm:$0xff] %v1368_v28 }
  0xcb   : > { %694 = vst [vmem:[%s1306_s14 + $0x20] sm:$0xff] %v621_v30  ;;  %v764_v11 = vmul.f32 %v621_v30, %v621_v30  ;;  %v725_v13 = vadd.f32 %v724_v8, %v621_v30 }
  0xcc   : > { %702 = vst [vmem:[%s1306_s14 + $0x60] sm:$0xff] %v1371_v31 }
  0xcd   : > { %717 = vst [vmem:[%s1306_s14 + $0xd8] sm:$0xff] %v1378_v35  ;;  %v795_v22 = vadd.f32 %v794_v12, %v764_v11 }
  0xcf   : > { %v660_v38 = vpop.f32.mrf.mxu2  ;;  %v680_v44 = vpop.f32.mrf.mxu3 }
  0xd0   : > { %v622_v39 = vpop.f32.mrf.mxu0  ;;  %v642_v40 = vpop.f32.mrf.mxu1  ;;  %v1390_v41 = vadd.f32 %v660_v38, %v541_v9  ;;  %v1413_v48 = vadd.f32 %v680_v44, %v549_v62  ;;  %v544_v44 = vld [vmem:[%s1299_s11 + $0xb8] sm:$0xff] }
  0xd1   : > { %v623_v42 = vadd.f32 %v622_v39, %v526_v36  ;;  %v1392_v43 = vadd.f32 %v642_v40, %v534_v37  ;;  %v768_v39 = vmul.f32 %v1310_v49, %v1310_v49 }
  0xd2   : > { %710 = vst [vmem:[%s1306_s14 + $0xa0] sm:$0xff] %v1390_v41 }
  0xd3   : > { %695 = vst [vmem:[%s1306_s14 + $0x28] sm:$0xff] %v623_v42  ;;  %v765_v14 = vmul.f32 %v623_v42, %v623_v42  ;;  %v726_v23 = vadd.f32 %v725_v13, %v623_v42 }
  0xd4   : > { %703 = vst [vmem:[%s1306_s14 + $0x68] sm:$0xff] %v1392_v43 }
  0xd5   : > { %718 = vst [vmem:[%s1306_s14 + $0xe0] sm:$0xff] %v1413_v48  ;;  %v796_v29 = vadd.f32 %v795_v22, %v765_v14  ;;  %v777_v22 = vmul.f32 %v1337_v4, %v1337_v4 }
  0xd7   : > { %v662_v53 = vpop.f32.mrf.mxu2  ;;  %v682_v3 = vpop.f32.mrf.mxu3 }
  0xd8   : > { %v625_v59 = vpop.f32.mrf.mxu0  ;;  %v645_v60 = vpop.f32.mrf.mxu1  ;;  %v1408_v61 = vadd.f32 %v662_v53, %v542_v45  ;;  %v1418_v5 = vadd.f32 %v682_v3, %v550_v57  ;;  %v770_v53 = vmul.f32 %v1342_v7, %v1342_v7  ;;  %v773_v3 = vmul.f32 %v1392_v43, %v1392_v43 }
  0xd9   : > { %v626_v1 = vadd.f32 %v625_v59, %v527_v50  ;;  %v1411_v2 = vadd.f32 %v645_v60, %v535_v51  ;;  %v551_v51 = vld [vmem:[%s1299_s11 + $0xf0] sm:$0xff] }
  0xda   : > { %711 = vst [vmem:[%s1306_s14 + $0xa8] sm:$0xff] %v1408_v61 }
  0xdb   : > { %696 = vst [vmem:[%s1306_s14 + $0x30] sm:$0xff] %v626_v1  ;;  %v766_v19 = vmul.f32 %v626_v1, %v626_v1  ;;  %v727_v30 = vadd.f32 %v726_v23, %v626_v1 }
  0xdc   : > { %704 = vst [vmem:[%s1306_s14 + $0x70] sm:$0xff] %v1411_v2 }
  0xdd   : > { %719 = vst [vmem:[%s1306_s14 + $0xe8] sm:$0xff] %v1418_v5  ;;  %v797_v36 = vadd.f32 %v796_v29, %v766_v19  ;;  %v778_v19 = vmul.f32 %v1356_v18, %v1356_v18 }
  0xdf   : > { %v665_v24 = vpop.f32.mrf.mxu2  ;;  %v685_v9 = vpop.f32.mrf.mxu3 }
  0xe0   : > { %v627_v25 = vpop.f32.mrf.mxu0  ;;  %v647_v26 = vpop.f32.mrf.mxu1  ;;  %v1430_v27 = vadd.f32 %v665_v24, %v543_v15  ;;  %v1448_v55 = vadd.f32 %v685_v9, %v551_v51  ;;  %v788_v51 = vmul.f32 %v1413_v48, %v1413_v48 }
  0xe1   : > { %v628_v33 = vadd.f32 %v627_v25, %v528_v16  ;;  %v648_v34 = vadd.f32 %v647_v26, %v536_v21  ;;  %v776_v16 = vmul.f32 %v1319_v56, %v1319_v56  ;;  %v779_v25 = vmul.f32 %v1368_v28, %v1368_v28 }
  0xe2   : > { %712 = vst [vmem:[%s1306_s14 + $0xb0] sm:$0xff] %v1430_v27 }
  0xe3   : > { %697 = vst [vmem:[%s1306_s14 + $0x38] sm:$0xff] %v628_v33  ;;  %v728_v37 = vadd.f32 %v727_v30, %v628_v33  ;;  %v767_v38 = vmul.f32 %v628_v33, %v628_v33  ;;  %v775_v15 = vmul.f32 %v648_v34, %v648_v34 }
  0xe4   : > { %705 = vst [vmem:[%s1306_s14 + $0x78] sm:$0xff] %v648_v34 }
  0xe5   : > { %v729_v40 = vadd.f32 %v728_v37, %v1310_v49  ;;  %v798_v42 = vadd.f32 %v797_v36, %v767_v38  ;;  %720 = vst [vmem:[%s1306_s14 + $0xf0] sm:$0xff] %v1448_v55  ;;  %v782_v37 = vmul.f32 %v1430_v27, %v1430_v27 }
  0xe7   : > { %v730_v45 = vadd.f32 %v729_v40, %v1323_v58  ;;  %v799_v46 = vadd.f32 %v798_v42, %v768_v39  ;;  %v667_v47 = vpop.f32.mrf.mxu2  ;;  %v687_v59 = vpop.f32.mrf.mxu3  ;;  %v771_v58 = vmul.f32 %v1358_v20, %v1358_v20  ;;  %v784_v40 = vmul.f32 %v1335_v0, %v1335_v0 }
  0xe8   : > { %v668_v50 = vadd.f32 %v667_v47, %v544_v44  ;;  %v1451_v60 = vadd.f32 %v687_v59, %v552_v52  ;;  %v785_v44 = vmul.f32 %v1346_v10, %v1346_v10  ;;  %v787_v47 = vmul.f32 %v1378_v35, %v1378_v35 }
  0xe9   : > { %v731_v54 = vadd.f32 %v730_v45, %v1342_v7  ;;  %v800_v49 = vadd.f32 %v799_v46, %v769_v17  ;;  %v772_v7 = vmul.f32 %v1371_v31, %v1371_v31  ;;  %v786_v45 = vmul.f32 %v1373_v32, %v1373_v32 }
  0xea   : > { %713 = vst [vmem:[%s1306_s14 + $0xb8] sm:$0xff] %v668_v50  ;;  %v783_v39 = vmul.f32 %v668_v50, %v668_v50 }
  0xeb   : > { %v801_v62 = vadd.f32 %v800_v49, %v770_v53  ;;  %v732_v63 = vadd.f32 %v731_v54, %v1358_v20  ;;  %721 = vst [vmem:[%s1306_s14 + $0xf8] sm:$0xff] %v1451_v60  ;;  %v774_v20 = vmul.f32 %v1411_v2, %v1411_v2  ;;  %v789_v54 = vmul.f32 %v1418_v5, %v1418_v5 }
  0xed   : > { %v733_v1 = vadd.f32 %v732_v63, %v1371_v31  ;;  %v802_v57 = vadd.f32 %v801_v62, %v771_v58 }
  0xef   : > { %v734_v6 = vadd.f32 %v733_v1, %v1392_v43  ;;  %v803_v8 = vadd.f32 %v802_v57, %v772_v7 }
  0xf1   : > { %v735_v11 = vadd.f32 %v734_v6, %v1411_v2  ;;  %v804_v12 = vadd.f32 %v803_v8, %v773_v3 }
  0xf3   : > { %v805_v13 = vadd.f32 %v804_v12, %v774_v20  ;;  %v736_v14 = vadd.f32 %v735_v11, %v648_v34  ;;  %v781_v34 = vmul.f32 %v1408_v61, %v1408_v61 }
  0xf5   : > { %v737_v31 = vadd.f32 %v736_v14, %v1319_v56  ;;  %v806_v21 = vadd.f32 %v805_v13, %v775_v15  ;;  %v780_v56 = vmul.f32 %v1390_v41, %v1390_v41 }
  0xf7   : > { %v738_v43 = vadd.f32 %v737_v31, %v1337_v4  ;;  %v807_v23 = vadd.f32 %v806_v21, %v776_v16 }
  0xf9   : > { %v808_v2 = vadd.f32 %v807_v23, %v777_v22  ;;  %v739_v24 = vadd.f32 %v738_v43, %v1356_v18 }
  0xfb   : > { %v740_v26 = vadd.f32 %v739_v24, %v1368_v28  ;;  %v809_v29 = vadd.f32 %v808_v2, %v778_v19 }
  0xfd   : > { %v741_v30 = vadd.f32 %v740_v26, %v1390_v41  ;;  %v810_v33 = vadd.f32 %v809_v29, %v779_v25 }
  0xff   : > { %v742_v4 = vadd.f32 %v741_v30, %v1408_v61  ;;  %v811_v9 = vadd.f32 %v810_v33, %v780_v56 }
 0x101   : > { %v812_v36 = vadd.f32 %v811_v9, %v781_v34  ;;  %v743_v18 = vadd.f32 %v742_v4, %v1430_v27 }
 0x103   : > { %v813_v28 = vadd.f32 %v812_v36, %v782_v37  ;;  %v744_v38 = vadd.f32 %v743_v18, %v668_v50 }
 0x105   : > { %v745_v41 = vadd.f32 %v744_v38, %v1335_v0  ;;  %v814_v42 = vadd.f32 %v813_v28, %v783_v39 }
 0x107   : > { %v746_v61 = vadd.f32 %v745_v41, %v1346_v10  ;;  %v815_v17 = vadd.f32 %v814_v42, %v784_v40 }
 0x109   : > { %v816_v46 = vadd.f32 %v815_v17, %v785_v44  ;;  %v747_v27 = vadd.f32 %v746_v61, %v1373_v32 }
 0x10b   : > { %v748_v50 = vadd.f32 %v747_v27, %v1378_v35  ;;  %v817_v0 = vadd.f32 %v816_v46, %v786_v45  ;;  %v790_v35 = vmul.f32 %v1448_v55, %v1448_v55 }
 0x10d   : > { %v749_v52 = vadd.f32 %v748_v50, %v1413_v48  ;;  %v818_v10 = vadd.f32 %v817_v0, %v787_v47  ;;  %v791_v48 = vmul.f32 %v1451_v60, %v1451_v60 }
 0x10f   : > { %v750_v53 = vadd.f32 %v749_v52, %v1418_v5  ;;  %v819_v32 = vadd.f32 %v818_v10, %v788_v51 }
 0x111   : > { %v820_v49 = vadd.f32 %v819_v32, %v789_v54  ;;  %v751_v59 = vadd.f32 %v750_v53, %v1448_v55 }
 0x113   : > { %v821_v58 = vadd.f32 %v820_v49, %v790_v35  ;;  %v752_v62 = vadd.f32 %v751_v59, %v1451_v60 }
 0x115   : > { %v753_v63 = vrot.slane %v752_v62, 4  ;;  %v822_v7 = vadd.f32 %v821_v58, %v791_v48 }
 0x117   : > { %v754_v1 = vadd.f32 %v753_v63, %v752_v62  ;;  %v823_v57 = vrot.slane %v822_v7, 4 }
 0x119   : > { %v755_v3 = vrot.slane %v754_v1, 2  ;;  %v824_v5 = vadd.f32 %v823_v57, %v822_v7 }
 0x11b   : > { %v756_v6 = vadd.f32 %v755_v3, %v754_v1  ;;  %v825_v8 = vrot.slane %v824_v5, 2 }
 0x11d   : > { %v757_v11 = vrot.slane %v756_v6, 1  ;;  %v826_v20 = vadd.f32 %v825_v8, %v824_v5 }
 0x11f   : > { %v758_v55 = vadd.f32 %v757_v11, %v756_v6  ;;  %v827_v12 = vrot.slane %v826_v20, 1 }
 0x121   : > { %759 = vst [vmem:[%s317_s16] sm:$0x1] %v758_v55  ;;  %v828_v60 = vadd.f32 %v827_v12, %v826_v20 }
 0x123   : > { %829 = vst [vmem:[%s320_s19] sm:$0x1] %v828_v60 }
 0x124 PF: > { %s18_s24 = sadd.s32 1, %s1120_s24  }
 0x125   : > { %p15_p5 = scmp.ge.s32.totalorder %s18_s24, 4  }
 0x127   :  { %17 = sbr.rel (!%p15_p5) target bundleno = 1 (0x1), region = 97 }

// kernel: fmf_hourglass_forward.16
= control target key start
LH: loop header
LB: loop body
LE: loop exit
PB: predicated region body
PF: predicated region fallthrough
CT: control target
= control target key end

     0   :  { %s4569_s27 = smov 0   ;;  %s4571_s28 = smov 0   ;;  %s5803_s0 = inlined_call_operand.vmem [shape: bf16[2,16,16,128], index: 0, kind: input, shape index: {}, may-alias: {0,1,2}]   ;;  %s5804_s1 = inlined_call_operand.vmem [shape: bf16[2,16,16,128], index: 1, kind: input, shape index: {}, may-alias: {0,1,2}]   ;;  %s5805_s2 = inlined_call_operand.vmem [shape: bf16[2,16,16,128], index: 2, kind: input, shape index: {}, may-alias: {0,1,2}]   ;;  %s5806_s3 = inlined_call_operand.vmem [shape: f32[1,128], index: 3, kind: input, shape index: {}]   ;;  %s5807_s4 = inlined_call_operand.vmem [shape: f32[1,128], index: 4, kind: input, shape index: {}]   ;;  %s5808_s5 = inlined_call_operand.vmem [shape: bf16[3,384,128], index: 5, kind: input, shape index: {}]   ;;  %s5809_s6 = inlined_call_operand.vmem [shape: bf16[2,16,16,128], index: 6, kind: output, shape index: {0}]   ;;  %s5810_s7 = inlined_call_operand.vmem [shape: f32[2,1,1,128], index: 7, kind: output, shape index: {1}]   ;;  %s5811_s8 = inlined_call_operand.vmem [shape: f32[2,1,1,128], index: 8, kind: output, shape index: {2}]  }
   0x1   :  { %s4573_s29 = smov 0  }
   0x2 LB: > { %s31_s30 = sadd.s32 1, %s4517_s28  ;;  %p3455_p0 = scmp.ge.s32.totalorder %s4521_s29, 1  ;;  %s4521_s29 = sphi %s4573_s29, %s19_s29   ;;  %s4517_s28 = sphi %s4571_s28, %s5946_s28   ;;  %s4513_s27 = sphi %s4569_s27, %s5945_s27  }
   0x3   : > { %p33_p1 = scmp.ge.s32.totalorder %s31_s30, 2  ;;  %p357_p2 = scmp.lt.s32.totalorder %s4521_s29, 3 }
   0x5   : > { %s5948_s30 = smov (%p33_p1, %s31_s30), 0  ;;  %p358_p3 = pnand %p3455_p0, %p357_p2 }
   0x7   : > { %361 = sbr.rel (%p358_p3) target bundleno = 768 (0x300), region = 44 }
   0xc   : > { %v4222_v0 = vld [vmem:[%s5808_s5 + $0xf8] sm:$0xff]  ;;  %p443_p4 = scmp.lt.s32.totalorder %s4513_s27, 1  ;;  %v4221_v1 = vld [vmem:[%s5808_s5 + $0xf0] sm:$0xff]  ;;  %v4220_v2 = vld [vmem:[%s5808_s5 + $0xe8] sm:$0xff]  ;;  %vm809_vm0 = vcmask 1040384   ;;  %vm4523_vm2 = vmmov 1  }
   0xd   : > { %1596 = vmatpush.bf16.msra.mxu0 %v4222_v0  ;;  %4446 = vmatpush.bf16.msra.mxu1 %v4222_v0  ;;  %v4610_v3 = vld [vmem:[%s5806_s3] ss:$0 sm:$0xff]  ;;  %v4218_v33 = vld [vmem:[%s5808_s5 + $0xd8] sm:$0xff]  ;;  %v4217_v44 = vld [vmem:[%s5808_s5 + $0xd0] sm:$0xff]  ;;  %vm906_vm4 = vcmask 1046528  }
   0xe   : > { %s5950_s27 = smov (!%p443_p4, %s4513_s27), 1  ;;  %4447 = vmatpush.bf16.msra.mxu2 %v4222_v0  ;;  %4448 = vmatpush.bf16.msra.mxu3 %v4222_v0  ;;  %v4618_v7 = vld [vmem:[%s5807_s4] ss:$0 sm:$0xff]  ;;  %v4216_v59 = vld [vmem:[%s5808_s5 + $0xc8] sm:$0xff]  ;;  %vm4691_vm1 = vmneg %vm809_vm0 }
   0xf   : > { %s4596_s13 = sshll.u32 %s5950_s27, 7  ;;  %v4219_v21 = vld [vmem:[%s5808_s5 + $0xe0] sm:$0xff]  ;;  %vm4718_vm3 = vmpackc.low %vm4523_vm2, %vm4691_vm1  ;;  %s500_s26 = scalar_lea.vmem %s5810_s7, %s5950_s27 }
  0x10   : > { %s4605_s18 = scalar_lea.vmem %s5804_s1, %s4596_s13  ;;  %s451_s17 = scalar_lea.vmem %s5803_s0, %s4596_s13  ;;  %vm5067_vm5 = vmpackc.low %vm906_vm4, %vm4523_vm2 }
  0x11   : > { %1597 = vmatpush.bf16.msra.mxu0 %v4221_v1  ;;  %4449 = vmatpush.bf16.msra.mxu1 %v4221_v1  ;;  %v4268_v4 = vld [vmem:[%s4605_s18] sm:$0xff]   ;;  %v4416_v40 = vld [vmem:[%s4605_s18 + $0x8] sm:$0xff]   ;;  %s5669_s16 = scalar_lea.vmem %s5809_s6, %s4596_s13  ;;  %s506_s11 = scalar_lea.vmem %s5811_s8, %s5950_s27 }
  0x12   : > { %v4419_v5 = vld [vmem:[%s4605_s18 + $0x20] sm:$0xff]   ;;  %4450 = vmatpush.bf16.msra.mxu2 %v4221_v1  ;;  %4451 = vmatpush.bf16.msra.mxu3 %v4221_v1  ;;  %v4269_v8 = vunpack.c.l.bf16 %v4268_v4  ;;  %v4270_v9 = vunpack.c.h.bf16 %v4268_v4  ;;  %v4420_v45 = vld [vmem:[%s4605_s18 + $0x28] sm:$0xff]   ;;  %v4273_v47 = vunpack.c.l.bf16 %v4416_v40  ;;  %v4274_v48 = vunpack.c.h.bf16 %v4416_v40 }
  0x13   : > { %v4423_v6 = vld [vmem:[%s4605_s18 + $0x40] sm:$0xff]   ;;  %v4285_v10 = vunpack.c.l.bf16 %v4419_v5  ;;  %v4286_v11 = vunpack.c.h.bf16 %v4419_v5  ;;  %v4424_v49 = vld [vmem:[%s4605_s18 + $0x48] sm:$0xff]   ;;  %v4289_v58 = vunpack.c.l.bf16 %v4420_v45  ;;  %v4290_v60 = vunpack.c.h.bf16 %v4420_v45  ;;  %v4237_v45 = vld [vmem:[%s5808_s5 + $0x170] sm:$0xff] }
  0x14   : > { %v4427_v12 = vld [vmem:[%s4605_s18 + $0x60] sm:$0xff]   ;;  %v4301_v13 = vunpack.c.l.bf16 %v4423_v6  ;;  %v4302_v14 = vunpack.c.h.bf16 %v4423_v6  ;;  %v600_v17 = vmul.f32 %v4610_v3, %v4269_v8  ;;  %v601_v18 = vmul.f32 %v4610_v3, %v4270_v9  ;;  %v4428_v54 = vld [vmem:[%s4605_s18 + $0x68] sm:$0xff]  }
  0x15   : > { %v4317_v15 = vunpack.c.l.bf16 %v4427_v12  ;;  %v4318_v16 = vunpack.c.h.bf16 %v4427_v12  ;;  %v608_v19 = vmul.f32 %v4610_v3, %v4285_v10  ;;  %v609_v20 = vmul.f32 %v4610_v3, %v4286_v11  ;;  %1598 = vmatpush.bf16.msra.mxu0 %v4220_v2  ;;  %4452 = vmatpush.bf16.msra.mxu1 %v4220_v2  ;;  %v4215_v10 = vld [vmem:[%s5808_s5 + $0xc0] sm:$0xff] }
  0x16   : > { %v616_v22 = vmul.f32 %v4610_v3, %v4301_v13  ;;  %v617_v23 = vmul.f32 %v4610_v3, %v4302_v14  ;;  %4453 = vmatpush.bf16.msra.mxu2 %v4220_v2  ;;  %4454 = vmatpush.bf16.msra.mxu3 %v4220_v2  ;;  %v632_v25 = vadd.f32 %v4618_v7, %v600_v17  ;;  %v4305_v61 = vunpack.c.l.bf16 %v4424_v49 }
  0x17   : > { %v624_v24 = vmul.f32 %v4610_v3, %v4317_v15  ;;  %v633_v26 = vadd.f32 %v4618_v7, %v601_v18  ;;  %v640_v27 = vadd.f32 %v4618_v7, %v608_v19  ;;  %v641_v28 = vadd.f32 %v4618_v7, %v609_v20  ;;  %v4238_v18 = vld [vmem:[%s5808_s5 + $0x178] sm:$0xff] }
  0x18   : > { %v648_v29 = vadd.f32 %v4618_v7, %v616_v22  ;;  %v625_v30 = vmul.f32 %v4610_v3, %v4318_v16  ;;  %v649_v31 = vadd.f32 %v4618_v7, %v617_v23  ;;  %v4643_v35 = vmax.f32 %v632_v25, 0.0  ;;  %v4198_v19 = vld [vmem:[%s5808_s5 + $0x38] sm:$0xff]  ;;  %v4417_v22 = vld [vmem:[%s4605_s18 + $0x10] sm:$0xff]  }
  0x19   : > { %v656_v32 = vadd.f32 %v4618_v7, %v624_v24  ;;  %1599 = vmatpush.bf16.msra.mxu0 %v4219_v21  ;;  %4455 = vmatpush.bf16.msra.mxu1 %v4219_v21  ;;  %v4645_v36 = vmax.f32 %v633_v26, 0.0  ;;  %v4647_v37 = vmax.f32 %v640_v27, 0.0  ;;  %v4649_v38 = vmax.f32 %v641_v28, 0.0 }
  0x1a   : > { %v657_v34 = vadd.f32 %v4618_v7, %v625_v30  ;;  %4456 = vmatpush.bf16.msra.mxu2 %v4219_v21  ;;  %4457 = vmatpush.bf16.msra.mxu3 %v4219_v21  ;;  %v4651_v39 = vmax.f32 %v648_v29, 0.0  ;;  %v4654_v41 = vmax.f32 %v649_v31, 0.0  ;;  %v813_v46 = vrot.slane %v4643_v35, 7  ;;  %v4230_v31 = vld [vmem:[%s5808_s5 + $0x138] sm:$0xff] }
  0x1b   : > { %v4656_v42 = vmax.f32 %v656_v32, 0.0  ;;  %v814_v50 = vrot.slane %v4645_v36, 7  ;;  %v825_v51 = vrot.slane %v4647_v37, 7  ;;  %v826_v52 = vrot.slane %v4649_v38, 7  ;;  %v4206_v32 = vld [vmem:[%s5808_s5 + $0x78] sm:$0xff] }
  0x1c   : > { %v4658_v43 = vmax.f32 %v657_v34, 0.0  ;;  %v837_v53 = vrot.slane %v4651_v39, 7  ;;  %v838_v55 = vrot.slane %v4654_v41, 7  ;;  %v4306_v62 = vunpack.c.h.bf16 %v4424_v49 }
  0x1d   : > { %1600 = vmatpush.bf16.msra.mxu0 %v4218_v33  ;;  %4458 = vmatpush.bf16.msra.mxu1 %v4218_v33  ;;  %v849_v56 = vrot.slane %v4656_v42, 7  ;;  %v4321_v63 = vunpack.c.l.bf16 %v4428_v54  ;;  %v4322_v0 = vunpack.c.h.bf16 %v4428_v54  ;;  %v815_v1 = vsel %vm809_vm0, %v813_v46, %v814_v50  ;;  %v4421_v50 = vld [vmem:[%s4605_s18 + $0x30] sm:$0xff]  }
  0x1e   : > { %4459 = vmatpush.bf16.msra.mxu2 %v4218_v33  ;;  %4460 = vmatpush.bf16.msra.mxu3 %v4218_v33  ;;  %v850_v57 = vrot.slane %v4658_v43, 7  ;;  %v602_v2 = vmul.f32 %v4610_v3, %v4273_v47  ;;  %v603_v4 = vmul.f32 %v4610_v3, %v4274_v48  ;;  %v827_v5 = vsel %vm809_vm0, %v825_v51, %v826_v52  ;;  %v4425_v54 = vld [vmem:[%s4605_s18 + $0x50] sm:$0xff]  }
  0x1f   : > { %v839_v6 = vsel %vm809_vm0, %v837_v53, %v838_v55  ;;  %v610_v9 = vmul.f32 %v4610_v3, %v4289_v58  ;;  %v611_v11 = vmul.f32 %v4610_v3, %v4290_v60  ;;  %v618_v12 = vmul.f32 %v4610_v3, %v4305_v61  ;;  %v4429_v55 = vld [vmem:[%s4605_s18 + $0x70] sm:$0xff]  }
  0x20   : > { %v851_v8 = vsel %vm809_vm0, %v849_v56, %v850_v57  ;;  %v619_v13 = vmul.f32 %v4610_v3, %v4306_v62  ;;  %v626_v15 = vmul.f32 %v4610_v3, %v4321_v63  ;;  %v627_v16 = vmul.f32 %v4610_v3, %v4322_v0  ;;  %v4229_v58 = vld [vmem:[%s5808_s5 + $0x130] sm:$0xff]  ;;  %v4236_v0 = vld [vmem:[%s5808_s5 + $0x168] sm:$0xff] }
  0x21   : > { %1601 = vmatpush.bf16.msra.mxu0 %v4217_v44  ;;  %4461 = vmatpush.bf16.msra.mxu1 %v4217_v44  ;;  %v4697_v17 = vpack.c.bf16 %v815_v1, %v813_v46  ;;  %v634_v20 = vadd.f32 %v4618_v7, %v602_v2  ;;  %v635_v21 = vadd.f32 %v4618_v7, %v603_v4  ;;  %v4277_v40 = vunpack.c.l.bf16 %v4417_v22  ;;  %v4197_v46 = vld [vmem:[%s5808_s5 + $0x30] sm:$0xff]  ;;  %v4196_v1 = vld [vmem:[%s5808_s5 + $0x28] sm:$0xff] }
  0x22   : > { %4462 = vmatpush.bf16.msra.mxu2 %v4217_v44  ;;  %4463 = vmatpush.bf16.msra.mxu3 %v4217_v44  ;;  %v4708_v23 = vpack.c.bf16 %v827_v5, %v825_v51  ;;  %v4710_v24 = vpack.c.bf16 %v839_v6, %v837_v53  ;;  %v4712_v25 = vpack.c.bf16 %v851_v8, %v849_v56  ;;  %v4278_v44 = vunpack.c.h.bf16 %v4417_v22  ;;  %v4195_v22 = vld [vmem:[%s5808_s5 + $0x20] sm:$0xff] }
  0x23   : > { %v642_v26 = vadd.f32 %v4618_v7, %v610_v9  ;;  %v643_v28 = vadd.f32 %v4618_v7, %v611_v11  ;;  %v650_v29 = vadd.f32 %v4618_v7, %v618_v12  ;;  %v651_v30 = vadd.f32 %v4618_v7, %v619_v13 }
  0x24   : > { %5849 = vst [vmem:[#allocation3_spill] sm:$0xff] %v4708_v23  ;;  %v658_v33 = vadd.f32 %v4618_v7, %v626_v15  ;;  %v659_v34 = vadd.f32 %v4618_v7, %v627_v16  ;;  %v4739_v47 = vmax.f32 %v634_v20, 0.0  ;;  %v4741_v48 = vmax.f32 %v635_v21, 0.0  ;;  %v4228_v16 = vld [vmem:[%s5808_s5 + $0x128] sm:$0xff]  ;;  %v4235_v21 = vld [vmem:[%s5808_s5 + $0x160] sm:$0xff] }
  0x25   : > { %1602 = vmatpush.bf16.msra.mxu0 %v4216_v59  ;;  %4464 = vmatpush.bf16.msra.mxu1 %v4216_v59  ;;  %v4749_v49 = vmax.f32 %v642_v26, 0.0  ;;  %v4758_v51 = vmax.f32 %v643_v28, 0.0  ;;  %v4760_v52 = vmax.f32 %v650_v29, 0.0  ;;  %v4762_v53 = vmax.f32 %v651_v30, 0.0 }
  0x26   : > { %4465 = vmatpush.bf16.msra.mxu2 %v4216_v59  ;;  %4466 = vmatpush.bf16.msra.mxu3 %v4216_v59  ;;  %v4766_v56 = vmax.f32 %v658_v33, 0.0  ;;  %v4768_v57 = vmax.f32 %v659_v34, 0.0  ;;  %v4205_v59 = vld [vmem:[%s5808_s5 + $0x70] sm:$0xff]  ;;  %v604_v60 = vmul.f32 %v4610_v3, %v4277_v40  ;;  %v605_v61 = vmul.f32 %v4610_v3, %v4278_v44 }
  0x27   : > { %v816_v62 = vrot.slane %v4739_v47, 7  ;;  %v817_v63 = vrot.slane %v4741_v48, 7  ;;  %v4293_v2 = vunpack.c.l.bf16 %v4421_v50  ;;  %v4294_v4 = vunpack.c.h.bf16 %v4421_v50  ;;  %v4227_v50 = vld [vmem:[%s5808_s5 + $0x120] sm:$0xff] }
  0x28   : > { %v828_v5 = vrot.slane %v4749_v49, 7  ;;  %v4309_v6 = vunpack.c.l.bf16 %v4425_v54  ;;  %v4310_v8 = vunpack.c.h.bf16 %v4425_v54  ;;  %v4325_v9 = vunpack.c.l.bf16 %v4429_v55  ;;  %v4203_v54 = vld [vmem:[%s5808_s5 + $0x60] sm:$0xff] }
  0x29   : > { %1603 = vmatpush.bf16.msra.mxu0 %v4215_v10  ;;  %4467 = vmatpush.bf16.msra.mxu1 %v4215_v10  ;;  %v840_v11 = vrot.slane %v4760_v52, 7  ;;  %v841_v12 = vrot.slane %v4762_v53, 7  ;;  %v4326_v13 = vunpack.c.h.bf16 %v4429_v55  ;;  %v852_v14 = vrot.slane %v4766_v56, 7 }
  0x2a   : > { %4468 = vmatpush.bf16.msra.mxu2 %v4215_v10  ;;  %4469 = vmatpush.bf16.msra.mxu3 %v4215_v10  ;;  %v829_v10 = vrot.slane %v4758_v51, 7  ;;  %v853_v15 = vrot.slane %v4768_v57, 7  ;;  %v637_v20 = vadd.f32 %v4618_v7, %v605_v61  ;;  %v612_v26 = vmul.f32 %v4610_v3, %v4293_v2  ;;  %v4194_v61 = vld [vmem:[%s5808_s5 + $0x18] sm:$0xff] }
  0x2b   : > { %v613_v28 = vmul.f32 %v4610_v3, %v4294_v4  ;;  %v818_v29 = vsel %vm809_vm0, %v816_v62, %v817_v63  ;;  %v620_v30 = vmul.f32 %v4610_v3, %v4309_v6  ;;  %v629_v34 = vmul.f32 %v4610_v3, %v4326_v13  ;;  %v4233_v13 = vld [vmem:[%s5808_s5 + $0x150] sm:$0xff] }
  0x2c   : > { %3611 = vmatmul.msk.bf16.vlgmr.msra.gmra.mxu0 %vm4718_vm3, %v4697_v17  ;;  %3627 = vmatmul.msk.bf16.vlgmr.msra.gmra.mxu1 %vm4718_vm3, %v4708_v23  ;;  %v830_v33 = vsel %vm809_vm0, %v828_v5, %v829_v10  ;;  %v842_v40 = vsel %vm809_vm0, %v840_v11, %v841_v12  ;;  %v854_v44 = vsel %vm809_vm0, %v852_v14, %v853_v15  ;;  %v4202_v10 = vld [vmem:[%s5808_s5 + $0x58] sm:$0xff] }
  0x2d   : > { %3643 = vmatmul.msk.bf16.vlgmr.msra.gmra.mxu2 %vm4718_vm3, %v4710_v24  ;;  %3659 = vmatmul.msk.bf16.vlgmr.msra.gmra.mxu3 %vm4718_vm3, %v4712_v25  ;;  %v4826_v55 = vpack.c.bf16 %v818_v29, %v816_v62  ;;  %v4836_v63 = vpack.c.bf16 %v830_v33, %v828_v5  ;;  %v4841_v2 = vpack.c.bf16 %v842_v40, %v840_v11  ;;  %v4226_v5 = vld [vmem:[%s5808_s5 + $0x118] sm:$0xff]  ;;  %v4225_v29 = vld [vmem:[%s5808_s5 + $0x110] sm:$0xff]  ;;  %v4232_v40 = vld [vmem:[%s5808_s5 + $0x148] sm:$0xff] }
  0x2e   : > { %1774 = vmatpush.bf16.msrb.mxu2 %v4238_v18  ;;  %2007 = vmatpush.bf16.msrb.mxu3 %v4198_v19  ;;  %v4204_v18 = vld [vmem:[%s5808_s5 + $0x68] sm:$0xff]  ;;  %v636_v19 = vadd.f32 %v4618_v7, %v604_v60  ;;  %v4234_v60 = vld [vmem:[%s5808_s5 + $0x158] sm:$0xff]  ;;  %v4843_v4 = vpack.c.bf16 %v854_v44, %v852_v14  ;;  %v661_v6 = vadd.f32 %v4618_v7, %v629_v34  ;;  %v4193_v14 = vld [vmem:[%s5808_s5 + $0x10] sm:$0xff] }
  0x2f   : > { %1685 = vmatpush.bf16.msrb.mxu1 %v4230_v31  ;;  %2096 = vmatpush.bf16.msrb.mxu0 %v4206_v32  ;;  %v621_v31 = vmul.f32 %v4610_v3, %v4310_v8  ;;  %v628_v32 = vmul.f32 %v4610_v3, %v4325_v9  ;;  %5852 = vst [vmem:[#allocation4_spill] sm:$0xff] %v4836_v63  ;;  %v4418_v15 = vld [vmem:[%s4605_s18 + $0x18] sm:$0xff]   ;;  %v4192_v44 = vld [vmem:[%s5808_s5 + $0x8] sm:$0xff] }
  0x30   : > { %5853 = vst [vmem:[#allocation5_spill] sm:$0xff] %v4843_v4  ;;  %v4282_v33 = vunpack.c.h.bf16 %v4418_v15  ;;  %v4430_v34 = vld [vmem:[%s4605_s18 + $0x78] sm:$0xff]  }
  0x31   : > { %v653_v62 = vadd.f32 %v4618_v7, %v621_v31 }
  0x32   : > { %1775 = vmatpush.bf16.msrb.mxu2 %v4237_v45  ;;  %2008 = vmatpush.bf16.msrb.mxu3 %v4197_v46  ;;  %v4816_v45 = vmax.f32 %v636_v19, 0.0  ;;  %v4818_v46 = vmax.f32 %v637_v20, 0.0  ;;  %v4883_v20 = vmax.f32 %v661_v6, 0.0  ;;  %v4329_v6 = vunpack.c.l.bf16 %v4430_v34 }
  0x33   : > { %1686 = vmatpush.bf16.msrb.mxu1 %v4229_v58  ;;  %2097 = vmatpush.bf16.msrb.mxu0 %v4205_v59  ;;  %v644_v58 = vadd.f32 %v4618_v7, %v612_v26  ;;  %v645_v59 = vadd.f32 %v4618_v7, %v613_v28  ;;  %v4281_v26 = vunpack.c.l.bf16 %v4418_v15  ;;  %v4426_v28 = vld [vmem:[%s4605_s18 + $0x58] sm:$0xff]   ;;  %v607_v15 = vmul.f32 %v4610_v3, %v4282_v33 }
  0x34   : > { %v819_v8 = vrot.slane %v4816_v45, 7  ;;  %v820_v9 = vrot.slane %v4818_v46, 7  ;;  %5854 = vst [vmem:[#allocation6_spill] sm:$0xff] %v4883_v20 }
  0x35   : > { %v4854_v11 = vmax.f32 %v644_v58, 0.0  ;;  %v4856_v12 = vmax.f32 %v645_v59, 0.0 }
  0x36   : > { %1776 = vmatpush.bf16.msrb.mxu2 %v4236_v0  ;;  %2009 = vmatpush.bf16.msrb.mxu3 %v4196_v1  ;;  %v652_v0 = vadd.f32 %v4618_v7, %v620_v30  ;;  %v660_v1 = vadd.f32 %v4618_v7, %v628_v32  ;;  %v4201_v30 = vld [vmem:[%s5808_s5 + $0x50] sm:$0xff] }
  0x37   : > { %1687 = vmatpush.bf16.msrb.mxu1 %v4228_v16  ;;  %2098 = vmatpush.bf16.msrb.mxu0 %v4204_v18  ;;  %v4873_v18 = vmax.f32 %v653_v62, 0.0  ;;  %v831_v31 = vrot.slane %v4854_v11, 7  ;;  %v832_v32 = vrot.slane %v4856_v12, 7  ;;  %v4313_v62 = vunpack.c.l.bf16 %v4426_v28 }
  0x38   : > { %v4871_v16 = vmax.f32 %v652_v0, 0.0  ;;  %v4875_v19 = vmax.f32 %v660_v1, 0.0  ;;  %v4314_v1 = vunpack.c.h.bf16 %v4426_v28  ;;  %v4191_v28 = vld [vmem:[%s5808_s5] sm:$0xff] }
  0x39   : > { %v844_v58 = vrot.slane %v4873_v18, 7 }
  0x3a   : > { %1777 = vmatpush.bf16.msrb.mxu2 %v4235_v21  ;;  %2010 = vmatpush.bf16.msrb.mxu3 %v4195_v22  ;;  %v4422_v21 = vld [vmem:[%s4605_s18 + $0x38] sm:$0xff]   ;;  %v821_v22 = vsel %vm809_vm0, %v819_v8, %v820_v9  ;;  %v855_v59 = vrot.slane %v4875_v19, 7  ;;  %v4330_v9 = vunpack.c.h.bf16 %v4430_v34  ;;  %v622_v34 = vmul.f32 %v4610_v3, %v4313_v62 }
  0x3b   : > { %1688 = vmatpush.bf16.msrb.mxu1 %v4227_v50  ;;  %2099 = vmatpush.bf16.msrb.mxu0 %v4203_v54  ;;  %v4905_v50 = vpack.c.bf16 %v4645_v36, %v4643_v35  ;;  %v843_v54 = vrot.slane %v4871_v16, 7  ;;  %v4298_v0 = vunpack.c.h.bf16 %v4422_v21 }
  0x3c   : > { %3615 = vmatmul.msk.bf16.gmra.mxu0 %vm4718_vm3, %v4826_v55  ;;  %3631 = vmatmul.msk.bf16.gmra.mxu1 %vm4718_vm3, %v4836_v63 }
  0x3d   : > { %3647 = vmatmul.msk.bf16.gmra.mxu2 %vm4718_vm3, %v4841_v2  ;;  %3663 = vmatmul.msk.bf16.gmra.mxu3 %vm4718_vm3, %v4843_v4  ;;  %v615_v33 = vmul.f32 %v4610_v3, %v4298_v0  ;;  %v630_v4 = vmul.f32 %v4610_v3, %v4329_v6  ;;  %v911_v6 = vrot.slane %v4645_v36, 1 }
  0x3e   : > { %1778 = vmatpush.bf16.msrb.mxu2 %v4234_v60  ;;  %2011 = vmatpush.bf16.msrb.mxu3 %v4194_v61  ;;  %v4297_v60 = vunpack.c.l.bf16 %v4422_v21  ;;  %v856_v61 = vrot.slane %v4883_v20, 7  ;;  %v4231_v21 = vld [vmem:[%s5808_s5 + $0x140] sm:$0xff] }
  0x3f   : > { %1689 = vmatpush.bf16.msrb.mxu1 %v4226_v5  ;;  %2100 = vmatpush.bf16.msrb.mxu0 %v4202_v10  ;;  %v4224_v5 = vld [vmem:[%s5808_s5 + $0x108] sm:$0xff] }
  0x40   : > { %v4200_v10 = vld [vmem:[%s5808_s5 + $0x48] sm:$0xff] }
  0x42   : > { %1779 = vmatpush.bf16.msrb.mxu2 %v4233_v13  ;;  %2012 = vmatpush.bf16.msrb.mxu3 %v4193_v14  ;;  %v833_v13 = vsel %vm809_vm0, %v831_v31, %v832_v32  ;;  %v606_v14 = vmul.f32 %v4610_v3, %v4281_v26  ;;  %v614_v32 = vmul.f32 %v4610_v3, %v4297_v60 }
  0x43   : > { %1690 = vmatpush.bf16.msrb.mxu1 %v4225_v29  ;;  %2101 = vmatpush.bf16.msrb.mxu0 %v4201_v30  ;;  %v4926_v29 = vpack.c.bf16 %v821_v22, %v819_v8  ;;  %v845_v30 = vsel %vm809_vm0, %v843_v54, %v844_v58  ;;  %v857_v26 = vsel %vm809_vm0, %v855_v59, %v856_v61  ;;  %v4223_v22 = vld [vmem:[%s5808_s5 + $0x100] sm:$0xff] }
  0x44   : > { %v631_v8 = vmul.f32 %v4610_v3, %v4330_v9  ;;  %v4199_v58 = vld [vmem:[%s5808_s5 + $0x40] sm:$0xff]  ;;  %v4944_v60 = vpack.c.bf16 %v845_v30, %v843_v54  ;;  %v639_v61 = vadd.f32 %v4618_v7, %v607_v15  ;;  %v4948_v0 = vpack.c.bf16 %v857_v26, %v855_v59  ;;  %v4254_v26 = vld [vmem:[%s5808_s5 + $0x1f8] sm:$0xff] }
  0x45   : > { %v646_v62 = vadd.f32 %v4618_v7, %v614_v32  ;;  %v647_v54 = vadd.f32 %v4618_v7, %v615_v33  ;;  %v654_v9 = vadd.f32 %v4618_v7, %v622_v34  ;;  %v662_v59 = vadd.f32 %v4618_v7, %v630_v4  ;;  %v4246_v32 = vld [vmem:[%s5808_s5 + $0x1b8] sm:$0xff] }
  0x46   : > { %1780 = vmatpush.bf16.msrb.mxu2 %v4232_v40  ;;  %2013 = vmatpush.bf16.msrb.mxu3 %v4192_v44  ;;  %v623_v40 = vmul.f32 %v4610_v3, %v4314_v1  ;;  %v4934_v44 = vpack.c.bf16 %v833_v13, %v831_v31  ;;  %v638_v31 = vadd.f32 %v4618_v7, %v606_v14  ;;  %v910_v1 = vrot.slane %v4643_v35, 1  ;;  %v4264_v13 = vld [vmem:[%s451_s17] sm:$0xff]   ;;  %v4214_v33 = vld [vmem:[%s5808_s5 + $0xb8] sm:$0xff]  ;;  %s4189_s17 = sadd.s32 120, %s4596_s13 }
  0x47   : > { %1691 = vmatpush.bf16.msrb.mxu1 %v4224_v5  ;;  %2102 = vmatpush.bf16.msrb.mxu0 %v4200_v10  ;;  %5856 = vst [vmem:[#allocation8_spill] sm:$0xff] %v4948_v0  ;;  %v663_v10 = vadd.f32 %v4618_v7, %v631_v8  ;;  %v4973_v4 = vmax.f32 %v639_v61, 0.0  ;;  %v4975_v15 = vmax.f32 %v646_v62, 0.0  ;;  %v5000_v34 = vpack.c.bf16 %v4741_v48, %v4739_v47  ;;  %s479_s18 = scalar_lea.vmem %s5805_s2, %s4189_s17 }
  0x48   : > { %5855 = vst [vmem:[#allocation7_spill] sm:$0xff] %v4934_v44  ;;  %v655_v5 = vadd.f32 %v4618_v7, %v623_v40  ;;  %v912_v35 = vsel %vm906_vm4, %v910_v1, %v911_v6  ;;  %v4971_v14 = vmax.f32 %v638_v31, 0.0  ;;  %v5002_v40 = vmax.f32 %v662_v59, 0.0  ;;  %v4262_v31 = vld [vmem:[%s5808_s5 + $0x238] sm:$0xff] }
  0x49   : > { %v4963_v36 = vpack.c.bf16 %v911_v6, %v912_v35  ;;  %v5004_v8 = vmax.f32 %v663_v10, 0.0  ;;  %v823_v62 = vrot.slane %v4973_v4, 7  ;;  %v834_v1 = vrot.slane %v4975_v15, 7 }
  0x4a   : > { %1781 = vmatpush.bf16.msrb.mxu2 %v4231_v21  ;;  %2014 = vmatpush.bf16.msrb.mxu3 %v4191_v28  ;;  %v4983_v21 = vmax.f32 %v647_v54, 0.0  ;;  %v4985_v28 = vmax.f32 %v654_v9, 0.0  ;;  %v4987_v30 = vmax.f32 %v655_v5, 0.0  ;;  %5857 = vst [vmem:[#allocation9_spill] sm:$0xff] %v5002_v40  ;;  %v822_v61 = vrot.slane %v4971_v14, 7 }
  0x4b   : > { %1692 = vmatpush.bf16.msrb.mxu1 %v4223_v22  ;;  %2103 = vmatpush.bf16.msrb.mxu0 %v4199_v58  ;;  %5858 = vst [vmem:[#allocation10_spill] sm:$0xff] %v5004_v8  ;;  %v4265_v22 = vunpack.c.l.bf16 %v4264_v13  ;;  %v4266_v58 = vunpack.c.h.bf16 %v4264_v13  ;;  %v1208_v5 = vrot.slane %v5002_v40, 7  ;;  %v1209_v59 = vrot.slane %v5004_v8, 7 }
  0x4c   : > { %3619 = vmatmul.msk.bf16.gmra.mxu0 %vm4718_vm3, %v4926_v29  ;;  %3635 = vmatmul.msk.bf16.gmra.mxu1 %vm4718_vm3, %v4934_v44  ;;  %v835_v6 = vrot.slane %v4983_v21, 7  ;;  %v846_v54 = vrot.slane %v4985_v28, 7  ;;  %v847_v9 = vrot.slane %v4987_v30, 7  ;;  %v824_v13 = vsel %vm809_vm0, %v822_v61, %v823_v62 }
  0x4d   : > { %3651 = vmatmul.msk.bf16.gmra.mxu2 %vm4718_vm3, %v4944_v60  ;;  %3667 = vmatmul.msk.bf16.gmra.mxu3 %vm4718_vm3, %v4948_v0  ;;  %v522_v10 = vmul.f32 %v4610_v3, %v4265_v22  ;;  %v523_v35 = vmul.f32 %v4610_v3, %v4266_v58  ;;  %v5025_v20 = vpack.c.bf16 %v824_v13, %v822_v61  ;;  %v913_v22 = vrot.slane %v4739_v47, 1 }
  0x4e   : > { %2772 = vmatpush.bf16.msra.mxu2 %v4246_v32  ;;  %2861 = vmatpush.bf16.msra.mxu3 %v4254_v26  ;;  %v836_v32 = vsel %vm809_vm0, %v834_v1, %v835_v6  ;;  %v848_v26 = vsel %vm809_vm0, %v846_v54, %v847_v9  ;;  %v914_v3 = vrot.slane %v4741_v48, 1 }
  0x4f   : > { %2185 = vmatpush.bf16.msra.mxu1 %v4214_v33  ;;  %2950 = vmatpush.bf16.msra.mxu0 %v4262_v31  ;;  %v1210_v33 = vsel %vm809_vm0, %v1208_v5, %v1209_v59  ;;  %v527_v31 = vadd.f32 %v4618_v7, %v522_v10  ;;  %v528_v0 = vadd.f32 %v4618_v7, %v523_v35  ;;  %v917_v10 = vrot.slane %v4818_v46, 1 }
  0x50   : > { %5859 = vst [vmem:[#allocation11_spill] sm:$0xff] %v5025_v20  ;;  %v5027_v40 = vpack.c.bf16 %v836_v32, %v834_v1  ;;  %v5031_v58 = vpack.c.bf16 %v848_v26, %v846_v54  ;;  %v5033_v62 = vpack.c.bf16 %v1210_v33, %v1208_v5  ;;  %v915_v59 = vsel %vm906_vm4, %v913_v22, %v914_v3  ;;  %v4213_v33 = vld [vmem:[%s5808_s5 + $0xb0] sm:$0xff] }
  0x51   : > { %v529_v6 = vmax.f32 %v527_v31, 0.0  ;;  %v530_v9 = vmax.f32 %v528_v0, 0.0  ;;  %v5036_v8 = vpack.c.bf16 %v914_v3, %v915_v59  ;;  %v5052_v7 = vpack.c.bf16 %v4818_v46, %v4816_v45  ;;  %v4253_v46 = vld [vmem:[%s5808_s5 + $0x1f0] sm:$0xff] }
  0x52   : > { %5860 = vst [vmem:[#allocation12_spill] sm:$0xff] %v5027_v40  ;;  %v916_v5 = vrot.slane %v4816_v45, 1  ;;  %v4245_v45 = vld [vmem:[%s5808_s5 + $0x1b0] sm:$0xff]  ;;  %v5091_v31 = vpack.c.bf16 %v4973_v4, %v4971_v14  ;;  %2862 = vmatpush.bf16.msra.mxu3 %v4253_v46  ;;  %v919_v3 = vrot.slane %v4971_v14, 1  ;;  %v4212_v14 = vld [vmem:[%s5808_s5 + $0xa8] sm:$0xff] }
  0x53   : > { %5861 = vst [vmem:[#allocation13_spill] sm:$0xff] %v5033_v62  ;;  %v5054_v47 = vmul.f32 0.0, %v529_v6  ;;  %v5056_v48 = vmul.f32 0.0, %v530_v9  ;;  %v4261_v22 = vld [vmem:[%s5808_s5 + $0x230] sm:$0xff]  ;;  %2773 = vmatpush.bf16.msra.mxu2 %v4245_v45  ;;  %2186 = vmatpush.bf16.msra.mxu1 %v4213_v33  ;;  %v920_v6 = vrot.slane %v4973_v4, 1  ;;  %v4260_v4 = vld [vmem:[%s5808_s5 + $0x228] sm:$0xff] }
  0x54   : > { %v918_v32 = vsel %vm906_vm4, %v916_v5, %v917_v10  ;;  %5864 = vst [vmem:[#allocation14_spill] sm:$0xff] %v5091_v31  ;;  %2951 = vmatpush.bf16.msra.mxu0 %v4261_v22  ;;  %v4211_v22 = vld [vmem:[%s5808_s5 + $0xa0] sm:$0xff] }
  0x55   : > { %v810_v0 = vrot.slane %v5054_v47, 7  ;;  %v811_v61 = vrot.slane %v5056_v48, 7  ;;  %v1004_v54 = vpack.c.bf16 %v5056_v48, %v5054_v47  ;;  %v5072_v26 = vpack.c.bf16 %v917_v10, %v918_v32 }
  0x56   : > { %v921_v9 = vsel %vm906_vm4, %v919_v3, %v920_v6  ;;  %v4259_v3 = vld [vmem:[%s5808_s5 + $0x220] sm:$0xff] }
  0x57   : > { %v812_v1 = vsel %vm809_vm0, %v810_v0, %v811_v61  ;;  %v5099_v59 = vpack.c.bf16 %v920_v6, %v921_v9  ;;  %2187 = vmatpush.bf16.msra.mxu1 %v4212_v14  ;;  %v923_v61 = vrot.slane %v4649_v38, 1  ;;  %v925_v6 = vrot.slane %v4749_v49, 1 }
  0x58   : > { %v3818_v35 = vpack.c.bf16 %v812_v1, %v810_v0  ;;  %2952 = vmatpush.bf16.msra.mxu0 %v4260_v4  ;;  %v922_v0 = vrot.slane %v4647_v37, 1  ;;  %v926_v9 = vrot.slane %v4758_v51, 1  ;;  %v5187_v4 = vpack.c.bf16 %v4758_v51, %v4749_v49 }
  0x59   : > { %5865 = vst [vmem:[#allocation15_spill] sm:$0xff] %v5099_v59 }
  0x5a   : > { %v924_v1 = vsel %vm906_vm4, %v922_v0, %v923_v61  ;;  %5870 = vst [vmem:[#allocation20_spill] sm:$0xff] %v5187_v4 }
  0x5b   : > { %2188 = vmatpush.bf16.msra.mxu1 %v4211_v22  ;;  %v928_v22 = vrot.slane %v4854_v11, 1 }
  0x5c   : > { %3623 = vmatmul.msk.bf16.gmra.mxu0 %vm4718_vm3, %v5025_v20  ;;  %3639 = vmatmul.msk.bf16.gmra.mxu1 %vm4718_vm3, %v5027_v40 }
  0x5d   : > { %3655 = vmatmul.msk.bf16.gmra.mxu2 %vm4718_vm3, %v5031_v58  ;;  %3671 = vmatmul.msk.bf16.gmra.mxu3 %vm4718_vm3, %v5033_v62  ;;  %v5220_v62 = vpack.c.bf16 %v4856_v12, %v4854_v11  ;;  %v4242_v11 = vld [vmem:[%s5808_s5 + $0x198] sm:$0xff] }
  0x5e   : > { %2953 = vmatpush.bf16.msra.mxu0 %v4259_v3  ;;  %v929_v3 = vrot.slane %v4856_v12, 1  ;;  %v4250_v12 = vld [vmem:[%s5808_s5 + $0x1d8] sm:$0xff] }
  0x5f   : > { %5875 = vst [vmem:[#allocation25_spill] sm:$0xff] %v5220_v62 }
  0x6c   : > { %1693 = vmatmul.bf16.vlgmr.msrb.gmra.mxu1 %v4905_v50  ;;  %2104 = vmatmul.bf16.vlgmr.msrb.gmra.mxu0 %v1004_v54  ;;  %v5142_v54 = vpack.c.bf16 %v4649_v38, %v4647_v37  ;;  %v4243_v37 = vld [vmem:[%s5808_s5 + $0x1a0] sm:$0xff] }
  0x6d   : > { %3674 = vmatmul.msk.bf16.vlgmr.msrb.gmra.mxu2 %vm5067_vm5, %v4963_v36  ;;  %3819 = vmatmul.msk.bf16.vlgmr.msrb.gmra.mxu3 %vm4718_vm3, %v3818_v35  ;;  %v5148_v35 = vpack.c.bf16 %v923_v61, %v924_v1  ;;  %v4251_v38 = vld [vmem:[%s5808_s5 + $0x1e0] sm:$0xff] }
  0x6e   : > { %5866 = vst [vmem:[#allocation16_spill] sm:$0xff] %v5142_v54 }
  0x6f   : > { %5867 = vst [vmem:[#allocation17_spill] sm:$0xff] %v5148_v35 }
  0x7c   : > { %1698 = vmatmul.bf16.gmra.mxu1 %v5000_v34  ;;  %2109 = vmatmul.bf16.gmra.mxu0 %v4905_v50  ;;  %v4244_v50 = vld [vmem:[%s5808_s5 + $0x1a8] sm:$0xff] }
  0x7d   : > { %3677 = vmatmul.msk.bf16.gmra.mxu2 %vm5067_vm5, %v5036_v8  ;;  %3823 = vmatmul.msk.bf16.gmra.mxu3 %vm4718_vm3, %v4697_v17  ;;  %v4252_v17 = vld [vmem:[%s5808_s5 + $0x1e8] sm:$0xff] }
  0x7e   : > { %2774 = vmatpush.bf16.msra.mxu2 %v4244_v50  ;;  %2863 = vmatpush.bf16.msra.mxu3 %v4252_v17  ;;  %v927_v50 = vsel %vm906_vm4, %v925_v6, %v926_v9  ;;  %v930_v6 = vsel %vm906_vm4, %v928_v22, %v929_v3 }
  0x7f   : > { %v5193_v1 = vpack.c.bf16 %v926_v9, %v927_v50 }
  0x81   : > { %5871 = vst [vmem:[#allocation21_spill] sm:$0xff] %v5193_v1 }
  0x82   : > { %2775 = vmatpush.bf16.msra.mxu2 %v4243_v37  ;;  %2864 = vmatpush.bf16.msra.mxu3 %v4251_v38 }
  0x86   : > { %2776 = vmatpush.bf16.msra.mxu2 %v4242_v11  ;;  %2865 = vmatpush.bf16.msra.mxu3 %v4250_v12  ;;  %v4258_v11 = vld [vmem:[%s5808_s5 + $0x218] sm:$0xff] }
  0x87   : > { %2954 = vmatpush.bf16.msra.mxu0 %v4258_v11  ;;  %v935_v11 = vrot.slane %v4654_v41, 1 }
  0x8c   : > { %1703 = vmatmul.bf16.gmra.mxu1 %v5052_v7  ;;  %2114 = vmatmul.bf16.gmra.mxu0 %v5000_v34 }
  0x8d   : > { %3680 = vmatmul.msk.bf16.gmra.mxu2 %vm5067_vm5, %v5072_v26  ;;  %3827 = vmatmul.msk.bf16.gmra.mxu3 %vm4718_vm3, %v4826_v55 }
  0x9c   : > { %1708 = vmatmul.bf16.gmra.mxu1 %v5091_v31  ;;  %2119 = vmatmul.bf16.gmra.mxu0 %v5052_v7 }
  0x9d   : > { %3683 = vmatmul.msk.bf16.gmra.mxu2 %vm5067_vm5, %v5099_v59  ;;  %3831 = vmatmul.msk.bf16.gmra.mxu3 %vm4718_vm3, %v4926_v29 }
  0xa9   : > { %v5144_v5 = vpop.f32.mrf.mxu0  ;;  %v5146_v10 = vpop.f32.mrf.mxu1 }
  0xac   : > { %1713 = vmatmul.bf16.gmra.mxu1 %v5142_v54  ;;  %2124 = vmatmul.bf16.gmra.mxu0 %v5091_v31 }
  0xad   : > { %3686 = vmatmul.msk.bf16.gmra.mxu2 %vm5067_vm5, %v5148_v35  ;;  %3835 = vmatmul.msk.bf16.gmra.mxu3 %vm4718_vm3, %v5025_v20 }
  0xb0   : > { %v5164_v32 = vpop.f32.mrf.mxu2  ;;  %v5166_v45 = vpop.f32.mrf.mxu3 }
  0xb1   : > { %5868 = vst [vmem:[#allocation18_spill] sm:$0xff] %v5166_v45  ;;  %v5168_v46 = vpop.f32.mrf.mxu0  ;;  %v5170_v33 = vpop.f32.mrf.mxu1  ;;  %v5226_v45 = vpack.c.bf16 %v929_v3, %v930_v6 }
  0xb3   : > { %5876 = vst [vmem:[#allocation26_spill] sm:$0xff] %v5226_v45 }
  0xb8   : > { %v5181_v17 = vpop.f32.mrf.mxu2  ;;  %v5183_v14 = vpop.f32.mrf.mxu3 }
  0xb9   : > { %5869 = vst [vmem:[#allocation19_spill] sm:$0xff] %v5183_v14  ;;  %v5189_v0 = vpop.f32.mrf.mxu0  ;;  %v5191_v61 = vpop.f32.mrf.mxu1 }
  0xbc   : > { %1718 = vmatmul.bf16.gmra.mxu1 %v5187_v4  ;;  %2129 = vmatmul.bf16.gmra.mxu0 %v5142_v54  ;;  %v5265_v54 = vpack.c.bf16 %v4983_v21, %v4975_v15 }
  0xbd   : > { %3689 = vmatmul.msk.bf16.gmra.mxu2 %vm5067_vm5, %v5193_v1  ;;  %3839 = vmatmul.msk.bf16.gmra.mxu3 %vm4718_vm3, %v4708_v23 }
  0xbe   : > { %5881 = vst [vmem:[#allocation31_spill] sm:$0xff] %v5265_v54 }
  0xc0   : > { %v5203_v49 = vpop.f32.mrf.mxu2  ;;  %v5205_v51 = vpop.f32.mrf.mxu3 }
  0xc1   : > { %5872 = vst [vmem:[#allocation22_spill] sm:$0xff] %v5205_v51  ;;  %v5207_v37 = vpop.f32.mrf.mxu0  ;;  %v5209_v38 = vpop.f32.mrf.mxu1 }
  0xc8   : > { %v5214_v9 = vpop.f32.mrf.mxu2  ;;  %v5216_v50 = vpop.f32.mrf.mxu3 }
  0xc9   : > { %5873 = vst [vmem:[#allocation23_spill] sm:$0xff] %v5214_v9  ;;  %v5222_v14 = vpop.f32.mrf.mxu0  ;;  %v5224_v51 = vpop.f32.mrf.mxu1 }
  0xca   : > { %5874 = vst [vmem:[#allocation24_spill] sm:$0xff] %v5216_v50 }
  0xcc   : > { %1723 = vmatmul.bf16.gmra.mxu1 %v5220_v62  ;;  %2134 = vmatmul.bf16.gmra.mxu0 %v5187_v4  ;;  %v932_v4 = vrot.slane %v4983_v21, 1 }
  0xcd   : > { %3692 = vmatmul.msk.bf16.gmra.mxu2 %vm5067_vm5, %v5226_v45  ;;  %3843 = vmatmul.msk.bf16.gmra.mxu3 %vm4718_vm3, %v4836_v63  ;;  %v931_v45 = vrot.slane %v4975_v15, 1  ;;  %v4210_v63 = vld [vmem:[%s5808_s5 + $0x98] sm:$0xff] }
  0xce   : > { %2189 = vmatpush.bf16.msra.mxu1 %v4210_v63 }
  0xcf   : > { %v933_v12 = vsel %vm906_vm4, %v931_v45, %v932_v4 }
  0xd0   : > { %v5242_v22 = vpop.f32.mrf.mxu2  ;;  %v5244_v3 = vpop.f32.mrf.mxu3 }
  0xd1   : > { %5877 = vst [vmem:[#allocation27_spill] sm:$0xff] %v5242_v22  ;;  %v5246_v6 = vpop.f32.mrf.mxu0  ;;  %v5248_v50 = vpop.f32.mrf.mxu1  ;;  %v5271_v22 = vpack.c.bf16 %v932_v4, %v933_v12  ;;  %v934_v4 = vrot.slane %v4651_v39, 1 }
  0xd2   : > { %5878 = vst [vmem:[#allocation28_spill] sm:$0xff] %v5244_v3 }
  0xd3   : > { %5882 = vst [vmem:[#allocation32_spill] sm:$0xff] %v5271_v22  ;;  %v936_v12 = vsel %vm906_vm4, %v934_v4, %v935_v11 }
  0xd8   : > { %v5259_v3 = vpop.f32.mrf.mxu2  ;;  %v5261_v1 = vpop.f32.mrf.mxu3 }
  0xd9   : > { %5879 = vst [vmem:[#allocation29_spill] sm:$0xff] %v5259_v3  ;;  %v5267_v23 = vpop.f32.mrf.mxu0  ;;  %v5269_v35 = vpop.f32.mrf.mxu1 }
  0xda   : > { %5880 = vst [vmem:[#allocation30_spill] sm:$0xff] %v5261_v1 }
  0xdc   : > { %1728 = vmatmul.bf16.gmra.mxu1 %v5265_v54  ;;  %2139 = vmatmul.bf16.gmra.mxu0 %v5220_v62  ;;  %v5298_v62 = vpack.c.bf16 %v4654_v41, %v4651_v39  ;;  %v4241_v39 = vld [vmem:[%s5808_s5 + $0x190] sm:$0xff] }
  0xdd   : > { %3695 = vmatmul.msk.bf16.gmra.mxu2 %vm5067_vm5, %v5271_v22  ;;  %3847 = vmatmul.msk.bf16.gmra.mxu3 %vm4718_vm3, %v4934_v44  ;;  %v4249_v41 = vld [vmem:[%s5808_s5 + $0x1d0] sm:$0xff] }
  0xde   : > { %2777 = vmatpush.bf16.msra.mxu2 %v4241_v39  ;;  %2866 = vmatpush.bf16.msra.mxu3 %v4249_v41  ;;  %v4257_v39 = vld [vmem:[%s5808_s5 + $0x210] sm:$0xff] }
  0xdf   : > { %2955 = vmatpush.bf16.msra.mxu0 %v4257_v39 }
  0xe0   : > { %v5281_v63 = vpop.f32.mrf.mxu2  ;;  %v5283_v15 = vpop.f32.mrf.mxu3 }
  0xe1   : > { %5883 = vst [vmem:[#allocation33_spill] sm:$0xff] %v5281_v63  ;;  %v5285_v21 = vpop.f32.mrf.mxu0  ;;  %v5287_v45 = vpop.f32.mrf.mxu1  ;;  %v5300_v63 = vpack.c.bf16 %v935_v11, %v936_v12 }
  0xe2   : > { %5884 = vst [vmem:[#allocation34_spill] sm:$0xff] %v5283_v15 }
  0xe3   : > { %5887 = vst [vmem:[#allocation37_spill] sm:$0xff] %v5300_v63 }
  0xe8   : > { %v5292_v1 = vpop.f32.mrf.mxu2  ;;  %v5294_v22 = vpop.f32.mrf.mxu3 }
  0xe9   : > { %5885 = vst [vmem:[#allocation35_spill] sm:$0xff] %v5292_v1  ;;  %v1694_v44 = vpop.f32.mrf.mxu1  ;;  %v2105_v15 = vpop.f32.mrf.mxu0  ;;  %v4209_v1 = vld [vmem:[%s5808_s5 + $0x90] sm:$0xff] }
  0xea   : > { %5886 = vst [vmem:[#allocation36_spill] sm:$0xff] %v5294_v22  ;;  %v1695_v3 = vadd.f32 %v1694_v44, %v5144_v5  ;;  %2190 = vmatpush.bf16.msra.mxu1 %v4209_v1 }
  0xec   : > { %1733 = vmatmul.bf16.gmra.mxu1 %v5298_v62  ;;  %2144 = vmatmul.bf16.gmra.mxu0 %v5265_v54  ;;  %v938_v54 = vrot.slane %v4762_v53, 1 }
  0xed   : > { %3698 = vmatmul.msk.bf16.gmra.mxu2 %vm5067_vm5, %v5300_v63  ;;  %3851 = vmatmul.msk.bf16.gmra.mxu3 %vm4718_vm3, %v5027_v40  ;;  %v937_v63 = vrot.slane %v4760_v52, 1 }
  0xef   : > { %v939_v41 = vsel %vm906_vm4, %v937_v63, %v938_v54  ;;  %v940_v63 = vrot.slane %v4871_v16, 1 }
  0xf0   : > { %v1783_v44 = vpop.f32.mrf.mxu2  ;;  %v2016_v5 = vpop.f32.mrf.mxu3  ;;  %v5333_v20 = vpack.c.bf16 %v938_v54, %v939_v41 }
  0xf1   : > { %v1784_v4 = vadd.f32 %v1783_v44, %v1695_v3  ;;  %v1696_v11 = vpop.f32.mrf.mxu1  ;;  %v2107_v12 = vpop.f32.mrf.mxu0 }
  0xf2   : > { %v1697_v22 = vadd.f32 %v1696_v11, %v5168_v46  ;;  %v5331_v11 = vpack.c.bf16 %v4762_v53, %v4760_v52 }
  0xf3   : > { %v2017_v40 = vadd.f32 %v2016_v5, %v1784_v4 }
  0xf5   : > { %v5326_v3 = vadd.f32 %v2105_v15, %v2017_v40  ;;  %v941_v15 = vrot.slane %v4873_v18, 1 }
  0xf8   : > { %v1785_v46 = vpop.f32.mrf.mxu2  ;;  %v2018_v44 = vpop.f32.mrf.mxu3 }
  0xf9   : > { %v1786_v5 = vadd.f32 %v1785_v46, %v1697_v22  ;;  %v1699_v4 = vpop.f32.mrf.mxu1  ;;  %v2110_v31 = vpop.f32.mrf.mxu0  ;;  %v942_v46 = vsel %vm906_vm4, %v940_v63, %v941_v15 }
  0xfa   : > { %v1700_v59 = vadd.f32 %v1699_v4, %v5189_v0 }
  0xfb   : > { %v2019_v9 = vadd.f32 %v2018_v44, %v1786_v5 }
  0xfc   : > { %1738 = vmatmul.bf16.gmra.mxu1 %v5331_v11  ;;  %2149 = vmatmul.bf16.gmra.mxu0 %v5298_v62 }
  0xfd   : > { %3701 = vmatmul.msk.bf16.gmra.mxu2 %vm5067_vm5, %v5333_v20  ;;  %3855 = vmatmul.msk.bf16.gmra.mxu3 %vm4718_vm3, %v4710_v24  ;;  %v5344_v52 = vadd.f32 %v2107_v12, %v2019_v9  ;;  %v5354_v9 = vpack.c.bf16 %v4873_v18, %v4871_v16  ;;  %v4240_v16 = vld [vmem:[%s5808_s5 + $0x188] sm:$0xff] }
  0xfe   : > { %v4248_v18 = vld [vmem:[%s5808_s5 + $0x1c8] sm:$0xff]  ;;  %2778 = vmatpush.bf16.msra.mxu2 %v4240_v16 }
  0xff   : > { %2867 = vmatpush.bf16.msra.mxu3 %v4248_v18 }
 0x100   : > { %v1788_v53 = vpop.f32.mrf.mxu2  ;;  %v2021_v40 = vpop.f32.mrf.mxu3 }
 0x101   : > { %v1789_v54 = vadd.f32 %v1788_v53, %v1700_v59  ;;  %v1701_v1 = vpop.f32.mrf.mxu1  ;;  %v2112_v0 = vpop.f32.mrf.mxu0  ;;  %v5356_v53 = vpack.c.bf16 %v941_v15, %v942_v46  ;;  %v944_v46 = vrot.slane %v4987_v30, 1 }
 0x102   : > { %v1702_v22 = vadd.f32 %v1701_v1, %v5207_v37 }
 0x103   : > { %v2022_v39 = vadd.f32 %v2021_v40, %v1789_v54 }
 0x105   : > { %v5349_v41 = vadd.f32 %v2110_v31, %v2022_v39  ;;  %v943_v39 = vrot.slane %v4985_v28, 1 }
 0x108   : > { %v1790_v44 = vpop.f32.mrf.mxu2  ;;  %v2023_v5 = vpop.f32.mrf.mxu3 }
 0x109   : > { %v1791_v59 = vadd.f32 %v1790_v44, %v1702_v22  ;;  %v1704_v12 = vpop.f32.mrf.mxu1  ;;  %v2115_v4 = vpop.f32.mrf.mxu0 }
 0x10a   : > { %v1705_v37 = vadd.f32 %v1704_v12, %v5222_v14  ;;  %v945_v12 = vsel %vm906_vm4, %v943_v39, %v944_v46 }
 0x10b   : > { %v2024_v1 = vadd.f32 %v2023_v5, %v1791_v59  ;;  %v4208_v5 = vld [vmem:[%s5808_s5 + $0x88] sm:$0xff] }
 0x10c   : > { %1743 = vmatmul.bf16.gmra.mxu1 %v5354_v9  ;;  %2154 = vmatmul.bf16.gmra.mxu0 %v5331_v11 }
 0x10d   : > { %3704 = vmatmul.msk.bf16.gmra.mxu2 %vm5067_vm5, %v5356_v53  ;;  %3859 = vmatmul.msk.bf16.gmra.mxu3 %vm4718_vm3, %v4841_v2  ;;  %v5373_v31 = vadd.f32 %v2112_v0, %v2024_v1  ;;  %v4256_v0 = vld [vmem:[%s5808_s5 + $0x208] sm:$0xff]  ;;  %v5389_v1 = vpack.c.bf16 %v4987_v30, %v4985_v28 }
 0x10e   : > { %2191 = vmatpush.bf16.msra.mxu1 %v4208_v5  ;;  %2956 = vmatpush.bf16.msra.mxu0 %v4256_v0  ;;  %v947_v5 = vrot.slane %v4658_v43, 1 }
 0x110   : > { %v1793_v14 = vpop.f32.mrf.mxu2  ;;  %v2026_v40 = vpop.f32.mrf.mxu3 }
 0x111   : > { %v1794_v54 = vadd.f32 %v1793_v14, %v1705_v37  ;;  %v1706_v22 = vpop.f32.mrf.mxu1  ;;  %v2117_v63 = vpop.f32.mrf.mxu0 }
 0x112   : > { %v1707_v15 = vadd.f32 %v1706_v22, %v5246_v6 }
 0x113   : > { %v2027_v44 = vadd.f32 %v2026_v40, %v1794_v54  ;;  %v5391_v40 = vpack.c.bf16 %v944_v46, %v945_v12 }
 0x115   : > { %v5384_v59 = vadd.f32 %v2115_v4, %v2027_v44  ;;  %v946_v44 = vrot.slane %v4656_v42, 1 }
 0x118   : > { %v1795_v6 = vpop.f32.mrf.mxu2  ;;  %v2028_v37 = vpop.f32.mrf.mxu3 }
 0x119   : > { %v1796_v16 = vadd.f32 %v1795_v6, %v1707_v15  ;;  %v1709_v18 = vpop.f32.mrf.mxu1  ;;  %v2120_v14 = vpop.f32.mrf.mxu0  ;;  %v948_v6 = vsel %vm906_vm4, %v946_v44, %v947_v5 }
 0x11a   : > { %v1710_v54 = vadd.f32 %v1709_v18, %v5267_v23 }
 0x11b   : > { %v2029_v22 = vadd.f32 %v2028_v37, %v1796_v16 }
 0x11c   : > { %1748 = vmatmul.bf16.gmra.mxu1 %v5389_v1  ;;  %2159 = vmatmul.bf16.gmra.mxu0 %v5354_v9 }
 0x11d   : > { %3707 = vmatmul.msk.bf16.gmra.mxu2 %vm5067_vm5, %v5391_v40  ;;  %3863 = vmatmul.msk.bf16.gmra.mxu3 %vm4718_vm3, %v4944_v60  ;;  %v5402_v28 = vadd.f32 %v2117_v63, %v2029_v22  ;;  %v5412_v63 = vpack.c.bf16 %v4658_v43, %v4656_v42  ;;  %v4239_v42 = vld [vmem:[%s5808_s5 + $0x180] sm:$0xff] }
 0x11e   : > { %v4247_v43 = vld [vmem:[%s5808_s5 + $0x1c0] sm:$0xff]  ;;  %2779 = vmatpush.bf16.msra.mxu2 %v4239_v42 }
 0x11f   : > { %2868 = vmatpush.bf16.msra.mxu3 %v4247_v43  ;;  %v5447_v43 = vpack.c.bf16 %v4768_v57, %v4766_v56 }
 0x120   : > { %v1798_v30 = vpop.f32.mrf.mxu2  ;;  %v2031_v4 = vpop.f32.mrf.mxu3 }
 0x121   : > { %v1799_v15 = vadd.f32 %v1798_v30, %v1710_v54  ;;  %v1711_v39 = vpop.f32.mrf.mxu1  ;;  %v2122_v23 = vpop.f32.mrf.mxu0  ;;  %v5414_v30 = vpack.c.bf16 %v947_v5, %v948_v6  ;;  %v950_v6 = vrot.slane %v4768_v57, 1 }
 0x122   : > { %v1712_v46 = vadd.f32 %v1711_v39, %v5285_v21 }
 0x123   : > { %v2032_v0 = vadd.f32 %v2031_v4, %v1799_v15 }
 0x125   : > { %v5407_v12 = vadd.f32 %v2120_v14, %v2032_v0  ;;  %v949_v0 = vrot.slane %v4766_v56, 1 }
 0x128   : > { %v1800_v37 = vpop.f32.mrf.mxu2  ;;  %v2033_v16 = vpop.f32.mrf.mxu3 }
 0x129   : > { %v1801_v18 = vadd.f32 %v1800_v37, %v1712_v46  ;;  %v1714_v54 = vpop.f32.mrf.mxu1  ;;  %v2125_v22 = vpop.f32.mrf.mxu0 }
 0x12a   : > { %v1715_v4 = vadd.f32 %v1714_v54, %v5146_v10  ;;  %v4255_v10 = vld [vmem:[%s5808_s5 + $0x200] sm:$0xff] }
 0x12b   : > { %v2034_v21 = vadd.f32 %v2033_v16, %v1801_v18  ;;  %v4207_v16 = vld [vmem:[%s5808_s5 + $0x80] sm:$0xff]  ;;  %2957 = vmatpush.bf16.msra.mxu0 %v4255_v10  ;;  %v951_v18 = vsel %vm906_vm4, %v949_v0, %v950_v6 }
 0x12c   : > { %1753 = vmatmul.bf16.gmra.mxu1 %v5412_v63  ;;  %2164 = vmatmul.bf16.gmra.mxu0 %v5389_v1 }
 0x12d   : > { %3710 = vmatmul.msk.bf16.gmra.mxu2 %vm5067_vm5, %v5414_v30  ;;  %3867 = vmatmul.msk.bf16.gmra.mxu3 %vm4718_vm3, %v5031_v58  ;;  %v5430_v14 = vadd.f32 %v2122_v23, %v2034_v21 }
 0x12e   : > { %2192 = vmatpush.bf16.msra.mxu1 %v4207_v16  ;;  %v5890_v16 = vld [vmem:[#allocation6_spill] sm:$0xff] }
 0x12f   : > { %5888 = vst [vmem:[#allocation38_spill] sm:$0xff] %v5430_v14  ;;  %v953_v10 = vrot.slane %v5890_v16, 1 }
 0x130   : > { %v1803_v15 = vpop.f32.mrf.mxu2  ;;  %v2036_v39 = vpop.f32.mrf.mxu3 }
 0x131   : > { %v1804_v46 = vadd.f32 %v1803_v15, %v1715_v4  ;;  %v1716_v44 = vpop.f32.mrf.mxu1  ;;  %v2127_v5 = vpop.f32.mrf.mxu0 }
 0x132   : > { %v1717_v54 = vadd.f32 %v1716_v44, %v5170_v33 }
 0x133   : > { %v2037_v37 = vadd.f32 %v2036_v39, %v1804_v46  ;;  %v5449_v46 = vpack.c.bf16 %v950_v6, %v951_v18 }
 0x135   : > { %v5441_v23 = vadd.f32 %v2125_v22, %v2037_v37  ;;  %v952_v37 = vrot.slane %v4875_v19, 1 }
 0x138   : > { %v1805_v21 = vpop.f32.mrf.mxu2  ;;  %v2038_v42 = vpop.f32.mrf.mxu3 }
 0x139   : > { %v1806_v4 = vadd.f32 %v1805_v21, %v1717_v54  ;;  %v1719_v15 = vpop.f32.mrf.mxu1  ;;  %v2130_v39 = vpop.f32.mrf.mxu0  ;;  %v954_v21 = vsel %vm906_vm4, %v952_v37, %v953_v10 }
 0x13a   : > { %v1720_v57 = vadd.f32 %v1719_v15, %v5191_v61  ;;  %v5470_v61 = vpack.c.bf16 %v5890_v16, %v4875_v19 }
 0x13b   : > { %v2039_v14 = vadd.f32 %v2038_v42, %v1806_v4 }
 0x13c   : > { %1758 = vmatmul.bf16.gmra.mxu1 %v5447_v43  ;;  %2169 = vmatmul.bf16.gmra.mxu0 %v5412_v63 }
 0x13d   : > { %3713 = vmatmul.msk.bf16.gmra.mxu2 %vm5067_vm5, %v5449_v46  ;;  %3871 = vmatmul.msk.bf16.gmra.mxu3 %vm4718_vm3, %v4712_v25  ;;  %v5459_v56 = vadd.f32 %v2127_v5, %v2039_v14 }
 0x13f   : > { %5889 = vst [vmem:[#allocation39_spill] sm:$0xff] %v5459_v56 }
 0x140   : > { %v1808_v33 = vpop.f32.mrf.mxu2  ;;  %v2041_v22 = vpop.f32.mrf.mxu3 }
 0x141   : > { %v1809_v44 = vadd.f32 %v1808_v33, %v1720_v57  ;;  %v1721_v0 = vpop.f32.mrf.mxu1  ;;  %v2132_v6 = vpop.f32.mrf.mxu0  ;;  %v5472_v33 = vpack.c.bf16 %v953_v10, %v954_v21  ;;  %v5895_v10 = vld [vmem:[#allocation9_spill] sm:$0xff]  ;;  %v5896_v21 = vld [vmem:[#allocation10_spill] sm:$0xff] }
 0x142   : > { %v1722_v42 = vadd.f32 %v1721_v0, %v5209_v38  ;;  %v5893_v38 = vld [vmem:[#allocation5_spill] sm:$0xff] }
 0x143   : > { %v2042_v18 = vadd.f32 %v2041_v22, %v1809_v44  ;;  %5892 = vst [vmem:[#allocation40_spill] sm:$0xff] %v5472_v33 }
 0x145   : > { %v5464_v54 = vadd.f32 %v2130_v39, %v2042_v18  ;;  %v1304_v18 = vrot.slane %v5895_v10, 1 }
 0x147   : > { %5891 = vst [vmem:[#allocation6_spill] sm:$0xff] %v5464_v54 }
 0x148   : > { %v1810_v14 = vpop.f32.mrf.mxu2  ;;  %v2043_v5 = vpop.f32.mrf.mxu3 }
 0x149   : > { %v1811_v4 = vadd.f32 %v1810_v14, %v1722_v42  ;;  %v1724_v15 = vpop.f32.mrf.mxu1  ;;  %v2135_v57 = vpop.f32.mrf.mxu0  ;;  %v1305_v42 = vrot.slane %v5896_v21, 1 }
 0x14a   : > { %v1725_v39 = vadd.f32 %v1724_v15, %v5224_v51  ;;  %v5493_v51 = vpack.c.bf16 %v5896_v21, %v5895_v10 }
 0x14b   : > { %v2044_v56 = vadd.f32 %v2043_v5, %v1811_v4  ;;  %v1306_v4 = vsel %vm906_vm4, %v1304_v18, %v1305_v42 }
 0x14c   : > { %1763 = vmatmul.bf16.gmra.mxu1 %v5470_v61  ;;  %2174 = vmatmul.bf16.gmra.mxu0 %v5447_v43 }
 0x14d   : > { %3716 = vmatmul.msk.bf16.gmra.mxu2 %vm5067_vm5, %v5472_v33  ;;  %3875 = vmatmul.msk.bf16.gmra.mxu3 %vm4718_vm3, %v5893_v38  ;;  %v5482_v19 = vadd.f32 %v2132_v6, %v2044_v56 }
 0x14f   : > { %5894 = vst [vmem:[#allocation5_spill] sm:$0xff] %v5482_v19  ;;  %v5495_v19 = vpack.c.bf16 %v1305_v42, %v1306_v4  ;;  %v908_v42 = vrot.slane %v5056_v48, 1 }
 0x150   : > { %v1813_v22 = vpop.f32.mrf.mxu2  ;;  %v2046_v44 = vpop.f32.mrf.mxu3 }
 0x151   : > { %v1814_v0 = vadd.f32 %v1813_v22, %v1725_v39  ;;  %v1726_v37 = vpop.f32.mrf.mxu1  ;;  %v2137_v16 = vpop.f32.mrf.mxu0 }
 0x152   : > { %v1727_v54 = vadd.f32 %v1726_v37, %v5248_v50  ;;  %v5898_v50 = vld [vmem:[#allocation8_spill] sm:$0xff]  ;;  %v907_v37 = vrot.slane %v5054_v47, 1 }
 0x153   : > { %v2047_v14 = vadd.f32 %v2046_v44, %v1814_v0 }
 0x154   : > { %v909_v4 = vsel %vm906_vm4, %v907_v37, %v908_v42 }
 0x155   : > { %v5487_v5 = vadd.f32 %v2135_v57, %v2047_v14 }
 0x157   : > { %5897 = vst [vmem:[#allocation9_spill] sm:$0xff] %v5487_v5 }
 0x158   : > { %v1815_v56 = vpop.f32.mrf.mxu2  ;;  %v2048_v6 = vpop.f32.mrf.mxu3 }
 0x159   : > { %v1816_v15 = vadd.f32 %v1815_v56, %v1727_v54  ;;  %v1729_v39 = vpop.f32.mrf.mxu1  ;;  %v2140_v22 = vpop.f32.mrf.mxu0 }
 0x15a   : > { %v1730_v54 = vadd.f32 %v1729_v39, %v5269_v35 }
 0x15b   : > { %v2049_v33 = vadd.f32 %v2048_v6, %v1816_v15  ;;  %v3881_v15 = vpack.c.bf16 %v908_v42, %v909_v4 }
 0x15c   : > { %1768 = vmatmul.bf16.gmra.mxu1 %v5493_v51  ;;  %2179 = vmatmul.bf16.gmra.mxu0 %v5470_v61 }
 0x15d   : > { %3719 = vmatmul.msk.bf16.gmra.mxu2 %vm5067_vm5, %v5495_v19  ;;  %3879 = vmatmul.msk.bf16.gmra.mxu3 %vm4718_vm3, %v5898_v50  ;;  %v5505_v57 = vadd.f32 %v2137_v16, %v2049_v33 }
 0x15f   : > { %5899 = vst [vmem:[#allocation10_spill] sm:$0xff] %v5505_v57 }
 0x160   : > { %v1818_v44 = vpop.f32.mrf.mxu2  ;;  %v2051_v0 = vpop.f32.mrf.mxu3 }
 0x161   : > { %v1819_v10 = vadd.f32 %v1818_v44, %v1730_v54  ;;  %v1731_v18 = vpop.f32.mrf.mxu1  ;;  %v2142_v21 = vpop.f32.mrf.mxu0 }
 0x162   : > { %v1732_v6 = vadd.f32 %v1731_v18, %v5287_v45 }
 0x163   : > { %v2052_v14 = vadd.f32 %v2051_v0, %v1819_v10 }
 0x165   : > { %v5511_v56 = vadd.f32 %v2140_v22, %v2052_v14 }
 0x168   : > { %v1820_v33 = vpop.f32.mrf.mxu2  ;;  %v2053_v16 = vpop.f32.mrf.mxu3 }
 0x169   : > { %v1821_v35 = vadd.f32 %v1820_v33, %v1732_v6  ;;  %v1734_v39 = vpop.f32.mrf.mxu1  ;;  %v2145_v57 = vpop.f32.mrf.mxu0 }
 0x16a   : > { %v1735_v48 = vadd.f32 %v1734_v39, %v5164_v32 }
 0x16b   : > { %v2054_v5 = vadd.f32 %v2053_v16, %v1821_v35  ;;  %v5900_v35 = vld [vmem:[#allocation23_spill] sm:$0xff] }
 0x16c   : > { %3882 = vmatmul.msk.bf16.vlgmr.msra.gmra.mxu1 %vm5067_vm5, %v3881_v15  ;;  %4138 = vmatmul.msk.bf16.vlgmr.msra.gmra.mxu0 %vm5067_vm5, %v5036_v8 }
 0x16d   : > { %4075 = vmatmul.msk.bf16.vlgmr.msra.gmra.mxu2 %vm4718_vm3, %v4826_v55  ;;  %2869 = vmatmul.bf16.vlgmr.msra.gmra.mxu3 %v5000_v34  ;;  %v5523_v47 = vadd.f32 %v2142_v21, %v2054_v5 }
 0x170   : > { %v1823_v45 = vpop.f32.mrf.mxu2  ;;  %v2056_v22 = vpop.f32.mrf.mxu3 }
 0x171   : > { %v1824_v54 = vadd.f32 %v1823_v45, %v1735_v48  ;;  %v1736_v44 = vpop.f32.mrf.mxu1  ;;  %v2147_v0 = vpop.f32.mrf.mxu0 }
 0x172   : > { %v1737_v18 = vadd.f32 %v1736_v44, %v5181_v17  ;;  %v5902_v44 = vld [vmem:[#allocation11_spill] sm:$0xff] }
 0x173   : > { %v2057_v37 = vadd.f32 %v2056_v22, %v1824_v54 }
 0x175   : > { %v5526_v10 = vadd.f32 %v2145_v57, %v2057_v37 }
 0x178   : > { %v1825_v42 = vpop.f32.mrf.mxu2  ;;  %v2058_v14 = vpop.f32.mrf.mxu3 }
 0x179   : > { %v1826_v4 = vadd.f32 %v1825_v42, %v1737_v18  ;;  %v1739_v55 = vpop.f32.mrf.mxu1  ;;  %v2150_v6 = vpop.f32.mrf.mxu0  ;;  %v5904_v18 = vld [vmem:[#allocation27_spill] sm:$0xff] }
 0x17a   : > { %v1740_v17 = vadd.f32 %v1739_v55, %v5203_v49  ;;  %v5901_v49 = vld [vmem:[#allocation15_spill] sm:$0xff] }
 0x17b   : > { %v2059_v34 = vadd.f32 %v2058_v14, %v1826_v4 }
 0x17c   : > { %3885 = vmatmul.msk.bf16.gmra.mxu1 %vm5067_vm5, %v4963_v36  ;;  %4141 = vmatmul.msk.bf16.gmra.mxu0 %vm5067_vm5, %v5072_v26 }
 0x17d   : > { %4079 = vmatmul.msk.bf16.gmra.mxu2 %vm4718_vm3, %v4926_v29  ;;  %2874 = vmatmul.bf16.gmra.mxu3 %v5052_v7  ;;  %v5539_v32 = vadd.f32 %v2147_v0, %v2059_v34  ;;  %v5903_v0 = vld [vmem:[#allocation14_spill] sm:$0xff] }
 0x180   : > { %v1828_v5 = vpop.f32.mrf.mxu2  ;;  %v2061_v57 = vpop.f32.mrf.mxu3 }
 0x181   : > { %v1829_v21 = vadd.f32 %v1828_v5, %v1740_v17  ;;  %v1741_v33 = vpop.f32.mrf.mxu1  ;;  %v2152_v16 = vpop.f32.mrf.mxu0  ;;  %v5905_v5 = vld [vmem:[#allocation29_spill] sm:$0xff] }
 0x182   : > { %v1742_v39 = vadd.f32 %v1741_v33, %v5900_v35 }
 0x183   : > { %v2062_v36 = vadd.f32 %v2061_v57, %v1829_v21 }
 0x185   : > { %v5542_v15 = vadd.f32 %v2150_v6, %v2062_v36 }
 0x188   : > { %v1830_v48 = vpop.f32.mrf.mxu2  ;;  %v2063_v45 = vpop.f32.mrf.mxu3 }
 0x189   : > { %v1831_v22 = vadd.f32 %v1830_v48, %v1742_v39  ;;  %v1744_v29 = vpop.f32.mrf.mxu1  ;;  %v2155_v54 = vpop.f32.mrf.mxu0 }
 0x18a   : > { %v1745_v42 = vadd.f32 %v1744_v29, %v5904_v18 }
 0x18b   : > { %v2064_v7 = vadd.f32 %v2063_v45, %v1831_v22  ;;  %v5907_v45 = vld [vmem:[#allocation3_spill] sm:$0xff]  ;;  %v5908_v22 = vld [vmem:[#allocation16_spill] sm:$0xff] }
 0x18c   : > { %3888 = vmatmul.msk.bf16.gmra.mxu1 %vm5067_vm5, %v5036_v8  ;;  %4144 = vmatmul.msk.bf16.gmra.mxu0 %vm5067_vm5, %v5901_v49 }
 0x18d   : > { %4083 = vmatmul.msk.bf16.gmra.mxu2 %vm4718_vm3, %v5902_v44  ;;  %2879 = vmatmul.bf16.gmra.mxu3 %v5903_v0  ;;  %v5555_v37 = vadd.f32 %v2152_v16, %v2064_v7  ;;  %v5906_v16 = vld [vmem:[#allocation17_spill] sm:$0xff] }
 0x190   : > { %v1833_v14 = vpop.f32.mrf.mxu2  ;;  %v2066_v4 = vpop.f32.mrf.mxu3 }
 0x191   : > { %v1834_v55 = vadd.f32 %v1833_v14, %v1745_v42  ;;  %v1746_v6 = vpop.f32.mrf.mxu1  ;;  %v2157_v34 = vpop.f32.mrf.mxu0 }
 0x192   : > { %v1747_v57 = vadd.f32 %v1746_v6, %v5905_v5 }
 0x193   : > { %v2067_v8 = vadd.f32 %v2066_v4, %v1834_v55  ;;  %v5910_v55 = vld [vmem:[#allocation35_spill] sm:$0xff] }
 0x195   : > { %v5558_v17 = vadd.f32 %v2155_v54, %v2067_v8  ;;  %v5909_v54 = vld [vmem:[#allocation33_spill] sm:$0xff] }
 0x198   : > { %v1835_v21 = vpop.f32.mrf.mxu2  ;;  %v2068_v33 = vpop.f32.mrf.mxu3 }
 0x199   : > { %v1836_v36 = vadd.f32 %v1835_v21, %v1747_v57  ;;  %v1749_v35 = vpop.f32.mrf.mxu1  ;;  %v2160_v39 = vpop.f32.mrf.mxu0 }
 0x19a   : > { %v1750_v7 = vadd.f32 %v1749_v35, %v5909_v54  ;;  %v5912_v35 = vld [vmem:[#allocation4_spill] sm:$0xff] }
 0x19b   : > { %v2069_v48 = vadd.f32 %v2068_v33, %v1836_v36 }
 0x19c   : > { %3891 = vmatmul.msk.bf16.gmra.mxu1 %vm5067_vm5, %v5072_v26  ;;  %4147 = vmatmul.msk.bf16.gmra.mxu0 %vm5067_vm5, %v5906_v16 }
 0x19d   : > { %4087 = vmatmul.msk.bf16.gmra.mxu2 %vm4718_vm3, %v5907_v45  ;;  %2884 = vmatmul.bf16.gmra.mxu3 %v5908_v22  ;;  %v5571_v29 = vadd.f32 %v2157_v34, %v2069_v48  ;;  %v5911_v34 = vld [vmem:[#allocation21_spill] sm:$0xff]  ;;  %v5915_v45 = vld [vmem:[#allocation18_spill] sm:$0xff] }
 0x1a0   : > { %v1838_v44 = vpop.f32.mrf.mxu2  ;;  %v2071_v0 = vpop.f32.mrf.mxu3 }
 0x1a1   : > { %v1839_v18 = vadd.f32 %v1838_v44, %v1750_v7  ;;  %v1751_v42 = vpop.f32.mrf.mxu1  ;;  %v2162_v14 = vpop.f32.mrf.mxu0 }
 0x1a2   : > { %v1752_v6 = vadd.f32 %v1751_v42, %v5910_v55 }
 0x1a3   : > { %v2072_v26 = vadd.f32 %v2071_v0, %v1839_v18 }
 0x1a5   : > { %v5574_v4 = vadd.f32 %v2160_v39, %v2072_v26  ;;  %v5913_v39 = vld [vmem:[#allocation20_spill] sm:$0xff]  ;;  %v5917_v26 = vld [vmem:[#allocation19_spill] sm:$0xff] }
 0x1a8   : > { %v1840_v8 = vpop.f32.mrf.mxu2  ;;  %v2073_v5 = vpop.f32.mrf.mxu3 }
 0x1a9   : > { %v1841_v57 = vadd.f32 %v1840_v8, %v1752_v6  ;;  %v1754_v21 = vpop.f32.mrf.mxu1  ;;  %v2165_v33 = vpop.f32.mrf.mxu0 }
 0x1aa   : > { %v1755_v22 = vadd.f32 %v1754_v21, %v5915_v45  ;;  %v5919_v21 = vld [vmem:[#allocation7_spill] sm:$0xff]  ;;  %v5922_v45 = vld [vmem:[#allocation22_spill] sm:$0xff] }
 0x1ab   : > { %v2074_v36 = vadd.f32 %v2073_v5, %v1841_v57 }
 0x1ac   : > { %3894 = vmatmul.msk.bf16.gmra.mxu1 %vm5067_vm5, %v5901_v49  ;;  %4150 = vmatmul.msk.bf16.gmra.mxu0 %vm5067_vm5, %v5911_v34 }
 0x1ad   : > { %4091 = vmatmul.msk.bf16.gmra.mxu2 %vm4718_vm3, %v5912_v35  ;;  %2889 = vmatmul.bf16.gmra.mxu3 %v5913_v39  ;;  %v5587_v48 = vadd.f32 %v2162_v14, %v2074_v36  ;;  %v5918_v14 = vld [vmem:[#allocation26_spill] sm:$0xff] }
 0x1af   : > { %5914 = vst [vmem:[#allocation8_spill] sm:$0xff] %v5587_v48 }
 0x1b0   : > { %v1843_v54 = vpop.f32.mrf.mxu2  ;;  %v2076_v7 = vpop.f32.mrf.mxu3 }
 0x1b1   : > { %v1844_v44 = vadd.f32 %v1843_v54, %v1755_v22  ;;  %v1756_v0 = vpop.f32.mrf.mxu1  ;;  %v2167_v18 = vpop.f32.mrf.mxu0 }
 0x1b2   : > { %v1757_v55 = vadd.f32 %v1756_v0, %v5917_v26 }
 0x1b3   : > { %v2077_v49 = vadd.f32 %v2076_v7, %v1844_v44 }
 0x1b5   : > { %v5590_v42 = vadd.f32 %v2165_v33, %v2077_v49  ;;  %v5920_v33 = vld [vmem:[#allocation25_spill] sm:$0xff] }
 0x1b7   : > { %5916 = vst [vmem:[#allocation23_spill] sm:$0xff] %v5590_v42 }
 0x1b8   : > { %v1845_v6 = vpop.f32.mrf.mxu2  ;;  %v2078_v8 = vpop.f32.mrf.mxu3 }
 0x1b9   : > { %v1846_v5 = vadd.f32 %v1845_v6, %v1757_v55  ;;  %v1759_v57 = vpop.f32.mrf.mxu1  ;;  %v2170_v35 = vpop.f32.mrf.mxu0  ;;  %v5924_v55 = vld [vmem:[#allocation24_spill] sm:$0xff] }
 0x1ba   : > { %v1760_v22 = vadd.f32 %v1759_v57, %v5922_v45  ;;  %v5926_v57 = vld [vmem:[#allocation12_spill] sm:$0xff] }
 0x1bb   : > { %v2079_v39 = vadd.f32 %v2078_v8, %v1846_v5  ;;  %v5928_v45 = vld [vmem:[#allocation28_spill] sm:$0xff] }
 0x1bc   : > { %3897 = vmatmul.msk.bf16.gmra.mxu1 %vm5067_vm5, %v5906_v16  ;;  %4153 = vmatmul.msk.bf16.gmra.mxu0 %vm5067_vm5, %v5918_v14 }
 0x1bd   : > { %4095 = vmatmul.msk.bf16.gmra.mxu2 %vm4718_vm3, %v5919_v21  ;;  %2894 = vmatmul.bf16.gmra.mxu3 %v5920_v33  ;;  %v5603_v36 = vadd.f32 %v2167_v18, %v2079_v39  ;;  %v5925_v18 = vld [vmem:[#allocation32_spill] sm:$0xff] }
 0x1bf   : > { %5921 = vst [vmem:[#allocation15_spill] sm:$0xff] %v5603_v36 }
 0x1c0   : > { %v1848_v54 = vpop.f32.mrf.mxu2  ;;  %v2081_v7 = vpop.f32.mrf.mxu3 }
 0x1c1   : > { %v1849_v44 = vadd.f32 %v1848_v54, %v1760_v22  ;;  %v1761_v0 = vpop.f32.mrf.mxu1  ;;  %v2172_v49 = vpop.f32.mrf.mxu0 }
 0x1c2   : > { %v1762_v6 = vadd.f32 %v1761_v0, %v5924_v55  ;;  %v5929_v55 = vld [vmem:[#allocation30_spill] sm:$0xff] }
 0x1c3   : > { %v2082_v16 = vadd.f32 %v2081_v7, %v1849_v44 }
 0x1c5   : > { %v5606_v26 = vadd.f32 %v2170_v35, %v2082_v16  ;;  %v5927_v35 = vld [vmem:[#allocation31_spill] sm:$0xff] }
 0x1c7   : > { %5923 = vst [vmem:[#allocation11_spill] sm:$0xff] %v5606_v26 }
 0x1c8   : > { %v1850_v8 = vpop.f32.mrf.mxu2  ;;  %v2083_v5 = vpop.f32.mrf.mxu3 }
 0x1c9   : > { %v1851_v42 = vadd.f32 %v1850_v8, %v1762_v6  ;;  %v1764_v21 = vpop.f32.mrf.mxu1  ;;  %v2175_v48 = vpop.f32.mrf.mxu0 }
 0x1ca   : > { %v1765_v22 = vadd.f32 %v1764_v21, %v5928_v45  ;;  %v5931_v21 = vld [vmem:[#allocation34_spill] sm:$0xff] }
 0x1cb   : > { %v2084_v33 = vadd.f32 %v2083_v5, %v1851_v42 }
 0x1cc   : > { %3900 = vmatmul.msk.bf16.gmra.mxu1 %vm5067_vm5, %v5911_v34  ;;  %4156 = vmatmul.msk.bf16.gmra.mxu0 %vm5067_vm5, %v5925_v18 }
 0x1cd   : > { %4099 = vmatmul.msk.bf16.gmra.mxu2 %vm4718_vm3, %v5926_v57  ;;  %2899 = vmatmul.bf16.gmra.mxu3 %v5927_v35  ;;  %v5619_v39 = vadd.f32 %v2172_v49, %v2084_v33  ;;  %v5930_v49 = vld [vmem:[#allocation37_spill] sm:$0xff] }
 0x1d0   : > { %v1853_v54 = vpop.f32.mrf.mxu2  ;;  %v2086_v42 = vpop.f32.mrf.mxu3 }
 0x1d1   : > { %v1854_v7 = vadd.f32 %v1853_v54, %v1765_v22  ;;  %v1766_v44 = vpop.f32.mrf.mxu1  ;;  %v2177_v0 = vpop.f32.mrf.mxu0 }
 0x1d2   : > { %v1767_v6 = vadd.f32 %v1766_v44, %v5929_v55  ;;  %v5932_v44 = vld [vmem:[#allocation36_spill] sm:$0xff] }
 0x1d3   : > { %v2087_v34 = vadd.f32 %v2086_v42, %v1854_v7 }
 0x1d5   : > { %v5622_v16 = vadd.f32 %v2175_v48, %v2087_v34 }
 0x1d8   : > { %v1855_v8 = vpop.f32.mrf.mxu2  ;;  %v2088_v5 = vpop.f32.mrf.mxu3 }
 0x1d9   : > { %v1856_v26 = vadd.f32 %v1855_v8, %v1767_v6  ;;  %v1769_v57 = vpop.f32.mrf.mxu1  ;;  %v2180_v36 = vpop.f32.mrf.mxu0 }
 0x1da   : > { %v1770_v33 = vadd.f32 %v1769_v57, %v5931_v21 }
 0x1db   : > { %v2089_v35 = vadd.f32 %v2088_v5, %v1856_v26 }
 0x1dc   : > { %3903 = vmatmul.msk.bf16.gmra.mxu1 %vm5067_vm5, %v5918_v14  ;;  %4159 = vmatmul.msk.bf16.gmra.mxu0 %vm5067_vm5, %v5930_v49 }
 0x1dd   : > { %4103 = vmatmul.msk.bf16.gmra.mxu2 %vm4718_vm3, %v4710_v24  ;;  %2904 = vmatmul.bf16.gmra.mxu3 %v5298_v62  ;;  %v5635_v48 = vadd.f32 %v2177_v0, %v2089_v35 }
 0x1e0   : > { %v1858_v45 = vpop.f32.mrf.mxu2  ;;  %v2091_v26 = vpop.f32.mrf.mxu3 }
 0x1e1   : > { %v1859_v22 = vadd.f32 %v1858_v45, %v1770_v33  ;;  %v1771_v54 = vpop.f32.mrf.mxu1  ;;  %v2182_v42 = vpop.f32.mrf.mxu0 }
 0x1e2   : > { %v1772_v34 = vadd.f32 %v1771_v54, %v5932_v44 }
 0x1e3   : > { %v2092_v14 = vadd.f32 %v2091_v26, %v1859_v22 }
 0x1e5   : > { %v5638_v7 = vadd.f32 %v2180_v36, %v2092_v14 }
 0x1e8   : > { %v1860_v55 = vpop.f32.mrf.mxu2  ;;  %v2093_v6 = vpop.f32.mrf.mxu3 }
 0x1e9   : > { %v1861_v8 = vadd.f32 %v1860_v55, %v1772_v34  ;;  %v2194_v24 = vpop.f32.mrf.mxu1  ;;  %v2959_v5 = vpop.f32.mrf.mxu0 }
 0x1ea   : > { %v2195_v22 = vadd.f32 %v2194_v24, %v5326_v3 }
 0x1eb   : > { %v2094_v62 = vadd.f32 %v2093_v6, %v1861_v8 }
 0x1ec   : > { %3906 = vmatmul.msk.bf16.gmra.mxu1 %vm5067_vm5, %v5925_v18  ;;  %4162 = vmatmul.msk.bf16.gmra.mxu0 %vm5067_vm5, %v5333_v20 }
 0x1ed   : > { %4107 = vmatmul.msk.bf16.gmra.mxu2 %vm4718_vm3, %v4841_v2  ;;  %2909 = vmatmul.bf16.gmra.mxu3 %v5331_v11  ;;  %v5651_v36 = vadd.f32 %v2182_v42, %v2094_v62 }
 0x1f0   : > { %v2781_v0 = vpop.f32.mrf.mxu2  ;;  %v2870_v57 = vpop.f32.mrf.mxu3 }
 0x1f1   : > { %v2196_v35 = vpop.f32.mrf.mxu1  ;;  %v2961_v21 = vpop.f32.mrf.mxu0  ;;  %v2871_v33 = vadd.f32 %v2870_v57, %v2781_v0 }
 0x1f2   : > { %v2197_v2 = vadd.f32 %v2196_v35, %v5344_v52 }
 0x1f3   : > { %v2960_v45 = vadd.f32 %v2959_v5, %v2871_v33 }
 0x1f5   : > { %v3039_v34 = vadd.f32 %v2960_v45, %v2195_v22 }
 0x1f7   : > { %v3173_v3 = vmul.f32 %v3039_v34, %v3039_v34 }
 0x1f8   : > { %v2783_v18 = vpop.f32.mrf.mxu2  ;;  %v2872_v26 = vpop.f32.mrf.mxu3 }
 0x1f9   : > { %v2873_v54 = vadd.f32 %v2872_v26, %v2783_v18  ;;  %v2199_v14 = vpop.f32.mrf.mxu1  ;;  %v2964_v44 = vpop.f32.mrf.mxu0 }
 0x1fb   : > { %v2962_v11 = vadd.f32 %v2961_v21, %v2873_v54 }
 0x1fc   : > { %3909 = vmatmul.msk.bf16.gmra.mxu1 %vm5067_vm5, %v5930_v49  ;;  %4165 = vmatmul.msk.bf16.gmra.mxu0 %vm5067_vm5, %v5356_v53 }
 0x1fd   : > { %v3040_v42 = vadd.f32 %v2962_v11, %v2197_v2  ;;  %4111 = vmatmul.msk.bf16.gmra.mxu2 %vm4718_vm3, %v4944_v60  ;;  %2914 = vmatmul.bf16.gmra.mxu3 %v5354_v9  ;;  %v2200_v60 = vadd.f32 %v2199_v14, %v5349_v41 }
 0x1ff   : > { %v4338_v52 = vpack.c.bf16 %v3040_v42, %v3039_v34  ;;  %v3135_v49 = vadd.f32 %v3040_v42, %v3039_v34  ;;  %v3174_v55 = vmul.f32 %v3040_v42, %v3040_v42 }
 0x200   : > { %v2786_v6 = vpop.f32.mrf.mxu2  ;;  %v2875_v8 = vpop.f32.mrf.mxu3 }
 0x201   : > { %4339 = vst [vmem:[%s5669_s16] sm:$0xff] %v4338_v52   ;;  %v3205_v24 = vadd.f32 %v3174_v55, %v3173_v3  ;;  %v2876_v5 = vadd.f32 %v2875_v8, %v2786_v6  ;;  %v2201_v62 = vpop.f32.mrf.mxu1  ;;  %v2966_v0 = vpop.f32.mrf.mxu0 }
 0x202   : > { %v2202_v34 = vadd.f32 %v2201_v62, %v5373_v31 }
 0x203   : > { %v2965_v9 = vadd.f32 %v2964_v44, %v2876_v5 }
 0x205   : > { %v3041_v57 = vadd.f32 %v2965_v9, %v2200_v60 }
 0x207   : > { %v3136_v35 = vadd.f32 %v3135_v49, %v3041_v57  ;;  %v3175_v21 = vmul.f32 %v3041_v57, %v3041_v57 }
 0x208   : > { %v2788_v33 = vpop.f32.mrf.mxu2  ;;  %v2877_v45 = vpop.f32.mrf.mxu3 }
 0x209   : > { %v3206_v18 = vadd.f32 %v3205_v24, %v3175_v21  ;;  %v2878_v26 = vadd.f32 %v2877_v45, %v2788_v33  ;;  %v2204_v22 = vpop.f32.mrf.mxu1  ;;  %v2969_v54 = vpop.f32.mrf.mxu0 }
 0x20a   : > { %v2205_v55 = vadd.f32 %v2204_v22, %v5384_v59 }
 0x20b   : > { %v2967_v2 = vadd.f32 %v2966_v0, %v2878_v26 }
 0x20c   : > { %3912 = vmatmul.msk.bf16.gmra.mxu1 %vm5067_vm5, %v5333_v20  ;;  %4168 = vmatmul.msk.bf16.gmra.mxu0 %vm5067_vm5, %v5391_v40 }
 0x20d   : > { %v3042_v41 = vadd.f32 %v2967_v2, %v2202_v34  ;;  %4115 = vmatmul.msk.bf16.gmra.mxu2 %vm4718_vm3, %v5031_v58  ;;  %2919 = vmatmul.bf16.gmra.mxu3 %v5389_v1 }
 0x20f   : > { %v4343_v14 = vpack.c.bf16 %v3042_v41, %v3041_v57  ;;  %v3137_v44 = vadd.f32 %v3136_v35, %v3042_v41  ;;  %v3176_v11 = vmul.f32 %v3042_v41, %v3042_v41 }
 0x210   : > { %v2791_v31 = vpop.f32.mrf.mxu2  ;;  %v2880_v42 = vpop.f32.mrf.mxu3 }
 0x211   : > { %4431 = vst [vmem:[%s5669_s16 + $0x8] sm:$0xff] %v4343_v14   ;;  %v3207_v3 = vadd.f32 %v3206_v18, %v3176_v11  ;;  %v2881_v52 = vadd.f32 %v2880_v42, %v2791_v31  ;;  %v2206_v20 = vpop.f32.mrf.mxu1  ;;  %v2971_v49 = vpop.f32.mrf.mxu0 }
 0x212   : > { %v2207_v57 = vadd.f32 %v2206_v20, %v5402_v28 }
 0x213   : > { %v2970_v6 = vadd.f32 %v2969_v54, %v2881_v52  ;;  %v5933_v52 = vld [vmem:[#allocation38_spill] sm:$0xff] }
 0x215   : > { %v3043_v8 = vadd.f32 %v2970_v6, %v2205_v55 }
 0x217   : > { %v3138_v24 = vadd.f32 %v3137_v44, %v3043_v8  ;;  %v3177_v5 = vmul.f32 %v3043_v8, %v3043_v8 }
 0x218   : > { %v2793_v62 = vpop.f32.mrf.mxu2  ;;  %v2882_v58 = vpop.f32.mrf.mxu3 }
 0x219   : > { %v3208_v0 = vadd.f32 %v3207_v3, %v3177_v5  ;;  %v2883_v1 = vadd.f32 %v2882_v58, %v2793_v62  ;;  %v2209_v60 = vpop.f32.mrf.mxu1  ;;  %v2974_v9 = vpop.f32.mrf.mxu0 }
 0x21a   : > { %v2210_v34 = vadd.f32 %v2209_v60, %v5407_v12 }
 0x21b   : > { %v2972_v35 = vadd.f32 %v2971_v49, %v2883_v1 }
 0x21c   : > { %3915 = vmatmul.msk.bf16.gmra.mxu1 %vm5067_vm5, %v5356_v53  ;;  %4171 = vmatmul.msk.bf16.gmra.mxu0 %vm5067_vm5, %v5414_v30 }
 0x21d   : > { %v3044_v59 = vadd.f32 %v2972_v35, %v2207_v57  ;;  %4119 = vmatmul.msk.bf16.gmra.mxu2 %vm4718_vm3, %v4712_v25  ;;  %2924 = vmatmul.bf16.gmra.mxu3 %v5412_v63 }
 0x21f   : > { %v4348_v21 = vpack.c.bf16 %v3044_v59, %v3043_v8  ;;  %v3139_v33 = vadd.f32 %v3138_v24, %v3044_v59  ;;  %v3178_v45 = vmul.f32 %v3044_v59, %v3044_v59 }
 0x220   : > { %v2796_v28 = vpop.f32.mrf.mxu2  ;;  %v2885_v18 = vpop.f32.mrf.mxu3 }
 0x221   : > { %4432 = vst [vmem:[%s5669_s16 + $0x10] sm:$0xff] %v4348_v21   ;;  %v3209_v26 = vadd.f32 %v3208_v0, %v3178_v45  ;;  %v2886_v22 = vadd.f32 %v2885_v18, %v2796_v28  ;;  %v2211_v53 = vpop.f32.mrf.mxu1  ;;  %v2976_v54 = vpop.f32.mrf.mxu0  ;;  %v4332_v28 = vld [vmem:[%s479_s18] sm:$0xff]  }
 0x222   : > { %v2212_v20 = vadd.f32 %v2211_v53, %v5933_v52  ;;  %v5934_v18 = vld [vmem:[#allocation39_spill] sm:$0xff]  ;;  %v5936_v52 = vld [vmem:[#allocation6_spill] sm:$0xff] }
 0x223   : > { %v2975_v2 = vadd.f32 %v2974_v9, %v2886_v22  ;;  %v5935_v22 = vld [vmem:[#allocation40_spill] sm:$0xff] }
 0x225   : > { %v3045_v41 = vadd.f32 %v2975_v2, %v2210_v34  ;;  %v4334_v34 = vunpack.c.h.bf16 %v4332_v28 }
 0x227   : > { %v3140_v14 = vadd.f32 %v3139_v33, %v3045_v41  ;;  %v3179_v44 = vmul.f32 %v3045_v41, %v3045_v41 }
 0x228   : > { %v2798_v11 = vpop.f32.mrf.mxu2  ;;  %v2887_v25 = vpop.f32.mrf.mxu3 }
 0x229   : > { %v3210_v31 = vadd.f32 %v3209_v26, %v3179_v44  ;;  %v2888_v63 = vadd.f32 %v2887_v25, %v2798_v11  ;;  %v2214_v42 = vpop.f32.mrf.mxu1  ;;  %v2979_v3 = vpop.f32.mrf.mxu0 }
 0x22a   : > { %v2215_v1 = vadd.f32 %v2214_v42, %v5441_v23  ;;  %v4497_v42 = vld [vmem:[%s5806_s3] ss:$0 sm:$0xff] }
 0x22b   : > { %v2977_v49 = vadd.f32 %v2976_v54, %v2888_v63  ;;  %v4333_v54 = vunpack.c.l.bf16 %v4332_v28 }
 0x22c   : > { %3918 = vmatmul.msk.bf16.gmra.mxu1 %vm5067_vm5, %v5391_v40  ;;  %4174 = vmatmul.msk.bf16.gmra.mxu0 %vm5067_vm5, %v5449_v46 }
 0x22d   : > { %v3046_v12 = vadd.f32 %v2977_v49, %v2212_v20  ;;  %4123 = vmatmul.msk.bf16.gmra.mxu2 %vm4718_vm3, %v5893_v38  ;;  %2929 = vmatmul.bf16.gmra.mxu3 %v5447_v43 }
 0x22f   : > { %v4353_v55 = vpack.c.bf16 %v3046_v12, %v3045_v41  ;;  %v3141_v6 = vadd.f32 %v3140_v14, %v3046_v12  ;;  %v3180_v8 = vmul.f32 %v3046_v12, %v3046_v12  ;;  %v4498_v12 = vld [vmem:[%s5807_s4] ss:$0 sm:$0xff] }
 0x230   : > { %v2801_v24 = vpop.f32.mrf.mxu2  ;;  %v2890_v5 = vpop.f32.mrf.mxu3 }
 0x231   : > { %4433 = vst [vmem:[%s5669_s16 + $0x18] sm:$0xff] %v4353_v55   ;;  %v3211_v62 = vadd.f32 %v3210_v31, %v3180_v8  ;;  %v2891_v40 = vadd.f32 %v2890_v5, %v2801_v24  ;;  %v2216_v58 = vpop.f32.mrf.mxu1  ;;  %v2981_v0 = vpop.f32.mrf.mxu0 }
 0x232   : > { %v2217_v26 = vadd.f32 %v2216_v58, %v5934_v18 }
 0x233   : > { %v2980_v60 = vadd.f32 %v2979_v3, %v2891_v40  ;;  %v733_v3 = vmul.f32 %v4497_v42, %v4333_v54 }
 0x235   : > { %v3047_v9 = vadd.f32 %v2980_v60, %v2215_v1  ;;  %v735_v55 = vadd.f32 %v4498_v12, %v733_v3 }
 0x237   : > { %v3142_v57 = vadd.f32 %v3141_v6, %v3047_v9  ;;  %v3181_v35 = vmul.f32 %v3047_v9, %v3047_v9  ;;  %v737_v60 = vmax.f32 %v735_v55, 0.0 }
 0x238   : > { %v2803_v43 = vpop.f32.mrf.mxu2  ;;  %v2892_v38 = vpop.f32.mrf.mxu3 }
 0x239   : > { %v3212_v59 = vadd.f32 %v3211_v62, %v3181_v35  ;;  %v2893_v21 = vadd.f32 %v2892_v38, %v2803_v43  ;;  %v2219_v33 = vpop.f32.mrf.mxu1  ;;  %v2984_v45 = vpop.f32.mrf.mxu0 }
 0x23b   : > { %v2982_v23 = vadd.f32 %v2981_v0, %v2893_v21  ;;  %v740_v21 = vmul.f32 0.0, %v737_v60 }
 0x23c   : > { %3921 = vmatmul.msk.bf16.gmra.mxu1 %vm5067_vm5, %v5414_v30  ;;  %4177 = vmatmul.msk.bf16.gmra.mxu0 %vm5067_vm5, %v5935_v22 }
 0x23d   : > { %v3048_v53 = vadd.f32 %v2982_v23, %v2217_v26  ;;  %4127 = vmatmul.msk.bf16.gmra.mxu2 %vm4718_vm3, %v5898_v50  ;;  %2934 = vmatmul.bf16.gmra.mxu3 %v5470_v61  ;;  %v734_v50 = vmul.f32 %v4497_v42, %v4334_v34  ;;  %v2220_v61 = vadd.f32 %v2219_v33, %v5936_v52 }
 0x23f   : > { %v4358_v2 = vpack.c.bf16 %v3048_v53, %v3047_v9  ;;  %v3143_v41 = vadd.f32 %v3142_v57, %v3048_v53  ;;  %v3182_v14 = vmul.f32 %v3048_v53, %v3048_v53  ;;  %v736_v6 = vadd.f32 %v4498_v12, %v734_v50  ;;  %v5937_v57 = vld [vmem:[#allocation5_spill] sm:$0xff] }
 0x240   : > { %v2806_v44 = vpop.f32.mrf.mxu2  ;;  %v2895_v11 = vpop.f32.mrf.mxu3 }
 0x241   : > { %4434 = vst [vmem:[%s5669_s16 + $0x20] sm:$0xff] %v4358_v2   ;;  %v3213_v30 = vadd.f32 %v3212_v59, %v3182_v14  ;;  %v2896_v25 = vadd.f32 %v2895_v11, %v2806_v44  ;;  %v2221_v31 = vpop.f32.mrf.mxu1  ;;  %v2986_v63 = vpop.f32.mrf.mxu0  ;;  %v738_v9 = vmax.f32 %v736_v6, 0.0  ;;  %v5938_v59 = vld [vmem:[#allocation13_spill] sm:$0xff] }
 0x242   : > { %v2222_v35 = vadd.f32 %v2221_v31, %v5937_v57  ;;  %v5939_v44 = vld [vmem:[#allocation9_spill] sm:$0xff] }
 0x243   : > { %v2985_v20 = vadd.f32 %v2984_v45, %v2896_v25  ;;  %v741_v33 = vmul.f32 0.0, %v738_v9 }
 0x245   : > { %v3049_v49 = vadd.f32 %v2985_v20, %v2220_v61  ;;  %v2481_v2 = vrot.slane %v741_v33, 1  ;;  %v2385_v14 = vrot.slane %v741_v33, 7  ;;  %v2577_v6 = vpack.c.bf16 %v741_v33, %v740_v21 }
 0x247   : > { %v3144_v8 = vadd.f32 %v3143_v41, %v3049_v49  ;;  %v3183_v24 = vmul.f32 %v3049_v49, %v3049_v49  ;;  %v2384_v41 = vrot.slane %v740_v21, 7 }
 0x248   : > { %v2808_v5 = vpop.f32.mrf.mxu2  ;;  %v2897_v62 = vpop.f32.mrf.mxu3 }
 0x249   : > { %v3214_v40 = vadd.f32 %v3213_v30, %v3183_v24  ;;  %v2898_v58 = vadd.f32 %v2897_v62, %v2808_v5  ;;  %v2224_v0 = vpop.f32.mrf.mxu1  ;;  %v2989_v1 = vpop.f32.mrf.mxu0  ;;  %v2386_v31 = vsel %vm809_vm0, %v2384_v41, %v2385_v14 }
 0x24a   : > { %v2225_v11 = vadd.f32 %v2224_v0, %v5939_v44  ;;  %v4134_v55 = vpack.c.bf16 %v2386_v31, %v2384_v41 }
 0x24b   : > { %v2987_v43 = vadd.f32 %v2986_v63, %v2898_v58 }
 0x24c   : > { %3924 = vmatmul.msk.bf16.gmra.mxu1 %vm5067_vm5, %v5449_v46  ;;  %4180 = vmatmul.msk.bf16.gmra.mxu0 %vm5067_vm5, %v5495_v19  ;;  %v2480_v19 = vrot.slane %v740_v21, 1 }
 0x24d   : > { %v3050_v38 = vadd.f32 %v2987_v43, %v2222_v35  ;;  %4131 = vmatmul.msk.bf16.gmra.mxu2 %vm4718_vm3, %v5938_v59  ;;  %2939 = vmatmul.bf16.gmra.mxu3 %v5493_v51 }
 0x24e   : > { %v2482_v25 = vsel %vm906_vm4, %v2480_v19, %v2481_v2 }
 0x24f   : > { %v4363_v45 = vpack.c.bf16 %v3050_v38, %v3049_v49  ;;  %v3145_v28 = vadd.f32 %v3144_v8, %v3050_v38  ;;  %v3184_v18 = vmul.f32 %v3050_v38, %v3050_v38  ;;  %v4182_v52 = vpack.c.bf16 %v2481_v2, %v2482_v25  ;;  %v5940_v8 = vld [vmem:[#allocation10_spill] sm:$0xff] }
 0x250   : > { %v2811_v26 = vpop.f32.mrf.mxu2  ;;  %v2900_v23 = vpop.f32.mrf.mxu3 }
 0x251   : > { %4435 = vst [vmem:[%s5669_s16 + $0x28] sm:$0xff] %v4363_v45   ;;  %v3215_v46 = vadd.f32 %v3214_v40, %v3184_v18  ;;  %v2901_v53 = vadd.f32 %v2900_v23, %v2811_v26  ;;  %v2226_v54 = vpop.f32.mrf.mxu1  ;;  %v2991_v34 = vpop.f32.mrf.mxu0 }
 0x252   : > { %v2227_v24 = vadd.f32 %v2226_v54, %v5940_v8 }
 0x253   : > { %v2990_v30 = vadd.f32 %v2989_v1, %v2901_v53 }
 0x255   : > { %v3051_v51 = vadd.f32 %v2990_v30, %v2225_v11 }
 0x257   : > { %v3146_v63 = vadd.f32 %v3145_v28, %v3051_v51  ;;  %v3185_v42 = vmul.f32 %v3051_v51, %v3051_v51 }
 0x258   : > { %v2813_v3 = vpop.f32.mrf.mxu2  ;;  %v2902_v50 = vpop.f32.mrf.mxu3 }
 0x259   : > { %v3216_v61 = vadd.f32 %v3215_v46, %v3185_v42  ;;  %v2903_v20 = vadd.f32 %v2902_v50, %v2813_v3  ;;  %v2229_v49 = vpop.f32.mrf.mxu1  ;;  %v2994_v12 = vpop.f32.mrf.mxu0 }
 0x25b   : > { %v2992_v5 = vadd.f32 %v2991_v34, %v2903_v20 }
 0x25c   : > { %3927 = vmatmul.msk.bf16.gmra.mxu1 %vm5067_vm5, %v5935_v22  ;;  %4183 = vmatmul.msk.bf16.gmra.mxu0 %vm5067_vm5, %v4182_v52  ;;  %v2230_v22 = vadd.f32 %v2229_v49, %v5511_v56 }
 0x25d   : > { %v3052_v62 = vadd.f32 %v2992_v5, %v2227_v24  ;;  %4135 = vmatmul.msk.bf16.gmra.mxu2 %vm4718_vm3, %v4134_v55  ;;  %2944 = vmatmul.bf16.gmra.mxu3 %v2577_v6 }
 0x25f   : > { %v4368_v40 = vpack.c.bf16 %v3052_v62, %v3051_v51  ;;  %v3147_v58 = vadd.f32 %v3146_v63, %v3052_v62  ;;  %v3186_v0 = vmul.f32 %v3052_v62, %v3052_v62 }
 0x260   : > { %v2816_v1 = vpop.f32.mrf.mxu2  ;;  %v2905_v60 = vpop.f32.mrf.mxu3 }
 0x261   : > { %4436 = vst [vmem:[%s5669_s16 + $0x30] sm:$0xff] %v4368_v40   ;;  %v3217_v9 = vadd.f32 %v3216_v61, %v3186_v0  ;;  %v2906_v57 = vadd.f32 %v2905_v60, %v2816_v1  ;;  %v2231_v35 = vpop.f32.mrf.mxu1  ;;  %v2996_v43 = vpop.f32.mrf.mxu0 }
 0x262   : > { %v2232_v23 = vadd.f32 %v2231_v35, %v5523_v47 }
 0x263   : > { %v2995_v38 = vadd.f32 %v2994_v12, %v2906_v57 }
 0x265   : > { %v3053_v13 = vadd.f32 %v2995_v38, %v2230_v22 }
 0x267   : > { %v3148_v59 = vadd.f32 %v3147_v58, %v3053_v13  ;;  %v3187_v21 = vmul.f32 %v3053_v13, %v3053_v13 }
 0x268   : > { %v2818_v27 = vpop.f32.mrf.mxu2  ;;  %v2907_v33 = vpop.f32.mrf.mxu3 }
 0x269   : > { %v3218_v45 = vadd.f32 %v3217_v9, %v3187_v21  ;;  %v2908_v28 = vadd.f32 %v2907_v33, %v2818_v27  ;;  %v2234_v18 = vpop.f32.mrf.mxu1  ;;  %v2999_v26 = vpop.f32.mrf.mxu0 }
 0x26a   : > { %v2235_v30 = vadd.f32 %v2234_v18, %v5526_v10 }
 0x26b   : > { %v2997_v46 = vadd.f32 %v2996_v43, %v2908_v28 }
 0x26d   : > { %v3054_v53 = vadd.f32 %v2997_v46, %v2232_v23 }
 0x26f   : > { %v4373_v54 = vpack.c.bf16 %v3054_v53, %v3053_v13  ;;  %v3149_v34 = vadd.f32 %v3148_v59, %v3054_v53  ;;  %v3188_v19 = vmul.f32 %v3054_v53, %v3054_v53 }
 0x270   : > { %v2821_v2 = vpop.f32.mrf.mxu2  ;;  %v2910_v56 = vpop.f32.mrf.mxu3 }
 0x271   : > { %4437 = vst [vmem:[%s5669_s16 + $0x38] sm:$0xff] %v4373_v54   ;;  %v3219_v41 = vadd.f32 %v3218_v45, %v3188_v19  ;;  %v2911_v14 = vadd.f32 %v2910_v56, %v2821_v2  ;;  %v2236_v44 = vpop.f32.mrf.mxu1  ;;  %v3001_v11 = vpop.f32.mrf.mxu0 }
 0x272   : > { %v2237_v20 = vadd.f32 %v2236_v44, %v5539_v32 }
 0x273   : > { %v3000_v51 = vadd.f32 %v2999_v26, %v2911_v14 }
 0x275   : > { %v3055_v25 = vadd.f32 %v3000_v51, %v2235_v30 }
 0x277   : > { %v3150_v31 = vadd.f32 %v3149_v34, %v3055_v25  ;;  %v3189_v63 = vmul.f32 %v3055_v25, %v3055_v25 }
 0x278   : > { %v2823_v47 = vpop.f32.mrf.mxu2  ;;  %v2912_v42 = vpop.f32.mrf.mxu3 }
 0x279   : > { %v3220_v3 = vadd.f32 %v3219_v41, %v3189_v63  ;;  %v2913_v50 = vadd.f32 %v2912_v42, %v2823_v47  ;;  %v2239_v52 = vpop.f32.mrf.mxu1  ;;  %v3004_v61 = vpop.f32.mrf.mxu0 }
 0x27a   : > { %v2240_v0 = vadd.f32 %v2239_v52, %v5542_v15 }
 0x27b   : > { %v3002_v49 = vadd.f32 %v3001_v11, %v2913_v50 }
 0x27d   : > { %v3056_v12 = vadd.f32 %v3002_v49, %v2237_v20 }
 0x27f   : > { %v4378_v55 = vpack.c.bf16 %v3056_v12, %v3055_v25  ;;  %v3151_v6 = vadd.f32 %v3150_v31, %v3056_v12  ;;  %v3190_v8 = vmul.f32 %v3056_v12, %v3056_v12 }
 0x280   : > { %v2826_v24 = vpop.f32.mrf.mxu2  ;;  %v2915_v10 = vpop.f32.mrf.mxu3 }
 0x281   : > { %4438 = vst [vmem:[%s5669_s16 + $0x40] sm:$0xff] %v4378_v55   ;;  %v3221_v5 = vadd.f32 %v3220_v3, %v3190_v8  ;;  %v2916_v62 = vadd.f32 %v2915_v10, %v2826_v24  ;;  %v2241_v40 = vpop.f32.mrf.mxu1  ;;  %v3006_v58 = vpop.f32.mrf.mxu0 }
 0x282   : > { %v2242_v59 = vadd.f32 %v2241_v40, %v5555_v37 }
 0x283   : > { %v3005_v1 = vadd.f32 %v3004_v61, %v2916_v62 }
 0x285   : > { %v3057_v60 = vadd.f32 %v3005_v1, %v2240_v0 }
 0x287   : > { %v3152_v9 = vadd.f32 %v3151_v6, %v3057_v60  ;;  %v3191_v57 = vmul.f32 %v3057_v60, %v3057_v60 }
 0x288   : > { %v2828_v32 = vpop.f32.mrf.mxu2  ;;  %v2917_v35 = vpop.f32.mrf.mxu3 }
 0x289   : > { %v3222_v43 = vadd.f32 %v3221_v5, %v3191_v57  ;;  %v2918_v22 = vadd.f32 %v2917_v35, %v2828_v32  ;;  %v2244_v38 = vpop.f32.mrf.mxu1  ;;  %v3009_v13 = vpop.f32.mrf.mxu0 }
 0x28a   : > { %v2245_v54 = vadd.f32 %v2244_v38, %v5558_v17 }
 0x28b   : > { %v3007_v21 = vadd.f32 %v3006_v58, %v2918_v22  ;;  %v5941_v58 = vld [vmem:[#allocation8_spill] sm:$0xff] }
 0x28d   : > { %v3058_v27 = vadd.f32 %v3007_v21, %v2242_v59  ;;  %v5942_v59 = vld [vmem:[#allocation23_spill] sm:$0xff] }
 0x28f   : > { %v4383_v33 = vpack.c.bf16 %v3058_v27, %v3057_v60  ;;  %v3153_v45 = vadd.f32 %v3152_v9, %v3058_v27  ;;  %v3192_v28 = vmul.f32 %v3058_v27, %v3058_v27 }
 0x290   : > { %v2831_v18 = vpop.f32.mrf.mxu2  ;;  %v2920_v15 = vpop.f32.mrf.mxu3 }
 0x291   : > { %4439 = vst [vmem:[%s5669_s16 + $0x48] sm:$0xff] %v4383_v33   ;;  %v3223_v26 = vadd.f32 %v3222_v43, %v3192_v28  ;;  %v2921_v23 = vadd.f32 %v2920_v15, %v2831_v18  ;;  %v2246_v46 = vpop.f32.mrf.mxu1  ;;  %v3011_v53 = vpop.f32.mrf.mxu0 }
 0x292   : > { %v2247_v51 = vadd.f32 %v2246_v46, %v5571_v29 }
 0x293   : > { %v3010_v34 = vadd.f32 %v3009_v13, %v2921_v23 }
 0x295   : > { %v3059_v19 = vadd.f32 %v3010_v34, %v2245_v54  ;;  %v5943_v54 = vld [vmem:[#allocation15_spill] sm:$0xff] }
 0x297   : > { %v3154_v2 = vadd.f32 %v3153_v45, %v3059_v19  ;;  %v3193_v56 = vmul.f32 %v3059_v19, %v3059_v19 }
 0x298   : > { %v2833_v37 = vpop.f32.mrf.mxu2  ;;  %v2922_v41 = vpop.f32.mrf.mxu3 }
 0x299   : > { %v3224_v14 = vadd.f32 %v3223_v26, %v3193_v56  ;;  %v2923_v44 = vadd.f32 %v2922_v41, %v2833_v37  ;;  %v2249_v11 = vpop.f32.mrf.mxu1  ;;  %v3014_v30 = vpop.f32.mrf.mxu0 }
 0x29a   : > { %v2250_v49 = vadd.f32 %v2249_v11, %v5574_v4 }
 0x29b   : > { %v3012_v25 = vadd.f32 %v3011_v53, %v2923_v44 }
 0x29d   : > { %v3060_v31 = vadd.f32 %v3012_v25, %v2247_v51 }
 0x29f   : > { %v4388_v63 = vpack.c.bf16 %v3060_v31, %v3059_v19  ;;  %v3155_v47 = vadd.f32 %v3154_v2, %v3060_v31  ;;  %v3194_v42 = vmul.f32 %v3060_v31, %v3060_v31  ;;  %v5944_v31 = vld [vmem:[#allocation11_spill] sm:$0xff] }
 0x2a0   : > { %v2836_v3 = vpop.f32.mrf.mxu2  ;;  %v2925_v17 = vpop.f32.mrf.mxu3 }
 0x2a1   : > { %4440 = vst [vmem:[%s5669_s16 + $0x50] sm:$0xff] %v4388_v63   ;;  %v3225_v50 = vadd.f32 %v3224_v14, %v3194_v42  ;;  %v2926_v52 = vadd.f32 %v2925_v17, %v2836_v3  ;;  %v2251_v61 = vpop.f32.mrf.mxu1  ;;  %v3016_v20 = vpop.f32.mrf.mxu0 }
 0x2a2   : > { %v2252_v0 = vadd.f32 %v2251_v61, %v5941_v58 }
 0x2a3   : > { %v3015_v12 = vadd.f32 %v3014_v30, %v2926_v52 }
 0x2a5   : > { %v3061_v55 = vadd.f32 %v3015_v12, %v2250_v49 }
 0x2a7   : > { %v3156_v6 = vadd.f32 %v3155_v47, %v3061_v55  ;;  %v3195_v8 = vmul.f32 %v3061_v55, %v3061_v55 }
 0x2a8   : > { %v2838_v29 = vpop.f32.mrf.mxu2  ;;  %v2927_v24 = vpop.f32.mrf.mxu3 }
 0x2a9   : > { %v3226_v10 = vadd.f32 %v3225_v50, %v3195_v8  ;;  %v2928_v5 = vadd.f32 %v2927_v24, %v2838_v29  ;;  %v2254_v62 = vpop.f32.mrf.mxu1  ;;  %v3019_v40 = vpop.f32.mrf.mxu0 }
 0x2aa   : > { %v2255_v21 = vadd.f32 %v2254_v62, %v5942_v59 }
 0x2ab   : > { %v3017_v1 = vadd.f32 %v3016_v20, %v2928_v5 }
 0x2ad   : > { %v3062_v60 = vadd.f32 %v3017_v1, %v2252_v0 }
 0x2af   : > { %v4393_v9 = vpack.c.bf16 %v3062_v60, %v3061_v55  ;;  %v3157_v57 = vadd.f32 %v3156_v6, %v3062_v60  ;;  %v3196_v32 = vmul.f32 %v3062_v60, %v3062_v60 }
 0x2b0   : > { %v2841_v35 = vpop.f32.mrf.mxu2  ;;  %v2930_v4 = vpop.f32.mrf.mxu3 }
 0x2b1   : > { %4441 = vst [vmem:[%s5669_s16 + $0x58] sm:$0xff] %v4393_v9   ;;  %v3227_v43 = vadd.f32 %v3226_v10, %v3196_v32  ;;  %v2931_v22 = vadd.f32 %v2930_v4, %v2841_v35  ;;  %v2256_v38 = vpop.f32.mrf.mxu1  ;;  %v3021_v13 = vpop.f32.mrf.mxu0 }
 0x2b2   : > { %v2257_v34 = vadd.f32 %v2256_v38, %v5943_v54 }
 0x2b3   : > { %v3020_v27 = vadd.f32 %v3019_v40, %v2931_v22 }
 0x2b5   : > { %v3063_v33 = vadd.f32 %v3020_v27, %v2255_v21 }
 0x2b7   : > { %v3158_v45 = vadd.f32 %v3157_v57, %v3063_v33  ;;  %v3197_v28 = vmul.f32 %v3063_v33, %v3063_v33 }
 0x2b8   : > { %v2843_v18 = vpop.f32.mrf.mxu2  ;;  %v2932_v15 = vpop.f32.mrf.mxu3 }
 0x2b9   : > { %v3228_v26 = vadd.f32 %v3227_v43, %v3197_v28  ;;  %v2933_v23 = vadd.f32 %v2932_v15, %v2843_v18  ;;  %v2259_v46 = vpop.f32.mrf.mxu1  ;;  %v3024_v53 = vpop.f32.mrf.mxu0 }
 0x2ba   : > { %v2260_v63 = vadd.f32 %v2259_v46, %v5944_v31 }
 0x2bb   : > { %v3022_v19 = vadd.f32 %v3021_v13, %v2933_v23 }
 0x2bd   : > { %v3064_v2 = vadd.f32 %v3022_v19, %v2257_v34 }
 0x2bf   : > { %v4398_v56 = vpack.c.bf16 %v3064_v2, %v3063_v33  ;;  %v3159_v37 = vadd.f32 %v3158_v45, %v3064_v2  ;;  %v3198_v41 = vmul.f32 %v3064_v2, %v3064_v2 }
 0x2c0   : > { %v2846_v14 = vpop.f32.mrf.mxu2  ;;  %v2935_v44 = vpop.f32.mrf.mxu3 }
 0x2c1   : > { %4442 = vst [vmem:[%s5669_s16 + $0x60] sm:$0xff] %v4398_v56   ;;  %v3229_v11 = vadd.f32 %v3228_v26, %v3198_v41  ;;  %v2936_v30 = vadd.f32 %v2935_v44, %v2846_v14  ;;  %v2261_v51 = vpop.f32.mrf.mxu1  ;;  %v3026_v25 = vpop.f32.mrf.mxu0 }
 0x2c2   : > { %v2262_v12 = vadd.f32 %v2261_v51, %v5619_v39 }
 0x2c3   : > { %v3025_v47 = vadd.f32 %v3024_v53, %v2936_v30 }
 0x2c5   : > { %v3065_v42 = vadd.f32 %v3025_v47, %v2260_v63 }
 0x2c7   : > { %v3160_v3 = vadd.f32 %v3159_v37, %v3065_v42  ;;  %v3199_v17 = vmul.f32 %v3065_v42, %v3065_v42 }
 0x2c8   : > { %v2848_v50 = vpop.f32.mrf.mxu2  ;;  %v2937_v52 = vpop.f32.mrf.mxu3 }
 0x2c9   : > { %v3230_v61 = vadd.f32 %v3229_v11, %v3199_v17  ;;  %v2938_v20 = vadd.f32 %v2937_v52, %v2848_v50  ;;  %v2264_v49 = vpop.f32.mrf.mxu1  ;;  %v3029_v6 = vpop.f32.mrf.mxu0 }
 0x2ca   : > { %v2265_v0 = vadd.f32 %v2264_v49, %v5622_v16 }
 0x2cb   : > { %v3027_v55 = vadd.f32 %v3026_v25, %v2938_v20 }
 0x2cd   : > { %v3066_v8 = vadd.f32 %v3027_v55, %v2262_v12 }
 0x2cf   : > { %v4403_v29 = vpack.c.bf16 %v3066_v8, %v3065_v42  ;;  %v3161_v24 = vadd.f32 %v3160_v3, %v3066_v8  ;;  %v3200_v10 = vmul.f32 %v3066_v8, %v3066_v8 }
 0x2d0   : > { %v2851_v5 = vpop.f32.mrf.mxu2  ;;  %v2940_v62 = vpop.f32.mrf.mxu3 }
 0x2d1   : > { %4443 = vst [vmem:[%s5669_s16 + $0x68] sm:$0xff] %v4403_v29   ;;  %v3231_v40 = vadd.f32 %v3230_v61, %v3200_v10  ;;  %v2941_v58 = vadd.f32 %v2940_v62, %v2851_v5  ;;  %v2266_v60 = vpop.f32.mrf.mxu1  ;;  %v3031_v57 = vpop.f32.mrf.mxu0 }
 0x2d2   : > { %v2267_v38 = vadd.f32 %v2266_v60, %v5635_v48 }
 0x2d3   : > { %v3030_v1 = vadd.f32 %v3029_v6, %v2941_v58 }
 0x2d5   : > { %v3067_v9 = vadd.f32 %v3030_v1, %v2265_v0 }
 0x2d7   : > { %v3162_v32 = vadd.f32 %v3161_v24, %v3067_v9  ;;  %v3201_v39 = vmul.f32 %v3067_v9, %v3067_v9 }
 0x2d8   : > { %v2853_v35 = vpop.f32.mrf.mxu2  ;;  %v2942_v4 = vpop.f32.mrf.mxu3 }
 0x2d9   : > { %v3232_v43 = vadd.f32 %v3231_v40, %v3201_v39  ;;  %v2943_v22 = vadd.f32 %v2942_v4, %v2853_v35  ;;  %v2269_v21 = vpop.f32.mrf.mxu1  ;;  %v3034_v16 = vpop.f32.mrf.mxu0 }
 0x2da   : > { %v2270_v23 = vadd.f32 %v2269_v21, %v5638_v7 }
 0x2db   : > { %v3032_v13 = vadd.f32 %v3031_v57, %v2943_v22 }
 0x2dd   : > { %v3068_v59 = vadd.f32 %v3032_v13, %v2267_v38 }
 0x2df   : > { %v4408_v27 = vpack.c.bf16 %v3068_v59, %v3067_v9  ;;  %v3163_v33 = vadd.f32 %v3162_v32, %v3068_v59  ;;  %v3202_v45 = vmul.f32 %v3068_v59, %v3068_v59 }
 0x2e0   : > { %v2856_v28 = vpop.f32.mrf.mxu2  ;;  %v2945_v18 = vpop.f32.mrf.mxu3 }
 0x2e1   : > { %4444 = vst [vmem:[%s5669_s16 + $0x70] sm:$0xff] %v4408_v27   ;;  %v3233_v15 = vadd.f32 %v3232_v43, %v3202_v45  ;;  %v2946_v26 = vadd.f32 %v2945_v18, %v2856_v28  ;;  %v2271_v48 = vpop.f32.mrf.mxu1  ;;  %v3036_v41 = vpop.f32.mrf.mxu0 }
 0x2e2   : > { %v2272_v14 = vadd.f32 %v2271_v48, %v5651_v36 }
 0x2e3   : > { %v3035_v46 = vadd.f32 %v3034_v16, %v2946_v26 }
 0x2e5   : > { %v3069_v53 = vadd.f32 %v3035_v46, %v2270_v23 }
 0x2e7   : > { %v3164_v54 = vadd.f32 %v3163_v33, %v3069_v53  ;;  %v3203_v34 = vmul.f32 %v3069_v53, %v3069_v53 }
 0x2e8   : > { %v2858_v19 = vpop.f32.mrf.mxu2  ;;  %v2947_v2 = vpop.f32.mrf.mxu3 }
 0x2e9   : > { %v3234_v56 = vadd.f32 %v3233_v15, %v3203_v34  ;;  %v2948_v37 = vadd.f32 %v2947_v2, %v2858_v19 }
 0x2eb   : > { %v3037_v44 = vadd.f32 %v3036_v41, %v2948_v37 }
 0x2ed   : > { %v3070_v11 = vadd.f32 %v3037_v44, %v2272_v14 }
 0x2ef   : > { %v4413_v30 = vpack.c.bf16 %v3070_v11, %v3069_v53  ;;  %v3165_v51 = vadd.f32 %v3164_v54, %v3070_v11  ;;  %v3204_v7 = vmul.f32 %v3070_v11, %v3070_v11 }
 0x2f1   : > { %4445 = vst [vmem:[%s5669_s16 + $0x78] sm:$0xff] %v4413_v30   ;;  %v3166_v25 = vrot.slane %v3165_v51, 4  ;;  %v3235_v31 = vadd.f32 %v3234_v56, %v3204_v7 }
 0x2f3   : > { %v3167_v63 = vadd.f32 %v3166_v25, %v3165_v51  ;;  %v3236_v47 = vrot.slane %v3235_v31, 4 }
 0x2f5   : > { %v3168_v42 = vrot.slane %v3167_v63, 2  ;;  %v3237_v3 = vadd.f32 %v3236_v47, %v3235_v31 }
 0x2f7   : > { %v3169_v17 = vadd.f32 %v3168_v42, %v3167_v63  ;;  %v3238_v50 = vrot.slane %v3237_v3, 2 }
 0x2f9   : > { %v3170_v52 = vrot.slane %v3169_v17, 1  ;;  %v3239_v61 = vadd.f32 %v3238_v50, %v3237_v3 }
 0x2fb   : > { %v3171_v36 = vadd.f32 %v3170_v52, %v3169_v17  ;;  %v3240_v20 = vrot.slane %v3239_v61, 1 }
 0x2fd   : > { %3172 = vst [vmem:[%s500_s26] sm:$0x1] %v3171_v36  ;;  %v3241_v49 = vadd.f32 %v3240_v20, %v3239_v61 }
 0x2ff   : > { %3242 = vst [vmem:[%s506_s11] sm:$0x1] %v3241_v49 }
 0x300 PF: > { %s19_s29 = sadd.s32 1, %s4521_s29   ;;  %s5945_s27 = smov %s4517_s28 }
 0x301   : > { %p16_p5 = scmp.ge.s32.totalorder %s19_s29, 4   ;;  %s5946_s28 = smov %s5948_s30 }
 0x303   :  { %18 = sbr.rel (!%p16_p5) target bundleno = 2 (0x2), region = 109 }

// kernel: fmf_hourglass_forward.21
= control target key start
LH: loop header
LB: loop body
LE: loop exit
PB: predicated region body
PF: predicated region fallthrough
CT: control target
= control target key end

     0   :  { %s718_s21 = smov 0   ;;  %s780_s0 = inlined_call_operand.vmem [shape: f32[128,128], index: 0, kind: input, shape index: {}]   ;;  %s781_s1 = inlined_call_operand.vmem [shape: f32[1,128], index: 1, kind: input, shape index: {}]   ;;  %s782_s2 = inlined_call_operand.vmem [shape: f32[1,128], index: 2, kind: input, shape index: {}]   ;;  %s783_s3 = inlined_call_operand.vmem [shape: bf16[128,128], index: 3, kind: input, shape index: {}]   ;;  %s784_s4 = inlined_call_operand.vmem [shape: bf16[128,128], index: 4, kind: output, shape index: {0}]   ;;  %s785_s5 = inlined_call_operand.vmem [shape: f32[2,1,128], index: 5, kind: output, shape index: {1}]   ;;  %s786_s6 = inlined_call_operand.vmem [shape: f32[2,1,128], index: 6, kind: output, shape index: {2}]  }
   0x1 LB: > { %s724_s22 = sadd.s32 4294967295, %s681_s21   ;;  %p571_p0 = scmp.ge.s32.totalorder %s681_s21, 1  ;;  %s681_s21 = sphi %s718_s21, %s17_s21  }
   0x2   : > { %p218_p1 = scmp.lt.s32.totalorder %s681_s21, 3 }
   0x4   : > { %p219_p2 = pnand %p571_p0, %p218_p1 }
   0x5   : > { %s572_s25 = sshll.u32 (!%p219_p2), %s724_s22, 3  ;;  %p266_p4 = scmp.lt.s32.totalorder (!%p219_p2), %s724_s22, 1 }
   0x6   : > { %222 = sbr.rel (%p219_p2) target bundleno = 206 (0xce), region = 36  ;;  %p255_p3 = scmp.lt.s32.totalorder (!%p219_p2), %s572_s25, 15 }
   0xb   : > { %v617_v0 = vld [vmem:[%s783_s3 + $0x38] sm:$0xff]  ;;  %v616_v1 = vld [vmem:[%s783_s3 + $0x30] sm:$0xff]  ;;  %s788_s25 = smov (!%p255_p3, %s572_s25), 15  ;;  %v615_v2 = vld [vmem:[%s783_s3 + $0x28] sm:$0xff]  ;;  %s790_s22 = smov (!%p266_p4, %s724_s22), 1 }
   0xc   : > { %380 = vmatpush.bf16.msra.mxu0 %v617_v0  ;;  %641 = vmatpush.bf16.msra.mxu1 %v617_v0  ;;  %s573_s30 = sshll.u32 %s788_s25, 3  ;;  %v614_v3 = vld [vmem:[%s783_s3 + $0x20] sm:$0xff]  ;;  %v613_v5 = vld [vmem:[%s783_s3 + $0x18] sm:$0xff]  ;;  %v612_v20 = vld [vmem:[%s783_s3 + $0x10] sm:$0xff]  ;;  %s575_s27 = sshll.u32 %s788_s25, 2 }
   0xd   : > { %642 = vmatpush.bf16.msra.mxu2 %v617_v0  ;;  %643 = vmatpush.bf16.msra.mxu3 %v617_v0  ;;  %s258_s11 = scalar_lea.vmem %s780_s0, %s573_s30  ;;  %v673_v4 = vld [vmem:[%s781_s1] ss:$0 sm:$0xff]  ;;  %v611_v29 = vld [vmem:[%s783_s3 + $0x8] sm:$0xff]  ;;  %s264_s30 = scalar_lea.vmem %s784_s4, %s575_s27 }
   0xe   : > { %v272_v6 = vld [vmem:[%s258_s11] sm:$0xff]  ;;  %v273_v7 = vld [vmem:[%s258_s11 + $0x8] sm:$0xff]  ;;  %v274_v8 = vld [vmem:[%s258_s11 + $0x10] sm:$0xff]  ;;  %s268_s8 = scalar_lea.vmem %s785_s5, %s790_s22 }
   0xf   : > { %v275_v9 = vld [vmem:[%s258_s11 + $0x18] sm:$0xff]  ;;  %v276_v10 = vld [vmem:[%s258_s11 + $0x20] sm:$0xff]  ;;  %v277_v11 = vld [vmem:[%s258_s11 + $0x28] sm:$0xff]  ;;  %v284_v14 = vmul.f32 %v673_v4, %v272_v6  ;;  %v285_v16 = vmul.f32 %v673_v4, %v273_v7  ;;  %v286_v17 = vmul.f32 %v673_v4, %v274_v8 }
  0x10   : > { %381 = vmatpush.bf16.msra.mxu0 %v616_v1  ;;  %644 = vmatpush.bf16.msra.mxu1 %v616_v1  ;;  %v278_v12 = vld [vmem:[%s258_s11 + $0x30] sm:$0xff]  ;;  %v279_v13 = vld [vmem:[%s258_s11 + $0x38] sm:$0xff]  ;;  %v674_v15 = vld [vmem:[%s782_s2] ss:$0 sm:$0xff]  ;;  %v287_v18 = vmul.f32 %v673_v4, %v275_v9  ;;  %v288_v19 = vmul.f32 %v673_v4, %v276_v10  ;;  %v289_v21 = vmul.f32 %v673_v4, %v277_v11  ;;  %s271_s11 = scalar_lea.vmem %s786_s6, %s790_s22 }
  0x11   : > { %645 = vmatpush.bf16.msra.mxu2 %v616_v1  ;;  %646 = vmatpush.bf16.msra.mxu3 %v616_v1  ;;  %v290_v22 = vmul.f32 %v673_v4, %v278_v12  ;;  %v291_v23 = vmul.f32 %v673_v4, %v279_v13  ;;  %v296_v24 = vadd.f32 %v674_v15, %v284_v14  ;;  %v610_v37 = vld [vmem:[%s783_s3] sm:$0xff] }
  0x12   : > { %v297_v25 = vadd.f32 %v674_v15, %v285_v16  ;;  %v298_v26 = vadd.f32 %v674_v15, %v286_v17  ;;  %v299_v27 = vadd.f32 %v674_v15, %v287_v18  ;;  %v300_v28 = vadd.f32 %v674_v15, %v288_v19 }
  0x13   : > { %v301_v30 = vadd.f32 %v674_v15, %v289_v21  ;;  %v302_v31 = vadd.f32 %v674_v15, %v290_v22  ;;  %v303_v32 = vadd.f32 %v674_v15, %v291_v23  ;;  %v304_v33 = vmax.f32 %v296_v24, 0.0 }
  0x14   : > { %382 = vmatpush.bf16.msra.mxu0 %v615_v2  ;;  %647 = vmatpush.bf16.msra.mxu1 %v615_v2  ;;  %v305_v34 = vmax.f32 %v297_v25, 0.0  ;;  %v306_v35 = vmax.f32 %v298_v26, 0.0  ;;  %v307_v36 = vmax.f32 %v299_v27, 0.0  ;;  %v308_v38 = vmax.f32 %v300_v28, 0.0 }
  0x15   : > { %648 = vmatpush.bf16.msra.mxu2 %v615_v2  ;;  %649 = vmatpush.bf16.msra.mxu3 %v615_v2  ;;  %v309_v39 = vmax.f32 %v301_v30, 0.0  ;;  %v310_v40 = vmax.f32 %v302_v31, 0.0  ;;  %v311_v41 = vmax.f32 %v303_v32, 0.0 }
  0x16   : > { %v312_v42 = vpack.c.bf16 %v305_v34, %v304_v33  ;;  %v313_v43 = vpack.c.bf16 %v307_v36, %v306_v35 }
  0x17   : > { %v314_v44 = vpack.c.bf16 %v309_v39, %v308_v38  ;;  %v315_v45 = vpack.c.bf16 %v311_v41, %v310_v40 }
  0x18   : > { %383 = vmatpush.bf16.msra.mxu0 %v614_v3  ;;  %650 = vmatpush.bf16.msra.mxu1 %v614_v3 }
  0x19   : > { %651 = vmatpush.bf16.msra.mxu2 %v614_v3  ;;  %652 = vmatpush.bf16.msra.mxu3 %v614_v3 }
  0x1c   : > { %384 = vmatpush.bf16.msra.mxu0 %v613_v5  ;;  %653 = vmatpush.bf16.msra.mxu1 %v613_v5 }
  0x1d   : > { %654 = vmatpush.bf16.msra.mxu2 %v613_v5  ;;  %655 = vmatpush.bf16.msra.mxu3 %v613_v5 }
  0x20   : > { %385 = vmatpush.bf16.msra.mxu0 %v612_v20  ;;  %656 = vmatpush.bf16.msra.mxu1 %v612_v20 }
  0x21   : > { %657 = vmatpush.bf16.msra.mxu2 %v612_v20  ;;  %658 = vmatpush.bf16.msra.mxu3 %v612_v20 }
  0x24   : > { %386 = vmatpush.bf16.msra.mxu0 %v611_v29  ;;  %659 = vmatpush.bf16.msra.mxu1 %v611_v29 }
  0x25   : > { %660 = vmatpush.bf16.msra.mxu2 %v611_v29  ;;  %661 = vmatpush.bf16.msra.mxu3 %v611_v29 }
  0x28   : > { %387 = vmatpush.bf16.msra.mxu0 %v610_v37  ;;  %662 = vmatpush.bf16.msra.mxu1 %v610_v37 }
  0x29   : > { %663 = vmatpush.bf16.msra.mxu2 %v610_v37  ;;  %664 = vmatpush.bf16.msra.mxu3 %v610_v37 }
  0x2b   : > { %388 = vmatmul.bf16.vlgmr.msra.gmra.mxu0 %v312_v42  ;;  %393 = vmatmul.bf16.vlgmr.msra.gmra.mxu1 %v313_v43 }
  0x2c   : > { %398 = vmatmul.bf16.vlgmr.msra.gmra.mxu2 %v314_v44  ;;  %403 = vmatmul.bf16.vlgmr.msra.gmra.mxu3 %v315_v45 }
  0xa8   : > { %v389_v46 = vpop.f32.mrf.mxu0  ;;  %v394_v47 = vpop.f32.mrf.mxu1 }
  0xa9   : > { %v439_v50 = vmul.f32 %v389_v46, %v389_v46  ;;  %v441_v57 = vmul.f32 %v394_v47, %v394_v47 }
  0xaf   : > { %v399_v48 = vpop.f32.mrf.mxu2  ;;  %v404_v49 = vpop.f32.mrf.mxu3 }
  0xb0   : > { %v391_v51 = vpop.f32.mrf.mxu0  ;;  %v396_v52 = vpop.f32.mrf.mxu1  ;;  %v443_v63 = vmul.f32 %v399_v48, %v399_v48  ;;  %v445_v9 = vmul.f32 %v404_v49, %v404_v49 }
  0xb1   : > { %v621_v53 = vpack.c.bf16 %v391_v51, %v389_v46  ;;  %v425_v54 = vadd.f32 %v391_v51, %v389_v46  ;;  %v440_v55 = vmul.f32 %v391_v51, %v391_v51  ;;  %v626_v56 = vpack.c.bf16 %v396_v52, %v394_v47 }
  0xb2   : > { %v442_v61 = vmul.f32 %v396_v52, %v396_v52 }
  0xb3   : > { %622 = vst [vmem:[%s264_s30] sm:$0xff] %v621_v53   ;;  %v447_v58 = vadd.f32 %v440_v55, %v439_v50  ;;  %v426_v59 = vadd.f32 %v425_v54, %v394_v47 }
  0xb4   : > { %638 = vst [vmem:[%s264_s30 + $0x8] sm:$0xff] %v626_v56  }
  0xb5   : > { %v427_v60 = vadd.f32 %v426_v59, %v396_v52  ;;  %v448_v62 = vadd.f32 %v447_v58, %v441_v57 }
  0xb7   : > { %v449_v0 = vadd.f32 %v448_v62, %v442_v61  ;;  %v401_v1 = vpop.f32.mrf.mxu2  ;;  %v428_v2 = vadd.f32 %v427_v60, %v399_v48  ;;  %v406_v3 = vpop.f32.mrf.mxu3 }
  0xb8   : > { %v631_v4 = vpack.c.bf16 %v401_v1, %v399_v48  ;;  %v636_v5 = vpack.c.bf16 %v406_v3, %v404_v49  ;;  %v444_v7 = vmul.f32 %v401_v1, %v401_v1  ;;  %v446_v13 = vmul.f32 %v406_v3, %v406_v3 }
  0xb9   : > { %v429_v6 = vadd.f32 %v428_v2, %v401_v1  ;;  %v450_v8 = vadd.f32 %v449_v0, %v443_v63 }
  0xba   : > { %639 = vst [vmem:[%s264_s30 + $0x10] sm:$0xff] %v631_v4  }
  0xbb   : > { %v451_v10 = vadd.f32 %v450_v8, %v444_v7  ;;  %640 = vst [vmem:[%s264_s30 + $0x18] sm:$0xff] %v636_v5   ;;  %v430_v11 = vadd.f32 %v429_v6, %v404_v49 }
  0xbd   : > { %v431_v12 = vadd.f32 %v430_v11, %v406_v3  ;;  %v452_v14 = vadd.f32 %v451_v10, %v445_v9 }
  0xbf   : > { %v432_v15 = vrot.slane %v431_v12, 4  ;;  %v453_v16 = vadd.f32 %v452_v14, %v446_v13 }
  0xc1   : > { %v433_v17 = vadd.f32 %v432_v15, %v431_v12  ;;  %v454_v18 = vrot.slane %v453_v16, 4 }
  0xc3   : > { %v434_v19 = vrot.slane %v433_v17, 2  ;;  %v455_v20 = vadd.f32 %v454_v18, %v453_v16 }
  0xc5   : > { %v435_v21 = vadd.f32 %v434_v19, %v433_v17  ;;  %v456_v22 = vrot.slane %v455_v20, 2 }
  0xc7   : > { %v436_v23 = vrot.slane %v435_v21, 1  ;;  %v457_v24 = vadd.f32 %v456_v22, %v455_v20 }
  0xc9   : > { %v437_v25 = vadd.f32 %v436_v23, %v435_v21  ;;  %v458_v26 = vrot.slane %v457_v24, 1 }
  0xcb   : > { %438 = vst [vmem:[%s268_s8] sm:$0x1] %v437_v25  ;;  %v459_v27 = vadd.f32 %v458_v26, %v457_v24 }
  0xcd   : > { %460 = vst [vmem:[%s271_s11] sm:$0x1] %v459_v27 }
  0xce PF: > { %s17_s21 = sadd.s32 1, %s681_s21  }
  0xcf   : > { %p14_p5 = scmp.ge.s32.totalorder %s17_s21, 4  }
  0xd1   :  { %16 = sbr.rel (!%p14_p5) target bundleno = 1 (0x1), region = 90 }

// kernel: fmf_hourglass_forward.23
= control target key start
LH: loop header
LB: loop body
LE: loop exit
PB: predicated region body
PF: predicated region fallthrough
CT: control target
= control target key end

     0   :  { %s790_s24 = smov 0   ;;  %s875_s0 = inlined_call_operand.vmem [shape: bf16[128,128], index: 0, kind: input, shape index: {}]   ;;  %s876_s1 = inlined_call_operand.vmem [shape: f32[1,128], index: 1, kind: input, shape index: {}]   ;;  %s877_s2 = inlined_call_operand.vmem [shape: f32[1,128], index: 2, kind: input, shape index: {}]   ;;  %s878_s3 = inlined_call_operand.vmem [shape: bf16[128,128], index: 3, kind: input, shape index: {}]   ;;  %s879_s4 = inlined_call_operand.vmem [shape: f32[128,128], index: 4, kind: input, shape index: {}]   ;;  %s880_s5 = inlined_call_operand.vmem [shape: f32[128,128], index: 5, kind: output, shape index: {0}]   ;;  %s881_s6 = inlined_call_operand.vmem [shape: f32[2,1,128], index: 6, kind: output, shape index: {1}]   ;;  %s882_s7 = inlined_call_operand.vmem [shape: f32[2,1,128], index: 7, kind: output, shape index: {2}]  }
   0x1 LB: > { %s796_s25 = sadd.s32 4294967295, %s748_s24   ;;  %p640_p0 = scmp.ge.s32.totalorder %s748_s24, 1  ;;  %s748_s24 = sphi %s790_s24, %s18_s24  }
   0x2   : > { %p254_p1 = scmp.lt.s32.totalorder %s748_s24, 3 }
   0x4   : > { %p255_p2 = pnand %p640_p0, %p254_p1 }
   0x5   : > { %s641_s28 = sshll.u32 (!%p255_p2), %s796_s25, 3  ;;  %p315_p4 = scmp.lt.s32.totalorder (!%p255_p2), %s796_s25, 1 }
   0x6   : > { %258 = sbr.rel (%p255_p2) target bundleno = 208 (0xd0), region = 40  ;;  %p298_p3 = scmp.lt.s32.totalorder (!%p255_p2), %s641_s28, 15 }
   0xb   : > { %v688_v0 = vld [vmem:[%s878_s3 + $0x38] sm:$0xff]  ;;  %v687_v1 = vld [vmem:[%s878_s3 + $0x30] sm:$0xff]  ;;  %s884_s28 = smov (!%p298_p3, %s641_s28), 15  ;;  %v686_v2 = vld [vmem:[%s878_s3 + $0x28] sm:$0xff]  ;;  %s886_s25 = smov (!%p315_p4, %s796_s25), 1 }
   0xc   : > { %445 = vmatpush.bf16.msra.mxu0 %v688_v0  ;;  %708 = vmatpush.bf16.msra.mxu1 %v688_v0  ;;  %s642_s8 = sshll.u32 %s884_s28, 2  ;;  %v685_v4 = vld [vmem:[%s878_s3 + $0x20] sm:$0xff]  ;;  %v684_v14 = vld [vmem:[%s878_s3 + $0x18] sm:$0xff]  ;;  %v683_v24 = vld [vmem:[%s878_s3 + $0x10] sm:$0xff]  ;;  %s317_s16 = scalar_lea.vmem %s881_s6, %s886_s25 }
   0xd   : > { %709 = vmatpush.bf16.msra.mxu2 %v688_v0  ;;  %710 = vmatpush.bf16.msra.mxu3 %v688_v0  ;;  %s301_s13 = scalar_lea.vmem %s875_s0, %s642_s8  ;;  %v740_v9 = vld [vmem:[%s876_s1] ss:$0 sm:$0xff]  ;;  %v682_v33 = vld [vmem:[%s878_s3 + $0x8] sm:$0xff]  ;;  %s644_s8 = sshll.u32 %s884_s28, 3 }
   0xe   : > { %v690_v3 = vld [vmem:[%s301_s13] sm:$0xff]   ;;  %v705_v5 = vld [vmem:[%s301_s13 + $0x8] sm:$0xff]   ;;  %v706_v6 = vld [vmem:[%s301_s13 + $0x10] sm:$0xff]   ;;  %s841_s11 = scalar_lea.vmem %s879_s4, %s644_s8  ;;  %s848_s14 = scalar_lea.vmem %s880_s5, %s644_s8 }
   0xf   : > { %v707_v7 = vld [vmem:[%s301_s13 + $0x18] sm:$0xff]   ;;  %v691_v8 = vunpack.c.l.bf16 %v690_v3  ;;  %v692_v10 = vunpack.c.h.bf16 %v690_v3  ;;  %v695_v11 = vunpack.c.l.bf16 %v705_v5  ;;  %v696_v12 = vunpack.c.h.bf16 %v705_v5  ;;  %v741_v19 = vld [vmem:[%s877_s2] ss:$0 sm:$0xff]  ;;  %v391_v51 = vld [vmem:[%s841_s11 + $0x10] sm:$0xff]  ;;  %s320_s19 = scalar_lea.vmem %s882_s7, %s886_s25 }
  0x10   : > { %446 = vmatpush.bf16.msra.mxu0 %v687_v1  ;;  %711 = vmatpush.bf16.msra.mxu1 %v687_v1  ;;  %v699_v13 = vunpack.c.l.bf16 %v706_v6  ;;  %v700_v15 = vunpack.c.h.bf16 %v706_v6  ;;  %v703_v16 = vunpack.c.l.bf16 %v707_v7  ;;  %v704_v17 = vunpack.c.h.bf16 %v707_v7  ;;  %v681_v41 = vld [vmem:[%s878_s3] sm:$0xff]  ;;  %v395_v57 = vld [vmem:[%s841_s11 + $0x30] sm:$0xff]  ;;  %v390_v58 = vld [vmem:[%s841_s11 + $0x8] sm:$0xff] }
  0x11   : > { %712 = vmatpush.bf16.msra.mxu2 %v687_v1  ;;  %713 = vmatpush.bf16.msra.mxu3 %v687_v1  ;;  %v341_v18 = vmul.f32 %v740_v9, %v691_v8  ;;  %v342_v20 = vmul.f32 %v740_v9, %v692_v10  ;;  %v343_v21 = vmul.f32 %v740_v9, %v695_v11  ;;  %v389_v50 = vld [vmem:[%s841_s11] sm:$0xff]  ;;  %v392_v59 = vld [vmem:[%s841_s11 + $0x18] sm:$0xff]  ;;  %v394_v10 = vld [vmem:[%s841_s11 + $0x28] sm:$0xff] }
  0x12   : > { %v344_v22 = vmul.f32 %v740_v9, %v696_v12  ;;  %v345_v23 = vmul.f32 %v740_v9, %v699_v13  ;;  %v346_v25 = vmul.f32 %v740_v9, %v700_v15  ;;  %v347_v26 = vmul.f32 %v740_v9, %v703_v16  ;;  %v393_v56 = vld [vmem:[%s841_s11 + $0x20] sm:$0xff]  ;;  %v396_v11 = vld [vmem:[%s841_s11 + $0x38] sm:$0xff] }
  0x13   : > { %v348_v27 = vmul.f32 %v740_v9, %v704_v17  ;;  %v353_v28 = vadd.f32 %v741_v19, %v341_v18  ;;  %v354_v29 = vadd.f32 %v741_v19, %v342_v20  ;;  %v355_v30 = vadd.f32 %v741_v19, %v343_v21 }
  0x14   : > { %447 = vmatpush.bf16.msra.mxu0 %v686_v2  ;;  %714 = vmatpush.bf16.msra.mxu1 %v686_v2  ;;  %v356_v31 = vadd.f32 %v741_v19, %v344_v22  ;;  %v357_v32 = vadd.f32 %v741_v19, %v345_v23  ;;  %v358_v34 = vadd.f32 %v741_v19, %v346_v25 }
  0x15   : > { %715 = vmatpush.bf16.msra.mxu2 %v686_v2  ;;  %716 = vmatpush.bf16.msra.mxu3 %v686_v2  ;;  %v359_v35 = vadd.f32 %v741_v19, %v347_v26  ;;  %v360_v36 = vadd.f32 %v741_v19, %v348_v27  ;;  %v361_v37 = vmax.f32 %v353_v28, 0.0  ;;  %v362_v38 = vmax.f32 %v354_v29, 0.0 }
  0x16   : > { %v363_v39 = vmax.f32 %v355_v30, 0.0  ;;  %v364_v40 = vmax.f32 %v356_v31, 0.0  ;;  %v365_v42 = vmax.f32 %v357_v32, 0.0  ;;  %v366_v43 = vmax.f32 %v358_v34, 0.0 }
  0x17   : > { %v367_v44 = vmax.f32 %v359_v35, 0.0  ;;  %v368_v45 = vmax.f32 %v360_v36, 0.0  ;;  %v369_v46 = vpack.c.bf16 %v362_v38, %v361_v37 }
  0x18   : > { %448 = vmatpush.bf16.msra.mxu0 %v685_v4  ;;  %717 = vmatpush.bf16.msra.mxu1 %v685_v4  ;;  %v370_v47 = vpack.c.bf16 %v364_v40, %v363_v39  ;;  %v371_v48 = vpack.c.bf16 %v366_v43, %v365_v42 }
  0x19   : > { %718 = vmatpush.bf16.msra.mxu2 %v685_v4  ;;  %719 = vmatpush.bf16.msra.mxu3 %v685_v4  ;;  %v372_v49 = vpack.c.bf16 %v368_v45, %v367_v44 }
  0x1c   : > { %449 = vmatpush.bf16.msra.mxu0 %v684_v14  ;;  %720 = vmatpush.bf16.msra.mxu1 %v684_v14 }
  0x1d   : > { %721 = vmatpush.bf16.msra.mxu2 %v684_v14  ;;  %722 = vmatpush.bf16.msra.mxu3 %v684_v14 }
  0x20   : > { %450 = vmatpush.bf16.msra.mxu0 %v683_v24  ;;  %723 = vmatpush.bf16.msra.mxu1 %v683_v24 }
  0x21   : > { %724 = vmatpush.bf16.msra.mxu2 %v683_v24  ;;  %725 = vmatpush.bf16.msra.mxu3 %v683_v24 }
  0x24   : > { %451 = vmatpush.bf16.msra.mxu0 %v682_v33  ;;  %726 = vmatpush.bf16.msra.mxu1 %v682_v33 }
  0x25   : > { %727 = vmatpush.bf16.msra.mxu2 %v682_v33  ;;  %728 = vmatpush.bf16.msra.mxu3 %v682_v33 }
  0x28   : > { %452 = vmatpush.bf16.msra.mxu0 %v681_v41  ;;  %729 = vmatpush.bf16.msra.mxu1 %v681_v41 }
  0x29   : > { %730 = vmatpush.bf16.msra.mxu2 %v681_v41  ;;  %731 = vmatpush.bf16.msra.mxu3 %v681_v41 }
  0x2b   : > { %453 = vmatmul.bf16.vlgmr.msra.gmra.mxu0 %v369_v46  ;;  %458 = vmatmul.bf16.vlgmr.msra.gmra.mxu1 %v370_v47 }
  0x2c   : > { %463 = vmatmul.bf16.vlgmr.msra.gmra.mxu2 %v371_v48  ;;  %468 = vmatmul.bf16.vlgmr.msra.gmra.mxu3 %v372_v49 }
  0xa8   : > { %v454_v52 = vpop.f32.mrf.mxu0  ;;  %v459_v53 = vpop.f32.mrf.mxu1 }
  0xa9   : > { %v455_v54 = vadd.f32 %v454_v52, %v389_v50  ;;  %v460_v55 = vadd.f32 %v459_v53, %v391_v51 }
  0xab   : > { %474 = vst [vmem:[%s848_s14] sm:$0xff] %v455_v54  ;;  %v496_v4 = vmul.f32 %v455_v54, %v455_v54  ;;  %v498_v7 = vmul.f32 %v460_v55, %v460_v55 }
  0xac   : > { %476 = vst [vmem:[%s848_s14 + $0x10] sm:$0xff] %v460_v55 }
  0xaf   : > { %v464_v60 = vpop.f32.mrf.mxu2  ;;  %v469_v61 = vpop.f32.mrf.mxu3 }
  0xb0   : > { %v465_v62 = vadd.f32 %v464_v60, %v393_v56  ;;  %v470_v63 = vadd.f32 %v469_v61, %v395_v57  ;;  %v456_v0 = vpop.f32.mrf.mxu0  ;;  %v461_v1 = vpop.f32.mrf.mxu1 }
  0xb1   : > { %v457_v2 = vadd.f32 %v456_v0, %v390_v58  ;;  %v462_v3 = vadd.f32 %v461_v1, %v392_v59 }
  0xb2   : > { %478 = vst [vmem:[%s848_s14 + $0x20] sm:$0xff] %v465_v62  ;;  %v500_v19 = vmul.f32 %v465_v62, %v465_v62  ;;  %v502_v25 = vmul.f32 %v470_v63, %v470_v63 }
  0xb3   : > { %480 = vst [vmem:[%s848_s14 + $0x30] sm:$0xff] %v470_v63  ;;  %v482_v5 = vadd.f32 %v457_v2, %v455_v54  ;;  %v497_v6 = vmul.f32 %v457_v2, %v457_v2  ;;  %v499_v13 = vmul.f32 %v462_v3, %v462_v3 }
  0xb4   : > { %475 = vst [vmem:[%s848_s14 + $0x8] sm:$0xff] %v457_v2 }
  0xb5   : > { %v504_v8 = vadd.f32 %v497_v6, %v496_v4  ;;  %477 = vst [vmem:[%s848_s14 + $0x18] sm:$0xff] %v462_v3  ;;  %v483_v9 = vadd.f32 %v482_v5, %v460_v55 }
  0xb7   : > { %v484_v12 = vadd.f32 %v483_v9, %v462_v3  ;;  %v505_v14 = vadd.f32 %v504_v8, %v498_v7  ;;  %v466_v15 = vpop.f32.mrf.mxu2  ;;  %v471_v16 = vpop.f32.mrf.mxu3 }
  0xb8   : > { %v467_v17 = vadd.f32 %v466_v15, %v394_v10  ;;  %v472_v18 = vadd.f32 %v471_v16, %v396_v11 }
  0xb9   : > { %v506_v20 = vadd.f32 %v505_v14, %v499_v13  ;;  %v485_v21 = vadd.f32 %v484_v12, %v465_v62 }
  0xba   : > { %479 = vst [vmem:[%s848_s14 + $0x28] sm:$0xff] %v467_v17  ;;  %v501_v23 = vmul.f32 %v467_v17, %v467_v17  ;;  %v503_v29 = vmul.f32 %v472_v18, %v472_v18 }
  0xbb   : > { %v486_v22 = vadd.f32 %v485_v21, %v467_v17  ;;  %v507_v24 = vadd.f32 %v506_v20, %v500_v19  ;;  %481 = vst [vmem:[%s848_s14 + $0x38] sm:$0xff] %v472_v18 }
  0xbd   : > { %v508_v26 = vadd.f32 %v507_v24, %v501_v23  ;;  %v487_v27 = vadd.f32 %v486_v22, %v470_v63 }
  0xbf   : > { %v488_v28 = vadd.f32 %v487_v27, %v472_v18  ;;  %v509_v30 = vadd.f32 %v508_v26, %v502_v25 }
  0xc1   : > { %v489_v31 = vrot.slane %v488_v28, 4  ;;  %v510_v32 = vadd.f32 %v509_v30, %v503_v29 }
  0xc3   : > { %v490_v33 = vadd.f32 %v489_v31, %v488_v28  ;;  %v511_v34 = vrot.slane %v510_v32, 4 }
  0xc5   : > { %v491_v35 = vrot.slane %v490_v33, 2  ;;  %v512_v36 = vadd.f32 %v511_v34, %v510_v32 }
  0xc7   : > { %v492_v37 = vadd.f32 %v491_v35, %v490_v33  ;;  %v513_v38 = vrot.slane %v512_v36, 2 }
  0xc9   : > { %v493_v39 = vrot.slane %v492_v37, 1  ;;  %v514_v40 = vadd.f32 %v513_v38, %v512_v36 }
  0xcb   : > { %v494_v41 = vadd.f32 %v493_v39, %v492_v37  ;;  %v515_v42 = vrot.slane %v514_v40, 1 }
  0xcd   : > { %495 = vst [vmem:[%s317_s16] sm:$0x1] %v494_v41  ;;  %v516_v43 = vadd.f32 %v515_v42, %v514_v40 }
  0xcf   : > { %517 = vst [vmem:[%s320_s19] sm:$0x1] %v516_v43 }
  0xd0 PF: > { %s18_s24 = sadd.s32 1, %s748_s24  }
  0xd1   : > { %p15_p5 = scmp.ge.s32.totalorder %s18_s24, 4  }
  0xd3   :  { %17 = sbr.rel (!%p15_p5) target bundleno = 1 (0x1), region = 97 }

// kernel: fmf_hourglass_forward.22
= control target key start
LH: loop header
LB: loop body
LE: loop exit
PB: predicated region body
PF: predicated region fallthrough
CT: control target
= control target key end

     0   :  { %s2625_s27 = smov 0   ;;  %s2627_s28 = smov 0   ;;  %s3151_s0 = inlined_call_operand.vmem [shape: bf16[2,8,8,128], index: 0, kind: input, shape index: {}, may-alias: {0,1,2}]   ;;  %s3152_s1 = inlined_call_operand.vmem [shape: bf16[2,8,8,128], index: 1, kind: input, shape index: {}, may-alias: {0,1,2}]   ;;  %s3153_s2 = inlined_call_operand.vmem [shape: bf16[2,8,8,128], index: 2, kind: input, shape index: {}, may-alias: {0,1,2}]   ;;  %s3154_s3 = inlined_call_operand.vmem [shape: f32[1,128], index: 3, kind: input, shape index: {}]   ;;  %s3155_s4 = inlined_call_operand.vmem [shape: f32[1,128], index: 4, kind: input, shape index: {}]   ;;  %s3156_s5 = inlined_call_operand.vmem [shape: bf16[3,384,128], index: 5, kind: input, shape index: {}]   ;;  %s3157_s6 = inlined_call_operand.vmem [shape: bf16[2,8,8,128], index: 6, kind: output, shape index: {0}]   ;;  %s3158_s7 = inlined_call_operand.vmem [shape: f32[2,1,1,128], index: 7, kind: output, shape index: {1}]   ;;  %s3159_s8 = inlined_call_operand.vmem [shape: f32[2,1,1,128], index: 8, kind: output, shape index: {2}]  }
   0x1   :  { %s2629_s29 = smov 0  }
   0x2 LB: > { %s31_s30 = sadd.s32 1, %s2574_s28  ;;  %p1903_p0 = scmp.ge.s32.totalorder %s2578_s29, 1  ;;  %s2578_s29 = sphi %s2629_s29, %s19_s29   ;;  %s2574_s28 = sphi %s2627_s28, %s3165_s28   ;;  %s2570_s27 = sphi %s2625_s27, %s3164_s27  }
   0x3   : > { %p33_p1 = scmp.ge.s32.totalorder %s31_s30, 2  ;;  %p354_p2 = scmp.lt.s32.totalorder %s2578_s29, 3 }
   0x5   : > { %s3167_s30 = smov (%p33_p1, %s31_s30), 0  ;;  %p355_p3 = pnand %p1903_p0, %p354_p2 }
   0x6   : > { %p436_p4 = scmp.lt.s32.totalorder (!%p355_p3), %s2570_s27, 1 }
   0x7   : > { %358 = sbr.rel (%p355_p3) target bundleno = 344 (0x158), region = 44 }
   0xc   : > { %v2430_v0 = vld [vmem:[%s3156_s5 + $0xf8] sm:$0xff]  ;;  %v2429_v3 = vld [vmem:[%s3156_s5 + $0xf0] sm:$0xff]  ;;  %s3169_s27 = smov (!%p436_p4, %s2570_s27), 1  ;;  %v2428_v6 = vld [vmem:[%s3156_s5 + $0xe8] sm:$0xff]  ;;  %vm608_vm0 = vcmask 1040384   ;;  %vm633_vm2 = vcmask 1046528  }
   0xd   : > { %v2446_v1 = vld [vmem:[%s3156_s5 + $0x178] sm:$0xff]  ;;  %971 = vmatpush.bf16.msra.mxu0 %v2430_v0  ;;  %2514 = vmatpush.bf16.msra.mxu1 %v2430_v0  ;;  %v2445_v4 = vld [vmem:[%s3156_s5 + $0x170] sm:$0xff]  ;;  %s2664_s21 = sshll.u32 %s3169_s27, 5  ;;  %v2444_v7 = vld [vmem:[%s3156_s5 + $0x168] sm:$0xff]  ;;  %s489_s19 = scalar_lea.vmem %s3158_s7, %s3169_s27 }
   0xe   : > { %v2406_v2 = vld [vmem:[%s3156_s5 + $0x38] sm:$0xff]  ;;  %1029 = vmatpush.bf16.msra.mxu2 %v2446_v1  ;;  %v2405_v5 = vld [vmem:[%s3156_s5 + $0x30] sm:$0xff]  ;;  %s2673_s26 = scalar_lea.vmem %s3152_s1, %s2664_s21  ;;  %v2404_v8 = vld [vmem:[%s3156_s5 + $0x28] sm:$0xff]  ;;  %s443_s17 = scalar_lea.vmem %s3151_s0, %s2664_s21 }
   0xf   : > { %1202 = vmatpush.bf16.msra.mxu3 %v2406_v2  ;;  %v2684_v9 = vld [vmem:[%s3154_s3] ss:$0 sm:$0xff]  ;;  %v2509_v15 = vld [vmem:[%s2673_s26 + $0x10] sm:$0xff]   ;;  %v2426_v26 = vld [vmem:[%s3156_s5 + $0xd8] sm:$0xff]  ;;  %s2397_s15 = sadd.s32 28, %s2664_s21 }
  0x10   : > { %v2472_v10 = vld [vmem:[%s2673_s26] sm:$0xff]   ;;  %v2481_v18 = vunpack.c.l.bf16 %v2509_v15  ;;  %v2482_v19 = vunpack.c.h.bf16 %v2509_v15  ;;  %v2508_v29 = vld [vmem:[%s2673_s26 + $0x8] sm:$0xff]   ;;  %v2442_v30 = vld [vmem:[%s3156_s5 + $0x158] sm:$0xff]  ;;  %s469_s23 = scalar_lea.vmem %s3153_s2, %s2397_s15 }
  0x11   : > { %972 = vmatpush.bf16.msra.mxu0 %v2429_v3  ;;  %2515 = vmatpush.bf16.msra.mxu1 %v2429_v3  ;;  %v2427_v11 = vld [vmem:[%s3156_s5 + $0xe0] sm:$0xff]  ;;  %v2473_v13 = vunpack.c.l.bf16 %v2472_v10  ;;  %v2474_v14 = vunpack.c.h.bf16 %v2472_v10  ;;  %v2402_v31 = vld [vmem:[%s3156_s5 + $0x18] sm:$0xff]  ;;  %v2477_v33 = vunpack.c.l.bf16 %v2508_v29  ;;  %v2425_v38 = vld [vmem:[%s3156_s5 + $0xd0] sm:$0xff]  ;;  %v2478_v56 = vunpack.c.h.bf16 %v2508_v29 }
  0x12   : > { %1030 = vmatpush.bf16.msra.mxu2 %v2445_v4  ;;  %v2697_v12 = vld [vmem:[%s3155_s4] ss:$0 sm:$0xff]  ;;  %v538_v24 = vmul.f32 %v2684_v9, %v2481_v18  ;;  %v539_v25 = vmul.f32 %v2684_v9, %v2482_v19  ;;  %v2441_v41 = vld [vmem:[%s3156_s5 + $0x150] sm:$0xff]  ;;  %v2510_v49 = vld [vmem:[%s2673_s26 + $0x18] sm:$0xff]  }
  0x13   : > { %1203 = vmatpush.bf16.msra.mxu3 %v2405_v5  ;;  %v2443_v16 = vld [vmem:[%s3156_s5 + $0x160] sm:$0xff]  ;;  %v534_v21 = vmul.f32 %v2684_v9, %v2473_v13  ;;  %v535_v22 = vmul.f32 %v2684_v9, %v2474_v14  ;;  %v536_v37 = vmul.f32 %v2684_v9, %v2477_v33  ;;  %v2401_v42 = vld [vmem:[%s3156_s5 + $0x10] sm:$0xff]  ;;  %v2424_v50 = vld [vmem:[%s3156_s5 + $0xc8] sm:$0xff]  ;;  %v2485_v61 = vunpack.c.l.bf16 %v2510_v49 }
  0x14   : > { %v2403_v17 = vld [vmem:[%s3156_s5 + $0x20] sm:$0xff]  ;;  %v546_v35 = vadd.f32 %v2697_v12, %v538_v24  ;;  %v547_v36 = vadd.f32 %v2697_v12, %v539_v25  ;;  %v2440_v53 = vld [vmem:[%s3156_s5 + $0x148] sm:$0xff]  ;;  %v2486_v0 = vunpack.c.h.bf16 %v2510_v49  ;;  %vm2056_vm1 = vmneg %vm608_vm0 }
  0x15   : > { %973 = vmatpush.bf16.msra.mxu0 %v2428_v6  ;;  %2516 = vmatpush.bf16.msra.mxu1 %v2428_v6  ;;  %v504_v20 = vld [vmem:[%s443_s17] sm:$0xf]  ;;  %v542_v27 = vadd.f32 %v2697_v12, %v534_v21  ;;  %v543_v32 = vadd.f32 %v2697_v12, %v535_v22  ;;  %v544_v44 = vadd.f32 %v2697_v12, %v536_v37  ;;  %v2400_v54 = vld [vmem:[%s3156_s5 + $0x8] sm:$0xff]  ;;  %v2438_v6 = vld [vmem:[%s3156_s5 + $0x138] sm:$0xff]  ;;  %s3117_s17 = scalar_lea.vmem %s3157_s6, %s2664_s21 }
  0x16   : > { %1031 = vmatpush.bf16.msra.mxu2 %v2444_v7  ;;  %v505_v23 = vunpack.c.l.bf16 %v504_v20  ;;  %v2743_v46 = vmax.f32 %v546_v35, 0.0  ;;  %v2745_v47 = vmax.f32 %v547_v36, 0.0  ;;  %v2423_v2 = vld [vmem:[%s3156_s5 + $0xc0] sm:$0xff]  ;;  %v2414_v7 = vld [vmem:[%s3156_s5 + $0x78] sm:$0xff]  ;;  %v540_v13 = vmul.f32 %v2684_v9, %v2485_v61  ;;  %vm2799_vm3 = vmpackc.low %vm2056_vm1, %vm2056_vm1 }
  0x17   : > { %1204 = vmatpush.bf16.msra.mxu3 %v2404_v8  ;;  %v2730_v39 = vmax.f32 %v542_v27, 0.0  ;;  %v2738_v43 = vmax.f32 %v543_v32, 0.0  ;;  %v2747_v48 = vmax.f32 %v544_v44, 0.0  ;;  %v2439_v4 = vld [vmem:[%s3156_s5 + $0x140] sm:$0xff]  ;;  %v537_v8 = vmul.f32 %v2684_v9, %v2478_v56  ;;  %vm2803_vm4 = vmpackc.low %vm633_vm2, %vm633_vm2  ;;  %v2454_v19 = vld [vmem:[%s3156_s5 + $0x1b8] sm:$0xff] }
  0x18   : > { %v509_v28 = vmul.f32 %v2684_v9, %v505_v23  ;;  %v597_v62 = vrot.slane %v2743_v46, 7  ;;  %v598_v63 = vrot.slane %v2745_v47, 7  ;;  %v2399_v5 = vld [vmem:[%s3156_s5] sm:$0xff]  ;;  %v541_v14 = vmul.f32 %v2684_v9, %v2486_v0  ;;  %v2462_v20 = vld [vmem:[%s3156_s5 + $0x1f8] sm:$0xff]  ;;  %v2437_v21 = vld [vmem:[%s3156_s5 + $0x130] sm:$0xff] }
  0x19   : > { %974 = vmatpush.bf16.msra.mxu0 %v2427_v11  ;;  %2517 = vmatpush.bf16.msra.mxu1 %v2427_v11  ;;  %v618_v52 = vrot.slane %v2730_v39, 1  ;;  %v619_v55 = vrot.slane %v2738_v43, 1  ;;  %v620_v57 = vrot.slane %v2747_v48, 1  ;;  %v593_v58 = vrot.slane %v2730_v39, 7  ;;  %v2413_v22 = vld [vmem:[%s3156_s5 + $0x70] sm:$0xff]  ;;  %v2412_v29 = vld [vmem:[%s3156_s5 + $0x68] sm:$0xff] }
  0x1a   : > { %1032 = vmatpush.bf16.msra.mxu2 %v2443_v16  ;;  %v513_v34 = vadd.f32 %v2697_v12, %v509_v28  ;;  %v594_v59 = vrot.slane %v2738_v43, 7  ;;  %v2069_v11 = vpack.c.bf16 %v598_v63, %v597_v62  ;;  %v545_v23 = vadd.f32 %v2697_v12, %v537_v8  ;;  %v2461_v27 = vld [vmem:[%s3156_s5 + $0x1f0] sm:$0xff]  ;;  %v2436_v28 = vld [vmem:[%s3156_s5 + $0x128] sm:$0xff]  ;;  %v2435_v35 = vld [vmem:[%s3156_s5 + $0x120] sm:$0xff] }
  0x1b   : > { %1205 = vmatpush.bf16.msra.mxu3 %v2403_v17  ;;  %v2771_v1 = vpack.c.bf16 %v620_v57, %v619_v55  ;;  %v2077_v16 = vpack.c.bf16 %v619_v55, %v618_v52  ;;  %v548_v24 = vadd.f32 %v2697_v12, %v540_v13  ;;  %v549_v25 = vadd.f32 %v2697_v12, %v541_v14  ;;  %v2452_v33 = vld [vmem:[%s3156_s5 + $0x1a8] sm:$0xff]  ;;  %v2411_v36 = vld [vmem:[%s3156_s5 + $0x60] sm:$0xff]  ;;  %v2450_v56 = vld [vmem:[%s3156_s5 + $0x198] sm:$0xff] }
  0x1c   : > { %v514_v40 = vmax.f32 %v513_v34, 0.0  ;;  %v2059_v10 = vpack.c.bf16 %v594_v59, %v593_v58  ;;  %v2460_v34 = vld [vmem:[%s3156_s5 + $0x1e8] sm:$0xff]  ;;  %v595_v37 = vrot.slane %v2747_v48, 7  ;;  %v2451_v44 = vld [vmem:[%s3156_s5 + $0x1a0] sm:$0xff]  ;;  %v2458_v0 = vld [vmem:[%s3156_s5 + $0x1d8] sm:$0xff] }
  0x1d   : > { %975 = vmatpush.bf16.msra.mxu0 %v2426_v26  ;;  %2518 = vmatpush.bf16.msra.mxu1 %v2426_v26  ;;  %v2453_v26 = vld [vmem:[%s3156_s5 + $0x1b0] sm:$0xff]  ;;  %v2846_v32 = vmax.f32 %v549_v25, 0.0  ;;  %v2459_v49 = vld [vmem:[%s3156_s5 + $0x1e0] sm:$0xff]  ;;  %v2470_v14 = vld [vmem:[%s3156_s5 + $0x238] sm:$0xff] }
  0x1e   : > { %1033 = vmatpush.bf16.msra.mxu2 %v2442_v30  ;;  %v2741_v45 = vmul.f32 0.0, %v514_v40  ;;  %v2842_v30 = vmax.f32 %v545_v23, 0.0  ;;  %v2890_v55 = vpack.c.bf16 %v595_v37, %v594_v59  ;;  %v567_v59 = vld [vmem:[%s469_s23] sm:$0xf]  ;;  %s495_s23 = scalar_lea.vmem %s3159_s8, %s3169_s27 }
  0x1f   : > { %1206 = vmatpush.bf16.msra.mxu3 %v2402_v31  ;;  %v2844_v31 = vmax.f32 %v548_v24, 0.0  ;;  %v568_v61 = vunpack.c.l.bf16 %v567_v59  ;;  %v767_v24 = vpack.c.bf16 %v2738_v43, %v2730_v39 }
  0x20   : > { %v617_v51 = vrot.slane %v2741_v45, 1  ;;  %v592_v3 = vrot.slane %v2741_v45, 7  ;;  %v643_v25 = vpack.c.bf16 %v2730_v39, %v2741_v45  ;;  %v2421_v39 = vld [vmem:[%s3156_s5 + $0xb0] sm:$0xff] }
  0x21   : > { %976 = vmatpush.bf16.msra.mxu0 %v2425_v38  ;;  %2519 = vmatpush.bf16.msra.mxu1 %v2425_v38  ;;  %v596_v38 = vrot.slane %v2842_v30, 7  ;;  %v599_v40 = vrot.slane %v2844_v31, 7  ;;  %v2469_v45 = vld [vmem:[%s3156_s5 + $0x230] sm:$0xff] }
  0x22   : > { %1034 = vmatpush.bf16.msra.mxu2 %v2441_v41  ;;  %v2765_v60 = vpack.c.bf16 %v618_v52, %v617_v51  ;;  %v2187_v17 = vpack.c.bf16 %v593_v58, %v592_v3  ;;  %v725_v41 = vrot.slane %v2846_v32, 7  ;;  %v2410_v51 = vld [vmem:[%s3156_s5 + $0x58] sm:$0xff]  ;;  %v2409_v58 = vld [vmem:[%s3156_s5 + $0x50] sm:$0xff] }
  0x23   : > { %1207 = vmatpush.bf16.msra.mxu3 %v2401_v42  ;;  %v621_v42 = vrot.slane %v2842_v30, 1  ;;  %v2064_v52 = vpack.c.bf16 %v596_v38, %v595_v37  ;;  %v2449_v3 = vld [vmem:[%s3156_s5 + $0x190] sm:$0xff]  ;;  %v2418_v37 = vld [vmem:[%s3156_s5 + $0x98] sm:$0xff] }
  0x25   : > { %977 = vmatpush.bf16.msra.mxu0 %v2424_v50  ;;  %2520 = vmatpush.bf16.msra.mxu1 %v2424_v50  ;;  %v2434_v50 = vld [vmem:[%s3156_s5 + $0x118] sm:$0xff] }
  0x26   : > { %1035 = vmatpush.bf16.msra.mxu2 %v2440_v53  ;;  %v2074_v53 = vpack.c.bf16 %v725_v41, %v599_v40 }
  0x27   : > { %1208 = vmatpush.bf16.msra.mxu3 %v2400_v54  ;;  %v2080_v54 = vpack.c.bf16 %v621_v42, %v620_v57  ;;  %v2433_v57 = vld [vmem:[%s3156_s5 + $0x110] sm:$0xff] }
  0x29   : > { %978 = vmatpush.bf16.msra.mxu0 %v2423_v2  ;;  %2521 = vmatpush.bf16.msra.mxu1 %v2423_v2  ;;  %v773_v2 = vpack.c.bf16 %v2745_v47, %v2743_v46 }
  0x2a   : > { %1036 = vmatpush.bf16.msra.mxu2 %v2439_v4  ;;  %v2432_v4 = vld [vmem:[%s3156_s5 + $0x108] sm:$0xff] }
  0x2b   : > { %1209 = vmatpush.bf16.msra.mxu3 %v2399_v5  ;;  %v2408_v5 = vld [vmem:[%s3156_s5 + $0x48] sm:$0xff] }
  0x2c   : > { %2060 = vmatmul.msk.bf16.vlgmr.msra.gmra.mxu0 %vm2799_vm3, %v2059_v10  ;;  %2070 = vmatmul.msk.bf16.vlgmr.msra.gmra.mxu1 %vm2799_vm3, %v2069_v11  ;;  %v2448_v10 = vld [vmem:[%s3156_s5 + $0x188] sm:$0xff]  ;;  %v2431_v11 = vld [vmem:[%s3156_s5 + $0x100] sm:$0xff] }
  0x2d   : > { %1000 = vmatpush.bf16.msrb.mxu1 %v2438_v6  ;;  %1231 = vmatpush.bf16.msrb.mxu0 %v2414_v7  ;;  %v569_v6 = vmul.f32 %v2684_v9, %v568_v61  ;;  %v2457_v7 = vld [vmem:[%s3156_s5 + $0x1d0] sm:$0xff]  ;;  %v2407_v9 = vld [vmem:[%s3156_s5 + $0x40] sm:$0xff] }
  0x2e   : > { %2078 = vmatmul.msk.bf16.vlgmr.msra.gmra.mxu2 %vm2803_vm4, %v2077_v16  ;;  %2188 = vmatmul.msk.bf16.vlgmr.msra.gmra.mxu3 %vm2799_vm3, %v2187_v17  ;;  %v622_v16 = vrot.slane %v2743_v46, 1  ;;  %v623_v17 = vrot.slane %v2745_v47, 1 }
  0x2f   : > { %1559 = vmatpush.bf16.msrb.mxu2 %v2454_v19  ;;  %1588 = vmatpush.bf16.msrb.mxu3 %v2462_v20  ;;  %v570_v8 = vadd.f32 %v2697_v12, %v569_v6  ;;  %v2422_v12 = vld [vmem:[%s3156_s5 + $0xb8] sm:$0xff]  ;;  %v2456_v20 = vld [vmem:[%s3156_s5 + $0x1c8] sm:$0xff] }
  0x31   : > { %1001 = vmatpush.bf16.msrb.mxu1 %v2437_v21  ;;  %1232 = vmatpush.bf16.msrb.mxu0 %v2413_v22  ;;  %v571_v13 = vmax.f32 %v570_v8, 0.0  ;;  %v2447_v21 = vld [vmem:[%s3156_s5 + $0x180] sm:$0xff]  ;;  %v749_v22 = vrot.slane %v2846_v32, 1 }
  0x33   : > { %1560 = vmatpush.bf16.msrb.mxu2 %v2453_v26  ;;  %1589 = vmatpush.bf16.msrb.mxu3 %v2461_v27  ;;  %v2949_v19 = vmul.f32 0.0, %v571_v13  ;;  %v2083_v26 = vpack.c.bf16 %v623_v17, %v622_v16  ;;  %v2971_v27 = vpack.c.bf16 %v597_v62, %v596_v38  ;;  %v2420_v62 = vld [vmem:[%s3156_s5 + $0xa8] sm:$0xff]  ;;  %v2466_v38 = vld [vmem:[%s3156_s5 + $0x218] sm:$0xff] }
  0x35   : > { %1002 = vmatpush.bf16.msrb.mxu1 %v2436_v28  ;;  %1233 = vmatpush.bf16.msrb.mxu0 %v2412_v29  ;;  %v1337_v23 = vrot.slane %v2949_v19, 1  ;;  %v2455_v29 = vld [vmem:[%s3156_s5 + $0x1c0] sm:$0xff] }
  0x37   : > { %1561 = vmatpush.bf16.msrb.mxu2 %v2452_v33  ;;  %1590 = vmatpush.bf16.msrb.mxu3 %v2460_v34  ;;  %v2973_v28 = vpack.c.bf16 %v1337_v23, %v749_v22  ;;  %v2468_v33 = vld [vmem:[%s3156_s5 + $0x228] sm:$0xff]  ;;  %v2419_v34 = vld [vmem:[%s3156_s5 + $0xa0] sm:$0xff] }
  0x39   : > { %1003 = vmatpush.bf16.msrb.mxu1 %v2435_v35  ;;  %1234 = vmatpush.bf16.msrb.mxu0 %v2411_v36  ;;  %v2467_v35 = vld [vmem:[%s3156_s5 + $0x220] sm:$0xff]  ;;  %v624_v36 = vrot.slane %v2844_v31, 1 }
  0x3b   : > { %1562 = vmatpush.bf16.msrb.mxu2 %v2451_v44  ;;  %1591 = vmatpush.bf16.msrb.mxu3 %v2459_v49  ;;  %v770_v44 = vpack.c.bf16 %v2842_v30, %v2747_v48  ;;  %v646_v49 = vpack.c.bf16 %v2747_v48, %v2738_v43  ;;  %v2465_v43 = vld [vmem:[%s3156_s5 + $0x210] sm:$0xff]  ;;  %v2416_v48 = vld [vmem:[%s3156_s5 + $0x88] sm:$0xff] }
  0x3c   : > { %2065 = vmatmul.msk.bf16.gmra.mxu0 %vm2799_vm3, %v2064_v52  ;;  %2075 = vmatmul.msk.bf16.gmra.mxu1 %vm2799_vm3, %v2074_v53  ;;  %v2417_v52 = vld [vmem:[%s3156_s5 + $0x90] sm:$0xff]  ;;  %v652_v53 = vpack.c.bf16 %v2844_v31, %v2745_v47 }
  0x3d   : > { %1004 = vmatpush.bf16.msrb.mxu1 %v2434_v50  ;;  %1235 = vmatpush.bf16.msrb.mxu0 %v2410_v51  ;;  %v2086_v50 = vpack.c.bf16 %v749_v22, %v624_v36  ;;  %v2202_v51 = vpack.c.bf16 %v599_v40, %v598_v63  ;;  %v2464_v63 = vld [vmem:[%s3156_s5 + $0x208] sm:$0xff]  ;;  %v2415_v40 = vld [vmem:[%s3156_s5 + $0x80] sm:$0xff] }
  0x3e   : > { %2081 = vmatmul.msk.bf16.gmra.mxu2 %vm2803_vm4, %v2080_v54  ;;  %2193 = vmatmul.msk.bf16.gmra.mxu3 %vm2799_vm3, %v2890_v55  ;;  %v2463_v54 = vld [vmem:[%s3156_s5 + $0x200] sm:$0xff] }
  0x3f   : > { %1563 = vmatpush.bf16.msrb.mxu2 %v2450_v56  ;;  %1592 = vmatpush.bf16.msrb.mxu3 %v2458_v0  ;;  %v649_v56 = vpack.c.bf16 %v2743_v46, %v2842_v30  ;;  %v2214_v46 = vpack.c.bf16 %v624_v36, %v623_v17 }
  0x41   : > { %1005 = vmatpush.bf16.msrb.mxu1 %v2433_v57  ;;  %1236 = vmatpush.bf16.msrb.mxu0 %v2409_v58  ;;  %v776_v57 = vpack.c.bf16 %v2846_v32, %v2844_v31  ;;  %v1313_v31 = vrot.slane %v2949_v19, 7 }
  0x43   : > { %1564 = vmatpush.bf16.msrb.mxu2 %v2449_v3  ;;  %1593 = vmatpush.bf16.msrb.mxu3 %v2457_v7  ;;  %v2378_v58 = vpack.c.bf16 %v1313_v31, %v725_v41 }
  0x45   : > { %1006 = vmatpush.bf16.msrb.mxu1 %v2432_v4  ;;  %1237 = vmatpush.bf16.msrb.mxu0 %v2408_v5 }
  0x47   : > { %1565 = vmatpush.bf16.msrb.mxu2 %v2448_v10  ;;  %1594 = vmatpush.bf16.msrb.mxu3 %v2456_v20 }
  0x49   : > { %1007 = vmatpush.bf16.msrb.mxu1 %v2431_v11  ;;  %1238 = vmatpush.bf16.msrb.mxu0 %v2407_v9 }
  0x4b   : > { %1566 = vmatpush.bf16.msrb.mxu2 %v2447_v21  ;;  %1595 = vmatpush.bf16.msrb.mxu3 %v2455_v29 }
  0x4c   : > { %1008 = vmatmul.bf16.vlgmr.msrb.gmra.mxu1 %v767_v24  ;;  %1239 = vmatmul.bf16.vlgmr.msrb.gmra.mxu0 %v643_v25 }
  0x4d   : > { %1260 = vmatpush.bf16.msra.mxu1 %v2422_v12  ;;  %1617 = vmatpush.bf16.msra.mxu0 %v2470_v14 }
  0x4e   : > { %2084 = vmatmul.msk.bf16.gmra.mxu2 %vm2803_vm4, %v2083_v26  ;;  %2198 = vmatmul.msk.bf16.gmra.mxu3 %vm2799_vm3, %v2971_v27 }
  0x4f   : > { %2522 = vmatpush.bf16.msra.mxu2 %v2470_v14 }
  0x51   : > { %1261 = vmatpush.bf16.msra.mxu1 %v2421_v39  ;;  %1618 = vmatpush.bf16.msra.mxu0 %v2469_v45 }
  0x53   : > { %2523 = vmatpush.bf16.msra.mxu2 %v2469_v45 }
  0x55   : > { %1262 = vmatpush.bf16.msra.mxu1 %v2420_v62  ;;  %1619 = vmatpush.bf16.msra.mxu0 %v2468_v33 }
  0x57   : > { %2524 = vmatpush.bf16.msra.mxu2 %v2468_v33 }
  0x59   : > { %1263 = vmatpush.bf16.msra.mxu1 %v2419_v34  ;;  %1620 = vmatpush.bf16.msra.mxu0 %v2467_v35 }
  0x5b   : > { %2525 = vmatpush.bf16.msra.mxu2 %v2467_v35 }
  0x5c   : > { %1013 = vmatmul.bf16.gmra.mxu1 %v770_v44  ;;  %1244 = vmatmul.bf16.gmra.mxu0 %v646_v49 }
  0x5d   : > { %1264 = vmatpush.bf16.msra.mxu1 %v2418_v37  ;;  %1621 = vmatpush.bf16.msra.mxu0 %v2466_v38 }
  0x5e   : > { %2087 = vmatmul.msk.bf16.gmra.mxu2 %vm2803_vm4, %v2086_v50  ;;  %2203 = vmatmul.msk.bf16.gmra.mxu3 %vm2799_vm3, %v2202_v51 }
  0x5f   : > { %2526 = vmatpush.bf16.msra.mxu2 %v2466_v38 }
  0x61   : > { %1265 = vmatpush.bf16.msra.mxu1 %v2417_v52  ;;  %1622 = vmatpush.bf16.msra.mxu0 %v2465_v43 }
  0x63   : > { %2527 = vmatpush.bf16.msra.mxu2 %v2465_v43 }
  0x65   : > { %1266 = vmatpush.bf16.msra.mxu1 %v2416_v48  ;;  %1623 = vmatpush.bf16.msra.mxu0 %v2464_v63 }
  0x67   : > { %2528 = vmatpush.bf16.msra.mxu2 %v2464_v63 }
  0x69   : > { %1267 = vmatpush.bf16.msra.mxu1 %v2415_v40  ;;  %1624 = vmatpush.bf16.msra.mxu0 %v2463_v54 }
  0x6b   : > { %2529 = vmatpush.bf16.msra.mxu2 %v2463_v54 }
  0x6c   : > { %1018 = vmatmul.bf16.gmra.mxu1 %v773_v2  ;;  %1249 = vmatmul.bf16.gmra.mxu0 %v649_v56 }
  0x6e   : > { %2364 = vmatmul.msk.bf16.vlgmr.msrb.gmra.mxu2 %vm2799_vm3, %v2890_v55  ;;  %1596 = vmatmul.bf16.vlgmr.msrb.gmra.mxu3 %v646_v49  ;;  %v2211_v55 = vpack.c.bf16 %v622_v16, %v621_v42 }
  0x7c   : > { %1023 = vmatmul.bf16.gmra.mxu1 %v776_v57  ;;  %1254 = vmatmul.bf16.gmra.mxu0 %v652_v53 }
  0x7e   : > { %2369 = vmatmul.msk.bf16.gmra.mxu2 %vm2799_vm3, %v2971_v27  ;;  %1601 = vmatmul.bf16.gmra.mxu3 %v649_v56 }
  0x8c   : > { %2206 = vmatmul.msk.bf16.vlgmr.msra.gmra.mxu1 %vm2803_vm4, %v2765_v60  ;;  %2382 = vmatmul.msk.bf16.vlgmr.msra.gmra.mxu0 %vm2803_vm4, %v2771_v1  ;;  %v1364_v60 = vpack.c.bf16 %v2949_v19, %v2846_v32 }
  0x8e   : > { %2374 = vmatmul.msk.bf16.gmra.mxu2 %vm2799_vm3, %v2202_v51  ;;  %1606 = vmatmul.bf16.gmra.mxu3 %v652_v53 }
  0x9c   : > { %2209 = vmatmul.msk.bf16.gmra.mxu1 %vm2803_vm4, %v2771_v1  ;;  %2385 = vmatmul.msk.bf16.gmra.mxu0 %vm2803_vm4, %v2211_v55 }
  0x9e   : > { %2379 = vmatmul.msk.bf16.gmra.mxu2 %vm2799_vm3, %v2378_v58  ;;  %1611 = vmatmul.bf16.gmra.mxu3 %v1364_v60 }
  0xa9   : > { %v980_v30 = vpop.f32.mrf.mxu0  ;;  %v990_v42 = vpop.f32.mrf.mxu1 }
  0xac   : > { %2212 = vmatmul.msk.bf16.gmra.mxu1 %vm2803_vm4, %v2211_v55  ;;  %2388 = vmatmul.msk.bf16.gmra.mxu0 %vm2803_vm4, %v2214_v46 }
  0xae   : > { %2391 = vmatmul.msk.bf16.vlgmr.msra.gmra.mxu2 %vm2803_vm4, %v2973_v28 }
  0xb1   : > { %v1038_v1 = vpop.f32.mrf.mxu2  ;;  %v1211_v32 = vpop.f32.mrf.mxu3 }
  0xb2   : > { %v982_v15 = vpop.f32.mrf.mxu0  ;;  %v992_v41 = vpop.f32.mrf.mxu1 }
  0xb9   : > { %v1040_v59 = vpop.f32.mrf.mxu2  ;;  %v3086_v61 = vpop.f32.mrf.mxu3 }
  0xba   : > { %v985_v47 = vpop.f32.mrf.mxu0  ;;  %v995_v0 = vpop.f32.mrf.mxu1 }
  0xbc   : > { %2215 = vmatmul.msk.bf16.gmra.mxu1 %vm2803_vm4, %v2214_v46 }
  0xc1   : > { %v1043_v2 = vpop.f32.mrf.mxu2  ;;  %v1216_v3 = vpop.f32.mrf.mxu3 }
  0xc2   : > { %v987_v4 = vpop.f32.mrf.mxu0  ;;  %v997_v5 = vpop.f32.mrf.mxu1 }
  0xc9   : > { %v1045_v6 = vpop.f32.mrf.mxu2  ;;  %v3090_v7 = vpop.f32.mrf.mxu3 }
  0xca   : > { %v1009_v8 = vpop.f32.mrf.mxu1  ;;  %v1240_v10 = vpop.f32.mrf.mxu0 }
  0xcb   : > { %v1010_v11 = vadd.f32 %v1009_v8, %v980_v30 }
  0xcd   : > { %v1039_v9 = vadd.f32 %v1038_v1, %v1010_v11 }
  0xcf   : > { %v1212_v13 = vadd.f32 %v1211_v32, %v1039_v9 }
  0xd1   : > { %v1241_v12 = vadd.f32 %v1240_v10, %v1212_v13  ;;  %v1048_v14 = vpop.f32.mrf.mxu2  ;;  %v1221_v16 = vpop.f32.mrf.mxu3 }
  0xd2   : > { %v1011_v17 = vpop.f32.mrf.mxu1  ;;  %v1242_v19 = vpop.f32.mrf.mxu0 }
  0xd3   : > { %v1012_v20 = vadd.f32 %v1011_v17, %v982_v15 }
  0xd5   : > { %v1041_v18 = vadd.f32 %v1040_v59, %v1012_v20 }
  0xd9   : > { %v1050_v21 = vpop.f32.mrf.mxu2  ;;  %v3092_v22 = vpop.f32.mrf.mxu3 }
  0xda   : > { %v1014_v23 = vpop.f32.mrf.mxu1  ;;  %v1245_v24 = vpop.f32.mrf.mxu0 }
  0xdb   : > { %v1015_v25 = vadd.f32 %v1014_v23, %v985_v47 }
  0xdd   : > { %v1044_v26 = vadd.f32 %v1043_v2, %v1015_v25 }
  0xdf   : > { %v1217_v27 = vadd.f32 %v1216_v3, %v1044_v26  ;;  %v1214_v3 = vadd.f32 %v3086_v61, %v1041_v18 }
  0xe1   : > { %v3094_v28 = vadd.f32 %v1245_v24, %v1217_v27  ;;  %v1053_v39 = vpop.f32.mrf.mxu2  ;;  %v1226_v33 = vpop.f32.mrf.mxu3  ;;  %v1243_v8 = vadd.f32 %v1242_v19, %v1214_v3 }
  0xe2   : > { %v1016_v45 = vpop.f32.mrf.mxu1  ;;  %v3096_v29 = vpop.f32.mrf.mxu0 }
  0xe3   : > { %v1017_v62 = vadd.f32 %v1016_v45, %v987_v4 }
  0xe5   : > { %v1046_v34 = vadd.f32 %v1045_v6, %v1017_v62 }
  0xe7   : > { %v1219_v45 = vadd.f32 %v3090_v7, %v1046_v34 }
  0xe9   : > { %v1055_v35 = vpop.f32.mrf.mxu2  ;;  %v3098_v49 = vpop.f32.mrf.mxu3 }
  0xea   : > { %v1019_v36 = vpop.f32.mrf.mxu1  ;;  %v1250_v37 = vpop.f32.mrf.mxu0 }
  0xeb   : > { %v1020_v38 = vadd.f32 %v1019_v36, %v990_v42 }
  0xed   : > { %v1049_v44 = vadd.f32 %v1048_v14, %v1020_v38 }
  0xef   : > { %v1222_v50 = vadd.f32 %v1221_v16, %v1049_v44 }
  0xf1   : > { %v3100_v51 = vadd.f32 %v1250_v37, %v1222_v50  ;;  %v1568_v52 = vpop.f32.mrf.mxu2  ;;  %v1597_v40 = vpop.f32.mrf.mxu3  ;;  %v1248_v37 = vadd.f32 %v3096_v29, %v1219_v45 }
  0xf2   : > { %v1021_v53 = vpop.f32.mrf.mxu1  ;;  %v3102_v43 = vpop.f32.mrf.mxu0 }
  0xf3   : > { %v1022_v48 = vadd.f32 %v1021_v53, %v992_v41 }
  0xf5   : > { %v3104_v63 = vadd.f32 %v1050_v21, %v1022_v48 }
  0xf9   : > { %v1570_v54 = vpop.f32.mrf.mxu2  ;;  %v1599_v46 = vpop.f32.mrf.mxu3 }
  0xfa   : > { %v1024_v56 = vpop.f32.mrf.mxu1  ;;  %v1255_v57 = vpop.f32.mrf.mxu0  ;;  %v1600_v10 = vadd.f32 %v1599_v46, %v1570_v54 }
  0xfb   : > { %v1025_v31 = vadd.f32 %v1024_v56, %v995_v0  ;;  %v1598_v0 = vadd.f32 %v1597_v40, %v1568_v52 }
  0xfd   : > { %v1054_v55 = vadd.f32 %v1053_v39, %v1025_v31 }
  0xff   : > { %v1227_v58 = vadd.f32 %v1226_v33, %v1054_v55 }
 0x101   : > { %v3106_v60 = vadd.f32 %v1255_v57, %v1227_v58  ;;  %v1573_v30 = vpop.f32.mrf.mxu2  ;;  %v1602_v2 = vpop.f32.mrf.mxu3 }
 0x102   : > { %v1026_v42 = vpop.f32.mrf.mxu1  ;;  %v3108_v1 = vpop.f32.mrf.mxu0  ;;  %v1603_v19 = vadd.f32 %v1602_v2, %v1573_v30 }
 0x103   : > { %v1027_v32 = vadd.f32 %v1026_v42, %v997_v5  ;;  %v1224_v42 = vadd.f32 %v3092_v22, %v3104_v63 }
 0x105   : > { %v3110_v15 = vadd.f32 %v1055_v35, %v1027_v32 }
 0x109   : > { %v1575_v41 = vpop.f32.mrf.mxu2  ;;  %v1604_v17 = vpop.f32.mrf.mxu3 }
 0x10a   : > { %v1269_v59 = vpop.f32.mrf.mxu1  ;;  %v1626_v47 = vpop.f32.mrf.mxu0  ;;  %v1605_v38 = vadd.f32 %v1604_v17, %v1575_v41 }
 0x10b   : > { %v1270_v4 = vadd.f32 %v1269_v59, %v1241_v12  ;;  %v1627_v6 = vadd.f32 %v1626_v47, %v1598_v0  ;;  %v1253_v47 = vadd.f32 %v3102_v43, %v1224_v42  ;;  %v1229_v43 = vadd.f32 %v3098_v49, %v3110_v15 }
 0x10d   : > { %v1646_v14 = vadd.f32 %v1627_v6, %v1270_v4 }
 0x10f   : > { %v1684_v61 = vmul.f32 %v1646_v14, %v1646_v14 }
 0x111   : > { %v1578_v11 = vpop.f32.mrf.mxu2  ;;  %v1607_v33 = vpop.f32.mrf.mxu3 }
 0x112   : > { %v1271_v9 = vpop.f32.mrf.mxu1  ;;  %v1628_v13 = vpop.f32.mrf.mxu0  ;;  %v1608_v31 = vadd.f32 %v1607_v33, %v1578_v11 }
 0x113   : > { %v1272_v16 = vadd.f32 %v1271_v9, %v1243_v8  ;;  %v1629_v5 = vadd.f32 %v1628_v13, %v1600_v10 }
 0x115   : > { %v1647_v20 = vadd.f32 %v1629_v5, %v1272_v16 }
 0x117   : > { %v2490_v18 = vpack.c.bf16 %v1647_v20, %v1646_v14  ;;  %v1670_v12 = vadd.f32 %v1647_v20, %v1646_v14  ;;  %v1685_v21 = vmul.f32 %v1647_v20, %v1647_v20 }
 0x119   : > { %2491 = vst [vmem:[%s3117_s17] sm:$0xff] %v2490_v18   ;;  %v1692_v23 = vadd.f32 %v1685_v21, %v1684_v61  ;;  %v1580_v24 = vpop.f32.mrf.mxu2  ;;  %v1609_v7 = vpop.f32.mrf.mxu3 }
 0x11a   : > { %v1274_v25 = vpop.f32.mrf.mxu1  ;;  %v1631_v26 = vpop.f32.mrf.mxu0  ;;  %v1610_v2 = vadd.f32 %v1609_v7, %v1580_v24 }
 0x11b   : > { %v1275_v27 = vadd.f32 %v1274_v25, %v3094_v28  ;;  %v1632_v39 = vadd.f32 %v1631_v26, %v1603_v19  ;;  %v1258_v19 = vadd.f32 %v3108_v1, %v1229_v43 }
 0x11d   : > { %v1648_v62 = vadd.f32 %v1632_v39, %v1275_v27 }
 0x11f   : > { %v1671_v35 = vadd.f32 %v1670_v12, %v1648_v62  ;;  %v1686_v36 = vmul.f32 %v1648_v62, %v1648_v62 }
 0x121   : > { %v1693_v44 = vadd.f32 %v1692_v23, %v1686_v36  ;;  %v1583_v50 = vpop.f32.mrf.mxu2  ;;  %v1612_v10 = vpop.f32.mrf.mxu3 }
 0x122   : > { %v1276_v52 = vpop.f32.mrf.mxu1  ;;  %v1633_v53 = vpop.f32.mrf.mxu0  ;;  %v1613_v16 = vadd.f32 %v1612_v10, %v1583_v50 }
 0x123   : > { %v1277_v48 = vadd.f32 %v1276_v52, %v1248_v37  ;;  %v1634_v40 = vadd.f32 %v1633_v53, %v1605_v38 }
 0x125   : > { %v1649_v54 = vadd.f32 %v1634_v40, %v1277_v48 }
 0x127   : > { %v2495_v56 = vpack.c.bf16 %v1649_v54, %v1648_v62  ;;  %v1672_v28 = vadd.f32 %v1671_v35, %v1649_v54  ;;  %v1687_v57 = vmul.f32 %v1649_v54, %v1649_v54 }
 0x129   : > { %2511 = vst [vmem:[%s3117_s17 + $0x8] sm:$0xff] %v2495_v56   ;;  %v1694_v34 = vadd.f32 %v1693_v44, %v1687_v57  ;;  %v1585_v30 = vpop.f32.mrf.mxu2  ;;  %v1614_v61 = vpop.f32.mrf.mxu3 }
 0x12a   : > { %v1279_v55 = vpop.f32.mrf.mxu1  ;;  %v1636_v58 = vpop.f32.mrf.mxu0  ;;  %v1615_v23 = vadd.f32 %v1614_v61, %v1585_v30 }
 0x12b   : > { %v1280_v46 = vadd.f32 %v1279_v55, %v3100_v51  ;;  %v1637_v29 = vadd.f32 %v1636_v58, %v1608_v31 }
 0x12d   : > { %v1650_v32 = vadd.f32 %v1637_v29, %v1280_v46 }
 0x12f   : > { %v1673_v41 = vadd.f32 %v1672_v28, %v1650_v32  ;;  %v1688_v59 = vmul.f32 %v1650_v32, %v1650_v32 }
 0x131   : > { %v1695_v3 = vadd.f32 %v1694_v34, %v1688_v59  ;;  %v1641_v51 = vpop.f32.mrf.mxu2 }
 0x132   : > { %v1281_v0 = vpop.f32.mrf.mxu1  ;;  %v1638_v4 = vpop.f32.mrf.mxu0  ;;  %v1642_v5 = vadd.f32 %v1641_v51, %v1613_v16 }
 0x133   : > { %v1282_v6 = vadd.f32 %v1281_v0, %v1253_v47  ;;  %v1639_v8 = vadd.f32 %v1638_v4, %v1610_v2 }
 0x135   : > { %v1651_v11 = vadd.f32 %v1639_v8, %v1282_v6 }
 0x137   : > { %v2500_v9 = vpack.c.bf16 %v1651_v11, %v1650_v32  ;;  %v1674_v13 = vadd.f32 %v1673_v41, %v1651_v11  ;;  %v1689_v14 = vmul.f32 %v1651_v11, %v1651_v11 }
 0x139   : > { %2512 = vst [vmem:[%s3117_s17 + $0x10] sm:$0xff] %v2500_v9   ;;  %v1696_v22 = vadd.f32 %v1695_v3, %v1689_v14  ;;  %v1643_v21 = vpop.f32.mrf.mxu2 }
 0x13a   : > { %v1284_v63 = vpop.f32.mrf.mxu1  ;;  %v1644_v26 = vadd.f32 %v1643_v21, %v1615_v23 }
 0x13b   : > { %v1285_v17 = vadd.f32 %v1284_v63, %v3106_v60 }
 0x13d   : > { %v1652_v20 = vadd.f32 %v1642_v5, %v1285_v17 }
 0x13f   : > { %v1675_v18 = vadd.f32 %v1674_v13, %v1652_v20  ;;  %v1690_v12 = vmul.f32 %v1652_v20, %v1652_v20 }
 0x141   : > { %v1697_v24 = vadd.f32 %v1696_v22, %v1690_v12 }
 0x142   : > { %v1286_v25 = vpop.f32.mrf.mxu1 }
 0x143   : > { %v1287_v27 = vadd.f32 %v1286_v25, %v1258_v19 }
 0x145   : > { %v1653_v39 = vadd.f32 %v1644_v26, %v1287_v27 }
 0x147   : > { %v2505_v45 = vpack.c.bf16 %v1653_v39, %v1652_v20  ;;  %v1676_v60 = vadd.f32 %v1675_v18, %v1653_v39  ;;  %v1691_v62 = vmul.f32 %v1653_v39, %v1653_v39 }
 0x149   : > { %2513 = vst [vmem:[%s3117_s17 + $0x18] sm:$0xff] %v2505_v45   ;;  %v1677_v49 = vrot.slane %v1676_v60, 4  ;;  %v1698_v15 = vadd.f32 %v1697_v24, %v1691_v62 }
 0x14b   : > { %v1678_v33 = vadd.f32 %v1677_v49, %v1676_v60  ;;  %v1699_v35 = vrot.slane %v1698_v15, 4 }
 0x14d   : > { %v1679_v36 = vrot.slane %v1678_v33, 2  ;;  %v1700_v37 = vadd.f32 %v1699_v35, %v1698_v15 }
 0x14f   : > { %v1680_v38 = vadd.f32 %v1679_v36, %v1678_v33  ;;  %v1701_v1 = vrot.slane %v1700_v37, 2 }
 0x151   : > { %v1681_v44 = vrot.slane %v1680_v38, 1  ;;  %v1702_v50 = vadd.f32 %v1701_v1, %v1700_v37 }
 0x153   : > { %v1682_v52 = vadd.f32 %v1681_v44, %v1680_v38  ;;  %v1703_v53 = vrot.slane %v1702_v50, 1 }
 0x155   : > { %1683 = vst [vmem:[%s489_s19] sm:$0x1] %v1682_v52  ;;  %v1704_v48 = vadd.f32 %v1703_v53, %v1702_v50 }
 0x157   : > { %1705 = vst [vmem:[%s495_s23] sm:$0x1] %v1704_v48 }
 0x158 PF: > { %s19_s29 = sadd.s32 1, %s2578_s29   ;;  %s3164_s27 = smov %s2574_s28 }
 0x159   : > { %p16_p5 = scmp.ge.s32.totalorder %s19_s29, 4   ;;  %s3165_s28 = smov %s3167_s30 }
 0x15b   :  { %18 = sbr.rel (!%p16_p5) target bundleno = 2 (0x2), region = 109 }

// kernel: fmf_hourglass_forward.26
= control target key start
LH: loop header
LB: loop body
LE: loop exit
PB: predicated region body
PF: predicated region fallthrough
CT: control target
= control target key end

     0   :  { %13 = vsyncpa [#allocation3], 0  ;;  %s1138_s0 = inlined_call_operand.vmem [shape: bf16[128,128], index: 0, kind: input, shape index: {}]   ;;  %s1139_s1 = inlined_call_operand.vmem [shape: f32[1,128], index: 1, kind: input, shape index: {}]   ;;  %s1140_s2 = inlined_call_operand.vmem [shape: f32[1,128], index: 2, kind: input, shape index: {}]   ;;  %s1141_s3 = inlined_call_operand.vmem [shape: bf16[128,128], index: 3, kind: input, shape index: {}]   ;;  %s1142_s4 = inlined_call_operand.vmem [shape: f32[128,128], index: 4, kind: input, shape index: {}]   ;;  %s1143_s5 = inlined_call_operand.vmem [shape: f32[128,128], index: 5, kind: output, shape index: {0}]   ;;  %s1144_s6 = inlined_call_operand.hbm [shape: f32[2,1,128], index: 6, kind: output, shape index: {1}]   ;;  %s1145_s7 = inlined_call_operand.hbm [shape: f32[2,1,128], index: 7, kind: output, shape index: {2}]  }
   0x1   :  { %15 = vsyncpa [#allocation3 + $0x1], 0 }
   0x2   :  { %16 = vsyncpa [#allocation5], 0 }
   0x3   :  { %18 = vsyncpa [#allocation5 + $0x1], 0  ;;  %s956_s24 = smov 0   ;;  %s958_s25 = smov 0  }
   0x4   :  { %s960_s26 = smov 0   ;;  %s962_s27 = smov 0  }
   0x5 LB: > { %s977_s28 = sadd.s32 4294967295, %s914_s27   ;;  %s679_s29 = sadd.s32 4294967294, %s914_s27   ;;  %s914_s27 = sphi %s962_s27, %s1155_s27   ;;  %s910_s26 = sphi %s960_s26, %s1154_s26   ;;  %s906_s25 = sphi %s958_s25, %s1153_s25   ;;  %s902_s24 = sphi %s956_s24, %s1152_s24  }
   0x6   : > { %s981_s30 = sadd.s32 1, %s914_s27   ;;  %s172_s8 = sadd.s32 1, %s910_s26 }
   0x7   : > { %s169_s9 = ssub.s32 %s914_s27, %s981_s30  ;;  %p182_p0 = scmp.ne.s32.totalorder %s910_s26, %s906_s25 }
   0x8   : > { %p170_p1 = scmp.eq.s32.totalorder %s169_s9, 0  ;;  %p183_p2 = scmp.eq.s32.totalorder %s977_s28, 1 }
   0x9   : > { %p188_p3 = scmp.ne.s32.totalorder %s906_s25, %s902_s24  ;;  %p189_p4 = scmp.eq.s32.totalorder %s679_s29, 1 }
   0xa   : > { %s992_s10 = scalar_select %p170_p1, %s910_s26, %s172_s8  }
   0xb   : > { %p994_p5 = por %p183_p2, %p182_p0  ;;  %p998_p6 = por %p189_p4, %p188_p3 }
   0xc   : > { %p682_p7 = scmp.ge.s32.totalorder %s914_s27, 1  ;;  %p260_p8 = scmp.lt.s32.totalorder %s914_s27, 3 }
   0xe   : > { %p261_p9 = pnand %p682_p7, %p260_p8 }
  0x10   : > { %264 = sbr.rel (%p261_p9) target bundleno = 237 (0xed), region = 40 }
  0x15   : > { %v730_v0 = vld [vmem:[%s1141_s3 + $0x38] sm:$0xff]  ;;  %s683_s15 = sshll.u32 %s977_s28, 3  ;;  %v729_v1 = vld [vmem:[%s1141_s3 + $0x30] sm:$0xff]  ;;  %v728_v2 = vld [vmem:[%s1141_s3 + $0x28] sm:$0xff]  ;;  %s542_s21 = scalar_lea.hbm %s1144_s6, %s977_s28 }
  0x16   : > { %p306_p10 = scmp.lt.s32.totalorder %s683_s15, 15  ;;  %447 = vmatpush.bf16.msra.mxu0 %v730_v0  ;;  %750 = vmatpush.bf16.msra.mxu1 %v730_v0  ;;  %v727_v4 = vld [vmem:[%s1141_s3 + $0x20] sm:$0xff]  ;;  %v726_v14 = vld [vmem:[%s1141_s3 + $0x18] sm:$0xff]  ;;  %v725_v24 = vld [vmem:[%s1141_s3 + $0x10] sm:$0xff]  ;;  %s555_s29 = scalar_lea.hbm %s1145_s7, %s977_s28 }
  0x17   : > { %751 = vmatpush.bf16.msra.mxu2 %v730_v0  ;;  %752 = vmatpush.bf16.msra.mxu3 %v730_v0  ;;  %v818_v9 = vld [vmem:[%s1139_s1] ss:$0 sm:$0xff]  ;;  %v724_v33 = vld [vmem:[%s1141_s3 + $0x8] sm:$0xff]  ;;  %s1082_s13 = sshll.u32 %s542_s21, 4  ;;  %s1087_s17 = sshll.u32 %s555_s29, 4  ;;  %s547_s13 = int_to_ptr.hbm [resolvable:$true] %s1082_s13  ;;  %s560_s17 = int_to_ptr.hbm [resolvable:$true] %s1087_s17 }
  0x18   : > { %s1157_s15 = smov (!%p306_p10, %s683_s15), 15  ;;  %v819_v19 = vld [vmem:[%s1140_s2] ss:$0 sm:$0xff]  ;;  %s840_s22 = scalar_lea.hbm %s1144_s6, 2 }
  0x19   : > { %s684_s18 = sshll.u32 %s1157_s15, 2  ;;  %v723_v41 = vld [vmem:[%s1141_s3] sm:$0xff]  ;;  %s686_s8 = sshll.u32 %s1157_s15, 3 }
  0x1a   : > { %448 = vmatpush.bf16.msra.mxu0 %v729_v1  ;;  %753 = vmatpush.bf16.msra.mxu1 %v729_v1  ;;  %s309_s23 = scalar_lea.vmem %s1138_s0, %s684_s18  ;;  %s1045_s14 = scalar_lea.vmem %s1142_s4, %s686_s8 }
  0x1b   : > { %754 = vmatpush.bf16.msra.mxu2 %v729_v1  ;;  %755 = vmatpush.bf16.msra.mxu3 %v729_v1  ;;  %v732_v3 = vld [vmem:[%s309_s23] sm:$0xff]   ;;  %v747_v5 = vld [vmem:[%s309_s23 + $0x8] sm:$0xff]   ;;  %v748_v6 = vld [vmem:[%s309_s23 + $0x10] sm:$0xff]   ;;  %s1052_s18 = scalar_lea.vmem %s1143_s5, %s686_s8  ;;  %s1069_s15 = sand.u32 1, %s906_s25  }
  0x1c   : > { %v749_v7 = vld [vmem:[%s309_s23 + $0x18] sm:$0xff]   ;;  %v733_v8 = vunpack.c.l.bf16 %v732_v3  ;;  %v734_v10 = vunpack.c.h.bf16 %v732_v3  ;;  %v737_v11 = vunpack.c.l.bf16 %v747_v5  ;;  %v738_v12 = vunpack.c.h.bf16 %v747_v5  ;;  %v391_v50 = vld [vmem:[%s1045_s14] sm:$0xff]  ;;  %v393_v51 = vld [vmem:[%s1045_s14 + $0x10] sm:$0xff]  ;;  %s298_s8 = scalar_lea.vmem [#allocation2], %s1069_s15  ;;  %s526_s28 = scalar_lea.sflag [#allocation3], %s1069_s15 }
  0x1d   : > { %v741_v13 = vunpack.c.l.bf16 %v748_v6  ;;  %v742_v15 = vunpack.c.h.bf16 %v748_v6  ;;  %v745_v16 = vunpack.c.l.bf16 %v749_v7  ;;  %v746_v17 = vunpack.c.h.bf16 %v749_v7  ;;  %v395_v56 = vld [vmem:[%s1045_s14 + $0x20] sm:$0xff]  ;;  %v397_v57 = vld [vmem:[%s1045_s14 + $0x30] sm:$0xff]  ;;  %v392_v58 = vld [vmem:[%s1045_s14 + $0x8] sm:$0xff]  ;;  %s1080_s9 = sshll.u32 %s298_s8, 4  ;;  %s545_s9 = int_to_ptr.vmem [resolvable:$true] %s1080_s9 }
  0x1e   : > { %449 = vmatpush.bf16.msra.mxu0 %v728_v2  ;;  %756 = vmatpush.bf16.msra.mxu1 %v728_v2  ;;  %v343_v18 = vmul.f32 %v818_v9, %v733_v8  ;;  %v344_v20 = vmul.f32 %v818_v9, %v734_v10  ;;  %v345_v21 = vmul.f32 %v818_v9, %v737_v11  ;;  %v394_v59 = vld [vmem:[%s1045_s14 + $0x18] sm:$0xff]  ;;  %v396_v10 = vld [vmem:[%s1045_s14 + $0x28] sm:$0xff] }
  0x1f   : > { %757 = vmatpush.bf16.msra.mxu2 %v728_v2  ;;  %758 = vmatpush.bf16.msra.mxu3 %v728_v2  ;;  %v346_v22 = vmul.f32 %v818_v9, %v738_v12  ;;  %v347_v23 = vmul.f32 %v818_v9, %v741_v13  ;;  %v348_v25 = vmul.f32 %v818_v9, %v742_v15  ;;  %v398_v11 = vld [vmem:[%s1045_s14 + $0x38] sm:$0xff]  ;;  %s304_s14 = scalar_lea.vmem [#allocation4], %s1069_s15 }
  0x20   : > { %v349_v26 = vmul.f32 %v818_v9, %v745_v16  ;;  %v350_v27 = vmul.f32 %v818_v9, %v746_v17  ;;  %v355_v28 = vadd.f32 %v819_v19, %v343_v18  ;;  %v356_v29 = vadd.f32 %v819_v19, %v344_v20  ;;  %s1085_s16 = sshll.u32 %s304_s14, 4 }
  0x21   : > { %v357_v30 = vadd.f32 %v819_v19, %v345_v21  ;;  %v358_v31 = vadd.f32 %v819_v19, %v346_v22  ;;  %v359_v32 = vadd.f32 %v819_v19, %v347_v23  ;;  %v360_v34 = vadd.f32 %v819_v19, %v348_v25  ;;  %1149 = sst [smem:[#allocation8_spill]] %s1085_s16 }
  0x22   : > { %450 = vmatpush.bf16.msra.mxu0 %v727_v4  ;;  %759 = vmatpush.bf16.msra.mxu1 %v727_v4  ;;  %v361_v35 = vadd.f32 %v819_v19, %v349_v26  ;;  %v362_v36 = vadd.f32 %v819_v19, %v350_v27  ;;  %v363_v37 = vmax.f32 %v355_v28, 0.0  ;;  %v364_v38 = vmax.f32 %v356_v29, 0.0 }
  0x23   : > { %760 = vmatpush.bf16.msra.mxu2 %v727_v4  ;;  %761 = vmatpush.bf16.msra.mxu3 %v727_v4  ;;  %v365_v39 = vmax.f32 %v357_v30, 0.0  ;;  %v366_v40 = vmax.f32 %v358_v31, 0.0  ;;  %v367_v42 = vmax.f32 %v359_v32, 0.0  ;;  %v368_v43 = vmax.f32 %v360_v34, 0.0 }
  0x24   : > { %v369_v44 = vmax.f32 %v361_v35, 0.0  ;;  %v370_v45 = vmax.f32 %v362_v36, 0.0  ;;  %v371_v46 = vpack.c.bf16 %v364_v38, %v363_v37 }
  0x25   : > { %v372_v47 = vpack.c.bf16 %v366_v40, %v365_v39  ;;  %v373_v48 = vpack.c.bf16 %v368_v43, %v367_v42 }
  0x26   : > { %451 = vmatpush.bf16.msra.mxu0 %v726_v14  ;;  %762 = vmatpush.bf16.msra.mxu1 %v726_v14  ;;  %v374_v49 = vpack.c.bf16 %v370_v45, %v369_v44 }
  0x27   : > { %763 = vmatpush.bf16.msra.mxu2 %v726_v14  ;;  %764 = vmatpush.bf16.msra.mxu3 %v726_v14 }
  0x2a   : > { %452 = vmatpush.bf16.msra.mxu0 %v725_v24  ;;  %765 = vmatpush.bf16.msra.mxu1 %v725_v24 }
  0x2b   : > { %766 = vmatpush.bf16.msra.mxu2 %v725_v24  ;;  %767 = vmatpush.bf16.msra.mxu3 %v725_v24 }
  0x2e   : > { %453 = vmatpush.bf16.msra.mxu0 %v724_v33  ;;  %768 = vmatpush.bf16.msra.mxu1 %v724_v33 }
  0x2f   : > { %769 = vmatpush.bf16.msra.mxu2 %v724_v33  ;;  %770 = vmatpush.bf16.msra.mxu3 %v724_v33 }
  0x32   : > { %454 = vmatpush.bf16.msra.mxu0 %v723_v41  ;;  %771 = vmatpush.bf16.msra.mxu1 %v723_v41 }
  0x33   : > { %772 = vmatpush.bf16.msra.mxu2 %v723_v41  ;;  %773 = vmatpush.bf16.msra.mxu3 %v723_v41 }
  0x35   : > { %455 = vmatmul.bf16.vlgmr.msra.gmra.mxu0 %v371_v46  ;;  %460 = vmatmul.bf16.vlgmr.msra.gmra.mxu1 %v372_v47 }
  0x36   : > { %465 = vmatmul.bf16.vlgmr.msra.gmra.mxu2 %v373_v48  ;;  %470 = vmatmul.bf16.vlgmr.msra.gmra.mxu3 %v374_v49 }
  0xb2   : > { %v456_v52 = vpop.f32.mrf.mxu0  ;;  %v461_v53 = vpop.f32.mrf.mxu1 }
  0xb3   : > { %v457_v54 = vadd.f32 %v456_v52, %v391_v50  ;;  %v462_v55 = vadd.f32 %v461_v53, %v393_v51 }
  0xb5   : > { %476 = vst [vmem:[%s1052_s18] sm:$0xff] %v457_v54  ;;  %v498_v4 = vmul.f32 %v457_v54, %v457_v54  ;;  %v500_v7 = vmul.f32 %v462_v55, %v462_v55 }
  0xb6   : > { %478 = vst [vmem:[%s1052_s18 + $0x10] sm:$0xff] %v462_v55 }
  0xb9   : > { %v466_v60 = vpop.f32.mrf.mxu2  ;;  %v471_v61 = vpop.f32.mrf.mxu3 }
  0xba   : > { %v467_v62 = vadd.f32 %v466_v60, %v395_v56  ;;  %v472_v63 = vadd.f32 %v471_v61, %v397_v57  ;;  %v458_v0 = vpop.f32.mrf.mxu0  ;;  %v463_v1 = vpop.f32.mrf.mxu1 }
  0xbb   : > { %v459_v2 = vadd.f32 %v458_v0, %v392_v58  ;;  %v464_v3 = vadd.f32 %v463_v1, %v394_v59 }
  0xbc   : > { %480 = vst [vmem:[%s1052_s18 + $0x20] sm:$0xff] %v467_v62  ;;  %v502_v19 = vmul.f32 %v467_v62, %v467_v62  ;;  %v504_v25 = vmul.f32 %v472_v63, %v472_v63 }
  0xbd   : > { %482 = vst [vmem:[%s1052_s18 + $0x30] sm:$0xff] %v472_v63  ;;  %v484_v5 = vadd.f32 %v459_v2, %v457_v54  ;;  %v499_v6 = vmul.f32 %v459_v2, %v459_v2  ;;  %v501_v13 = vmul.f32 %v464_v3, %v464_v3 }
  0xbe   : > { %477 = vst [vmem:[%s1052_s18 + $0x8] sm:$0xff] %v459_v2 }
  0xbf   : > { %v506_v8 = vadd.f32 %v499_v6, %v498_v4  ;;  %479 = vst [vmem:[%s1052_s18 + $0x18] sm:$0xff] %v464_v3  ;;  %v485_v9 = vadd.f32 %v484_v5, %v462_v55 }
  0xc1   : > { %v486_v12 = vadd.f32 %v485_v9, %v464_v3  ;;  %v507_v14 = vadd.f32 %v506_v8, %v500_v7  ;;  %v468_v15 = vpop.f32.mrf.mxu2  ;;  %v473_v16 = vpop.f32.mrf.mxu3 }
  0xc2   : > { %v469_v17 = vadd.f32 %v468_v15, %v396_v10  ;;  %v474_v18 = vadd.f32 %v473_v16, %v398_v11 }
  0xc3   : > { %v508_v20 = vadd.f32 %v507_v14, %v501_v13  ;;  %v487_v21 = vadd.f32 %v486_v12, %v467_v62 }
  0xc4   : > { %481 = vst [vmem:[%s1052_s18 + $0x28] sm:$0xff] %v469_v17  ;;  %v503_v23 = vmul.f32 %v469_v17, %v469_v17  ;;  %v505_v29 = vmul.f32 %v474_v18, %v474_v18 }
  0xc5   : > { %v488_v22 = vadd.f32 %v487_v21, %v469_v17  ;;  %v509_v24 = vadd.f32 %v508_v20, %v502_v19  ;;  %483 = vst [vmem:[%s1052_s18 + $0x38] sm:$0xff] %v474_v18  ;;  %s834_s18 = sshra.s32 %s547_s13, 4  ;;  %s835_s18 = int_to_ptr.hbm [resolvable:$true] %s834_s18 }
  0xc6   : > { %s836_s19 = scalar_lea.hbm %s835_s18, 1  ;;  %p841_p0 = scmp.lt.s32.totalorder %s835_s18, %s1144_s6 }
  0xc7   : > { %v510_v26 = vadd.f32 %v509_v24, %v503_v23  ;;  %v489_v27 = vadd.f32 %v488_v22, %v472_v63  ;;  %p837_p11 = scmp.ne.s32.totalorder %s835_s18, %s836_s19  ;;  %p842_p1 = scmp.lt.s32.totalorder %s840_s22, %s836_s19 }
  0xc9   : > { %v490_v28 = vadd.f32 %v489_v27, %v474_v18  ;;  %v511_v30 = vadd.f32 %v510_v26, %v504_v25  ;;  %p838_p12 = pnand %p837_p11, %p994_p5  ;;  %p843_p2 = por %p842_p1, %p841_p0 }
  0xcb   : > { %v491_v31 = vrot.slane %v490_v28, 4  ;;  %v512_v32 = vadd.f32 %v511_v30, %v505_v29  ;;  %p839_p13 = pneg %p838_p12 }
  0xcd   : > { %v492_v33 = vadd.f32 %v491_v31, %v490_v28  ;;  %v513_v34 = vrot.slane %v512_v32, 4  ;;  %p844_p3 = pnand %p843_p2, %p839_p13 }
  0xcf   : > { %v493_v35 = vrot.slane %v492_v33, 2  ;;  %v514_v36 = vadd.f32 %v513_v34, %v512_v32 }
  0xd1   : > { %v494_v37 = vadd.f32 %v493_v35, %v492_v33  ;;  %v515_v38 = vrot.slane %v514_v36, 2 }
  0xd3   : > { %v495_v39 = vrot.slane %v494_v37, 1  ;;  %v516_v40 = vadd.f32 %v515_v38, %v514_v36 }
  0xd5   : > { %v496_v41 = vadd.f32 %v495_v39, %v494_v37  ;;  %v517_v42 = vrot.slane %v516_v40, 1 }
  0xd7   : > { %497 = vst [vmem:[%s298_s8] sm:$0x1] %v496_v41  ;;  %v518_v43 = vadd.f32 %v517_v42, %v516_v40 }
  0xd8   : > { %847 = shalt.err (!%p844_p3)
}
  0xd9   : > { %774 = dma.vmem_to_hbm [thread:$0]  (%p994_p5), %s545_s9, 16, %s547_s13, %s526_s28   ;;  %519 = vst [vmem:[%s304_s14] sm:$0x1] %v518_v43 }
  0xda   : > { %s530_s8 = scalar_lea.sflag [#allocation5], %s1069_s15  ;;  %s862_s16 = sshra.s32 %s560_s17, 4  ;;  %s863_s16 = int_to_ptr.hbm [resolvable:$true] %s862_s16 }
  0xdb   : > { %s864_s20 = scalar_lea.hbm %s863_s16, 1  ;;  %s868_s21 = scalar_lea.hbm %s1145_s7, 2 }
  0xdc   : > { %p865_p4 = scmp.ne.s32.totalorder %s863_s16, %s864_s20  ;;  %p869_p9 = scmp.lt.s32.totalorder %s863_s16, %s1145_s7 }
  0xdd   : > { %p870_p10 = scmp.lt.s32.totalorder %s868_s21, %s864_s20 }
  0xde   : > { %p866_p7 = pnand %p865_p4, %p994_p5 }
  0xdf   : > { %p871_p11 = por %p870_p10, %p869_p9 }
  0xe0   : > { %p867_p8 = pneg %p866_p7 }
  0xe2   : > { %p872_p12 = pnand %p871_p11, %p867_p8 }
  0xe4   : > { %875 = shalt.err (!%p872_p12)
}
  0xe5   : > { %s1150_s15 = sld [smem:[#allocation8_spill]] }
  0xeb   : > { %s1151_s9 = int_to_ptr.vmem [resolvable:$true] %s1150_s15 }
  0xec   : > { %775 = dma.vmem_to_hbm [thread:$0]  (%p994_p5), %s1151_s9, 16, %s560_s17, %s530_s8  }
  0xed PF: > { %p785_p13 = scmp.ge.s32.totalorder %s914_s27, 2  ;;  %s579_s13 = sand.u32 1, %s902_s24  }
  0xee   : > { %s580_s14 = scalar_lea.sflag [#allocation3], %s579_s13 }
  0xef   : > { %p779_p0 = pnand %p785_p13, %p998_p6 }
  0xf1   : > { %p780_p1 = pneg %p779_p0 }
  0xf3   : > { %893 = dma.done.wait (%p780_p1), %s580_s14, 16  }
  0xf4   : > { %895 = vsyncadd (%p780_p1), %s580_s14, 4294967280  ;;  %s589_s16 = scalar_lea.sflag [#allocation5], %s579_s13 }
  0xf5   : > { %897 = dma.done.wait (%p780_p1), %s589_s16, 16  }
  0xf6   : > { %899 = vsyncadd (%p780_p1), %s589_s16, 4294967280  ;;  %p21_p5 = scmp.ge.s32.totalorder %s981_s30, 4   ;;  %s1152_s24 = smov %s906_s25 }
  0xf7   : > { %s1153_s25 = smov %s910_s26  ;;  %s1154_s26 = smov %s992_s10 }
  0xf8   : > { %s1155_s27 = smov %s981_s30  ;;  %23 = sbr.rel (!%p21_p5) target bundleno = 5 (0x5), region = 107 }
  0xfd   :  { %594 = vsyncpa [#allocation3], 1 }
  0xfe   :  { %596 = vsyncpa [#allocation3 + $0x1], 1 }
  0xff   :  { %597 = vsyncpa [#allocation5], 1 }
 0x100   :  { %599 = vsyncpa [#allocation5 + $0x1], 1 }

// kernel: fmf_hourglass_forward.20
= control target key start
LH: loop header
LB: loop body
LE: loop exit
PB: predicated region body
PF: predicated region fallthrough
CT: control target
= control target key end

     0   :  { %13 = vsyncpa [#allocation3], 0  ;;  %s1788_s0 = inlined_call_operand.vmem [shape: bf16[512,128], index: 0, kind: input, shape index: {}]   ;;  %s1789_s1 = inlined_call_operand.vmem [shape: f32[1,128], index: 1, kind: input, shape index: {}]   ;;  %s1790_s2 = inlined_call_operand.vmem [shape: f32[1,128], index: 2, kind: input, shape index: {}]   ;;  %s1791_s3 = inlined_call_operand.vmem [shape: bf16[128,128], index: 3, kind: input, shape index: {}]   ;;  %s1792_s4 = inlined_call_operand.vmem [shape: f32[512,128], index: 4, kind: input, shape index: {}]   ;;  %s1793_s5 = inlined_call_operand.vmem [shape: f32[512,128], index: 5, kind: output, shape index: {0}]   ;;  %s1794_s6 = inlined_call_operand.hbm [shape: f32[2,1,128], index: 6, kind: output, shape index: {1}]   ;;  %s1795_s7 = inlined_call_operand.hbm [shape: f32[2,1,128], index: 7, kind: output, shape index: {2}]  }
   0x1   :  { %15 = vsyncpa [#allocation3 + $0x1], 0 }
   0x2   :  { %16 = vsyncpa [#allocation5], 0 }
   0x3   :  { %18 = vsyncpa [#allocation5 + $0x1], 0  ;;  %s1328_s24 = smov 0   ;;  %s1330_s25 = smov 0  }
   0x4   :  { %s1332_s26 = smov 0   ;;  %s1334_s27 = smov 0  }
   0x5 LB: > { %s1349_s28 = sadd.s32 4294967295, %s1286_s27   ;;  %s991_s29 = sadd.s32 4294967294, %s1286_s27   ;;  %s1286_s27 = sphi %s1334_s27, %s1805_s27   ;;  %s1282_s26 = sphi %s1332_s26, %s1804_s26   ;;  %s1278_s25 = sphi %s1330_s25, %s1803_s25   ;;  %s1274_s24 = sphi %s1328_s24, %s1802_s24  }
   0x6   : > { %s1353_s30 = sadd.s32 1, %s1286_s27   ;;  %s172_s8 = sadd.s32 1, %s1282_s26 }
   0x7   : > { %s169_s9 = ssub.s32 %s1286_s27, %s1353_s30  ;;  %p182_p0 = scmp.ne.s32.totalorder %s1282_s26, %s1278_s25 }
   0x8   : > { %p170_p1 = scmp.eq.s32.totalorder %s169_s9, 0  ;;  %p183_p2 = scmp.eq.s32.totalorder %s1349_s28, 1 }
   0x9   : > { %p188_p3 = scmp.ne.s32.totalorder %s1278_s25, %s1274_s24  ;;  %p189_p4 = scmp.eq.s32.totalorder %s991_s29, 1 }
   0xa   : > { %s1364_s10 = scalar_select %p170_p1, %s1282_s26, %s172_s8  }
   0xb   : > { %p1366_p5 = por %p183_p2, %p182_p0  ;;  %p1370_p6 = por %p189_p4, %p188_p3 }
   0xc   : > { %p994_p7 = scmp.ge.s32.totalorder %s1286_s27, 1  ;;  %p260_p8 = scmp.lt.s32.totalorder %s1286_s27, 3 }
   0xe   : > { %p261_p9 = pnand %p994_p7, %p260_p8 }
  0x10   : > { %264 = sbr.rel (%p261_p9) target bundleno = 321 (0x141), region = 40 }
  0x15   : > { %v1042_v0 = vld [vmem:[%s1791_s3 + $0x38] sm:$0xff]  ;;  %s995_s15 = sshll.u32 %s1349_s28, 5  ;;  %v1041_v1 = vld [vmem:[%s1791_s3 + $0x30] sm:$0xff]  ;;  %v1040_v2 = vld [vmem:[%s1791_s3 + $0x28] sm:$0xff]  ;;  %s854_s21 = scalar_lea.hbm %s1794_s6, %s1349_s28 }
  0x16   : > { %p306_p10 = scmp.lt.s32.totalorder %s995_s15, 63  ;;  %603 = vmatpush.bf16.msra.mxu0 %v1042_v0  ;;  %1122 = vmatpush.bf16.msra.mxu1 %v1042_v0  ;;  %v1039_v4 = vld [vmem:[%s1791_s3 + $0x20] sm:$0xff]  ;;  %v1038_v12 = vld [vmem:[%s1791_s3 + $0x18] sm:$0xff]  ;;  %v1037_v20 = vld [vmem:[%s1791_s3 + $0x10] sm:$0xff]  ;;  %s867_s8 = scalar_lea.hbm %s1795_s7, %s1349_s28 }
  0x17   : > { %1123 = vmatpush.bf16.msra.mxu2 %v1042_v0  ;;  %1124 = vmatpush.bf16.msra.mxu3 %v1042_v0  ;;  %v1403_v9 = vld [vmem:[%s1789_s1] ss:$0 sm:$0xff]  ;;  %v1036_v27 = vld [vmem:[%s1791_s3 + $0x8] sm:$0xff]  ;;  %s1732_s13 = sshll.u32 %s854_s21, 4  ;;  %s1737_s17 = sshll.u32 %s867_s8, 4  ;;  %s859_s13 = int_to_ptr.hbm [resolvable:$true] %s1732_s13  ;;  %s872_s17 = int_to_ptr.hbm [resolvable:$true] %s1737_s17 }
  0x18   : > { %s1807_s15 = smov (!%p306_p10, %s995_s15), 63  ;;  %v1413_v17 = vld [vmem:[%s1790_s2] ss:$0 sm:$0xff]  ;;  %s1212_s22 = scalar_lea.hbm %s1794_s6, 2 }
  0x19   : > { %s996_s18 = sshll.u32 %s1807_s15, 2  ;;  %v1035_v39 = vld [vmem:[%s1791_s3] sm:$0xff] }
  0x1a   : > { %604 = vmatpush.bf16.msra.mxu0 %v1041_v1  ;;  %1125 = vmatpush.bf16.msra.mxu1 %v1041_v1  ;;  %s1392_s23 = scalar_lea.vmem %s1788_s0, %s996_s18 }
  0x1b   : > { %1126 = vmatpush.bf16.msra.mxu2 %v1041_v1  ;;  %1127 = vmatpush.bf16.msra.mxu3 %v1041_v1  ;;  %v1044_v3 = vld [vmem:[%s1392_s23] sm:$0xff]   ;;  %v1107_v32 = vld [vmem:[%s1392_s23 + $0x8] sm:$0xff]  }
  0x1c   : > { %v1110_v5 = vld [vmem:[%s1392_s23 + $0x20] sm:$0xff]   ;;  %v1045_v7 = vunpack.c.l.bf16 %v1044_v3  ;;  %v1046_v8 = vunpack.c.h.bf16 %v1044_v3  ;;  %v1111_v36 = vld [vmem:[%s1392_s23 + $0x28] sm:$0xff]   ;;  %v1049_v42 = vunpack.c.l.bf16 %v1107_v32  ;;  %v1050_v45 = vunpack.c.h.bf16 %v1107_v32 }
  0x1d   : > { %v1114_v6 = vld [vmem:[%s1392_s23 + $0x40] sm:$0xff]   ;;  %v1061_v10 = vunpack.c.l.bf16 %v1110_v5  ;;  %v1062_v11 = vunpack.c.h.bf16 %v1110_v5  ;;  %v1115_v43 = vld [vmem:[%s1392_s23 + $0x48] sm:$0xff]   ;;  %v1065_v46 = vunpack.c.l.bf16 %v1111_v36  ;;  %v1066_v47 = vunpack.c.h.bf16 %v1111_v36 }
  0x1e   : > { %605 = vmatpush.bf16.msra.mxu0 %v1040_v2  ;;  %1128 = vmatpush.bf16.msra.mxu1 %v1040_v2  ;;  %v1077_v13 = vunpack.c.l.bf16 %v1114_v6  ;;  %v1078_v14 = vunpack.c.h.bf16 %v1114_v6  ;;  %v391_v15 = vmul.f32 %v1403_v9, %v1045_v7  ;;  %v392_v16 = vmul.f32 %v1403_v9, %v1046_v8  ;;  %v1118_v33 = vld [vmem:[%s1392_s23 + $0x60] sm:$0xff]  }
  0x1f   : > { %1129 = vmatpush.bf16.msra.mxu2 %v1040_v2  ;;  %1130 = vmatpush.bf16.msra.mxu3 %v1040_v2  ;;  %v399_v18 = vmul.f32 %v1403_v9, %v1061_v10  ;;  %v400_v19 = vmul.f32 %v1403_v9, %v1062_v11  ;;  %v1093_v37 = vunpack.c.l.bf16 %v1118_v33  ;;  %v1094_v38 = vunpack.c.h.bf16 %v1118_v33 }
  0x20   : > { %v407_v21 = vmul.f32 %v1403_v9, %v1077_v13  ;;  %v408_v22 = vmul.f32 %v1403_v9, %v1078_v14  ;;  %v427_v23 = vadd.f32 %v1413_v17, %v391_v15  ;;  %v428_v24 = vadd.f32 %v1413_v17, %v392_v16  ;;  %v1108_v13 = vld [vmem:[%s1392_s23 + $0x10] sm:$0xff]  }
  0x21   : > { %v435_v25 = vadd.f32 %v1413_v17, %v399_v18  ;;  %v436_v26 = vadd.f32 %v1413_v17, %v400_v19  ;;  %v415_v44 = vmul.f32 %v1403_v9, %v1093_v37  ;;  %v416_v48 = vmul.f32 %v1403_v9, %v1094_v38  ;;  %v1112_v19 = vld [vmem:[%s1392_s23 + $0x30] sm:$0xff]  }
  0x22   : > { %606 = vmatpush.bf16.msra.mxu0 %v1039_v4  ;;  %1131 = vmatpush.bf16.msra.mxu1 %v1039_v4  ;;  %v443_v28 = vadd.f32 %v1413_v17, %v407_v21  ;;  %v444_v29 = vadd.f32 %v1413_v17, %v408_v22  ;;  %v459_v30 = vmax.f32 %v427_v23, 0.0  ;;  %v460_v31 = vmax.f32 %v428_v24, 0.0 }
  0x23   : > { %1132 = vmatpush.bf16.msra.mxu2 %v1039_v4  ;;  %1133 = vmatpush.bf16.msra.mxu3 %v1039_v4  ;;  %v467_v34 = vmax.f32 %v435_v25, 0.0  ;;  %v468_v35 = vmax.f32 %v436_v26, 0.0  ;;  %v451_v51 = vadd.f32 %v1413_v17, %v415_v44  ;;  %v1081_v53 = vunpack.c.l.bf16 %v1115_v43 }
  0x24   : > { %v475_v40 = vmax.f32 %v443_v28, 0.0  ;;  %v476_v41 = vmax.f32 %v444_v29, 0.0  ;;  %v491_v49 = vpack.c.bf16 %v460_v31, %v459_v30  ;;  %v1082_v54 = vunpack.c.h.bf16 %v1115_v43  ;;  %v1120_v43 = vld [vmem:[%s1392_s23 + $0x70] sm:$0xff]  }
  0x25   : > { %v495_v50 = vpack.c.bf16 %v468_v35, %v467_v34  ;;  %v452_v55 = vadd.f32 %v1413_v17, %v416_v48  ;;  %v393_v56 = vmul.f32 %v1403_v9, %v1049_v42  ;;  %v483_v57 = vmax.f32 %v451_v51, 0.0 }
  0x26   : > { %607 = vmatpush.bf16.msra.mxu0 %v1038_v12  ;;  %1134 = vmatpush.bf16.msra.mxu1 %v1038_v12  ;;  %v499_v52 = vpack.c.bf16 %v476_v41, %v475_v40  ;;  %v394_v58 = vmul.f32 %v1403_v9, %v1050_v45  ;;  %v401_v59 = vmul.f32 %v1403_v9, %v1065_v46  ;;  %v1053_v25 = vunpack.c.l.bf16 %v1108_v13 }
  0x27   : > { %1135 = vmatpush.bf16.msra.mxu2 %v1038_v12  ;;  %1136 = vmatpush.bf16.msra.mxu3 %v1038_v12  ;;  %v402_v60 = vmul.f32 %v1403_v9, %v1066_v47  ;;  %v484_v61 = vmax.f32 %v452_v55, 0.0  ;;  %v409_v62 = vmul.f32 %v1403_v9, %v1081_v53  ;;  %v410_v63 = vmul.f32 %v1403_v9, %v1082_v54  ;;  %v1119_v12 = vld [vmem:[%s1392_s23 + $0x68] sm:$0xff]  }
  0x28   : > { %v429_v1 = vadd.f32 %v1413_v17, %v393_v56  ;;  %v430_v2 = vadd.f32 %v1413_v17, %v394_v58  ;;  %v437_v3 = vadd.f32 %v1413_v17, %v401_v59  ;;  %v1097_v14 = vunpack.c.l.bf16 %v1119_v12 }
  0x29   : > { %v503_v0 = vpack.c.bf16 %v484_v61, %v483_v57  ;;  %v438_v4 = vadd.f32 %v1413_v17, %v402_v60  ;;  %v445_v5 = vadd.f32 %v1413_v17, %v409_v62  ;;  %v446_v6 = vadd.f32 %v1413_v17, %v410_v63  ;;  %v1109_v60 = vld [vmem:[%s1392_s23 + $0x18] sm:$0xff]  }
  0x2a   : > { %608 = vmatpush.bf16.msra.mxu0 %v1037_v20  ;;  %1137 = vmatpush.bf16.msra.mxu1 %v1037_v20  ;;  %v461_v7 = vmax.f32 %v429_v1, 0.0  ;;  %v462_v8 = vmax.f32 %v430_v2, 0.0  ;;  %v469_v10 = vmax.f32 %v437_v3, 0.0  ;;  %v1098_v15 = vunpack.c.h.bf16 %v1119_v12  ;;  %v1113_v63 = vld [vmem:[%s1392_s23 + $0x38] sm:$0xff]  }
  0x2b   : > { %1138 = vmatpush.bf16.msra.mxu2 %v1037_v20  ;;  %1139 = vmatpush.bf16.msra.mxu3 %v1037_v20  ;;  %v470_v11 = vmax.f32 %v438_v4, 0.0  ;;  %v477_v16 = vmax.f32 %v445_v5, 0.0  ;;  %v478_v18 = vmax.f32 %v446_v6, 0.0  ;;  %v1116_v20 = vld [vmem:[%s1392_s23 + $0x50] sm:$0xff]   ;;  %v417_v21 = vmul.f32 %v1403_v9, %v1097_v14 }
  0x2c   : > { %v418_v22 = vmul.f32 %v1403_v9, %v1098_v15  ;;  %v492_v23 = vpack.c.bf16 %v462_v8, %v461_v7  ;;  %v1054_v26 = vunpack.c.h.bf16 %v1108_v13  ;;  %v1070_v28 = vunpack.c.h.bf16 %v1112_v19 }
  0x2d   : > { %v496_v24 = vpack.c.bf16 %v470_v11, %v469_v10  ;;  %v453_v29 = vadd.f32 %v1413_v17, %v417_v21  ;;  %v500_v31 = vpack.c.bf16 %v478_v18, %v477_v16  ;;  %v1085_v32 = vunpack.c.l.bf16 %v1116_v20  ;;  %v1121_v10 = vld [vmem:[%s1392_s23 + $0x78] sm:$0xff]  }
  0x2e   : > { %609 = vmatpush.bf16.msra.mxu0 %v1036_v27  ;;  %1140 = vmatpush.bf16.msra.mxu1 %v1036_v27  ;;  %v454_v30 = vadd.f32 %v1413_v17, %v418_v22  ;;  %v1086_v33 = vunpack.c.h.bf16 %v1116_v20  ;;  %v395_v36 = vmul.f32 %v1403_v9, %v1053_v25  ;;  %v396_v37 = vmul.f32 %v1403_v9, %v1054_v26 }
  0x2f   : > { %1141 = vmatpush.bf16.msra.mxu2 %v1036_v27  ;;  %1142 = vmatpush.bf16.msra.mxu3 %v1036_v27  ;;  %v1069_v27 = vunpack.c.l.bf16 %v1112_v19  ;;  %v485_v34 = vmax.f32 %v453_v29, 0.0  ;;  %v411_v41 = vmul.f32 %v1403_v9, %v1085_v32  ;;  %v1101_v44 = vunpack.c.l.bf16 %v1120_v43 }
  0x30   : > { %v486_v35 = vmax.f32 %v454_v30, 0.0  ;;  %v412_v42 = vmul.f32 %v1403_v9, %v1086_v33  ;;  %v1102_v45 = vunpack.c.h.bf16 %v1120_v43  ;;  %v431_v46 = vadd.f32 %v1413_v17, %v395_v36 }
  0x31   : > { %v403_v38 = vmul.f32 %v1403_v9, %v1069_v27  ;;  %v432_v47 = vadd.f32 %v1413_v17, %v396_v37  ;;  %v1057_v2 = vunpack.c.l.bf16 %v1109_v60  ;;  %v1058_v6 = vunpack.c.h.bf16 %v1109_v60 }
  0x32   : > { %610 = vmatpush.bf16.msra.mxu0 %v1035_v39  ;;  %1143 = vmatpush.bf16.msra.mxu1 %v1035_v39  ;;  %v504_v40 = vpack.c.bf16 %v486_v35, %v485_v34  ;;  %v420_v51 = vmul.f32 %v1403_v9, %v1102_v45  ;;  %v448_v53 = vadd.f32 %v1413_v17, %v412_v42  ;;  %v463_v54 = vmax.f32 %v431_v46, 0.0 }
  0x33   : > { %1144 = vmatpush.bf16.msra.mxu2 %v1035_v39  ;;  %1145 = vmatpush.bf16.msra.mxu3 %v1035_v39  ;;  %v404_v39 = vmul.f32 %v1403_v9, %v1070_v28  ;;  %v439_v48 = vadd.f32 %v1413_v17, %v403_v38  ;;  %v464_v55 = vmax.f32 %v432_v47, 0.0  ;;  %v1073_v7 = vunpack.c.l.bf16 %v1113_v63 }
  0x34   : > { %v456_v57 = vadd.f32 %v1413_v17, %v420_v51  ;;  %v480_v62 = vmax.f32 %v448_v53, 0.0  ;;  %v1074_v8 = vunpack.c.h.bf16 %v1113_v63  ;;  %v397_v14 = vmul.f32 %v1403_v9, %v1057_v2 }
  0x35   : > { %611 = vmatmul.bf16.vlgmr.msra.gmra.mxu0 %v491_v49  ;;  %631 = vmatmul.bf16.vlgmr.msra.gmra.mxu1 %v495_v50  ;;  %v440_v49 = vadd.f32 %v1413_v17, %v404_v39  ;;  %v419_v50 = vmul.f32 %v1403_v9, %v1101_v44  ;;  %v471_v58 = vmax.f32 %v439_v48, 0.0  ;;  %v493_v1 = vpack.c.bf16 %v464_v55, %v463_v54 }
  0x36   : > { %651 = vmatmul.bf16.vlgmr.msra.gmra.mxu2 %v499_v52  ;;  %671 = vmatmul.bf16.vlgmr.msra.gmra.mxu3 %v503_v0  ;;  %v447_v52 = vadd.f32 %v1413_v17, %v411_v41  ;;  %v1117_v0 = vld [vmem:[%s1392_s23 + $0x58] sm:$0xff]   ;;  %v488_v4 = vmax.f32 %v456_v57, 0.0  ;;  %v1105_v16 = vunpack.c.l.bf16 %v1121_v10  ;;  %v1106_v18 = vunpack.c.h.bf16 %v1121_v10  ;;  %s998_s23 = sshll.u32 %s1807_s15, 3  ;;  %s1719_s15 = sand.u32 1, %s1278_s25  }
  0x37   : > { %v455_v56 = vadd.f32 %v1413_v17, %v419_v50  ;;  %v472_v59 = vmax.f32 %v440_v49, 0.0  ;;  %v1089_v12 = vunpack.c.l.bf16 %v1117_v0  ;;  %v1090_v13 = vunpack.c.h.bf16 %v1117_v0  ;;  %s1503_s14 = scalar_lea.vmem %s1792_s4, %s998_s23  ;;  %s1510_s18 = scalar_lea.vmem %s1793_s5, %s998_s23 }
  0x38   : > { %v479_v61 = vmax.f32 %v447_v52, 0.0  ;;  %v398_v19 = vmul.f32 %v1403_v9, %v1058_v6  ;;  %v405_v20 = vmul.f32 %v1403_v9, %v1073_v7  ;;  %v406_v21 = vmul.f32 %v1403_v9, %v1074_v8  ;;  %v531_v45 = vld [vmem:[%s1503_s14 + $0x40] sm:$0xff]  ;;  %v524_v51 = vld [vmem:[%s1503_s14 + $0x8] sm:$0xff]  ;;  %v533_v63 = vld [vmem:[%s1503_s14 + $0x50] sm:$0xff]  ;;  %s298_s23 = scalar_lea.vmem [#allocation2], %s1719_s15  ;;  %s838_s28 = scalar_lea.sflag [#allocation3], %s1719_s15 }
  0x39   : > { %v487_v3 = vmax.f32 %v455_v56, 0.0  ;;  %v497_v5 = vpack.c.bf16 %v472_v59, %v471_v58  ;;  %v413_v22 = vmul.f32 %v1403_v9, %v1089_v12  ;;  %v422_v25 = vmul.f32 %v1403_v9, %v1106_v18  ;;  %v539_v50 = vld [vmem:[%s1503_s14 + $0x80] sm:$0xff]  ;;  %v532_v52 = vld [vmem:[%s1503_s14 + $0x48] sm:$0xff]  ;;  %v526_v12 = vld [vmem:[%s1503_s14 + $0x18] sm:$0xff]  ;;  %s1730_s9 = sshll.u32 %s298_s23, 4  ;;  %s857_s9 = int_to_ptr.vmem [resolvable:$true] %s1730_s9 }
  0x3a   : > { %v501_v11 = vpack.c.bf16 %v480_v62, %v479_v61  ;;  %v433_v26 = vadd.f32 %v1413_v17, %v397_v14  ;;  %v434_v27 = vadd.f32 %v1413_v17, %v398_v19  ;;  %v441_v28 = vadd.f32 %v1413_v17, %v405_v20  ;;  %v540_v60 = vld [vmem:[%s1503_s14 + $0x88] sm:$0xff]  ;;  %v547_v61 = vld [vmem:[%s1503_s14 + $0xc0] sm:$0xff]  ;;  %v525_v62 = vld [vmem:[%s1503_s14 + $0x10] sm:$0xff] }
  0x3b   : > { %v505_v15 = vpack.c.bf16 %v488_v4, %v487_v3  ;;  %v442_v29 = vadd.f32 %v1413_v17, %v406_v21  ;;  %v449_v30 = vadd.f32 %v1413_v17, %v413_v22  ;;  %v458_v33 = vadd.f32 %v1413_v17, %v422_v25  ;;  %v542_v22 = vld [vmem:[%s1503_s14 + $0x98] sm:$0xff] }
  0x3c   : > { %v465_v34 = vmax.f32 %v433_v26, 0.0  ;;  %v466_v35 = vmax.f32 %v434_v27, 0.0 }
  0x3d   : > { %v474_v36 = vmax.f32 %v442_v29, 0.0  ;;  %v481_v37 = vmax.f32 %v449_v30, 0.0  ;;  %v549_v29 = vld [vmem:[%s1503_s14 + $0xd0] sm:$0xff] }
  0x3e   : > { %v494_v41 = vpack.c.bf16 %v466_v35, %v465_v34 }
  0x45   : > { %616 = vmatmul.bf16.gmra.mxu0 %v492_v23  ;;  %636 = vmatmul.bf16.gmra.mxu1 %v496_v24  ;;  %v414_v23 = vmul.f32 %v1403_v9, %v1090_v13  ;;  %v421_v24 = vmul.f32 %v1403_v9, %v1105_v16  ;;  %v473_v9 = vmax.f32 %v441_v28, 0.0  ;;  %v534_v13 = vld [vmem:[%s1503_s14 + $0x58] sm:$0xff] }
  0x46   : > { %656 = vmatmul.bf16.gmra.mxu2 %v500_v31  ;;  %676 = vmatmul.bf16.gmra.mxu3 %v504_v40  ;;  %v490_v40 = vmax.f32 %v458_v33, 0.0  ;;  %v550_v33 = vld [vmem:[%s1503_s14 + $0xd8] sm:$0xff] }
  0x47   : > { %v450_v31 = vadd.f32 %v1413_v17, %v414_v23  ;;  %v457_v32 = vadd.f32 %v1413_v17, %v421_v24  ;;  %v498_v42 = vpack.c.bf16 %v474_v36, %v473_v9  ;;  %v523_v17 = vld [vmem:[%s1503_s14] sm:$0xff]  ;;  %v528_v36 = vld [vmem:[%s1503_s14 + $0x28] sm:$0xff] }
  0x48   : > { %v527_v23 = vld [vmem:[%s1503_s14 + $0x20] sm:$0xff] }
  0x49   : > { %v482_v38 = vmax.f32 %v450_v31, 0.0  ;;  %v489_v39 = vmax.f32 %v457_v32, 0.0  ;;  %v535_v24 = vld [vmem:[%s1503_s14 + $0x60] sm:$0xff] }
  0x4a   : > { %v543_v9 = vld [vmem:[%s1503_s14 + $0xa0] sm:$0xff] }
  0x4b   : > { %v502_v43 = vpack.c.bf16 %v482_v38, %v481_v37  ;;  %v506_v44 = vpack.c.bf16 %v490_v40, %v489_v39  ;;  %v536_v37 = vld [vmem:[%s1503_s14 + $0x68] sm:$0xff] }
  0x55   : > { %621 = vmatmul.bf16.gmra.mxu0 %v493_v1  ;;  %641 = vmatmul.bf16.gmra.mxu1 %v497_v5  ;;  %v548_v5 = vld [vmem:[%s1503_s14 + $0xc8] sm:$0xff] }
  0x56   : > { %661 = vmatmul.bf16.gmra.mxu2 %v501_v11  ;;  %681 = vmatmul.bf16.gmra.mxu3 %v505_v15  ;;  %v541_v11 = vld [vmem:[%s1503_s14 + $0x90] sm:$0xff] }
  0x65   : > { %626 = vmatmul.bf16.gmra.mxu0 %v494_v41  ;;  %646 = vmatmul.bf16.gmra.mxu1 %v498_v42 }
  0x66   : > { %666 = vmatmul.bf16.gmra.mxu2 %v502_v43  ;;  %686 = vmatmul.bf16.gmra.mxu3 %v506_v44 }
  0xb2   : > { %v612_v46 = vpop.f32.mrf.mxu0  ;;  %v632_v47 = vpop.f32.mrf.mxu1 }
  0xb3   : > { %v1512_v48 = vadd.f32 %v612_v46, %v523_v17  ;;  %v1514_v49 = vadd.f32 %v632_v47, %v531_v45  ;;  %v544_v45 = vld [vmem:[%s1503_s14 + $0xa8] sm:$0xff] }
  0xb5   : > { %692 = vst [vmem:[%s1510_s18] sm:$0xff] %v1512_v48  ;;  %v762_v46 = vmul.f32 %v1512_v48, %v1512_v48 }
  0xb6   : > { %700 = vst [vmem:[%s1510_s18 + $0x40] sm:$0xff] %v1514_v49 }
  0xb9   : > { %v652_v53 = vpop.f32.mrf.mxu2  ;;  %v672_v59 = vpop.f32.mrf.mxu3 }
  0xba   : > { %v614_v54 = vpop.f32.mrf.mxu0  ;;  %v634_v55 = vpop.f32.mrf.mxu1  ;;  %v1523_v56 = vadd.f32 %v652_v53, %v539_v50  ;;  %v1539_v0 = vadd.f32 %v672_v59, %v547_v61  ;;  %v529_v50 = vld [vmem:[%s1503_s14 + $0x30] sm:$0xff] }
  0xbb   : > { %v1525_v57 = vadd.f32 %v614_v54, %v524_v51  ;;  %v1527_v58 = vadd.f32 %v634_v55, %v532_v52  ;;  %v537_v51 = vld [vmem:[%s1503_s14 + $0x70] sm:$0xff] }
  0xbc   : > { %708 = vst [vmem:[%s1510_s18 + $0x80] sm:$0xff] %v1523_v56 }
  0xbd   : > { %693 = vst [vmem:[%s1510_s18 + $0x8] sm:$0xff] %v1525_v57  ;;  %v763_v17 = vmul.f32 %v1525_v57, %v1525_v57  ;;  %v724_v47 = vadd.f32 %v1525_v57, %v1512_v48  ;;  %v552_v57 = vld [vmem:[%s1503_s14 + $0xe8] sm:$0xff] }
  0xbe   : > { %701 = vst [vmem:[%s1510_s18 + $0x48] sm:$0xff] %v1527_v58 }
  0xbf   : > { %716 = vst [vmem:[%s1510_s18 + $0xc0] sm:$0xff] %v1539_v0  ;;  %v794_v54 = vadd.f32 %v763_v17, %v762_v46  ;;  %v771_v17 = vmul.f32 %v1527_v58, %v1527_v58 }
  0xc1   : > { %v654_v1 = vpop.f32.mrf.mxu2  ;;  %v674_v8 = vpop.f32.mrf.mxu3 }
  0xc2   : > { %v617_v2 = vpop.f32.mrf.mxu0  ;;  %v637_v3 = vpop.f32.mrf.mxu1  ;;  %v1541_v4 = vadd.f32 %v654_v1, %v540_v60  ;;  %v1550_v10 = vadd.f32 %v674_v8, %v548_v5 }
  0xc3   : > { %v618_v6 = vadd.f32 %v617_v2, %v525_v62  ;;  %v1546_v7 = vadd.f32 %v637_v3, %v533_v63  ;;  %v551_v62 = vld [vmem:[%s1503_s14 + $0xe0] sm:$0xff] }
  0xc4   : > { %709 = vst [vmem:[%s1510_s18 + $0x88] sm:$0xff] %v1541_v4 }
  0xc5   : > { %694 = vst [vmem:[%s1510_s18 + $0x10] sm:$0xff] %v618_v6  ;;  %v764_v52 = vmul.f32 %v618_v6, %v618_v6  ;;  %v725_v55 = vadd.f32 %v724_v47, %v618_v6 }
  0xc6   : > { %702 = vst [vmem:[%s1510_s18 + $0x50] sm:$0xff] %v1546_v7 }
  0xc7   : > { %717 = vst [vmem:[%s1510_s18 + $0xc8] sm:$0xff] %v1550_v10  ;;  %v795_v6 = vadd.f32 %v794_v54, %v764_v52  ;;  %v554_v52 = vld [vmem:[%s1503_s14 + $0xf8] sm:$0xff] }
  0xc9   : > { %v657_v14 = vpop.f32.mrf.mxu2  ;;  %v677_v21 = vpop.f32.mrf.mxu3 }
  0xca   : > { %v619_v15 = vpop.f32.mrf.mxu0  ;;  %v639_v16 = vpop.f32.mrf.mxu1  ;;  %v1560_v18 = vadd.f32 %v657_v14, %v541_v11  ;;  %v1577_v32 = vadd.f32 %v677_v21, %v549_v29  ;;  %v538_v21 = vld [vmem:[%s1503_s14 + $0x78] sm:$0xff] }
  0xcb   : > { %v620_v19 = vadd.f32 %v619_v15, %v526_v12  ;;  %v1562_v20 = vadd.f32 %v639_v16, %v534_v13  ;;  %v545_v15 = vld [vmem:[%s1503_s14 + $0xb0] sm:$0xff]  ;;  %v530_v16 = vld [vmem:[%s1503_s14 + $0x38] sm:$0xff] }
  0xcc   : > { %710 = vst [vmem:[%s1510_s18 + $0x90] sm:$0xff] %v1560_v18 }
  0xcd   : > { %695 = vst [vmem:[%s1510_s18 + $0x18] sm:$0xff] %v620_v19  ;;  %v765_v63 = vmul.f32 %v620_v19, %v620_v19  ;;  %v726_v8 = vadd.f32 %v725_v55, %v620_v19 }
  0xce   : > { %703 = vst [vmem:[%s1510_s18 + $0x58] sm:$0xff] %v1562_v20 }
  0xcf   : > { %718 = vst [vmem:[%s1510_s18 + $0xd0] sm:$0xff] %v1577_v32  ;;  %v796_v12 = vadd.f32 %v795_v6, %v765_v63 }
  0xd1   : > { %v659_v25 = vpop.f32.mrf.mxu2  ;;  %v679_v34 = vpop.f32.mrf.mxu3 }
  0xd2   : > { %v622_v26 = vpop.f32.mrf.mxu0  ;;  %v642_v27 = vpop.f32.mrf.mxu1  ;;  %v1572_v28 = vadd.f32 %v659_v25, %v542_v22  ;;  %v1582_v35 = vadd.f32 %v679_v34, %v550_v33 }
  0xd3   : > { %v623_v30 = vadd.f32 %v622_v26, %v527_v23  ;;  %v1575_v31 = vadd.f32 %v642_v27, %v535_v24 }
  0xd4   : > { %711 = vst [vmem:[%s1510_s18 + $0x98] sm:$0xff] %v1572_v28 }
  0xd5   : > { %696 = vst [vmem:[%s1510_s18 + $0x20] sm:$0xff] %v623_v30  ;;  %v766_v11 = vmul.f32 %v623_v30, %v623_v30  ;;  %v727_v13 = vadd.f32 %v726_v8, %v623_v30 }
  0xd6   : > { %704 = vst [vmem:[%s1510_s18 + $0x60] sm:$0xff] %v1575_v31 }
  0xd7   : > { %719 = vst [vmem:[%s1510_s18 + $0xd8] sm:$0xff] %v1582_v35  ;;  %v797_v22 = vadd.f32 %v796_v12, %v766_v11 }
  0xd9   : > { %v662_v38 = vpop.f32.mrf.mxu2  ;;  %v682_v44 = vpop.f32.mrf.mxu3 }
  0xda   : > { %v624_v39 = vpop.f32.mrf.mxu0  ;;  %v644_v40 = vpop.f32.mrf.mxu1  ;;  %v1594_v41 = vadd.f32 %v662_v38, %v543_v9  ;;  %v1617_v48 = vadd.f32 %v682_v44, %v551_v62  ;;  %v546_v44 = vld [vmem:[%s1503_s14 + $0xb8] sm:$0xff] }
  0xdb   : > { %v625_v42 = vadd.f32 %v624_v39, %v528_v36  ;;  %v1596_v43 = vadd.f32 %v644_v40, %v536_v37  ;;  %v770_v39 = vmul.f32 %v1514_v49, %v1514_v49 }
  0xdc   : > { %712 = vst [vmem:[%s1510_s18 + $0xa0] sm:$0xff] %v1594_v41 }
  0xdd   : > { %697 = vst [vmem:[%s1510_s18 + $0x28] sm:$0xff] %v625_v42  ;;  %v767_v14 = vmul.f32 %v625_v42, %v625_v42  ;;  %v728_v23 = vadd.f32 %v727_v13, %v625_v42 }
  0xde   : > { %705 = vst [vmem:[%s1510_s18 + $0x68] sm:$0xff] %v1596_v43 }
  0xdf   : > { %720 = vst [vmem:[%s1510_s18 + $0xe0] sm:$0xff] %v1617_v48  ;;  %v798_v29 = vadd.f32 %v797_v22, %v767_v14  ;;  %v779_v22 = vmul.f32 %v1541_v4, %v1541_v4 }
  0xe1   : > { %v664_v53 = vpop.f32.mrf.mxu2  ;;  %v684_v3 = vpop.f32.mrf.mxu3 }
  0xe2   : > { %v627_v59 = vpop.f32.mrf.mxu0  ;;  %v647_v60 = vpop.f32.mrf.mxu1  ;;  %v1612_v61 = vadd.f32 %v664_v53, %v544_v45  ;;  %v1622_v5 = vadd.f32 %v684_v3, %v552_v57  ;;  %v772_v53 = vmul.f32 %v1546_v7, %v1546_v7  ;;  %v775_v3 = vmul.f32 %v1596_v43, %v1596_v43 }
  0xe3   : > { %v628_v1 = vadd.f32 %v627_v59, %v529_v50  ;;  %v1615_v2 = vadd.f32 %v647_v60, %v537_v51  ;;  %v553_v51 = vld [vmem:[%s1503_s14 + $0xf0] sm:$0xff]  ;;  %s304_s14 = scalar_lea.vmem [#allocation4], %s1719_s15 }
  0xe4   : > { %713 = vst [vmem:[%s1510_s18 + $0xa8] sm:$0xff] %v1612_v61  ;;  %s1735_s16 = sshll.u32 %s304_s14, 4 }
  0xe5   : > { %698 = vst [vmem:[%s1510_s18 + $0x30] sm:$0xff] %v628_v1  ;;  %v768_v19 = vmul.f32 %v628_v1, %v628_v1  ;;  %v729_v30 = vadd.f32 %v728_v23, %v628_v1  ;;  %1799 = sst [smem:[#allocation8_spill]] %s1735_s16 }
  0xe6   : > { %706 = vst [vmem:[%s1510_s18 + $0x70] sm:$0xff] %v1615_v2 }
  0xe7   : > { %721 = vst [vmem:[%s1510_s18 + $0xe8] sm:$0xff] %v1622_v5  ;;  %v799_v36 = vadd.f32 %v798_v29, %v768_v19  ;;  %v780_v19 = vmul.f32 %v1560_v18, %v1560_v18 }
  0xe9   : > { %v667_v24 = vpop.f32.mrf.mxu2  ;;  %v687_v9 = vpop.f32.mrf.mxu3 }
  0xea   : > { %v629_v25 = vpop.f32.mrf.mxu0  ;;  %v649_v26 = vpop.f32.mrf.mxu1  ;;  %v1634_v27 = vadd.f32 %v667_v24, %v545_v15  ;;  %v1652_v55 = vadd.f32 %v687_v9, %v553_v51  ;;  %v790_v51 = vmul.f32 %v1617_v48, %v1617_v48 }
  0xeb   : > { %v630_v33 = vadd.f32 %v629_v25, %v530_v16  ;;  %v650_v34 = vadd.f32 %v649_v26, %v538_v21  ;;  %v778_v16 = vmul.f32 %v1523_v56, %v1523_v56  ;;  %v781_v25 = vmul.f32 %v1572_v28, %v1572_v28 }
  0xec   : > { %714 = vst [vmem:[%s1510_s18 + $0xb0] sm:$0xff] %v1634_v27 }
  0xed   : > { %699 = vst [vmem:[%s1510_s18 + $0x38] sm:$0xff] %v630_v33  ;;  %v730_v37 = vadd.f32 %v729_v30, %v630_v33  ;;  %v769_v38 = vmul.f32 %v630_v33, %v630_v33  ;;  %v777_v15 = vmul.f32 %v650_v34, %v650_v34 }
  0xee   : > { %707 = vst [vmem:[%s1510_s18 + $0x78] sm:$0xff] %v650_v34 }
  0xef   : > { %v731_v40 = vadd.f32 %v730_v37, %v1514_v49  ;;  %v800_v42 = vadd.f32 %v799_v36, %v769_v38  ;;  %722 = vst [vmem:[%s1510_s18 + $0xf0] sm:$0xff] %v1652_v55  ;;  %v784_v37 = vmul.f32 %v1634_v27, %v1634_v27 }
  0xf1   : > { %v732_v45 = vadd.f32 %v731_v40, %v1527_v58  ;;  %v801_v46 = vadd.f32 %v800_v42, %v770_v39  ;;  %v669_v47 = vpop.f32.mrf.mxu2  ;;  %v689_v59 = vpop.f32.mrf.mxu3  ;;  %v773_v58 = vmul.f32 %v1562_v20, %v1562_v20  ;;  %v786_v40 = vmul.f32 %v1539_v0, %v1539_v0 }
  0xf2   : > { %v670_v50 = vadd.f32 %v669_v47, %v546_v44  ;;  %v1655_v60 = vadd.f32 %v689_v59, %v554_v52  ;;  %v787_v44 = vmul.f32 %v1550_v10, %v1550_v10  ;;  %v789_v47 = vmul.f32 %v1582_v35, %v1582_v35 }
  0xf3   : > { %v733_v54 = vadd.f32 %v732_v45, %v1546_v7  ;;  %v802_v49 = vadd.f32 %v801_v46, %v771_v17  ;;  %v774_v7 = vmul.f32 %v1575_v31, %v1575_v31  ;;  %v788_v45 = vmul.f32 %v1577_v32, %v1577_v32 }
  0xf4   : > { %715 = vst [vmem:[%s1510_s18 + $0xb8] sm:$0xff] %v670_v50  ;;  %v785_v39 = vmul.f32 %v670_v50, %v670_v50 }
  0xf5   : > { %v803_v62 = vadd.f32 %v802_v49, %v772_v53  ;;  %v734_v63 = vadd.f32 %v733_v54, %v1562_v20  ;;  %723 = vst [vmem:[%s1510_s18 + $0xf8] sm:$0xff] %v1655_v60  ;;  %v776_v20 = vmul.f32 %v1615_v2, %v1615_v2  ;;  %v791_v54 = vmul.f32 %v1622_v5, %v1622_v5  ;;  %s1206_s18 = sshra.s32 %s859_s13, 4  ;;  %s1207_s18 = int_to_ptr.hbm [resolvable:$true] %s1206_s18 }
  0xf6   : > { %s1208_s19 = scalar_lea.hbm %s1207_s18, 1  ;;  %p1213_p0 = scmp.lt.s32.totalorder %s1207_s18, %s1794_s6 }
  0xf7   : > { %v735_v1 = vadd.f32 %v734_v63, %v1575_v31  ;;  %v804_v57 = vadd.f32 %v803_v62, %v773_v58  ;;  %p1209_p11 = scmp.ne.s32.totalorder %s1207_s18, %s1208_s19  ;;  %p1214_p1 = scmp.lt.s32.totalorder %s1212_s22, %s1208_s19 }
  0xf9   : > { %v736_v6 = vadd.f32 %v735_v1, %v1596_v43  ;;  %v805_v8 = vadd.f32 %v804_v57, %v774_v7  ;;  %p1210_p12 = pnand %p1209_p11, %p1366_p5  ;;  %p1215_p2 = por %p1214_p1, %p1213_p0 }
  0xfb   : > { %v737_v11 = vadd.f32 %v736_v6, %v1615_v2  ;;  %v806_v12 = vadd.f32 %v805_v8, %v775_v3  ;;  %p1211_p13 = pneg %p1210_p12 }
  0xfd   : > { %v807_v13 = vadd.f32 %v806_v12, %v776_v20  ;;  %v738_v14 = vadd.f32 %v737_v11, %v650_v34  ;;  %v783_v34 = vmul.f32 %v1612_v61, %v1612_v61  ;;  %p1216_p3 = pnand %p1215_p2, %p1211_p13 }
  0xff   : > { %v739_v31 = vadd.f32 %v738_v14, %v1523_v56  ;;  %v808_v21 = vadd.f32 %v807_v13, %v777_v15  ;;  %v782_v56 = vmul.f32 %v1594_v41, %v1594_v41 }
 0x101   : > { %v740_v43 = vadd.f32 %v739_v31, %v1541_v4  ;;  %v809_v23 = vadd.f32 %v808_v21, %v778_v16 }
 0x103   : > { %v810_v2 = vadd.f32 %v809_v23, %v779_v22  ;;  %v741_v24 = vadd.f32 %v740_v43, %v1560_v18 }
 0x105   : > { %v742_v26 = vadd.f32 %v741_v24, %v1572_v28  ;;  %v811_v29 = vadd.f32 %v810_v2, %v780_v19 }
 0x107   : > { %v743_v30 = vadd.f32 %v742_v26, %v1594_v41  ;;  %v812_v33 = vadd.f32 %v811_v29, %v781_v25 }
 0x109   : > { %v744_v4 = vadd.f32 %v743_v30, %v1612_v61  ;;  %v813_v9 = vadd.f32 %v812_v33, %v782_v56 }
 0x10b   : > { %v814_v36 = vadd.f32 %v813_v9, %v783_v34  ;;  %v745_v18 = vadd.f32 %v744_v4, %v1634_v27 }
 0x10d   : > { %v815_v28 = vadd.f32 %v814_v36, %v784_v37  ;;  %v746_v38 = vadd.f32 %v745_v18, %v670_v50 }
 0x10f   : > { %v747_v41 = vadd.f32 %v746_v38, %v1539_v0  ;;  %v816_v42 = vadd.f32 %v815_v28, %v785_v39 }
 0x111   : > { %v748_v61 = vadd.f32 %v747_v41, %v1550_v10  ;;  %v817_v17 = vadd.f32 %v816_v42, %v786_v40 }
 0x113   : > { %v818_v46 = vadd.f32 %v817_v17, %v787_v44  ;;  %v749_v27 = vadd.f32 %v748_v61, %v1577_v32 }
 0x115   : > { %v750_v50 = vadd.f32 %v749_v27, %v1582_v35  ;;  %v819_v0 = vadd.f32 %v818_v46, %v788_v45  ;;  %v792_v35 = vmul.f32 %v1652_v55, %v1652_v55 }
 0x117   : > { %v751_v52 = vadd.f32 %v750_v50, %v1617_v48  ;;  %v820_v10 = vadd.f32 %v819_v0, %v789_v47  ;;  %v793_v48 = vmul.f32 %v1655_v60, %v1655_v60 }
 0x119   : > { %v752_v53 = vadd.f32 %v751_v52, %v1622_v5  ;;  %v821_v32 = vadd.f32 %v820_v10, %v790_v51 }
 0x11b   : > { %v822_v49 = vadd.f32 %v821_v32, %v791_v54  ;;  %v753_v59 = vadd.f32 %v752_v53, %v1652_v55 }
 0x11d   : > { %v823_v58 = vadd.f32 %v822_v49, %v792_v35  ;;  %v754_v62 = vadd.f32 %v753_v59, %v1655_v60 }
 0x11f   : > { %v755_v63 = vrot.slane %v754_v62, 4  ;;  %v824_v7 = vadd.f32 %v823_v58, %v793_v48 }
 0x121   : > { %v756_v5 = vadd.f32 %v755_v63, %v754_v62  ;;  %v825_v1 = vrot.slane %v824_v7, 4 }
 0x123   : > { %v757_v57 = vrot.slane %v756_v5, 2  ;;  %v826_v3 = vadd.f32 %v825_v1, %v824_v7 }
 0x125   : > { %v758_v55 = vadd.f32 %v757_v57, %v756_v5  ;;  %v827_v6 = vrot.slane %v826_v3, 2 }
 0x127   : > { %v759_v60 = vrot.slane %v758_v55, 1  ;;  %v828_v8 = vadd.f32 %v827_v6, %v826_v3 }
 0x129   : > { %v760_v11 = vadd.f32 %v759_v60, %v758_v55  ;;  %v829_v20 = vrot.slane %v828_v8, 1 }
 0x12b   : > { %761 = vst [vmem:[%s298_s23] sm:$0x1] %v760_v11  ;;  %v830_v12 = vadd.f32 %v829_v20, %v828_v8 }
 0x12c   : > { %1219 = shalt.err (!%p1216_p3)
}
 0x12d   : > { %1146 = dma.vmem_to_hbm [thread:$0]  (%p1366_p5), %s857_s9, 16, %s859_s13, %s838_s28   ;;  %831 = vst [vmem:[%s304_s14] sm:$0x1] %v830_v12 }
 0x12e   : > { %s842_s23 = scalar_lea.sflag [#allocation5], %s1719_s15  ;;  %s1234_s16 = sshra.s32 %s872_s17, 4  ;;  %s1235_s16 = int_to_ptr.hbm [resolvable:$true] %s1234_s16 }
 0x12f   : > { %s1236_s20 = scalar_lea.hbm %s1235_s16, 1  ;;  %s1240_s21 = scalar_lea.hbm %s1795_s7, 2 }
 0x130   : > { %p1237_p4 = scmp.ne.s32.totalorder %s1235_s16, %s1236_s20  ;;  %p1241_p9 = scmp.lt.s32.totalorder %s1235_s16, %s1795_s7 }
 0x131   : > { %p1242_p10 = scmp.lt.s32.totalorder %s1240_s21, %s1236_s20 }
 0x132   : > { %p1238_p7 = pnand %p1237_p4, %p1366_p5 }
 0x133   : > { %p1243_p11 = por %p1242_p10, %p1241_p9 }
 0x134   : > { %p1239_p8 = pneg %p1238_p7 }
 0x136   : > { %p1244_p12 = pnand %p1243_p11, %p1239_p8 }
 0x138   : > { %1247 = shalt.err (!%p1244_p12)
}
 0x139   : > { %s1800_s15 = sld [smem:[#allocation8_spill]] }
 0x13f   : > { %s1801_s9 = int_to_ptr.vmem [resolvable:$true] %s1800_s15 }
 0x140   : > { %1147 = dma.vmem_to_hbm [thread:$0]  (%p1366_p5), %s1801_s9, 16, %s872_s17, %s842_s23  }
 0x141 PF: > { %p1157_p13 = scmp.ge.s32.totalorder %s1286_s27, 2  ;;  %s891_s13 = sand.u32 1, %s1274_s24  }
 0x142   : > { %s892_s14 = scalar_lea.sflag [#allocation3], %s891_s13 }
 0x143   : > { %p1151_p0 = pnand %p1157_p13, %p1370_p6 }
 0x145   : > { %p1152_p1 = pneg %p1151_p0 }
 0x147   : > { %1265 = dma.done.wait (%p1152_p1), %s892_s14, 16  }
 0x148   : > { %1267 = vsyncadd (%p1152_p1), %s892_s14, 4294967280  ;;  %s901_s16 = scalar_lea.sflag [#allocation5], %s891_s13 }
 0x149   : > { %1269 = dma.done.wait (%p1152_p1), %s901_s16, 16  }
 0x14a   : > { %1271 = vsyncadd (%p1152_p1), %s901_s16, 4294967280  ;;  %p21_p5 = scmp.ge.s32.totalorder %s1353_s30, 4   ;;  %s1802_s24 = smov %s1278_s25 }
 0x14b   : > { %s1803_s25 = smov %s1282_s26  ;;  %s1804_s26 = smov %s1364_s10 }
 0x14c   : > { %s1805_s27 = smov %s1353_s30  ;;  %23 = sbr.rel (!%p21_p5) target bundleno = 5 (0x5), region = 107 }
 0x151   :  { %906 = vsyncpa [#allocation3], 1 }
 0x152   :  { %908 = vsyncpa [#allocation3 + $0x1], 1 }
 0x153   :  { %909 = vsyncpa [#allocation5], 1 }
 0x154   :  { %911 = vsyncpa [#allocation5 + $0x1], 1 }

</bundles_post_ra>
